<compile_context>
chip_gen: v7x
topology: tpu7x:2x2x1
jax: 0.10.0
libtpu: 0.0.40
codegen_flags: <defaults>
</compile_context>

<pallas_src>
import functools

import jax
import jax.numpy as jnp
from jax.experimental import pallas as pl
from jax.experimental.pallas import tpu as pltpu

_EPS = 1e-5
_SLOPE = 0.2                       # LeakyReLU negative slope
_STRIDES = (2, 2, 2, 2, 2, 1)
_PADS = (1, 1, 1, 1, 1, 0)
_KERNELS = (4, 4, 4, 4, 4, 10)


# ----------------------------- Pallas kernel -----------------------------

def _encoder_kernel(*refs):
    """Whole encoder fused in one kernel (all refs are 2-D, VMEM resident).

    Ref order:
      refs[0]              x       (B, nc*L0)   channel-major flattened input
      refs[1]              M0      conv-0 Toeplitz matrix (no BN layer)
      refs[2+5l .. 6+5l]   Ml, Pl, Ql, gamma_l, beta_l   for l = 1..4 (conv + BN)
      refs[22]             M5      final conv Toeplitz matrix
      refs[23]             out     (B, out_z)
    """
    x_ref = refs[0]
    out_ref = refs[-1]
    f32 = jnp.float32

    # conv0 -> LeakyReLU (no BatchNorm)
    a = jnp.dot(x_ref[...], refs[1][...], preferred_element_type=f32)
    a = jnp.maximum(a, _SLOPE * a)

    idx = 2
    for _ in range(4):                               # conv1..conv4: conv -> BN -> LeakyReLU
        m_ref, p_ref, q_ref, g_ref, b_ref = refs[idx:idx + 5]
        idx += 5
        y = jnp.dot(a, m_ref[...], preferred_element_type=f32)            # (B, C*L)

        # BatchNorm1d (training mode): stats over (batch, length) per channel.
        # P: (C*L, C) channel-mean pooling (includes 1/(B*L)); Q: (C, C*L) broadcast.
        s1 = jnp.sum(y, axis=0, keepdims=True)                            # (1, C*L)
        mean_c = jnp.dot(s1, p_ref[...], preferred_element_type=f32)      # (1, C)
        mean_f = jnp.dot(mean_c, q_ref[...], preferred_element_type=f32)  # (1, C*L)
        d = y - mean_f                                                     # centered
        var_c = jnp.dot(jnp.sum(d * d, axis=0, keepdims=True), p_ref[...],
                        preferred_element_type=f32)                       # biased var (1, C)
        scale_c = g_ref[...] * jax.lax.rsqrt(var_c + _EPS)                # gamma/sqrt(var+eps)
        scale_f = jnp.dot(scale_c, q_ref[...], preferred_element_type=f32)
        beta_f = jnp.dot(b_ref[...], q_ref[...], preferred_element_type=f32)
        y = d * scale_f + beta_f
        a = jnp.maximum(y, _SLOPE * y)                                    # LeakyReLU(0.2)

    # final conv (kernel 10, stride 1, pad 0)  -> (B, out_z)
    out_ref[...] = jnp.dot(a, refs[idx][...], preferred_element_type=f32)


# --------------------- wrapper-side weight pre-lowering -------------------

def _conv1d_toeplitz(w, l_in, stride, pad):
    """Dense matrix M with flat_out = flat_in @ M for a bias-free Conv1d.

    w: (C_out, C_in, K) (PyTorch Conv1d layout).
    Flattening (both sides) is channel-major: index = c * L + position.
    Exact (pure gather of weight values, no rounding).
    """
    c_out, c_in, k = w.shape
    l_out = (l_in + 2 * pad - k) // stride + 1
    i = jnp.arange(l_out)[:, None]                       # (Lo, 1)   output position
    j = jnp.arange(l_in)[None, :]                        # (1, Li)   input position
    tap = j - stride * i + pad                           # (Lo, Li)  kernel tap index
    valid = (tap >= 0) & (tap < k)
    w_g = w[:, :, jnp.clip(tap, 0, k - 1)]               # (C_out, C_in, Lo, Li)
    w_g = jnp.where(valid[None, None], w_g, 0.0)
    m = jnp.transpose(w_g, (1, 3, 0, 2))                 # (C_in, Li, C_out, Lo)
    return m.reshape(c_in * l_in, c_out * l_out), l_out


def _bn_pool_mats(c, l, count):
    """P: (C*L, C) channel-mean pooling (with 1/count); Q: (C, C*L) broadcast back."""
    eye = jnp.eye(c, dtype=jnp.float32)
    p = jnp.repeat(eye, l, axis=0) / float(count)
    q = jnp.repeat(eye, l, axis=1)
    return p, q


def frequency_1d_encoder(x, params, *, out_z=16):
    """x: (B, nc, L) float32 (PyTorch NCL layout). Returns (B, out_z, L_final)."""
    b, nc, l0 = x.shape

    inputs = [x.reshape(b, nc * l0).astype(jnp.float32)]
    l_cur = l0
    flops = 0
    for li in range(6):
        w = params[f"w{li}"].astype(jnp.float32)
        m, l_out = _conv1d_toeplitz(w, l_cur, _STRIDES[li], _PADS[li])
        inputs.append(m)
        flops += 2 * b * m.shape[0] * m.shape[1]
        if 1 <= li <= 4:                                 # layers with BatchNorm1d
            c_out = w.shape[0]
            p, q = _bn_pool_mats(c_out, l_out, b * l_out)
            inputs.append(p)
            inputs.append(q)
            inputs.append(params[f"g{li}"].reshape(1, c_out).astype(jnp.float32))
            inputs.append(params[f"b{li}"].reshape(1, c_out).astype(jnp.float32))
        l_cur = l_out

    bytes_accessed = int(sum(a.size for a in inputs) * 4 + b * out_z * 4)

    out = pl.pallas_call(
        _encoder_kernel,
        out_shape=jax.ShapeDtypeStruct((b, out_z), jnp.float32),
        grid=(1,),
        in_specs=[pl.BlockSpec(a.shape, lambda i: (0, 0)) for a in inputs],
        out_specs=pl.BlockSpec((b, out_z), lambda i: (0, 0)),
        compiler_params=pltpu.CompilerParams(
            dimension_semantics=("arbitrary",),
            vmem_limit_bytes=32 * 2**20,        # <= v7x's 64 MiB physical VMEM
        ),
        cost_estimate=pl.CostEstimate(
            flops=int(flops), transcendentals=256, bytes_accessed=bytes_accessed),
    )(*inputs)
    return out.reshape(b, out_z, l_cur)


# ------------------------------- reference --------------------------------

def _reference_encoder(x, params):
    """Pure-JAX reference mirroring the PyTorch module in training mode."""
    a = x.astype(jnp.float32)
    for li in range(6):
        w = params[f"w{li}"].astype(jnp.float32)
        a = jax.lax.conv_general_dilated(
            a, w, window_strides=(_STRIDES[li],),
            padding=[(_PADS[li], _PADS[li])],
            dimension_numbers=('NCH', 'OIH', 'NCH'),
            precision=jax.lax.Precision.HIGHEST)
        if 1 <= li <= 4:
            mean = jnp.mean(a, axis=(0, 2), keepdims=True)
            var = jnp.mean((a - mean) ** 2, axis=(0, 2), keepdims=True)
            g = params[f"g{li}"].reshape(1, -1, 1)
            bb = params[f"b{li}"].reshape(1, -1, 1)
            a = (a - mean) * jax.lax.rsqrt(var + _EPS) * g + bb
        if li < 5:
            a = jnp.maximum(a, _SLOPE * a)
    return a


def init_params(key, nc=1, ndfs=4, out_z=16):
    chans = [nc, ndfs, ndfs * 2, ndfs * 4, ndfs * 8, ndfs * 16, out_z]
    params = {}
    keys = jax.random.split(key, 6)
    for i in range(6):
        c_in, c_out, k = chans[i], chans[i + 1], _KERNELS[i]
        params[f"w{i}"] = 0.1 * jax.random.normal(keys[i], (c_out, c_in, k), jnp.float32)
        if 1 <= i <= 4:                     # BatchNorm1d affine params (PyTorch default init)
            params[f"g{i}"] = jnp.ones((c_out,), jnp.float32)
            params[f"b{i}"] = jnp.zeros((c_out,), jnp.float32)
    return params


if __name__ == "__main__":
    # Small shapes consistent with the module: nc=1, ndfs=4, out_z=16, seq=320
    # (five stride-2 convs: 320 -> 10, then kernel-10 conv -> length 1).
    nc, ndfs, out_z, batch, seq = 1, 4, 16, 2, 320
    k_params, k_x = jax.random.split(jax.random.PRNGKey(0))
    params = init_params(k_params, nc=nc, ndfs=ndfs, out_z=out_z)
    x = jax.random.normal(k_x, (batch, nc, seq), jnp.float32)

    encoder = jax.jit(functools.partial(frequency_1d_encoder, out_z=out_z))
    out = jax.block_until_ready(encoder(x, params))
    assert out.shape == (batch, out_z, 1), out.shape
    assert bool(jnp.all(jnp.isfinite(out)))

    ref = jax.jit(_reference_encoder)(x, params)
    assert bool(jnp.allclose(out, ref, rtol=5e-2, atol=5e-2)), \
        float(jnp.max(jnp.abs(out - ref)))
    print("KERNEL_OK")
</pallas_src>

<mosaic_0001>
module attributes {stable_mosaic.version = 11 : i64} {
  func.func @_encoder_kernel(%arg0: i32, %arg1: memref<2x320xf32, #tpu.memory_space<vmem>>, %arg2: memref<320x640xf32, #tpu.memory_space<vmem>>, %arg3: memref<640x640xf32, #tpu.memory_space<vmem>>, %arg4: memref<640x8xf32, #tpu.memory_space<vmem>>, %arg5: memref<8x640xf32, #tpu.memory_space<vmem>>, %arg6: memref<1x8xf32, #tpu.memory_space<vmem>>, %arg7: memref<1x8xf32, #tpu.memory_space<vmem>>, %arg8: memref<640x640xf32, #tpu.memory_space<vmem>>, %arg9: memref<640x16xf32, #tpu.memory_space<vmem>>, %arg10: memref<16x640xf32, #tpu.memory_space<vmem>>, %arg11: memref<1x16xf32, #tpu.memory_space<vmem>>, %arg12: memref<1x16xf32, #tpu.memory_space<vmem>>, %arg13: memref<640x640xf32, #tpu.memory_space<vmem>>, %arg14: memref<640x32xf32, #tpu.memory_space<vmem>>, %arg15: memref<32x640xf32, #tpu.memory_space<vmem>>, %arg16: memref<1x32xf32, #tpu.memory_space<vmem>>, %arg17: memref<1x32xf32, #tpu.memory_space<vmem>>, %arg18: memref<640x640xf32, #tpu.memory_space<vmem>>, %arg19: memref<640x64xf32, #tpu.memory_space<vmem>>, %arg20: memref<64x640xf32, #tpu.memory_space<vmem>>, %arg21: memref<1x64xf32, #tpu.memory_space<vmem>>, %arg22: memref<1x64xf32, #tpu.memory_space<vmem>>, %arg23: memref<640x16xf32, #tpu.memory_space<vmem>>, %arg24: memref<2x16xf32, #tpu.memory_space<vmem>>) attributes {dimension_semantics = [#tpu.dimension_semantics<arbitrary>], iteration_bounds = array<i64: 1>, scalar_prefetch = 0 : i64, scratch_operands = 0 : i64, tpu.core_type = #tpu.core_type<tc>, window_params = [{pipeline_mode = #tpu.pipeline_mode<synchronous>, transform_indices = @transform_0, window_bounds = array<i64: 2, 320>}, {pipeline_mode = #tpu.pipeline_mode<synchronous>, transform_indices = @transform_1, window_bounds = array<i64: 320, 640>}, {pipeline_mode = #tpu.pipeline_mode<synchronous>, transform_indices = @transform_2, window_bounds = array<i64: 640, 640>}, {pipeline_mode = #tpu.pipeline_mode<synchronous>, transform_indices = @transform_3, window_bounds = array<i64: 640, 8>}, {pipeline_mode = #tpu.pipeline_mode<synchronous>, transform_indices = @transform_4, window_bounds = array<i64: 8, 640>}, {pipeline_mode = #tpu.pipeline_mode<synchronous>, transform_indices = @transform_5, window_bounds = array<i64: 1, 8>}, {pipeline_mode = #tpu.pipeline_mode<synchronous>, transform_indices = @transform_6, window_bounds = array<i64: 1, 8>}, {pipeline_mode = #tpu.pipeline_mode<synchronous>, transform_indices = @transform_7, window_bounds = array<i64: 640, 640>}, {pipeline_mode = #tpu.pipeline_mode<synchronous>, transform_indices = @transform_8, window_bounds = array<i64: 640, 16>}, {pipeline_mode = #tpu.pipeline_mode<synchronous>, transform_indices = @transform_9, window_bounds = array<i64: 16, 640>}, {pipeline_mode = #tpu.pipeline_mode<synchronous>, transform_indices = @transform_10, window_bounds = array<i64: 1, 16>}, {pipeline_mode = #tpu.pipeline_mode<synchronous>, transform_indices = @transform_11, window_bounds = array<i64: 1, 16>}, {pipeline_mode = #tpu.pipeline_mode<synchronous>, transform_indices = @transform_12, window_bounds = array<i64: 640, 640>}, {pipeline_mode = #tpu.pipeline_mode<synchronous>, transform_indices = @transform_13, window_bounds = array<i64: 640, 32>}, {pipeline_mode = #tpu.pipeline_mode<synchronous>, transform_indices = @transform_14, window_bounds = array<i64: 32, 640>}, {pipeline_mode = #tpu.pipeline_mode<synchronous>, transform_indices = @transform_15, window_bounds = array<i64: 1, 32>}, {pipeline_mode = #tpu.pipeline_mode<synchronous>, transform_indices = @transform_16, window_bounds = array<i64: 1, 32>}, {pipeline_mode = #tpu.pipeline_mode<synchronous>, transform_indices = @transform_17, window_bounds = array<i64: 640, 640>}, {pipeline_mode = #tpu.pipeline_mode<synchronous>, transform_indices = @transform_18, window_bounds = array<i64: 640, 64>}, {pipeline_mode = #tpu.pipeline_mode<synchronous>, transform_indices = @transform_19, window_bounds = array<i64: 64, 640>}, {pipeline_mode = #tpu.pipeline_mode<synchronous>, transform_indices = @transform_20, window_bounds = array<i64: 1, 64>}, {pipeline_mode = #tpu.pipeline_mode<synchronous>, transform_indices = @transform_21, window_bounds = array<i64: 1, 64>}, {pipeline_mode = #tpu.pipeline_mode<synchronous>, transform_indices = @transform_22, window_bounds = array<i64: 640, 16>}, {pipeline_mode = #tpu.pipeline_mode<synchronous>, transform_indices = @transform_23, window_bounds = array<i64: 2, 16>}]} {
    %c0 = arith.constant 0 : index
    %c0_0 = arith.constant 0 : index
    %0 = vector.load %arg1[%c0, %c0_0] : memref<2x320xf32, #tpu.memory_space<vmem>>, vector<2x320xf32>
    %c0_1 = arith.constant 0 : index
    %c0_2 = arith.constant 0 : index
    %1 = vector.load %arg2[%c0_1, %c0_2] : memref<320x640xf32, #tpu.memory_space<vmem>>, vector<320x640xf32>
    %cst = arith.constant dense<0.000000e+00> : vector<2x640xf32>
    %2 = tpu.matmul %0, %1, %cst {dimension_numbers = #tpu.dot_dimension_numbers<[1], [0], [0], [1], [0, 0, 1, 1], [], []>} : vector<2x320xf32>, vector<320x640xf32>, vector<2x640xf32> -> vector<2x640xf32>
    %cst_3 = arith.constant 2.000000e-01 : f32
    %3 = vector.broadcast %cst_3 : f32 to vector<2x640xf32>
    %4 = arith.mulf %3, %2 : vector<2x640xf32>
    %5 = arith.maximumf %2, %4 : vector<2x640xf32>
    %c0_4 = arith.constant 0 : index
    %c0_5 = arith.constant 0 : index
    %6 = vector.load %arg3[%c0_4, %c0_5] : memref<640x640xf32, #tpu.memory_space<vmem>>, vector<640x640xf32>
    %cst_6 = arith.constant dense<0.000000e+00> : vector<2x640xf32>
    %7 = tpu.matmul %5, %6, %cst_6 {dimension_numbers = #tpu.dot_dimension_numbers<[1], [0], [0], [1], [0, 0, 1, 1], [], []>} : vector<2x640xf32>, vector<640x640xf32>, vector<2x640xf32> -> vector<2x640xf32>
    %cst_7 = arith.constant dense<0.000000e+00> : vector<640xf32>
    %8 = vector.multi_reduction <add>, %7, %cst_7 [0] : vector<2x640xf32> to vector<640xf32>
    %9 = vector.shape_cast %8 : vector<640xf32> to vector<1x640xf32>
    %c0_8 = arith.constant 0 : index
    %c0_9 = arith.constant 0 : index
    %10 = vector.load %arg4[%c0_8, %c0_9] : memref<640x8xf32, #tpu.memory_space<vmem>>, vector<640x8xf32>
    %cst_10 = arith.constant dense<0.000000e+00> : vector<1x8xf32>
    %11 = tpu.matmul %9, %10, %cst_10 {dimension_numbers = #tpu.dot_dimension_numbers<[1], [0], [0], [1], [0, 0, 1, 1], [], []>} : vector<1x640xf32>, vector<640x8xf32>, vector<1x8xf32> -> vector<1x8xf32>
    %c0_11 = arith.constant 0 : index
    %c0_12 = arith.constant 0 : index
    %12 = vector.load %arg5[%c0_11, %c0_12] : memref<8x640xf32, #tpu.memory_space<vmem>>, vector<8x640xf32>
    %cst_13 = arith.constant dense<0.000000e+00> : vector<1x640xf32>
    %13 = tpu.matmul %11, %12, %cst_13 {dimension_numbers = #tpu.dot_dimension_numbers<[1], [0], [0], [1], [0, 0, 1, 1], [], []>} : vector<1x8xf32>, vector<8x640xf32>, vector<1x640xf32> -> vector<1x640xf32>
    %14 = vector.broadcast %13 : vector<1x640xf32> to vector<2x640xf32>
    %15 = arith.subf %7, %14 : vector<2x640xf32>
    %16 = arith.mulf %15, %15 : vector<2x640xf32>
    %cst_14 = arith.constant dense<0.000000e+00> : vector<640xf32>
    %17 = vector.multi_reduction <add>, %16, %cst_14 [0] : vector<2x640xf32> to vector<640xf32>
    %18 = vector.shape_cast %17 : vector<640xf32> to vector<1x640xf32>
    %c0_15 = arith.constant 0 : index
    %c0_16 = arith.constant 0 : index
    %19 = vector.load %arg4[%c0_15, %c0_16] : memref<640x8xf32, #tpu.memory_space<vmem>>, vector<640x8xf32>
    %cst_17 = arith.constant dense<0.000000e+00> : vector<1x8xf32>
    %20 = tpu.matmul %18, %19, %cst_17 {dimension_numbers = #tpu.dot_dimension_numbers<[1], [0], [0], [1], [0, 0, 1, 1], [], []>} : vector<1x640xf32>, vector<640x8xf32>, vector<1x8xf32> -> vector<1x8xf32>
    %c0_18 = arith.constant 0 : index
    %c0_19 = arith.constant 0 : index
    %21 = vector.load %arg6[%c0_18, %c0_19] : memref<1x8xf32, #tpu.memory_space<vmem>>, vector<1x8xf32>
    %cst_20 = arith.constant 9.99999974E-6 : f32
    %22 = vector.broadcast %cst_20 : f32 to vector<1x8xf32>
    %23 = arith.addf %20, %22 : vector<1x8xf32>
    %24 = math.rsqrt %23 : vector<1x8xf32>
    %25 = arith.mulf %21, %24 : vector<1x8xf32>
    %c0_21 = arith.constant 0 : index
    %c0_22 = arith.constant 0 : index
    %26 = vector.load %arg5[%c0_21, %c0_22] : memref<8x640xf32, #tpu.memory_space<vmem>>, vector<8x640xf32>
    %cst_23 = arith.constant dense<0.000000e+00> : vector<1x640xf32>
    %27 = tpu.matmul %25, %26, %cst_23 {dimension_numbers = #tpu.dot_dimension_numbers<[1], [0], [0], [1], [0, 0, 1, 1], [], []>} : vector<1x8xf32>, vector<8x640xf32>, vector<1x640xf32> -> vector<1x640xf32>
    %c0_24 = arith.constant 0 : index
    %c0_25 = arith.constant 0 : index
    %28 = vector.load %arg7[%c0_24, %c0_25] : memref<1x8xf32, #tpu.memory_space<vmem>>, vector<1x8xf32>
    %c0_26 = arith.constant 0 : index
    %c0_27 = arith.constant 0 : index
    %29 = vector.load %arg5[%c0_26, %c0_27] : memref<8x640xf32, #tpu.memory_space<vmem>>, vector<8x640xf32>
    %cst_28 = arith.constant dense<0.000000e+00> : vector<1x640xf32>
    %30 = tpu.matmul %28, %29, %cst_28 {dimension_numbers = #tpu.dot_dimension_numbers<[1], [0], [0], [1], [0, 0, 1, 1], [], []>} : vector<1x8xf32>, vector<8x640xf32>, vector<1x640xf32> -> vector<1x640xf32>
    %31 = vector.broadcast %27 : vector<1x640xf32> to vector<2x640xf32>
    %32 = arith.mulf %15, %31 : vector<2x640xf32>
    %33 = vector.broadcast %30 : vector<1x640xf32> to vector<2x640xf32>
    %34 = arith.addf %32, %33 : vector<2x640xf32>
    %cst_29 = arith.constant 2.000000e-01 : f32
    %35 = vector.broadcast %cst_29 : f32 to vector<2x640xf32>
    %36 = arith.mulf %35, %34 : vector<2x640xf32>
    %37 = arith.maximumf %34, %36 : vector<2x640xf32>
    %c0_30 = arith.constant 0 : index
    %c0_31 = arith.constant 0 : index
    %38 = vector.load %arg8[%c0_30, %c0_31] : memref<640x640xf32, #tpu.memory_space<vmem>>, vector<640x640xf32>
    %cst_32 = arith.constant dense<0.000000e+00> : vector<2x640xf32>
    %39 = tpu.matmul %37, %38, %cst_32 {dimension_numbers = #tpu.dot_dimension_numbers<[1], [0], [0], [1], [0, 0, 1, 1], [], []>} : vector<2x640xf32>, vector<640x640xf32>, vector<2x640xf32> -> vector<2x640xf32>
    %cst_33 = arith.constant dense<0.000000e+00> : vector<640xf32>
    %40 = vector.multi_reduction <add>, %39, %cst_33 [0] : vector<2x640xf32> to vector<640xf32>
    %41 = vector.shape_cast %40 : vector<640xf32> to vector<1x640xf32>
    %c0_34 = arith.constant 0 : index
    %c0_35 = arith.constant 0 : index
    %42 = vector.load %arg9[%c0_34, %c0_35] : memref<640x16xf32, #tpu.memory_space<vmem>>, vector<640x16xf32>
    %cst_36 = arith.constant dense<0.000000e+00> : vector<1x16xf32>
    %43 = tpu.matmul %41, %42, %cst_36 {dimension_numbers = #tpu.dot_dimension_numbers<[1], [0], [0], [1], [0, 0, 1, 1], [], []>} : vector<1x640xf32>, vector<640x16xf32>, vector<1x16xf32> -> vector<1x16xf32>
    %c0_37 = arith.constant 0 : index
    %c0_38 = arith.constant 0 : index
    %44 = vector.load %arg10[%c0_37, %c0_38] : memref<16x640xf32, #tpu.memory_space<vmem>>, vector<16x640xf32>
    %cst_39 = arith.constant dense<0.000000e+00> : vector<1x640xf32>
    %45 = tpu.matmul %43, %44, %cst_39 {dimension_numbers = #tpu.dot_dimension_numbers<[1], [0], [0], [1], [0, 0, 1, 1], [], []>} : vector<1x16xf32>, vector<16x640xf32>, vector<1x640xf32> -> vector<1x640xf32>
    %46 = vector.broadcast %45 : vector<1x640xf32> to vector<2x640xf32>
    %47 = arith.subf %39, %46 : vector<2x640xf32>
    %48 = arith.mulf %47, %47 : vector<2x640xf32>
    %cst_40 = arith.constant dense<0.000000e+00> : vector<640xf32>
    %49 = vector.multi_reduction <add>, %48, %cst_40 [0] : vector<2x640xf32> to vector<640xf32>
    %50 = vector.shape_cast %49 : vector<640xf32> to vector<1x640xf32>
    %c0_41 = arith.constant 0 : index
    %c0_42 = arith.constant 0 : index
    %51 = vector.load %arg9[%c0_41, %c0_42] : memref<640x16xf32, #tpu.memory_space<vmem>>, vector<640x16xf32>
    %cst_43 = arith.constant dense<0.000000e+00> : vector<1x16xf32>
    %52 = tpu.matmul %50, %51, %cst_43 {dimension_numbers = #tpu.dot_dimension_numbers<[1], [0], [0], [1], [0, 0, 1, 1], [], []>} : vector<1x640xf32>, vector<640x16xf32>, vector<1x16xf32> -> vector<1x16xf32>
    %c0_44 = arith.constant 0 : index
    %c0_45 = arith.constant 0 : index
    %53 = vector.load %arg11[%c0_44, %c0_45] : memref<1x16xf32, #tpu.memory_space<vmem>>, vector<1x16xf32>
    %cst_46 = arith.constant 9.99999974E-6 : f32
    %54 = vector.broadcast %cst_46 : f32 to vector<1x16xf32>
    %55 = arith.addf %52, %54 : vector<1x16xf32>
    %56 = math.rsqrt %55 : vector<1x16xf32>
    %57 = arith.mulf %53, %56 : vector<1x16xf32>
    %c0_47 = arith.constant 0 : index
    %c0_48 = arith.constant 0 : index
    %58 = vector.load %arg10[%c0_47, %c0_48] : memref<16x640xf32, #tpu.memory_space<vmem>>, vector<16x640xf32>
    %cst_49 = arith.constant dense<0.000000e+00> : vector<1x640xf32>
    %59 = tpu.matmul %57, %58, %cst_49 {dimension_numbers = #tpu.dot_dimension_numbers<[1], [0], [0], [1], [0, 0, 1, 1], [], []>} : vector<1x16xf32>, vector<16x640xf32>, vector<1x640xf32> -> vector<1x640xf32>
    %c0_50 = arith.constant 0 : index
    %c0_51 = arith.constant 0 : index
    %60 = vector.load %arg12[%c0_50, %c0_51] : memref<1x16xf32, #tpu.memory_space<vmem>>, vector<1x16xf32>
    %c0_52 = arith.constant 0 : index
    %c0_53 = arith.constant 0 : index
    %61 = vector.load %arg10[%c0_52, %c0_53] : memref<16x640xf32, #tpu.memory_space<vmem>>, vector<16x640xf32>
    %cst_54 = arith.constant dense<0.000000e+00> : vector<1x640xf32>
    %62 = tpu.matmul %60, %61, %cst_54 {dimension_numbers = #tpu.dot_dimension_numbers<[1], [0], [0], [1], [0, 0, 1, 1], [], []>} : vector<1x16xf32>, vector<16x640xf32>, vector<1x640xf32> -> vector<1x640xf32>
    %63 = vector.broadcast %59 : vector<1x640xf32> to vector<2x640xf32>
    %64 = arith.mulf %47, %63 : vector<2x640xf32>
    %65 = vector.broadcast %62 : vector<1x640xf32> to vector<2x640xf32>
    %66 = arith.addf %64, %65 : vector<2x640xf32>
    %cst_55 = arith.constant 2.000000e-01 : f32
    %67 = vector.broadcast %cst_55 : f32 to vector<2x640xf32>
    %68 = arith.mulf %67, %66 : vector<2x640xf32>
    %69 = arith.maximumf %66, %68 : vector<2x640xf32>
    %c0_56 = arith.constant 0 : index
    %c0_57 = arith.constant 0 : index
    %70 = vector.load %arg13[%c0_56, %c0_57] : memref<640x640xf32, #tpu.memory_space<vmem>>, vector<640x640xf32>
    %cst_58 = arith.constant dense<0.000000e+00> : vector<2x640xf32>
    %71 = tpu.matmul %69, %70, %cst_58 {dimension_numbers = #tpu.dot_dimension_numbers<[1], [0], [0], [1], [0, 0, 1, 1], [], []>} : vector<2x640xf32>, vector<640x640xf32>, vector<2x640xf32> -> vector<2x640xf32>
    %cst_59 = arith.constant dense<0.000000e+00> : vector<640xf32>
    %72 = vector.multi_reduction <add>, %71, %cst_59 [0] : vector<2x640xf32> to vector<640xf32>
    %73 = vector.shape_cast %72 : vector<640xf32> to vector<1x640xf32>
    %c0_60 = arith.constant 0 : index
    %c0_61 = arith.constant 0 : index
    %74 = vector.load %arg14[%c0_60, %c0_61] : memref<640x32xf32, #tpu.memory_space<vmem>>, vector<640x32xf32>
    %cst_62 = arith.constant dense<0.000000e+00> : vector<1x32xf32>
    %75 = tpu.matmul %73, %74, %cst_62 {dimension_numbers = #tpu.dot_dimension_numbers<[1], [0], [0], [1], [0, 0, 1, 1], [], []>} : vector<1x640xf32>, vector<640x32xf32>, vector<1x32xf32> -> vector<1x32xf32>
    %c0_63 = arith.constant 0 : index
    %c0_64 = arith.constant 0 : index
    %76 = vector.load %arg15[%c0_63, %c0_64] : memref<32x640xf32, #tpu.memory_space<vmem>>, vector<32x640xf32>
    %cst_65 = arith.constant dense<0.000000e+00> : vector<1x640xf32>
    %77 = tpu.matmul %75, %76, %cst_65 {dimension_numbers = #tpu.dot_dimension_numbers<[1], [0], [0], [1], [0, 0, 1, 1], [], []>} : vector<1x32xf32>, vector<32x640xf32>, vector<1x640xf32> -> vector<1x640xf32>
    %78 = vector.broadcast %77 : vector<1x640xf32> to vector<2x640xf32>
    %79 = arith.subf %71, %78 : vector<2x640xf32>
    %80 = arith.mulf %79, %79 : vector<2x640xf32>
    %cst_66 = arith.constant dense<0.000000e+00> : vector<640xf32>
    %81 = vector.multi_reduction <add>, %80, %cst_66 [0] : vector<2x640xf32> to vector<640xf32>
    %82 = vector.shape_cast %81 : vector<640xf32> to vector<1x640xf32>
    %c0_67 = arith.constant 0 : index
    %c0_68 = arith.constant 0 : index
    %83 = vector.load %arg14[%c0_67, %c0_68] : memref<640x32xf32, #tpu.memory_space<vmem>>, vector<640x32xf32>
    %cst_69 = arith.constant dense<0.000000e+00> : vector<1x32xf32>
    %84 = tpu.matmul %82, %83, %cst_69 {dimension_numbers = #tpu.dot_dimension_numbers<[1], [0], [0], [1], [0, 0, 1, 1], [], []>} : vector<1x640xf32>, vector<640x32xf32>, vector<1x32xf32> -> vector<1x32xf32>
    %c0_70 = arith.constant 0 : index
    %c0_71 = arith.constant 0 : index
    %85 = vector.load %arg16[%c0_70, %c0_71] : memref<1x32xf32, #tpu.memory_space<vmem>>, vector<1x32xf32>
    %cst_72 = arith.constant 9.99999974E-6 : f32
    %86 = vector.broadcast %cst_72 : f32 to vector<1x32xf32>
    %87 = arith.addf %84, %86 : vector<1x32xf32>
    %88 = math.rsqrt %87 : vector<1x32xf32>
    %89 = arith.mulf %85, %88 : vector<1x32xf32>
    %c0_73 = arith.constant 0 : index
    %c0_74 = arith.constant 0 : index
    %90 = vector.load %arg15[%c0_73, %c0_74] : memref<32x640xf32, #tpu.memory_space<vmem>>, vector<32x640xf32>
    %cst_75 = arith.constant dense<0.000000e+00> : vector<1x640xf32>
    %91 = tpu.matmul %89, %90, %cst_75 {dimension_numbers = #tpu.dot_dimension_numbers<[1], [0], [0], [1], [0, 0, 1, 1], [], []>} : vector<1x32xf32>, vector<32x640xf32>, vector<1x640xf32> -> vector<1x640xf32>
    %c0_76 = arith.constant 0 : index
    %c0_77 = arith.constant 0 : index
    %92 = vector.load %arg17[%c0_76, %c0_77] : memref<1x32xf32, #tpu.memory_space<vmem>>, vector<1x32xf32>
    %c0_78 = arith.constant 0 : index
    %c0_79 = arith.constant 0 : index
    %93 = vector.load %arg15[%c0_78, %c0_79] : memref<32x640xf32, #tpu.memory_space<vmem>>, vector<32x640xf32>
    %cst_80 = arith.constant dense<0.000000e+00> : vector<1x640xf32>
    %94 = tpu.matmul %92, %93, %cst_80 {dimension_numbers = #tpu.dot_dimension_numbers<[1], [0], [0], [1], [0, 0, 1, 1], [], []>} : vector<1x32xf32>, vector<32x640xf32>, vector<1x640xf32> -> vector<1x640xf32>
    %95 = vector.broadcast %91 : vector<1x640xf32> to vector<2x640xf32>
    %96 = arith.mulf %79, %95 : vector<2x640xf32>
    %97 = vector.broadcast %94 : vector<1x640xf32> to vector<2x640xf32>
    %98 = arith.addf %96, %97 : vector<2x640xf32>
    %cst_81 = arith.constant 2.000000e-01 : f32
    %99 = vector.broadcast %cst_81 : f32 to vector<2x640xf32>
    %100 = arith.mulf %99, %98 : vector<2x640xf32>
    %101 = arith.maximumf %98, %100 : vector<2x640xf32>
    %c0_82 = arith.constant 0 : index
    %c0_83 = arith.constant 0 : index
    %102 = vector.load %arg18[%c0_82, %c0_83] : memref<640x640xf32, #tpu.memory_space<vmem>>, vector<640x640xf32>
    %cst_84 = arith.constant dense<0.000000e+00> : vector<2x640xf32>
    %103 = tpu.matmul %101, %102, %cst_84 {dimension_numbers = #tpu.dot_dimension_numbers<[1], [0], [0], [1], [0, 0, 1, 1], [], []>} : vector<2x640xf32>, vector<640x640xf32>, vector<2x640xf32> -> vector<2x640xf32>
    %cst_85 = arith.constant dense<0.000000e+00> : vector<640xf32>
    %104 = vector.multi_reduction <add>, %103, %cst_85 [0] : vector<2x640xf32> to vector<640xf32>
    %105 = vector.shape_cast %104 : vector<640xf32> to vector<1x640xf32>
    %c0_86 = arith.constant 0 : index
    %c0_87 = arith.constant 0 : index
    %106 = vector.load %arg19[%c0_86, %c0_87] : memref<640x64xf32, #tpu.memory_space<vmem>>, vector<640x64xf32>
    %cst_88 = arith.constant dense<0.000000e+00> : vector<1x64xf32>
    %107 = tpu.matmul %105, %106, %cst_88 {dimension_numbers = #tpu.dot_dimension_numbers<[1], [0], [0], [1], [0, 0, 1, 1], [], []>} : vector<1x640xf32>, vector<640x64xf32>, vector<1x64xf32> -> vector<1x64xf32>
    %c0_89 = arith.constant 0 : index
    %c0_90 = arith.constant 0 : index
    %108 = vector.load %arg20[%c0_89, %c0_90] : memref<64x640xf32, #tpu.memory_space<vmem>>, vector<64x640xf32>
    %cst_91 = arith.constant dense<0.000000e+00> : vector<1x640xf32>
    %109 = tpu.matmul %107, %108, %cst_91 {dimension_numbers = #tpu.dot_dimension_numbers<[1], [0], [0], [1], [0, 0, 1, 1], [], []>} : vector<1x64xf32>, vector<64x640xf32>, vector<1x640xf32> -> vector<1x640xf32>
    %110 = vector.broadcast %109 : vector<1x640xf32> to vector<2x640xf32>
    %111 = arith.subf %103, %110 : vector<2x640xf32>
    %112 = arith.mulf %111, %111 : vector<2x640xf32>
    %cst_92 = arith.constant dense<0.000000e+00> : vector<640xf32>
    %113 = vector.multi_reduction <add>, %112, %cst_92 [0] : vector<2x640xf32> to vector<640xf32>
    %114 = vector.shape_cast %113 : vector<640xf32> to vector<1x640xf32>
    %c0_93 = arith.constant 0 : index
    %c0_94 = arith.constant 0 : index
    %115 = vector.load %arg19[%c0_93, %c0_94] : memref<640x64xf32, #tpu.memory_space<vmem>>, vector<640x64xf32>
    %cst_95 = arith.constant dense<0.000000e+00> : vector<1x64xf32>
    %116 = tpu.matmul %114, %115, %cst_95 {dimension_numbers = #tpu.dot_dimension_numbers<[1], [0], [0], [1], [0, 0, 1, 1], [], []>} : vector<1x640xf32>, vector<640x64xf32>, vector<1x64xf32> -> vector<1x64xf32>
    %c0_96 = arith.constant 0 : index
    %c0_97 = arith.constant 0 : index
    %117 = vector.load %arg21[%c0_96, %c0_97] : memref<1x64xf32, #tpu.memory_space<vmem>>, vector<1x64xf32>
    %cst_98 = arith.constant 9.99999974E-6 : f32
    %118 = vector.broadcast %cst_98 : f32 to vector<1x64xf32>
    %119 = arith.addf %116, %118 : vector<1x64xf32>
    %120 = math.rsqrt %119 : vector<1x64xf32>
    %121 = arith.mulf %117, %120 : vector<1x64xf32>
    %c0_99 = arith.constant 0 : index
    %c0_100 = arith.constant 0 : index
    %122 = vector.load %arg20[%c0_99, %c0_100] : memref<64x640xf32, #tpu.memory_space<vmem>>, vector<64x640xf32>
    %cst_101 = arith.constant dense<0.000000e+00> : vector<1x640xf32>
    %123 = tpu.matmul %121, %122, %cst_101 {dimension_numbers = #tpu.dot_dimension_numbers<[1], [0], [0], [1], [0, 0, 1, 1], [], []>} : vector<1x64xf32>, vector<64x640xf32>, vector<1x640xf32> -> vector<1x640xf32>
    %c0_102 = arith.constant 0 : index
    %c0_103 = arith.constant 0 : index
    %124 = vector.load %arg22[%c0_102, %c0_103] : memref<1x64xf32, #tpu.memory_space<vmem>>, vector<1x64xf32>
    %c0_104 = arith.constant 0 : index
    %c0_105 = arith.constant 0 : index
    %125 = vector.load %arg20[%c0_104, %c0_105] : memref<64x640xf32, #tpu.memory_space<vmem>>, vector<64x640xf32>
    %cst_106 = arith.constant dense<0.000000e+00> : vector<1x640xf32>
    %126 = tpu.matmul %124, %125, %cst_106 {dimension_numbers = #tpu.dot_dimension_numbers<[1], [0], [0], [1], [0, 0, 1, 1], [], []>} : vector<1x64xf32>, vector<64x640xf32>, vector<1x640xf32> -> vector<1x640xf32>
    %127 = vector.broadcast %123 : vector<1x640xf32> to vector<2x640xf32>
    %128 = arith.mulf %111, %127 : vector<2x640xf32>
    %129 = vector.broadcast %126 : vector<1x640xf32> to vector<2x640xf32>
    %130 = arith.addf %128, %129 : vector<2x640xf32>
    %cst_107 = arith.constant 2.000000e-01 : f32
    %131 = vector.broadcast %cst_107 : f32 to vector<2x640xf32>
    %132 = arith.mulf %131, %130 : vector<2x640xf32>
    %133 = arith.maximumf %130, %132 : vector<2x640xf32>
    %c0_108 = arith.constant 0 : index
    %c0_109 = arith.constant 0 : index
    %134 = vector.load %arg23[%c0_108, %c0_109] : memref<640x16xf32, #tpu.memory_space<vmem>>, vector<640x16xf32>
    %cst_110 = arith.constant dense<0.000000e+00> : vector<2x16xf32>
    %135 = tpu.matmul %133, %134, %cst_110 {dimension_numbers = #tpu.dot_dimension_numbers<[1], [0], [0], [1], [0, 0, 1, 1], [], []>} : vector<2x640xf32>, vector<640x16xf32>, vector<2x16xf32> -> vector<2x16xf32>
    %c0_111 = arith.constant 0 : index
    %c0_112 = arith.constant 0 : index
    %136 = vector.load %arg24[%c0_111, %c0_112] : memref<2x16xf32, #tpu.memory_space<vmem>>, vector<2x16xf32>
    tpu.vector_store %arg24[%c0_111, %c0_112], %135 {strides = array<i32>} : memref<2x16xf32, #tpu.memory_space<vmem>>, vector<2x16xf32>,
    return
  }
  func.func @transform_0(%arg0: i32) -> (i32, i32) {
    %c0_i32 = arith.constant 0 : i32
    %c0_i32_0 = arith.constant 0 : i32
    %c0_i32_1 = arith.constant 0 : i32
    return %c0_i32, %c0_i32_0 : i32, i32
  }
  func.func @transform_1(%arg0: i32) -> (i32, i32) {
    %c0_i32 = arith.constant 0 : i32
    %c0_i32_0 = arith.constant 0 : i32
    %c0_i32_1 = arith.constant 0 : i32
    return %c0_i32, %c0_i32_0 : i32, i32
  }
  func.func @transform_2(%arg0: i32) -> (i32, i32) {
    %c0_i32 = arith.constant 0 : i32
    %c0_i32_0 = arith.constant 0 : i32
    %c0_i32_1 = arith.constant 0 : i32
    return %c0_i32, %c0_i32_0 : i32, i32
  }
  func.func @transform_3(%arg0: i32) -> (i32, i32) {
    %c0_i32 = arith.constant 0 : i32
    %c0_i32_0 = arith.constant 0 : i32
    %c0_i32_1 = arith.constant 0 : i32
    return %c0_i32, %c0_i32_0 : i32, i32
  }
  func.func @transform_4(%arg0: i32) -> (i32, i32) {
    %c0_i32 = arith.constant 0 : i32
    %c0_i32_0 = arith.constant 0 : i32
    %c0_i32_1 = arith.constant 0 : i32
    return %c0_i32, %c0_i32_0 : i32, i32
  }
  func.func @transform_5(%arg0: i32) -> (i32, i32) {
    %c0_i32 = arith.constant 0 : i32
    %c0_i32_0 = arith.constant 0 : i32
    %c0_i32_1 = arith.constant 0 : i32
    return %c0_i32, %c0_i32_0 : i32, i32
  }
  func.func @transform_6(%arg0: i32) -> (i32, i32) {
    %c0_i32 = arith.constant 0 : i32
    %c0_i32_0 = arith.constant 0 : i32
    %c0_i32_1 = arith.constant 0 : i32
    return %c0_i32, %c0_i32_0 : i32, i32
  }
  func.func @transform_7(%arg0: i32) -> (i32, i32) {
    %c0_i32 = arith.constant 0 : i32
    %c0_i32_0 = arith.constant 0 : i32
    %c0_i32_1 = arith.constant 0 : i32
    return %c0_i32, %c0_i32_0 : i32, i32
  }
  func.func @transform_8(%arg0: i32) -> (i32, i32) {
    %c0_i32 = arith.constant 0 : i32
    %c0_i32_0 = arith.constant 0 : i32
    %c0_i32_1 = arith.constant 0 : i32
    return %c0_i32, %c0_i32_0 : i32, i32
  }
  func.func @transform_9(%arg0: i32) -> (i32, i32) {
    %c0_i32 = arith.constant 0 : i32
    %c0_i32_0 = arith.constant 0 : i32
    %c0_i32_1 = arith.constant 0 : i32
    return %c0_i32, %c0_i32_0 : i32, i32
  }
  func.func @transform_10(%arg0: i32) -> (i32, i32) {
    %c0_i32 = arith.constant 0 : i32
    %c0_i32_0 = arith.constant 0 : i32
    %c0_i32_1 = arith.constant 0 : i32
    return %c0_i32, %c0_i32_0 : i32, i32
  }
  func.func @transform_11(%arg0: i32) -> (i32, i32) {
    %c0_i32 = arith.constant 0 : i32
    %c0_i32_0 = arith.constant 0 : i32
    %c0_i32_1 = arith.constant 0 : i32
    return %c0_i32, %c0_i32_0 : i32, i32
  }
  func.func @transform_12(%arg0: i32) -> (i32, i32) {
    %c0_i32 = arith.constant 0 : i32
    %c0_i32_0 = arith.constant 0 : i32
    %c0_i32_1 = arith.constant 0 : i32
    return %c0_i32, %c0_i32_0 : i32, i32
  }
  func.func @transform_13(%arg0: i32) -> (i32, i32) {
    %c0_i32 = arith.constant 0 : i32
    %c0_i32_0 = arith.constant 0 : i32
    %c0_i32_1 = arith.constant 0 : i32
    return %c0_i32, %c0_i32_0 : i32, i32
  }
  func.func @transform_14(%arg0: i32) -> (i32, i32) {
    %c0_i32 = arith.constant 0 : i32
    %c0_i32_0 = arith.constant 0 : i32
    %c0_i32_1 = arith.constant 0 : i32
    return %c0_i32, %c0_i32_0 : i32, i32
  }
  func.func @transform_15(%arg0: i32) -> (i32, i32) {
    %c0_i32 = arith.constant 0 : i32
    %c0_i32_0 = arith.constant 0 : i32
    %c0_i32_1 = arith.constant 0 : i32
    return %c0_i32, %c0_i32_0 : i32, i32
  }
  func.func @transform_16(%arg0: i32) -> (i32, i32) {
    %c0_i32 = arith.constant 0 : i32
    %c0_i32_0 = arith.constant 0 : i32
    %c0_i32_1 = arith.constant 0 : i32
    return %c0_i32, %c0_i32_0 : i32, i32
  }
  func.func @transform_17(%arg0: i32) -> (i32, i32) {
    %c0_i32 = arith.constant 0 : i32
    %c0_i32_0 = arith.constant 0 : i32
    %c0_i32_1 = arith.constant 0 : i32
    return %c0_i32, %c0_i32_0 : i32, i32
  }
  func.func @transform_18(%arg0: i32) -> (i32, i32) {
    %c0_i32 = arith.constant 0 : i32
    %c0_i32_0 = arith.constant 0 : i32
    %c0_i32_1 = arith.constant 0 : i32
    return %c0_i32, %c0_i32_0 : i32, i32
  }
  func.func @transform_19(%arg0: i32) -> (i32, i32) {
    %c0_i32 = arith.constant 0 : i32
    %c0_i32_0 = arith.constant 0 : i32
    %c0_i32_1 = arith.constant 0 : i32
    return %c0_i32, %c0_i32_0 : i32, i32
  }
  func.func @transform_20(%arg0: i32) -> (i32, i32) {
    %c0_i32 = arith.constant 0 : i32
    %c0_i32_0 = arith.constant 0 : i32
    %c0_i32_1 = arith.constant 0 : i32
    return %c0_i32, %c0_i32_0 : i32, i32
  }
  func.func @transform_21(%arg0: i32) -> (i32, i32) {
    %c0_i32 = arith.constant 0 : i32
    %c0_i32_0 = arith.constant 0 : i32
    %c0_i32_1 = arith.constant 0 : i32
    return %c0_i32, %c0_i32_0 : i32, i32
  }
  func.func @transform_22(%arg0: i32) -> (i32, i32) {
    %c0_i32 = arith.constant 0 : i32
    %c0_i32_0 = arith.constant 0 : i32
    %c0_i32_1 = arith.constant 0 : i32
    return %c0_i32, %c0_i32_0 : i32, i32
  }
  func.func @transform_23(%arg0: i32) -> (i32, i32) {
    %c0_i32 = arith.constant 0 : i32
    %c0_i32_0 = arith.constant 0 : i32
    %c0_i32_1 = arith.constant 0 : i32
    return %c0_i32, %c0_i32_0 : i32, i32
  }
}

</mosaic_0001>

<bundles_post_ra>
// kernel: frequency_1d_encoder.1
= control target key start
LH: loop header
LB: loop body
LE: loop exit
PB: predicated region body
PF: predicated region fallthrough
CT: control target
= control target key end

     0   :  { %s23842_s0 = inlined_call_operand.vmem [shape: f32[2,320], index: 0, kind: input, shape index: {}]   ;;  %s23843_s1 = inlined_call_operand.vmem [shape: f32[320,640], index: 1, kind: input, shape index: {}]   ;;  %s23844_s2 = inlined_call_operand.vmem [shape: f32[640,640], index: 2, kind: input, shape index: {}]   ;;  %s23845_s3 = inlined_call_operand.vmem [shape: f32[640,8], index: 3, kind: input, shape index: {}]   ;;  %s23846_s4 = inlined_call_operand.vmem [shape: f32[8,640], index: 4, kind: input, shape index: {}]   ;;  %s23847_s5 = inlined_call_operand.vmem [shape: f32[1,8], index: 5, kind: input, shape index: {}]   ;;  %s23848_s6 = inlined_call_operand.vmem [shape: f32[1,8], index: 6, kind: input, shape index: {}]   ;;  %s23849_s7 = inlined_call_operand.vmem [shape: f32[640,640], index: 7, kind: input, shape index: {}]   ;;  %s23850_s8 = inlined_call_operand.vmem [shape: f32[640,16], index: 8, kind: input, shape index: {}]   ;;  %s23851_s9 = inlined_call_operand.vmem [shape: f32[16,640], index: 9, kind: input, shape index: {}]   ;;  %s23852_s10 = inlined_call_operand.vmem [shape: f32[1,16], index: 10, kind: input, shape index: {}]   ;;  %s23853_s11 = inlined_call_operand.vmem [shape: f32[1,16], index: 11, kind: input, shape index: {}]   ;;  %s23854_s12 = inlined_call_operand.vmem [shape: f32[640,640], index: 12, kind: input, shape index: {}]   ;;  %s23855_s13 = inlined_call_operand.vmem [shape: f32[640,32], index: 13, kind: input, shape index: {}]   ;;  %s23856_s14 = inlined_call_operand.vmem [shape: f32[32,640], index: 14, kind: input, shape index: {}]   ;;  %s23857_s15 = inlined_call_operand.vmem [shape: f32[1,32], index: 15, kind: input, shape index: {}]   ;;  %s23858_s16 = inlined_call_operand.vmem [shape: f32[1,32], index: 16, kind: input, shape index: {}]   ;;  %s23859_s17 = inlined_call_operand.vmem [shape: f32[640,640], index: 17, kind: input, shape index: {}]   ;;  %s23860_s18 = inlined_call_operand.vmem [shape: f32[640,64], index: 18, kind: input, shape index: {}]   ;;  %s23861_s19 = inlined_call_operand.vmem [shape: f32[64,640], index: 19, kind: input, shape index: {}]   ;;  %s23862_s20 = inlined_call_operand.vmem [shape: f32[1,64], index: 20, kind: input, shape index: {}]   ;;  %s23863_s21 = inlined_call_operand.vmem [shape: f32[1,64], index: 21, kind: input, shape index: {}]   ;;  %s23864_s22 = inlined_call_operand.vmem [shape: f32[640,16], index: 22, kind: input, shape index: {}]   ;;  %s23865_s23 = inlined_call_operand.hbm [shape: f32[2,16], index: 23, kind: output, shape index: {}]  }
   0x1   :  { %23897 = sst [smem:[#allocation18_spill]] %s23842_s0 }
   0x2   :  { %23898 = sst [smem:[#allocation19_spill]] %s23843_s1 }
   0x3   :  { %23899 = sst [smem:[#allocation20_spill]] %s23844_s2 }
   0x4   :  { %23900 = sst [smem:[#allocation21_spill]] %s23845_s3 }
   0x5   :  { %23901 = sst [smem:[#allocation22_spill]] %s23846_s4 }
   0x6   :  { %23902 = sst [smem:[#allocation23_spill]] %s23847_s5 }
   0x7   :  { %23903 = sst [smem:[#allocation24_spill]] %s23848_s6 }
   0x8   :  { %23904 = sst [smem:[#allocation25_spill]] %s23849_s7 }
   0x9   :  { %s23905_s24 = sld [smem:[#allocation19_spill]]  ;;  %v15301_v40 = vmov 1983009808   ;;  %v281_v42 = vlaneseq  ;;  %s23906_s3 = sld [smem:[#allocation18_spill]]  ;;  %vm295_vm0 = vcmask 523264   ;;  %vm15304_vm1 = vmmov 0  }
   0xa   :  { %v279_v41 = vunpack.c.l.s4 %v15301_v40  ;;  %s23907_s0 = sld [smem:[#allocation20_spill]] }
   0xb   :  { %v15543_v60 = vshrl.u32 %v281_v42, 7 }
   0xc   :  { %v280_v59 = vunpack.c.0.s8 %v279_v41 }
   0xf   :  { %v77_v0 = vld [vmem:[%s23905_s24 + $0x8] sm:$0xff]  ;;  %v82_v1 = vld [vmem:[%s23905_s24 + $0x30] sm:$0xff]  ;;  %v76_v2 = vld [vmem:[%s23905_s24] sm:$0xff] }
  0x10   :  { %v12368_v3 = vpack.c.bf16 %v82_v1, %v77_v0  ;;  %v81_v4 = vld [vmem:[%s23905_s24 + $0x28] sm:$0xff]  ;;  %v87_v5 = vld [vmem:[%s23905_s24 + $0x58] sm:$0xff]  ;;  %v92_v6 = vld [vmem:[%s23905_s24 + $0x80] sm:$0xff] }
  0x11   :  { %v12370_v7 = vpack.c.bf16 %v81_v4, %v76_v2  ;;  %v12372_v8 = vpack.c.bf16 %v92_v6, %v87_v5  ;;  %v86_v9 = vld [vmem:[%s23905_s24 + $0x50] sm:$0xff]  ;;  %v91_v10 = vld [vmem:[%s23905_s24 + $0x78] sm:$0xff]  ;;  %v97_v11 = vld [vmem:[%s23905_s24 + $0xa8] sm:$0xff] }
  0x12   :  { %12369 = vmatprep.subr.bf16.mxu0 %v12368_v3  ;;  %v102_v12 = vld [vmem:[%s23905_s24 + $0xd0] sm:$0xff]  ;;  %v12374_v13 = vpack.c.bf16 %v91_v10, %v86_v9  ;;  %v96_v15 = vld [vmem:[%s23905_s24 + $0xa0] sm:$0xff]  ;;  %v101_v16 = vld [vmem:[%s23905_s24 + $0xc8] sm:$0xff] }
  0x13   :  { %12371 = vmatpush1.bf16.msra.mxu0 %v12370_v7  ;;  %v12376_v14 = vpack.c.bf16 %v102_v12, %v97_v11  ;;  %v107_v17 = vld [vmem:[%s23905_s24 + $0xf8] sm:$0xff]  ;;  %v112_v18 = vld [vmem:[%s23905_s24 + $0x120] sm:$0xff]  ;;  %v12378_v19 = vpack.c.bf16 %v101_v16, %v96_v15  ;;  %v106_v21 = vld [vmem:[%s23905_s24 + $0xf0] sm:$0xff]  ;;  %v15573_v11 = vsub.s32 %v280_v59, %v15543_v60 }
  0x14   :  { %12373 = vmatprep.subr.bf16.mxu0 %v12372_v8  ;;  %v12380_v20 = vpack.c.bf16 %v112_v18, %v107_v17  ;;  %v111_v22 = vld [vmem:[%s23905_s24 + $0x118] sm:$0xff]  ;;  %v117_v23 = vld [vmem:[%s23905_s24 + $0x148] sm:$0xff]  ;;  %v122_v24 = vld [vmem:[%s23905_s24 + $0x170] sm:$0xff] }
  0x15   :  { %v12382_v25 = vpack.c.bf16 %v111_v22, %v106_v21  ;;  %v12384_v26 = vpack.c.bf16 %v122_v24, %v117_v23  ;;  %v116_v27 = vld [vmem:[%s23905_s24 + $0x140] sm:$0xff]  ;;  %v121_v28 = vld [vmem:[%s23905_s24 + $0x168] sm:$0xff]  ;;  %v127_v29 = vld [vmem:[%s23905_s24 + $0x198] sm:$0xff] }
  0x16   :  { %v132_v30 = vld [vmem:[%s23905_s24 + $0x1c0] sm:$0xff]  ;;  %v12386_v31 = vpack.c.bf16 %v121_v28, %v116_v27  ;;  %v79_v32 = vld [vmem:[%s23905_s24 + $0x18] sm:$0xff]  ;;  %v78_v34 = vld [vmem:[%s23905_s24 + $0x10] sm:$0xff] }
  0x17   :  { %12375 = vmatpush1.bf16.msra.mxu0 %v12374_v13  ;;  %v84_v33 = vld [vmem:[%s23905_s24 + $0x40] sm:$0xff]  ;;  %v12388_v35 = vpack.c.bf16 %v132_v30, %v127_v29  ;;  %v126_v36 = vld [vmem:[%s23905_s24 + $0x190] sm:$0xff]  ;;  %v131_v37 = vld [vmem:[%s23905_s24 + $0x1b8] sm:$0xff] }
  0x18   :  { %12377 = vmatprep.subr.bf16.mxu0 %v12376_v14  ;;  %v12448_v38 = vpack.c.bf16 %v84_v33, %v79_v32  ;;  %v83_v39 = vld [vmem:[%s23905_s24 + $0x38] sm:$0xff]  ;;  %v137_v43 = vld [vmem:[%s23905_s24 + $0x1e8] sm:$0xff]  ;;  %v142_v44 = vld [vmem:[%s23905_s24 + $0x210] sm:$0xff]  ;;  %v12390_v50 = vpack.c.bf16 %v131_v37, %v126_v36 }
  0x19   :  { %v12450_v45 = vpack.c.bf16 %v83_v39, %v78_v34  ;;  %v89_v46 = vld [vmem:[%s23905_s24 + $0x68] sm:$0xff]  ;;  %v94_v47 = vld [vmem:[%s23905_s24 + $0x90] sm:$0xff]  ;;  %v88_v48 = vld [vmem:[%s23905_s24 + $0x60] sm:$0xff]  ;;  %v12392_v55 = vpack.c.bf16 %v142_v44, %v137_v43 }
  0x1a   :  { %12449 = vmatprep.subr.bf16.mxu1 %v12448_v38  ;;  %v93_v49 = vld [vmem:[%s23905_s24 + $0x88] sm:$0xff]  ;;  %v136_v51 = vld [vmem:[%s23905_s24 + $0x1e0] sm:$0xff]  ;;  %v12452_v53 = vpack.c.bf16 %v94_v47, %v89_v46  ;;  %v147_v56 = vld [vmem:[%s23905_s24 + $0x238] sm:$0xff] }
  0x1b   :  { %12379 = vmatpush1.bf16.msra.mxu0 %v12378_v19  ;;  %v141_v52 = vld [vmem:[%s23905_s24 + $0x208] sm:$0xff]  ;;  %12451 = vmatpush1.bf16.msra.mxu1 %v12450_v45  ;;  %v12454_v54 = vpack.c.bf16 %v93_v49, %v88_v48  ;;  %v99_v57 = vld [vmem:[%s23905_s24 + $0xb8] sm:$0xff]  ;;  %v104_v58 = vld [vmem:[%s23905_s24 + $0xe0] sm:$0xff] }
  0x1c   :  { %12381 = vmatprep.subr.bf16.mxu0 %v12380_v20  ;;  %v152_v61 = vld [vmem:[%s23905_s24 + $0x260] sm:$0xff]  ;;  %12453 = vmatprep.subr.bf16.mxu1 %v12452_v53  ;;  %v12456_v62 = vpack.c.bf16 %v104_v58, %v99_v57  ;;  %v98_v63 = vld [vmem:[%s23905_s24 + $0xb0] sm:$0xff]  ;;  %v103_v0 = vld [vmem:[%s23905_s24 + $0xd8] sm:$0xff]  ;;  %v12394_v1 = vpack.c.bf16 %v141_v52, %v136_v51 }
  0x1d   :  { %v146_v2 = vld [vmem:[%s23905_s24 + $0x230] sm:$0xff]  ;;  %v12458_v3 = vpack.c.bf16 %v103_v0, %v98_v63  ;;  %v109_v4 = vld [vmem:[%s23905_s24 + $0x108] sm:$0xff]  ;;  %v12396_v6 = vpack.c.bf16 %v152_v61, %v147_v56  ;;  %v151_v7 = vld [vmem:[%s23905_s24 + $0x258] sm:$0xff] }
  0x1e   :  { %v114_v5 = vld [vmem:[%s23905_s24 + $0x130] sm:$0xff]  ;;  %v108_v9 = vld [vmem:[%s23905_s24 + $0x100] sm:$0xff]  ;;  %v113_v10 = vld [vmem:[%s23905_s24 + $0x128] sm:$0xff]  ;;  %v12398_v16 = vpack.c.bf16 %v151_v7, %v146_v2 }
  0x1f   :  { %12383 = vmatpush1.bf16.msra.mxu0 %v12382_v25  ;;  %12455 = vmatpush1.bf16.msra.mxu1 %v12454_v54  ;;  %v12460_v8 = vpack.c.bf16 %v114_v5, %v109_v4  ;;  %v157_v12 = vld [vmem:[%s23905_s24 + $0x288] sm:$0xff]  ;;  %v162_v13 = vld [vmem:[%s23905_s24 + $0x2b0] sm:$0xff]  ;;  %v119_v14 = vld [vmem:[%s23905_s24 + $0x158] sm:$0xff]  ;;  %v12462_v19 = vpack.c.bf16 %v113_v10, %v108_v9 }
  0x20   :  { %12385 = vmatprep.subr.bf16.mxu0 %v12384_v26  ;;  %12457 = vmatprep.subr.bf16.mxu1 %v12456_v62  ;;  %v124_v15 = vld [vmem:[%s23905_s24 + $0x180] sm:$0xff]  ;;  %v161_v18 = vld [vmem:[%s23905_s24 + $0x2a8] sm:$0xff]  ;;  %v12400_v21 = vpack.c.bf16 %v162_v13, %v157_v12  ;;  %v167_v22 = vld [vmem:[%s23905_s24 + $0x2d8] sm:$0xff] }
  0x21   :  { %v156_v17 = vld [vmem:[%s23905_s24 + $0x280] sm:$0xff]  ;;  %v12464_v23 = vpack.c.bf16 %v124_v15, %v119_v14  ;;  %v118_v24 = vld [vmem:[%s23905_s24 + $0x150] sm:$0xff]  ;;  %v123_v25 = vld [vmem:[%s23905_s24 + $0x178] sm:$0xff] }
  0x22   :  { %v15596_v20 = vld [vmem:[%s23906_s3] sm:$0x3f]  ;;  %v129_v28 = vld [vmem:[%s23905_s24 + $0x1a8] sm:$0xff]  ;;  %v134_v29 = vld [vmem:[%s23905_s24 + $0x1d0] sm:$0xff]  ;;  %v12466_v34 = vpack.c.bf16 %v123_v25, %v118_v24 }
  0x23   :  { %12387 = vmatpush1.bf16.msra.mxu0 %v12386_v31  ;;  %12459 = vmatpush1.bf16.msra.mxu1 %v12458_v3  ;;  %v15609_v26 = vrot.slane %v15596_v20, %v15573_v11  ;;  %v172_v27 = vld [vmem:[%s23905_s24 + $0x300] sm:$0xff]  ;;  %v12402_v31 = vpack.c.bf16 %v161_v18, %v156_v17  ;;  %v166_v32 = vld [vmem:[%s23905_s24 + $0x2d0] sm:$0xff]  ;;  %v171_v33 = vld [vmem:[%s23905_s24 + $0x2f8] sm:$0xff]  ;;  %v12468_v37 = vpack.c.bf16 %v134_v29, %v129_v28 }
  0x24   :  { %12389 = vmatprep.subr.bf16.mxu0 %v12388_v35  ;;  %12461 = vmatprep.subr.bf16.mxu1 %v12460_v8  ;;  %v12404_v35 = vpack.c.bf16 %v172_v27, %v167_v22  ;;  %v177_v36 = vld [vmem:[%s23905_s24 + $0x328] sm:$0xff]  ;;  %v128_v38 = vld [vmem:[%s23905_s24 + $0x1a0] sm:$0xff]  ;;  %v182_v40 = vld [vmem:[%s23905_s24 + $0x350] sm:$0xff]  ;;  %v12406_v43 = vpack.c.bf16 %v171_v33, %v166_v32 }
  0x25   :  { %v15622_v30 = vcombine.high %v15609_v26, %v15609_v26  ;;  %v133_v39 = vld [vmem:[%s23905_s24 + $0x1c8] sm:$0xff]  ;;  %v139_v41 = vld [vmem:[%s23905_s24 + $0x1f8] sm:$0xff]  ;;  %v144_v42 = vld [vmem:[%s23905_s24 + $0x220] sm:$0xff]  ;;  %v12408_v47 = vpack.c.bf16 %v182_v40, %v177_v36 }
  0x26   :  { %v176_v44 = vld [vmem:[%s23905_s24 + $0x320] sm:$0xff]  ;;  %v181_v45 = vld [vmem:[%s23905_s24 + $0x348] sm:$0xff]  ;;  %v12470_v46 = vpack.c.bf16 %v133_v39, %v128_v38  ;;  %v187_v48 = vld [vmem:[%s23905_s24 + $0x378] sm:$0xff]  ;;  %v12472_v49 = vpack.c.bf16 %v144_v42, %v139_v41 }
  0x27   :  { %12391 = vmatpush1.bf16.msra.mxu0 %v12390_v50  ;;  %12463 = vmatpush1.bf16.msra.mxu1 %v12462_v19  ;;  %v138_v50 = vld [vmem:[%s23905_s24 + $0x1f0] sm:$0xff]  ;;  %v143_v51 = vld [vmem:[%s23905_s24 + $0x218] sm:$0xff]  ;;  %v192_v52 = vld [vmem:[%s23905_s24 + $0x3a0] sm:$0xff] }
  0x28   :  { %12393 = vmatprep.subr.bf16.mxu0 %v12392_v55  ;;  %12465 = vmatprep.subr.bf16.mxu1 %v12464_v23  ;;  %v149_v53 = vld [vmem:[%s23905_s24 + $0x248] sm:$0xff]  ;;  %v154_v54 = vld [vmem:[%s23905_s24 + $0x270] sm:$0xff]  ;;  %v12410_v55 = vpack.c.bf16 %v181_v45, %v176_v44  ;;  %v191_v57 = vld [vmem:[%s23905_s24 + $0x398] sm:$0xff]  ;;  %v12474_v58 = vpack.c.bf16 %v143_v51, %v138_v50  ;;  %v12412_v59 = vpack.c.bf16 %v192_v52, %v187_v48 }
  0x29   :  { %362 = vmatprep.mubr.f32.mxu0 %v15622_v30  ;;  %504 = vmatprep.mubr.f32.mxu1 %v15622_v30  ;;  %v186_v56 = vld [vmem:[%s23905_s24 + $0x370] sm:$0xff]  ;;  %v197_v61 = vld [vmem:[%s23905_s24 + $0x3c8] sm:$0xff]  ;;  %v12476_v62 = vpack.c.bf16 %v154_v54, %v149_v53  ;;  %v148_v63 = vld [vmem:[%s23905_s24 + $0x240] sm:$0xff] }
  0x2a   :  { %v153_v0 = vld [vmem:[%s23905_s24 + $0x268] sm:$0xff]  ;;  %v159_v2 = vld [vmem:[%s23905_s24 + $0x298] sm:$0xff]  ;;  %v164_v3 = vld [vmem:[%s23905_s24 + $0x2c0] sm:$0xff]  ;;  %v12414_v4 = vpack.c.bf16 %v191_v57, %v186_v56 }
  0x2b   :  { %12395 = vmatpush1.bf16.msra.mxu0 %v12394_v1  ;;  %12467 = vmatpush1.bf16.msra.mxu1 %v12466_v34  ;;  %v202_v1 = vld [vmem:[%s23905_s24 + $0x3f0] sm:$0xff]  ;;  %v196_v5 = vld [vmem:[%s23905_s24 + $0x3c0] sm:$0xff]  ;;  %v12478_v7 = vpack.c.bf16 %v153_v0, %v148_v63  ;;  %v207_v9 = vld [vmem:[%s23905_s24 + $0x418] sm:$0xff]  ;;  %v12480_v10 = vpack.c.bf16 %v164_v3, %v159_v2 }
  0x2c   :  { %12397 = vmatprep.subr.bf16.mxu0 %v12396_v6  ;;  %12469 = vmatprep.subr.bf16.mxu1 %v12468_v37  ;;  %v201_v6 = vld [vmem:[%s23905_s24 + $0x3e8] sm:$0xff]  ;;  %v12416_v8 = vpack.c.bf16 %v202_v1, %v197_v61  ;;  %v158_v12 = vld [vmem:[%s23905_s24 + $0x290] sm:$0xff]  ;;  %v163_v13 = vld [vmem:[%s23905_s24 + $0x2b8] sm:$0xff] }
  0x2d   :  { %v212_v14 = vld [vmem:[%s23905_s24 + $0x440] sm:$0xff]  ;;  %v169_v15 = vld [vmem:[%s23905_s24 + $0x2e8] sm:$0xff]  ;;  %v12418_v17 = vpack.c.bf16 %v201_v6, %v196_v5  ;;  %v206_v18 = vld [vmem:[%s23905_s24 + $0x410] sm:$0xff] }
  0x2e   :  { %v211_v19 = vld [vmem:[%s23905_s24 + $0x438] sm:$0xff]  ;;  %v12420_v22 = vpack.c.bf16 %v212_v14, %v207_v9  ;;  %v217_v23 = vld [vmem:[%s23905_s24 + $0x468] sm:$0xff]  ;;  %v168_v25 = vld [vmem:[%s23905_s24 + $0x2e0] sm:$0xff] }
  0x2f   :  { %12399 = vmatpush1.bf16.msra.mxu0 %v12398_v16  ;;  %12471 = vmatpush1.bf16.msra.mxu1 %v12470_v46  ;;  %v174_v16 = vld [vmem:[%s23905_s24 + $0x310] sm:$0xff]  ;;  %v173_v27 = vld [vmem:[%s23905_s24 + $0x308] sm:$0xff]  ;;  %v179_v29 = vld [vmem:[%s23905_s24 + $0x338] sm:$0xff]  ;;  %v12422_v32 = vpack.c.bf16 %v211_v19, %v206_v18  ;;  %v23873_v19 = vmov 0.0  }
  0x30   :  { %12401 = vmatprep.subr.bf16.mxu0 %v12400_v21  ;;  %12473 = vmatprep.subr.bf16.mxu1 %v12472_v49  ;;  %v12482_v21 = vpack.c.bf16 %v163_v13, %v158_v12  ;;  %v12484_v24 = vpack.c.bf16 %v174_v16, %v169_v15  ;;  %v222_v28 = vld [vmem:[%s23905_s24 + $0x490] sm:$0xff]  ;;  %v216_v33 = vld [vmem:[%s23905_s24 + $0x460] sm:$0xff]  ;;  %v221_v34 = vld [vmem:[%s23905_s24 + $0x488] sm:$0xff] }
  0x31   :  { %v12424_v36 = vpack.c.bf16 %v222_v28, %v217_v23  ;;  %v227_v37 = vld [vmem:[%s23905_s24 + $0x4b8] sm:$0xff]  ;;  %v178_v39 = vld [vmem:[%s23905_s24 + $0x330] sm:$0xff]  ;;  %v232_v41 = vld [vmem:[%s23905_s24 + $0x4e0] sm:$0xff]  ;;  %v12426_v44 = vpack.c.bf16 %v221_v34, %v216_v33 }
  0x32   :  { %v183_v40 = vld [vmem:[%s23905_s24 + $0x358] sm:$0xff]  ;;  %v189_v42 = vld [vmem:[%s23905_s24 + $0x388] sm:$0xff]  ;;  %v226_v45 = vld [vmem:[%s23905_s24 + $0x4b0] sm:$0xff]  ;;  %v12428_v48 = vpack.c.bf16 %v232_v41, %v227_v37 }
  0x33   :  { %12403 = vmatpush1.bf16.msra.mxu0 %v12402_v31  ;;  %12475 = vmatpush1.bf16.msra.mxu1 %v12474_v58  ;;  %v184_v31 = vld [vmem:[%s23905_s24 + $0x360] sm:$0xff]  ;;  %v231_v46 = vld [vmem:[%s23905_s24 + $0x4d8] sm:$0xff]  ;;  %v237_v49 = vld [vmem:[%s23905_s24 + $0x508] sm:$0xff] }
  0x34   :  { %12405 = vmatprep.subr.bf16.mxu0 %v12404_v35  ;;  %12477 = vmatprep.subr.bf16.mxu1 %v12476_v62  ;;  %v12486_v35 = vpack.c.bf16 %v173_v27, %v168_v25  ;;  %v12488_v38 = vpack.c.bf16 %v184_v31, %v179_v29  ;;  %v188_v51 = vld [vmem:[%s23905_s24 + $0x380] sm:$0xff]  ;;  %v193_v52 = vld [vmem:[%s23905_s24 + $0x3a8] sm:$0xff]  ;;  %v242_v53 = vld [vmem:[%s23905_s24 + $0x530] sm:$0xff]  ;;  %v12430_v56 = vpack.c.bf16 %v231_v46, %v226_v45 }
  0x35   :  { %v199_v54 = vld [vmem:[%s23905_s24 + $0x3d8] sm:$0xff]  ;;  %v12494_v57 = vpack.c.bf16 %v193_v52, %v188_v51  ;;  %v12432_v58 = vpack.c.bf16 %v242_v53, %v237_v49  ;;  %v241_v61 = vld [vmem:[%s23905_s24 + $0x528] sm:$0xff]  ;;  %v252_v0 = vld [vmem:[%s23905_s24 + $0x580] sm:$0xff] }
  0x36   :  { %v247_v62 = vld [vmem:[%s23905_s24 + $0x558] sm:$0xff]  ;;  %v198_v1 = vld [vmem:[%s23905_s24 + $0x3d0] sm:$0xff]  ;;  %v209_v3 = vld [vmem:[%s23905_s24 + $0x428] sm:$0xff] }
  0x37   :  { %12407 = vmatpush1.bf16.msra.mxu0 %v12406_v43  ;;  %12479 = vmatpush1.bf16.msra.mxu1 %v12478_v7  ;;  %v194_v43 = vld [vmem:[%s23905_s24 + $0x3b0] sm:$0xff]  ;;  %v203_v2 = vld [vmem:[%s23905_s24 + $0x3f8] sm:$0xff]  ;;  %v12436_v6 = vpack.c.bf16 %v252_v0, %v247_v62  ;;  %v257_v9 = vld [vmem:[%s23905_s24 + $0x5a8] sm:$0xff] }
  0x38   :  { %12409 = vmatprep.subr.bf16.mxu0 %v12408_v47  ;;  %12481 = vmatprep.subr.bf16.mxu1 %v12480_v10  ;;  %v12490_v47 = vpack.c.bf16 %v183_v40, %v178_v39  ;;  %v12492_v50 = vpack.c.bf16 %v194_v43, %v189_v42  ;;  %v246_v7 = vld [vmem:[%s23905_s24 + $0x550] sm:$0xff]  ;;  %v12498_v10 = vpack.c.bf16 %v203_v2, %v198_v1  ;;  %v208_v14 = vld [vmem:[%s23905_s24 + $0x420] sm:$0xff]  ;;  %v213_v15 = vld [vmem:[%s23905_s24 + $0x448] sm:$0xff] }
  0x39   :  { %v262_v12 = vld [vmem:[%s23905_s24 + $0x5d0] sm:$0xff]  ;;  %v219_v16 = vld [vmem:[%s23905_s24 + $0x478] sm:$0xff]  ;;  %v261_v23 = vld [vmem:[%s23905_s24 + $0x5c8] sm:$0xff]  ;;  %v12502_v25 = vpack.c.bf16 %v213_v15, %v208_v14 }
  0x3a   :  { %v272_v27 = vld [vmem:[%s23905_s24 + $0x620] sm:$0xff]  ;;  %v218_v29 = vld [vmem:[%s23905_s24 + $0x470] sm:$0xff]  ;;  %v223_v31 = vld [vmem:[%s23905_s24 + $0x498] sm:$0xff] }
  0x3b   :  { %12411 = vmatpush1.bf16.msra.mxu0 %v12410_v55  ;;  %12483 = vmatpush1.bf16.msra.mxu1 %v12482_v21  ;;  %v204_v55 = vld [vmem:[%s23905_s24 + $0x400] sm:$0xff]  ;;  %v12440_v21 = vpack.c.bf16 %v262_v12, %v257_v9  ;;  %v234_v33 = vld [vmem:[%s23905_s24 + $0x4f0] sm:$0xff]  ;;  %v271_v37 = vld [vmem:[%s23905_s24 + $0x618] sm:$0xff] }
  0x3c   :  { %12413 = vmatprep.subr.bf16.mxu0 %v12412_v59  ;;  %12485 = vmatprep.subr.bf16.mxu1 %v12484_v24  ;;  %v236_v59 = vld [vmem:[%s23905_s24 + $0x500] sm:$0xff]  ;;  %v12496_v63 = vpack.c.bf16 %v204_v55, %v199_v54  ;;  %v267_v24 = vld [vmem:[%s23905_s24 + $0x5f8] sm:$0xff]  ;;  %v233_v41 = vld [vmem:[%s23905_s24 + $0x4e8] sm:$0xff] }
  0x3d   :  { %v12434_v5 = vpack.c.bf16 %v241_v61, %v236_v59  ;;  %v228_v39 = vld [vmem:[%s23905_s24 + $0x4c0] sm:$0xff]  ;;  %v165_v43 = vld [vmem:[%s23905_s24 + $0x2c8] sm:$0xff]  ;;  %v239_v45 = vld [vmem:[%s23905_s24 + $0x518] sm:$0xff] }
  0x3e   :  { %v160_v42 = vld [vmem:[%s23905_s24 + $0x2a0] sm:$0xff]  ;;  %v238_v52 = vld [vmem:[%s23905_s24 + $0x510] sm:$0xff]  ;;  %v243_v53 = vld [vmem:[%s23905_s24 + $0x538] sm:$0xff] }
  0x3f   :  { %12415 = vmatpush1.bf16.msra.mxu0 %v12414_v4  ;;  %12487 = vmatpush1.bf16.msra.mxu1 %v12486_v35  ;;  %v214_v4 = vld [vmem:[%s23905_s24 + $0x450] sm:$0xff]  ;;  %v12444_v35 = vpack.c.bf16 %v272_v27, %v267_v24  ;;  %v244_v46 = vld [vmem:[%s23905_s24 + $0x540] sm:$0xff]  ;;  %v12528_v49 = vpack.c.bf16 %v165_v43, %v160_v42  ;;  %v249_v54 = vld [vmem:[%s23905_s24 + $0x568] sm:$0xff]  ;;  %v12514_v61 = vpack.c.bf16 %v243_v53, %v238_v52 }
  0x40   :  { %12417 = vmatprep.subr.bf16.mxu0 %v12416_v8  ;;  %12489 = vmatprep.subr.bf16.mxu1 %v12488_v38  ;;  %v251_v8 = vld [vmem:[%s23905_s24 + $0x578] sm:$0xff]  ;;  %v12500_v13 = vpack.c.bf16 %v214_v4, %v209_v3  ;;  %v12506_v38 = vpack.c.bf16 %v223_v31, %v218_v29  ;;  %v12512_v51 = vpack.c.bf16 %v244_v46, %v239_v45  ;;  %v90_v62 = vld [vmem:[%s23905_s24 + $0x70] sm:$0xff]  ;;  %v253_v1 = vld [vmem:[%s23905_s24 + $0x588] sm:$0xff] }
  0x41   :  { %v12438_v18 = vpack.c.bf16 %v251_v8, %v246_v7  ;;  %v180_v3 = vld [vmem:[%s23905_s24 + $0x340] sm:$0xff]  ;;  %v185_v4 = vld [vmem:[%s23905_s24 + $0x368] sm:$0xff]  ;;  %v258_v9 = vld [vmem:[%s23905_s24 + $0x5b0] sm:$0xff] }
  0x42   :  { %v100_v12 = vld [vmem:[%s23905_s24 + $0xc0] sm:$0xff]  ;;  %v263_v15 = vld [vmem:[%s23905_s24 + $0x5d8] sm:$0xff]  ;;  %v110_v27 = vld [vmem:[%s23905_s24 + $0x110] sm:$0xff] }
  0x43   :  { %12419 = vmatpush1.bf16.msra.mxu0 %v12418_v17  ;;  %12491 = vmatpush1.bf16.msra.mxu1 %v12490_v47  ;;  %v224_v17 = vld [vmem:[%s23905_s24 + $0x4a0] sm:$0xff]  ;;  %v273_v29 = vld [vmem:[%s23905_s24 + $0x628] sm:$0xff]  ;;  %v130_v45 = vld [vmem:[%s23905_s24 + $0x1b0] sm:$0xff] }
  0x44   :  { %12421 = vmatprep.subr.bf16.mxu0 %v12420_v22  ;;  %12493 = vmatprep.subr.bf16.mxu1 %v12492_v50  ;;  %v256_v22 = vld [vmem:[%s23905_s24 + $0x5a0] sm:$0xff]  ;;  %v12504_v28 = vpack.c.bf16 %v224_v17, %v219_v16  ;;  %v190_v16 = vld [vmem:[%s23905_s24 + $0x390] sm:$0xff]  ;;  %v195_v17 = vld [vmem:[%s23905_s24 + $0x3b8] sm:$0xff] }
  0x45   :  { %v12442_v34 = vpack.c.bf16 %v261_v23, %v256_v22  ;;  %v80_v50 = vld [vmem:[%s23905_s24 + $0x20] sm:$0xff]  ;;  %v12522_v23 = vpack.c.bf16 %v263_v15, %v258_v9  ;;  %v135_v46 = vld [vmem:[%s23905_s24 + $0x1d8] sm:$0xff] }
  0x46   :  { %v268_v24 = vld [vmem:[%s23905_s24 + $0x600] sm:$0xff] }
  0x47   :  { %12423 = vmatpush1.bf16.msra.mxu0 %v12422_v32  ;;  %12495 = vmatpush1.bf16.msra.mxu1 %v12494_v57  ;;  %v229_v32 = vld [vmem:[%s23905_s24 + $0x4c8] sm:$0xff]  ;;  %v170_v57 = vld [vmem:[%s23905_s24 + $0x2f0] sm:$0xff]  ;;  %v200_v31 = vld [vmem:[%s23905_s24 + $0x3e0] sm:$0xff] }
  0x48   :  { %12425 = vmatprep.subr.bf16.mxu0 %v12424_v36  ;;  %12497 = vmatprep.subr.bf16.mxu1 %v12496_v63  ;;  %v266_v36 = vld [vmem:[%s23905_s24 + $0x5f0] sm:$0xff]  ;;  %v12508_v40 = vpack.c.bf16 %v234_v33, %v229_v32  ;;  %v95_v63 = vld [vmem:[%s23905_s24 + $0x98] sm:$0xff]  ;;  %v205_v32 = vld [vmem:[%s23905_s24 + $0x408] sm:$0xff] }
  0x49   :  { %v12446_v47 = vpack.c.bf16 %v271_v37, %v266_v36  ;;  %v12534_v7 = vpack.c.bf16 %v95_v63, %v90_v62  ;;  %v120_v36 = vld [vmem:[%s23905_s24 + $0x160] sm:$0xff]  ;;  %v125_v37 = vld [vmem:[%s23905_s24 + $0x188] sm:$0xff] }
  0x4a   :  { %v12546_v42 = vpack.c.bf16 %v125_v37, %v120_v36 }
  0x4b   :  { %12427 = vmatpush1.bf16.msra.mxu0 %v12426_v44  ;;  %12499 = vmatpush1.bf16.msra.mxu1 %v12498_v10  ;;  %v277_v44 = vcombine.high %v15596_v20, %v15596_v20  ;;  %v85_v20 = vld [vmem:[%s23905_s24 + $0x48] sm:$0xff]  ;;  %v12536_v10 = vpack.c.bf16 %v185_v4, %v180_v3  ;;  %v275_v3 = vld [vmem:[%s23905_s24 + $0x638] sm:$0xff] }
  0x4c   :  { %12429 = vmatprep.subr.bf16.mxu0 %v12428_v48  ;;  %12501 = vmatprep.subr.bf16.mxu1 %v12500_v13  ;;  %v12510_v48 = vpack.c.bf16 %v233_v41, %v228_v39  ;;  %v12530_v59 = vpack.c.bf16 %v85_v20, %v80_v50  ;;  %v105_v13 = vld [vmem:[%s23905_s24 + $0xe8] sm:$0xff]  ;;  %v215_v39 = vld [vmem:[%s23905_s24 + $0x458] sm:$0xff]  ;;  %v250_v50 = vld [vmem:[%s23905_s24 + $0x570] sm:$0xff] }
  0x4d   :  { %v15910_v55 = vrot.slane %v277_v44, %v15573_v11  ;;  %v248_v11 = vld [vmem:[%s23905_s24 + $0x560] sm:$0xff]  ;;  %v12538_v22 = vpack.c.bf16 %v105_v13, %v100_v12  ;;  %v245_v41 = vld [vmem:[%s23905_s24 + $0x548] sm:$0xff]  ;;  %v255_v20 = vld [vmem:[%s23905_s24 + $0x598] sm:$0xff] }
  0x4e   :  { %v12518_v8 = vpack.c.bf16 %v253_v1, %v248_v11  ;;  %v12564_v53 = vpack.c.bf16 %v255_v20, %v250_v50  ;;  %v155_v1 = vld [vmem:[%s23905_s24 + $0x278] sm:$0xff] }
  0x4f   :  { %12431 = vmatpush1.bf16.msra.mxu0 %v12430_v56  ;;  %12503 = vmatpush1.bf16.msra.mxu1 %v12502_v25  ;;  %v254_v56 = vld [vmem:[%s23905_s24 + $0x590] sm:$0xff]  ;;  %v12540_v25 = vpack.c.bf16 %v195_v17, %v190_v16  ;;  %v735_v4 = vld [vmem:[%s23907_s0 + $0x18] sm:$0xff] }
  0x50   :  { %12433 = vmatprep.subr.bf16.mxu0 %v12432_v58  ;;  %12505 = vmatprep.subr.bf16.mxu1 %v12504_v28  ;;  %v175_v58 = vld [vmem:[%s23905_s24 + $0x318] sm:$0xff]  ;;  %v12516_v0 = vpack.c.bf16 %v254_v56, %v249_v54  ;;  %v140_v54 = vld [vmem:[%s23905_s24 + $0x200] sm:$0xff]  ;;  %v145_v56 = vld [vmem:[%s23905_s24 + $0x228] sm:$0xff] }
  0x51   :  { %v12532_v2 = vpack.c.bf16 %v175_v58, %v170_v57  ;;  %v115_v28 = vld [vmem:[%s23905_s24 + $0x138] sm:$0xff]  ;;  %v230_v57 = vld [vmem:[%s23905_s24 + $0x4d0] sm:$0xff]  ;;  %v12554_v11 = vpack.c.bf16 %v145_v56, %v140_v54 }
  0x52   :  { %363 = vmatmul.mubr.f32.vlgmr.msra.gmra.mrb[0].mxu0 %v15609_v26  ;;  %v12542_v33 = vpack.c.bf16 %v115_v28, %v110_v27  ;;  %v235_v58 = vld [vmem:[%s23905_s24 + $0x4f8] sm:$0xff] }
  0x53   :  { %12435 = vmatpush1.bf16.msra.mxu0 %v12434_v5  ;;  %433 = vmatprep.mubr.f32.mxu0 %v23873_v19  ;;  %v259_v5 = vld [vmem:[%s23905_s24 + $0x5b8] sm:$0xff]  ;;  %v12556_v62 = vpack.c.bf16 %v235_v58, %v230_v57 }
  0x54   :  { %12437 = vmatprep.subr.bf16.mxu0 %v12436_v6  ;;  %12507 = vmatpush1.bf16.msra.mxu1 %v12506_v38  ;;  %v264_v6 = vld [vmem:[%s23905_s24 + $0x5e0] sm:$0xff]  ;;  %v210_v38 = vld [vmem:[%s23905_s24 + $0x430] sm:$0xff] }
  0x55   :  { %12509 = vmatprep.subr.bf16.mxu1 %v12508_v40  ;;  %v12520_v14 = vpack.c.bf16 %v264_v6, %v259_v5  ;;  %v240_v40 = vld [vmem:[%s23905_s24 + $0x520] sm:$0xff]  ;;  %v12548_v43 = vpack.c.bf16 %v215_v39, %v210_v38  ;;  %v733_v6 = vld [vmem:[%s23907_s0 + $0x8] sm:$0xff] }
  0x56   :  { %v12561_v44 = vpack.c.bf16 %v245_v41, %v240_v40  ;;  %v740_v5 = vld [vmem:[%s23907_s0 + $0x40] sm:$0xff] }
  0x57   :  { %12439 = vmatpush1.bf16.msra.mxu0 %v12438_v18  ;;  %v269_v18 = vld [vmem:[%s23905_s24 + $0x608] sm:$0xff] }
  0x58   :  { %12441 = vmatprep.subr.bf16.mxu0 %v12440_v21  ;;  %12511 = vmatpush1.bf16.msra.mxu1 %v12510_v48  ;;  %v274_v21 = vld [vmem:[%s23905_s24 + $0x630] sm:$0xff]  ;;  %v23871_v48 = vmov 0.0|0.0  }
  0x59   :  { %12513 = vmatprep.subr.bf16.mxu1 %v12512_v51  ;;  %v12550_v51 = vpack.c.bf16 %v135_v46, %v130_v45 }
  0x5b   :  { %12443 = vmatpush1.bf16.msra.mxu0 %v12442_v34  ;;  %505 = vmatmul.mubr.f32.vlgmr.msra.gmra.mrb[0].mxu1 %v15609_v26  ;;  %v12526_v34 = vpack.c.bf16 %v273_v29, %v268_v24 }
  0x5c   :  { %12445 = vmatprep.subr.bf16.mxu0 %v12444_v35  ;;  %12515 = vmatpush1.bf16.msra.mxu1 %v12514_v61  ;;  %v12544_v35 = vpack.c.bf16 %v205_v32, %v200_v31  ;;  %v265_v61 = vld [vmem:[%s23905_s24 + $0x5e8] sm:$0xff] }
  0x5d   :  { %575 = vmatprep.mubr.f32.mxu1 %v23873_v19  ;;  %12517 = vmatprep.subr.bf16.mxu1 %v12516_v0  ;;  %v150_v0 = vld [vmem:[%s23905_s24 + $0x250] sm:$0xff] }
  0x5f   :  { %12447 = vmatpush1.bf16.msra.mxu0 %v12446_v47  ;;  %v220_v47 = vld [vmem:[%s23905_s24 + $0x480] sm:$0xff] }
  0x60   :  { %12529 = vmatprep.subr.bf16.mxu0 %v12528_v49  ;;  %12519 = vmatpush1.bf16.msra.mxu1 %v12518_v8  ;;  %v225_v49 = vld [vmem:[%s23905_s24 + $0x4a8] sm:$0xff] }
  0x61   :  { %12521 = vmatprep.subr.bf16.mxu1 %v12520_v14  ;;  %v12552_v52 = vpack.c.bf16 %v225_v49, %v220_v47 }
  0x62   :  { %10497 = vmatmul.mubr.msk.f32.vlgmr.msra.gmra.mrb[0].mxu0 %vm295_vm0, %v15910_v55 }
  0x63   :  { %12531 = vmatpush3.bf16.msra.mxu0 %v12530_v59  ;;  %646 = vmatprep.mubr.f32.mxu0 %v15622_v30  ;;  %v12524_v30 = vpack.c.bf16 %v274_v21, %v269_v18  ;;  %v260_v59 = vld [vmem:[%s23905_s24 + $0x5c0] sm:$0xff] }
  0x64   :  { %12533 = vmatprep.subr.bf16.mxu0 %v12532_v2  ;;  %12523 = vmatpush1.bf16.msra.mxu1 %v12522_v23  ;;  %v12567_v63 = vpack.c.bf16 %v265_v61, %v260_v59  ;;  %v270_v2 = vld [vmem:[%s23905_s24 + $0x610] sm:$0xff] }
  0x65   :  { %12525 = vmatprep.subr.bf16.mxu1 %v12524_v30 }
  0x67   :  { %12535 = vmatpush3.bf16.msra.mxu0 %v12534_v7  ;;  %v738_v7 = vld [vmem:[%s23907_s0 + $0x30] sm:$0xff] }
  0x68   :  { %12537 = vmatprep.subr.bf16.mxu0 %v12536_v10  ;;  %12527 = vmatpush1.bf16.msra.mxu1 %v12526_v34 }
  0x69   :  { %12560 = vmatprep.subr.bf16.mxu1 %v23871_v48 }
  0x6b   :  { %12539 = vmatpush3.bf16.msra.mxu0 %v12538_v22  ;;  %10498 = vmatmul.mubr.msk.f32.vlgmr.msra.gmra.mrb[0].mxu1 %vm295_vm0, %v15910_v55 }
  0x6c   :  { %12541 = vmatprep.subr.bf16.mxu0 %v12540_v25  ;;  %12562 = vmatpush3.bf16.msra.mxu1 %v12561_v44 }
  0x6d   :  { %12563 = vmatprep.subr.bf16.mxu1 %v23871_v48  ;;  %11784 = vmatprep.mubr.msk.f32.mxu1 %vm15304_vm1, %v23873_v19 }
  0x6f   :  { %12543 = vmatpush3.bf16.msra.mxu0 %v12542_v33 }
  0x70   :  { %12545 = vmatprep.subr.bf16.mxu0 %v12544_v35  ;;  %12565 = vmatpush3.bf16.msra.mxu1 %v12564_v53 }
  0x71   :  { %12566 = vmatprep.subr.bf16.mxu1 %v23871_v48 }
  0x73   :  { %12547 = vmatpush3.bf16.msra.mxu0 %v12546_v42 }
  0x74   :  { %12549 = vmatprep.subr.bf16.mxu0 %v12548_v43 }
  0x77   :  { %12551 = vmatpush3.bf16.msra.mxu0 %v12550_v51 }
  0x78   :  { %12553 = vmatprep.subr.bf16.mxu0 %v12552_v52 }
  0x79   :  { %28 = vsyncpa [#allocation3], 0  ;;  %v12558_v8 = vpack.c.bf16 %v155_v1, %v150_v0  ;;  %12568 = vmatpush3.bf16.msra.mxu1 %v12567_v63  ;;  %v12570_v9 = vpack.c.bf16 %v275_v3, %v270_v2  ;;  %v12732_v10 = vpack.c.bf16 %v740_v5, %v735_v4  ;;  %v732_v12 = vld [vmem:[%s23907_s0] sm:$0xff]  ;;  %v734_v13 = vld [vmem:[%s23907_s0 + $0x10] sm:$0xff]  ;;  %v12572_v15 = vpack.c.bf16 %v738_v7, %v733_v6  ;;  %s23908_s29 = sld [smem:[#allocation21_spill]]  ;;  %s23909_s3 = sld [smem:[#allocation22_spill]] }
  0x7a   :  { %v739_v14 = vld [vmem:[%s23907_s0 + $0x38] sm:$0xff]  ;;  %12569 = vmatprep.subr.bf16.mxu1 %v23871_v48  ;;  %v737_v16 = vld [vmem:[%s23907_s0 + $0x28] sm:$0xff]  ;;  %v750_v18 = vld [vmem:[%s23907_s0 + $0x90] sm:$0xff]  ;;  %vm1768_vm2 = vcmask 1041408   ;;  %vm2099_vm3 = vcmask 64512   ;;  %s23910_s27 = sld [smem:[#allocation25_spill]] }
  0x7b   :  { %12555 = vmatpush3.bf16.msra.mxu0 %v12554_v11  ;;  %v745_v17 = vld [vmem:[%s23907_s0 + $0x68] sm:$0xff]  ;;  %v743_v21 = vld [vmem:[%s23907_s0 + $0x58] sm:$0xff]  ;;  %v748_v22 = vld [vmem:[%s23907_s0 + $0x80] sm:$0xff]  ;;  %v12734_v23 = vpack.c.bf16 %v739_v14, %v734_v13  ;;  %v12574_v24 = vpack.c.bf16 %v737_v16, %v732_v12  ;;  %s23911_s4 = sld [smem:[#allocation23_spill]]  ;;  %vm4455_vm4 = vcmask 130048   ;;  %vm6821_vm5 = vcmask 261120  }
  0x7c   :  { %12557 = vmatprep.subr.bf16.mxu0 %v12556_v62  ;;  %v12736_v25 = vpack.c.bf16 %v750_v18, %v745_v17  ;;  %v742_v27 = vld [vmem:[%s23907_s0 + $0x50] sm:$0xff]  ;;  %v744_v28 = vld [vmem:[%s23907_s0 + $0x60] sm:$0xff]  ;;  %v749_v30 = vld [vmem:[%s23907_s0 + $0x88] sm:$0xff]  ;;  %v12576_v29 = vpack.c.bf16 %v748_v22, %v743_v21  ;;  %s15305_s7 = smov [#allocation2]   ;;  %vm10481_vm6 = vcmask 123904  }
  0x7d   :  { %12571 = vmatpush3.bf16.msra.mxu1 %v12570_v9  ;;  %v747_v31 = vld [vmem:[%s23907_s0 + $0x78] sm:$0xff]  ;;  %v760_v33 = vld [vmem:[%s23907_s0 + $0xe0] sm:$0xff]  ;;  %v753_v34 = vld [vmem:[%s23907_s0 + $0xa8] sm:$0xff]  ;;  %v12738_v36 = vpack.c.bf16 %v749_v30, %v744_v28 }
  0x7e   :  { %12573 = vmatprep.subr.bf16.mxu1 %v12572_v15  ;;  %v755_v32 = vld [vmem:[%s23907_s0 + $0xb8] sm:$0xff]  ;;  %v758_v35 = vld [vmem:[%s23907_s0 + $0xd0] sm:$0xff]  ;;  %v12578_v37 = vpack.c.bf16 %v747_v31, %v742_v27  ;;  %v757_v41 = vld [vmem:[%s23907_s0 + $0xc8] sm:$0xff] }
  0x7f   :  { %12559 = vmatpush3.bf16.msra.mxu0 %v12558_v8  ;;  %v12740_v38 = vpack.c.bf16 %v760_v33, %v755_v32  ;;  %v754_v39 = vld [vmem:[%s23907_s0 + $0xb0] sm:$0xff]  ;;  %v759_v40 = vld [vmem:[%s23907_s0 + $0xd8] sm:$0xff]  ;;  %v765_v42 = vld [vmem:[%s23907_s0 + $0x108] sm:$0xff] }
  0x80   :  { %12733 = vmatprep.subr.bf16.mxu0 %v12732_v10  ;;  %11785 = vmatmul.mubr.msk.f32.vlgmr.msra.gmra.mrb[2].mxu1 %vm295_vm0, %v15910_v55  ;;  %v12580_v55 = vpack.c.bf16 %v758_v35, %v753_v34  ;;  %v770_v43 = vld [vmem:[%s23907_s0 + $0x130] sm:$0xff]  ;;  %v763_v44 = vld [vmem:[%s23907_s0 + $0xf8] sm:$0xff]  ;;  %v768_v45 = vld [vmem:[%s23907_s0 + $0x120] sm:$0xff]  ;;  %v12742_v46 = vpack.c.bf16 %v759_v40, %v754_v39 }
  0x81   :  { %12575 = vmatpush1.bf16.msra.mxu1 %v12574_v24  ;;  %v12744_v49 = vpack.c.bf16 %v770_v43, %v765_v42  ;;  %v762_v50 = vld [vmem:[%s23907_s0 + $0xf0] sm:$0xff]  ;;  %v764_v20 = vld [vmem:[%s23907_s0 + $0x100] sm:$0xff]  ;;  %v769_v51 = vld [vmem:[%s23907_s0 + $0x128] sm:$0xff]  ;;  %v12584_v52 = vpack.c.bf16 %v768_v45, %v763_v44 }
  0x82   :  { %647 = vmatmul.mubr.f32.vlgmr.msra.gmra.mrb[2].mxu0 %v15609_v26  ;;  %v752_v26 = vld [vmem:[%s23907_s0 + $0xa0] sm:$0xff]  ;;  %12577 = vmatprep.subr.bf16.mxu1 %v12576_v29  ;;  %v767_v53 = vld [vmem:[%s23907_s0 + $0x118] sm:$0xff]  ;;  %v773_v57 = vld [vmem:[%s23907_s0 + $0x148] sm:$0xff]  ;;  %v12746_v59 = vpack.c.bf16 %v769_v51, %v764_v20 }
  0x83   :  { %12735 = vmatpush1.bf16.msra.mxu0 %v12734_v23  ;;  %v12582_v47 = vpack.c.bf16 %v757_v41, %v752_v26  ;;  %v775_v54 = vld [vmem:[%s23907_s0 + $0x158] sm:$0xff]  ;;  %v780_v56 = vld [vmem:[%s23907_s0 + $0x180] sm:$0xff]  ;;  %v778_v58 = vld [vmem:[%s23907_s0 + $0x170] sm:$0xff]  ;;  %v12586_v61 = vpack.c.bf16 %v767_v53, %v762_v50 }
  0x84   :  { %12737 = vmatprep.subr.bf16.mxu0 %v12736_v25  ;;  %v12748_v11 = vpack.c.bf16 %v780_v56, %v775_v54  ;;  %v772_v62 = vld [vmem:[%s23907_s0 + $0x140] sm:$0xff]  ;;  %v774_v63 = vld [vmem:[%s23907_s0 + $0x150] sm:$0xff]  ;;  %v779_v0 = vld [vmem:[%s23907_s0 + $0x178] sm:$0xff]  ;;  %v12588_v1 = vpack.c.bf16 %v778_v58, %v773_v57 }
  0x85   :  { %12579 = vmatpush1.bf16.msra.mxu1 %v12578_v37  ;;  %v777_v2 = vld [vmem:[%s23907_s0 + $0x168] sm:$0xff]  ;;  %v790_v4 = vld [vmem:[%s23907_s0 + $0x1d0] sm:$0xff]  ;;  %v783_v5 = vld [vmem:[%s23907_s0 + $0x198] sm:$0xff]  ;;  %v12750_v7 = vpack.c.bf16 %v779_v0, %v774_v63 }
  0x86   :  { %12581 = vmatprep.subr.bf16.mxu1 %v12580_v55  ;;  %v785_v3 = vld [vmem:[%s23907_s0 + $0x1a8] sm:$0xff]  ;;  %v788_v6 = vld [vmem:[%s23907_s0 + $0x1c0] sm:$0xff]  ;;  %v12590_v8 = vpack.c.bf16 %v777_v2, %v772_v62  ;;  %v782_v10 = vld [vmem:[%s23907_s0 + $0x190] sm:$0xff] }
  0x87   :  { %12739 = vmatpush1.bf16.msra.mxu0 %v12738_v36  ;;  %v12752_v9 = vpack.c.bf16 %v790_v4, %v785_v3  ;;  %v784_v12 = vld [vmem:[%s23907_s0 + $0x1a0] sm:$0xff]  ;;  %v789_v13 = vld [vmem:[%s23907_s0 + $0x1c8] sm:$0xff]  ;;  %v12592_v14 = vpack.c.bf16 %v788_v6, %v783_v5  ;;  %v787_v15 = vld [vmem:[%s23907_s0 + $0x1b8] sm:$0xff] }
  0x88   :  { %12741 = vmatprep.subr.bf16.mxu0 %v12740_v38  ;;  %v795_v16 = vld [vmem:[%s23907_s0 + $0x1f8] sm:$0xff]  ;;  %v800_v17 = vld [vmem:[%s23907_s0 + $0x220] sm:$0xff]  ;;  %v793_v18 = vld [vmem:[%s23907_s0 + $0x1e8] sm:$0xff]  ;;  %v12754_v22 = vpack.c.bf16 %v789_v13, %v784_v12  ;;  %v12594_v23 = vpack.c.bf16 %v787_v15, %v782_v10 }
  0x89   :  { %12583 = vmatpush1.bf16.msra.mxu1 %v12582_v47  ;;  %v798_v21 = vld [vmem:[%s23907_s0 + $0x210] sm:$0xff]  ;;  %v12756_v24 = vpack.c.bf16 %v800_v17, %v795_v16  ;;  %v792_v25 = vld [vmem:[%s23907_s0 + $0x1e0] sm:$0xff]  ;;  %v799_v28 = vld [vmem:[%s23907_s0 + $0x218] sm:$0xff] }
  0x8a   :  { %12585 = vmatprep.subr.bf16.mxu1 %v12584_v52  ;;  %v794_v27 = vld [vmem:[%s23907_s0 + $0x1f0] sm:$0xff]  ;;  %v12596_v30 = vpack.c.bf16 %v798_v21, %v793_v18  ;;  %v797_v29 = vld [vmem:[%s23907_s0 + $0x208] sm:$0xff]  ;;  %v803_v33 = vld [vmem:[%s23907_s0 + $0x238] sm:$0xff] }
  0x8b   :  { %12743 = vmatpush1.bf16.msra.mxu0 %v12742_v46  ;;  %v805_v31 = vld [vmem:[%s23907_s0 + $0x248] sm:$0xff]  ;;  %v810_v32 = vld [vmem:[%s23907_s0 + $0x270] sm:$0xff]  ;;  %v808_v34 = vld [vmem:[%s23907_s0 + $0x260] sm:$0xff]  ;;  %v12758_v35 = vpack.c.bf16 %v799_v28, %v794_v27  ;;  %v12598_v36 = vpack.c.bf16 %v797_v29, %v792_v25 }
  0x8c   :  { %12745 = vmatprep.subr.bf16.mxu0 %v12744_v49  ;;  %v12760_v37 = vpack.c.bf16 %v810_v32, %v805_v31  ;;  %v802_v38 = vld [vmem:[%s23907_s0 + $0x230] sm:$0xff]  ;;  %v804_v26 = vld [vmem:[%s23907_s0 + $0x240] sm:$0xff]  ;;  %v809_v39 = vld [vmem:[%s23907_s0 + $0x268] sm:$0xff]  ;;  %v12600_v40 = vpack.c.bf16 %v808_v34, %v803_v33 }
  0x8d   :  { %12587 = vmatpush1.bf16.msra.mxu1 %v12586_v61  ;;  %v807_v55 = vld [vmem:[%s23907_s0 + $0x258] sm:$0xff]  ;;  %v820_v42 = vld [vmem:[%s23907_s0 + $0x2c0] sm:$0xff]  ;;  %v813_v43 = vld [vmem:[%s23907_s0 + $0x288] sm:$0xff]  ;;  %v12762_v45 = vpack.c.bf16 %v809_v39, %v804_v26 }
  0x8e   :  { %12589 = vmatprep.subr.bf16.mxu1 %v12588_v1  ;;  %v815_v41 = vld [vmem:[%s23907_s0 + $0x298] sm:$0xff]  ;;  %v818_v44 = vld [vmem:[%s23907_s0 + $0x2b0] sm:$0xff]  ;;  %v12602_v46 = vpack.c.bf16 %v807_v55, %v802_v38  ;;  %v812_v49 = vld [vmem:[%s23907_s0 + $0x280] sm:$0xff] }
  0x8f   :  { %12747 = vmatpush1.bf16.msra.mxu0 %v12746_v59  ;;  %v12764_v47 = vpack.c.bf16 %v820_v42, %v815_v41  ;;  %v814_v50 = vld [vmem:[%s23907_s0 + $0x290] sm:$0xff]  ;;  %v819_v20 = vld [vmem:[%s23907_s0 + $0x2b8] sm:$0xff]  ;;  %v12604_v51 = vpack.c.bf16 %v818_v44, %v813_v43  ;;  %v817_v52 = vld [vmem:[%s23907_s0 + $0x2a8] sm:$0xff] }
  0x90   :  { %12749 = vmatprep.subr.bf16.mxu0 %v12748_v11  ;;  %v825_v53 = vld [vmem:[%s23907_s0 + $0x2e8] sm:$0xff]  ;;  %v830_v54 = vld [vmem:[%s23907_s0 + $0x310] sm:$0xff]  ;;  %v823_v56 = vld [vmem:[%s23907_s0 + $0x2d8] sm:$0xff]  ;;  %v12766_v58 = vpack.c.bf16 %v819_v20, %v814_v50  ;;  %v12606_v59 = vpack.c.bf16 %v817_v52, %v812_v49 }
  0x91   :  { %12591 = vmatpush1.bf16.msra.mxu1 %v12590_v8  ;;  %v828_v57 = vld [vmem:[%s23907_s0 + $0x300] sm:$0xff]  ;;  %v12768_v61 = vpack.c.bf16 %v830_v54, %v825_v53  ;;  %v822_v11 = vld [vmem:[%s23907_s0 + $0x2d0] sm:$0xff]  ;;  %v829_v63 = vld [vmem:[%s23907_s0 + $0x308] sm:$0xff] }
  0x92   :  { %12593 = vmatprep.subr.bf16.mxu1 %v12592_v14  ;;  %v824_v62 = vld [vmem:[%s23907_s0 + $0x2e0] sm:$0xff]  ;;  %v12608_v0 = vpack.c.bf16 %v828_v57, %v823_v56  ;;  %v827_v1 = vld [vmem:[%s23907_s0 + $0x2f8] sm:$0xff]  ;;  %v833_v4 = vld [vmem:[%s23907_s0 + $0x328] sm:$0xff] }
  0x93   :  { %12751 = vmatpush1.bf16.msra.mxu0 %v12750_v7  ;;  %v835_v2 = vld [vmem:[%s23907_s0 + $0x338] sm:$0xff]  ;;  %v840_v3 = vld [vmem:[%s23907_s0 + $0x360] sm:$0xff]  ;;  %v838_v5 = vld [vmem:[%s23907_s0 + $0x350] sm:$0xff]  ;;  %v12770_v6 = vpack.c.bf16 %v829_v63, %v824_v62  ;;  %v12610_v7 = vpack.c.bf16 %v827_v1, %v822_v11 }
  0x94   :  { %12753 = vmatprep.subr.bf16.mxu0 %v12752_v9  ;;  %v12772_v8 = vpack.c.bf16 %v840_v3, %v835_v2  ;;  %v832_v9 = vld [vmem:[%s23907_s0 + $0x320] sm:$0xff]  ;;  %v834_v10 = vld [vmem:[%s23907_s0 + $0x330] sm:$0xff]  ;;  %v839_v12 = vld [vmem:[%s23907_s0 + $0x358] sm:$0xff]  ;;  %v12612_v13 = vpack.c.bf16 %v838_v5, %v833_v4 }
  0x95   :  { %12595 = vmatpush1.bf16.msra.mxu1 %v12594_v23  ;;  %v837_v14 = vld [vmem:[%s23907_s0 + $0x348] sm:$0xff]  ;;  %v850_v16 = vld [vmem:[%s23907_s0 + $0x3b0] sm:$0xff]  ;;  %v843_v17 = vld [vmem:[%s23907_s0 + $0x378] sm:$0xff]  ;;  %v12774_v21 = vpack.c.bf16 %v839_v12, %v834_v10 }
  0x96   :  { %12597 = vmatprep.subr.bf16.mxu1 %v12596_v30  ;;  %v845_v15 = vld [vmem:[%s23907_s0 + $0x388] sm:$0xff]  ;;  %v848_v18 = vld [vmem:[%s23907_s0 + $0x3a0] sm:$0xff]  ;;  %v847_v30 = vld [vmem:[%s23907_s0 + $0x398] sm:$0xff] }
  0x97   :  { %12755 = vmatpush1.bf16.msra.mxu0 %v12754_v22  ;;  %v12614_v22 = vpack.c.bf16 %v837_v14, %v832_v9  ;;  %v12776_v23 = vpack.c.bf16 %v850_v16, %v845_v15  ;;  %v844_v25 = vld [vmem:[%s23907_s0 + $0x380] sm:$0xff]  ;;  %v849_v27 = vld [vmem:[%s23907_s0 + $0x3a8] sm:$0xff]  ;;  %v12616_v28 = vpack.c.bf16 %v848_v18, %v843_v17  ;;  %v855_v29 = vld [vmem:[%s23907_s0 + $0x3d8] sm:$0xff] }
  0x98   :  { %12757 = vmatprep.subr.bf16.mxu0 %v12756_v24  ;;  %v842_v24 = vld [vmem:[%s23907_s0 + $0x370] sm:$0xff]  ;;  %v860_v31 = vld [vmem:[%s23907_s0 + $0x400] sm:$0xff]  ;;  %v853_v32 = vld [vmem:[%s23907_s0 + $0x3c8] sm:$0xff]  ;;  %v12778_v34 = vpack.c.bf16 %v849_v27, %v844_v25 }
  0x99   :  { %12599 = vmatpush1.bf16.msra.mxu1 %v12598_v36  ;;  %v858_v33 = vld [vmem:[%s23907_s0 + $0x3f0] sm:$0xff]  ;;  %v12780_v36 = vpack.c.bf16 %v860_v31, %v855_v29  ;;  %v859_v26 = vld [vmem:[%s23907_s0 + $0x3f8] sm:$0xff]  ;;  %v865_v55 = vld [vmem:[%s23907_s0 + $0x428] sm:$0xff] }
  0x9a   :  { %12601 = vmatprep.subr.bf16.mxu1 %v12600_v40  ;;  %v854_v38 = vld [vmem:[%s23907_s0 + $0x3d0] sm:$0xff]  ;;  %v12620_v39 = vpack.c.bf16 %v858_v33, %v853_v32  ;;  %v857_v40 = vld [vmem:[%s23907_s0 + $0x3e8] sm:$0xff]  ;;  %v863_v42 = vld [vmem:[%s23907_s0 + $0x418] sm:$0xff] }
  0x9b   :  { %12759 = vmatpush1.bf16.msra.mxu0 %v12758_v35  ;;  %v12618_v35 = vpack.c.bf16 %v847_v30, %v842_v24  ;;  %v870_v41 = vld [vmem:[%s23907_s0 + $0x450] sm:$0xff]  ;;  %v868_v43 = vld [vmem:[%s23907_s0 + $0x440] sm:$0xff]  ;;  %v12782_v44 = vpack.c.bf16 %v859_v26, %v854_v38  ;;  %v869_v50 = vld [vmem:[%s23907_s0 + $0x448] sm:$0xff] }
  0x9c   :  { %12761 = vmatprep.subr.bf16.mxu0 %v12760_v37  ;;  %v852_v37 = vld [vmem:[%s23907_s0 + $0x3c0] sm:$0xff]  ;;  %v12624_v20 = vpack.c.bf16 %v868_v43, %v863_v42  ;;  %v875_v52 = vld [vmem:[%s23907_s0 + $0x478] sm:$0xff]  ;;  %v873_v54 = vld [vmem:[%s23907_s0 + $0x468] sm:$0xff] }
  0x9d   :  { %12603 = vmatpush1.bf16.msra.mxu1 %v12602_v46  ;;  %v12784_v46 = vpack.c.bf16 %v870_v41, %v865_v55  ;;  %v864_v49 = vld [vmem:[%s23907_s0 + $0x420] sm:$0xff]  ;;  %v878_v56 = vld [vmem:[%s23907_s0 + $0x490] sm:$0xff]  ;;  %v879_v62 = vld [vmem:[%s23907_s0 + $0x498] sm:$0xff] }
  0x9e   :  { %12605 = vmatprep.subr.bf16.mxu1 %v12604_v51  ;;  %v867_v51 = vld [vmem:[%s23907_s0 + $0x438] sm:$0xff]  ;;  %v880_v53 = vld [vmem:[%s23907_s0 + $0x4a0] sm:$0xff]  ;;  %v12786_v57 = vpack.c.bf16 %v869_v50, %v864_v49  ;;  %v874_v11 = vld [vmem:[%s23907_s0 + $0x470] sm:$0xff]  ;;  %v12628_v63 = vpack.c.bf16 %v878_v56, %v873_v54 }
  0x9f   :  { %12763 = vmatpush1.bf16.msra.mxu0 %v12762_v45  ;;  %v12622_v45 = vpack.c.bf16 %v857_v40, %v852_v37  ;;  %v885_v1 = vld [vmem:[%s23907_s0 + $0x4c8] sm:$0xff]  ;;  %v890_v2 = vld [vmem:[%s23907_s0 + $0x4f0] sm:$0xff]  ;;  %v883_v3 = vld [vmem:[%s23907_s0 + $0x4b8] sm:$0xff]  ;;  %v12790_v5 = vpack.c.bf16 %v879_v62, %v874_v11 }
  0xa0   :  { %12765 = vmatprep.subr.bf16.mxu0 %v12764_v47  ;;  %v862_v47 = vld [vmem:[%s23907_s0 + $0x410] sm:$0xff]  ;;  %v888_v4 = vld [vmem:[%s23907_s0 + $0x4e0] sm:$0xff]  ;;  %v889_v10 = vld [vmem:[%s23907_s0 + $0x4e8] sm:$0xff] }
  0xa1   :  { %12607 = vmatpush1.bf16.msra.mxu1 %v12606_v59  ;;  %v12788_v59 = vpack.c.bf16 %v880_v53, %v875_v52  ;;  %v884_v9 = vld [vmem:[%s23907_s0 + $0x4c0] sm:$0xff]  ;;  %v12632_v12 = vpack.c.bf16 %v888_v4, %v883_v3  ;;  %v895_v14 = vld [vmem:[%s23907_s0 + $0x518] sm:$0xff]  ;;  %v893_v16 = vld [vmem:[%s23907_s0 + $0x508] sm:$0xff] }
  0xa2   :  { %12609 = vmatprep.subr.bf16.mxu1 %v12608_v0  ;;  %v877_v0 = vld [vmem:[%s23907_s0 + $0x488] sm:$0xff]  ;;  %v900_v15 = vld [vmem:[%s23907_s0 + $0x540] sm:$0xff]  ;;  %v898_v17 = vld [vmem:[%s23907_s0 + $0x530] sm:$0xff]  ;;  %v12794_v18 = vpack.c.bf16 %v889_v10, %v884_v9 }
  0xa3   :  { %12767 = vmatpush1.bf16.msra.mxu0 %v12766_v58  ;;  %v12626_v58 = vpack.c.bf16 %v867_v51, %v862_v47  ;;  %v892_v25 = vld [vmem:[%s23907_s0 + $0x500] sm:$0xff]  ;;  %v897_v27 = vld [vmem:[%s23907_s0 + $0x528] sm:$0xff]  ;;  %v894_v29 = vld [vmem:[%s23907_s0 + $0x510] sm:$0xff] }
  0xa4   :  { %12769 = vmatprep.subr.bf16.mxu0 %v12768_v61  ;;  %v872_v61 = vld [vmem:[%s23907_s0 + $0x460] sm:$0xff]  ;;  %v899_v31 = vld [vmem:[%s23907_s0 + $0x538] sm:$0xff]  ;;  %v12638_v38 = vpack.c.bf16 %v897_v27, %v892_v25  ;;  %v917_v52 = vld [vmem:[%s23907_s0 + $0x5c8] sm:$0xff] }
  0xa5   :  { %12611 = vmatpush1.bf16.msra.mxu1 %v12610_v7  ;;  %v12792_v7 = vpack.c.bf16 %v890_v2, %v885_v1  ;;  %v903_v32 = vld [vmem:[%s23907_s0 + $0x558] sm:$0xff]  ;;  %v12798_v26 = vpack.c.bf16 %v899_v31, %v894_v29  ;;  %v904_v43 = vld [vmem:[%s23907_s0 + $0x560] sm:$0xff]  ;;  %v914_v56 = vld [vmem:[%s23907_s0 + $0x5b0] sm:$0xff] }
  0xa6   :  { %12613 = vmatprep.subr.bf16.mxu1 %v12612_v13  ;;  %v887_v13 = vld [vmem:[%s23907_s0 + $0x4d8] sm:$0xff]  ;;  %v920_v49 = vld [vmem:[%s23907_s0 + $0x5e0] sm:$0xff]  ;;  %v930_v11 = vld [vmem:[%s23907_s0 + $0x630] sm:$0xff] }
  0xa7   :  { %12771 = vmatpush1.bf16.msra.mxu0 %v12770_v6  ;;  %v12630_v6 = vpack.c.bf16 %v877_v0, %v872_v61  ;;  %v907_v40 = vld [vmem:[%s23907_s0 + $0x578] sm:$0xff]  ;;  %v912_v51 = vld [vmem:[%s23907_s0 + $0x5a0] sm:$0xff]  ;;  %v925_v61 = vld [vmem:[%s23907_s0 + $0x608] sm:$0xff] }
  0xa8   :  { %12773 = vmatprep.subr.bf16.mxu0 %v12772_v8  ;;  %v882_v8 = vld [vmem:[%s23907_s0 + $0x4b0] sm:$0xff]  ;;  %v915_v47 = vld [vmem:[%s23907_s0 + $0x5b8] sm:$0xff]  ;;  %v12646_v62 = vpack.c.bf16 %v917_v52, %v912_v51  ;;  %v12808_v3 = vpack.c.bf16 %v930_v11, %v925_v61  ;;  %v924_v4 = vld [vmem:[%s23907_s0 + $0x600] sm:$0xff] }
  0xa9   :  { %12615 = vmatpush1.bf16.msra.mxu1 %v12614_v22  ;;  %v12796_v22 = vpack.c.bf16 %v900_v15, %v895_v14  ;;  %v12804_v54 = vpack.c.bf16 %v920_v49, %v915_v47  ;;  %v922_v0 = vld [vmem:[%s23907_s0 + $0x5f0] sm:$0xff]  ;;  %v927_v1 = vld [vmem:[%s23907_s0 + $0x618] sm:$0xff]  ;;  %v940_v9 = vld [vmem:[%s23907_s0 + $0x680] sm:$0xff] }
  0xaa   :  { %12617 = vmatprep.subr.bf16.mxu1 %v12616_v28  ;;  %v12650_v10 = vpack.c.bf16 %v927_v1, %v922_v0  ;;  %v937_v14 = vld [vmem:[%s23907_s0 + $0x668] sm:$0xff]  ;;  %v950_v25 = vld [vmem:[%s23907_s0 + $0x6d0] sm:$0xff]  ;;  %v968_v51 = vld [vmem:[%s23907_s0 + $0x760] sm:$0xff] }
  0xab   :  { %12775 = vmatpush1.bf16.msra.mxu0 %v12774_v21  ;;  %v12634_v21 = vpack.c.bf16 %v887_v13, %v882_v8  ;;  %v935_v8 = vld [vmem:[%s23907_s0 + $0x658] sm:$0xff]  ;;  %v932_v13 = vld [vmem:[%s23907_s0 + $0x640] sm:$0xff]  ;;  %v942_v31 = vld [vmem:[%s23907_s0 + $0x690] sm:$0xff] }
  0xac   :  { %12777 = vmatprep.subr.bf16.mxu0 %v12776_v23  ;;  %v12636_v23 = vpack.c.bf16 %v898_v17, %v893_v16  ;;  %v12812_v16 = vpack.c.bf16 %v940_v9, %v935_v8  ;;  %v934_v17 = vld [vmem:[%s23907_s0 + $0x650] sm:$0xff]  ;;  %v965_v52 = vld [vmem:[%s23907_s0 + $0x748] sm:$0xff]  ;;  %v964_v11 = vld [vmem:[%s23907_s0 + $0x740] sm:$0xff] }
  0xad   :  { %12619 = vmatpush1.bf16.msra.mxu1 %v12618_v35  ;;  %v905_v35 = vld [vmem:[%s23907_s0 + $0x568] sm:$0xff]  ;;  %v954_v49 = vld [vmem:[%s23907_s0 + $0x6f0] sm:$0xff]  ;;  %v975_v1 = vld [vmem:[%s23907_s0 + $0x798] sm:$0xff] }
  0xae   :  { %12621 = vmatprep.subr.bf16.mxu1 %v12620_v39  ;;  %v902_v39 = vld [vmem:[%s23907_s0 + $0x550] sm:$0xff] }
  0xaf   :  { %12779 = vmatpush1.bf16.msra.mxu0 %v12778_v34  ;;  %v908_v34 = vld [vmem:[%s23907_s0 + $0x580] sm:$0xff]  ;;  %v12642_v50 = vpack.c.bf16 %v907_v40, %v902_v39  ;;  %v958_v39 = vld [vmem:[%s23907_s0 + $0x710] sm:$0xff]  ;;  %v955_v40 = vld [vmem:[%s23907_s0 + $0x6f8] sm:$0xff] }
  0xb0   :  { %12781 = vmatprep.subr.bf16.mxu0 %v12780_v36  ;;  %v910_v36 = vld [vmem:[%s23907_s0 + $0x590] sm:$0xff]  ;;  %v12640_v41 = vpack.c.bf16 %v908_v34, %v903_v32  ;;  %v947_v32 = vld [vmem:[%s23907_s0 + $0x6b8] sm:$0xff] }
  0xb1   :  { %12623 = vmatpush1.bf16.msra.mxu1 %v12622_v45  ;;  %v12800_v42 = vpack.c.bf16 %v910_v36, %v905_v35  ;;  %v913_v45 = vld [vmem:[%s23907_s0 + $0x5a8] sm:$0xff]  ;;  %v944_v35 = vld [vmem:[%s23907_s0 + $0x6a0] sm:$0xff]  ;;  %v978_v0 = vld [vmem:[%s23907_s0 + $0x7b0] sm:$0xff] }
  0xb2   :  { %12625 = vmatprep.subr.bf16.mxu1 %v12624_v20  ;;  %v949_v36 = vld [vmem:[%s23907_s0 + $0x6c8] sm:$0xff] }
  0xb3   :  { %12783 = vmatpush1.bf16.msra.mxu0 %v12782_v44  ;;  %v909_v44 = vld [vmem:[%s23907_s0 + $0x588] sm:$0xff] }
  0xb4   :  { %12785 = vmatprep.subr.bf16.mxu0 %v12784_v46  ;;  %v918_v46 = vld [vmem:[%s23907_s0 + $0x5d0] sm:$0xff]  ;;  %v12802_v20 = vpack.c.bf16 %v909_v44, %v904_v43  ;;  %v12818_v43 = vpack.c.bf16 %v949_v36, %v944_v35  ;;  %v952_v44 = vld [vmem:[%s23907_s0 + $0x6e0] sm:$0xff]  ;;  %v995_v36 = vld [vmem:[%s23907_s0 + $0x838] sm:$0xff] }
  0xb5   :  { %12627 = vmatpush1.bf16.msra.mxu1 %v12626_v58  ;;  %v12644_v53 = vpack.c.bf16 %v918_v46, %v913_v45  ;;  %v923_v58 = vld [vmem:[%s23907_s0 + $0x5f8] sm:$0xff]  ;;  %v957_v45 = vld [vmem:[%s23907_s0 + $0x708] sm:$0xff]  ;;  %v998_v35 = vld [vmem:[%s23907_s0 + $0x850] sm:$0xff] }
  0xb6   :  { %12629 = vmatprep.subr.bf16.mxu1 %v12628_v63 }
  0xb7   :  { %12787 = vmatpush1.bf16.msra.mxu0 %v12786_v57  ;;  %v919_v57 = vld [vmem:[%s23907_s0 + $0x5d8] sm:$0xff] }
  0xb8   :  { %12789 = vmatprep.subr.bf16.mxu0 %v12788_v59  ;;  %v928_v59 = vld [vmem:[%s23907_s0 + $0x620] sm:$0xff]  ;;  %v12806_v63 = vpack.c.bf16 %v919_v57, %v914_v56  ;;  %v962_v57 = vld [vmem:[%s23907_s0 + $0x730] sm:$0xff] }
  0xb9   :  { %12631 = vmatpush1.bf16.msra.mxu1 %v12630_v6  ;;  %v12648_v2 = vpack.c.bf16 %v928_v59, %v923_v58  ;;  %v933_v6 = vld [vmem:[%s23907_s0 + $0x648] sm:$0xff]  ;;  %v967_v58 = vld [vmem:[%s23907_s0 + $0x758] sm:$0xff] }
  0xba   :  { %12633 = vmatprep.subr.bf16.mxu1 %v12632_v12 }
  0xbb   :  { %12791 = vmatpush1.bf16.msra.mxu0 %v12790_v5  ;;  %v929_v5 = vld [vmem:[%s23907_s0 + $0x628] sm:$0xff] }
  0xbc   :  { %12793 = vmatprep.subr.bf16.mxu0 %v12792_v7  ;;  %v938_v7 = vld [vmem:[%s23907_s0 + $0x670] sm:$0xff]  ;;  %v12810_v12 = vpack.c.bf16 %v929_v5, %v924_v4  ;;  %v972_v5 = vld [vmem:[%s23907_s0 + $0x780] sm:$0xff] }
  0xbd   :  { %12635 = vmatpush1.bf16.msra.mxu1 %v12634_v21  ;;  %v12652_v15 = vpack.c.bf16 %v938_v7, %v933_v6  ;;  %v943_v21 = vld [vmem:[%s23907_s0 + $0x698] sm:$0xff]  ;;  %v977_v6 = vld [vmem:[%s23907_s0 + $0x7a8] sm:$0xff] }
  0xbe   :  { %12637 = vmatprep.subr.bf16.mxu1 %v12636_v23  ;;  %v948_v23 = vld [vmem:[%s23907_s0 + $0x6c0] sm:$0xff] }
  0xbf   :  { %12795 = vmatpush1.bf16.msra.mxu0 %v12794_v18  ;;  %v939_v18 = vld [vmem:[%s23907_s0 + $0x678] sm:$0xff] }
  0xc0   :  { %12797 = vmatprep.subr.bf16.mxu0 %v12796_v22  ;;  %v12814_v29 = vpack.c.bf16 %v939_v18, %v934_v17  ;;  %v985_v17 = vld [vmem:[%s23907_s0 + $0x7e8] sm:$0xff]  ;;  %v990_v18 = vld [vmem:[%s23907_s0 + $0x810] sm:$0xff] }
 0x135   :  { %v435_v24 = vpop.f32.mrb[0].mxu0 }
 0x136   :  { %v722_v28 = vmul.f32 0.2, %v435_v24  ;;  %v437_v30 = vpop.f32.mrb[1].mxu0 }
 0x137   :  { %v723_v33 = vmul.f32 0.2, %v437_v30 }
 0x138   :  { %v16497_v55 = vmax.f32 %v435_v24, %v722_v28  ;;  %v945_v24 = vld [vmem:[%s23907_s0 + $0x6a8] sm:$0xff] }
 0x139   :  { %v16489_v37 = vmax.f32 %v437_v30, %v723_v33  ;;  %v12654_v30 = vpack.c.bf16 %v937_v14, %v932_v13  ;;  %v12656_v33 = vpack.c.bf16 %v948_v23, %v943_v21  ;;  %v12816_v34 = vpack.c.bf16 %v950_v25, %v945_v24  ;;  %v983_v13 = vld [vmem:[%s23907_s0 + $0x7d8] sm:$0xff] }
 0x13a   :  { %v12670_v24 = vpack.c.bf16 %v977_v6, %v972_v5  ;;  %v1014_v6 = vld [vmem:[%s23907_s0 + $0x8d0] sm:$0xff] }
 0x13b   :  { %1196 = vmatprep.mubr.f32.mxu1 %v16489_v37  ;;  %1409 = vmatprep.mubr.f32.mxu0 %v16489_v37 }
 0x13c   :  { %1197 = vmatmul.mubr.f32.vlgmr.msra.gmra.mrb[4].mxu1 %v16497_v55  ;;  %1410 = vmatmul.mubr.f32.vlgmr.msra.gmra.mrb[4].mxu0 %v16497_v55 }
 0x13d   :  { %12639 = vmatpush1.bf16.msra.mxu1 %v12638_v38  ;;  %12799 = vmatpush1.bf16.msra.mxu0 %v12798_v26  ;;  %v953_v38 = vld [vmem:[%s23907_s0 + $0x6e8] sm:$0xff] }
 0x13e   :  { %12641 = vmatprep.subr.bf16.mxu1 %v12640_v41  ;;  %12801 = vmatprep.subr.bf16.mxu0 %v12800_v42  ;;  %v16584_v22 = vpop.f32.mrb[0].mxu1  ;;  %v960_v41 = vld [vmem:[%s23907_s0 + $0x720] sm:$0xff]  ;;  %v12658_v42 = vpack.c.bf16 %v947_v32, %v942_v31  ;;  %v12660_v46 = vpack.c.bf16 %v958_v39, %v953_v38  ;;  %v12832_v31 = vpack.c.bf16 %v990_v18, %v985_v17 }
 0x13f   :  { %v579_v27 = vpop.f32.mrb[1].mxu1  ;;  %v12820_v47 = vpack.c.bf16 %v960_v41, %v955_v40  ;;  %v984_v32 = vld [vmem:[%s23907_s0 + $0x7e0] sm:$0xff] }
 0x140   :  { %v725_v28 = vmul.f32 0.2, %v579_v27  ;;  %v1000_v38 = vld [vmem:[%s23907_s0 + $0x860] sm:$0xff] }
 0x141   :  { %12643 = vmatpush1.bf16.msra.mxu1 %v12642_v50  ;;  %12803 = vmatpush1.bf16.msra.mxu0 %v12802_v20  ;;  %v959_v50 = vld [vmem:[%s23907_s0 + $0x718] sm:$0xff]  ;;  %v992_v41 = vld [vmem:[%s23907_s0 + $0x820] sm:$0xff] }
 0x142   :  { %12645 = vmatprep.subr.bf16.mxu1 %v12644_v53  ;;  %12805 = vmatprep.subr.bf16.mxu0 %v12804_v54  ;;  %v16610_v26 = vmax.f32 %v579_v27, %v725_v28  ;;  %v963_v20 = vld [vmem:[%s23907_s0 + $0x738] sm:$0xff]  ;;  %v970_v53 = vld [vmem:[%s23907_s0 + $0x770] sm:$0xff]  ;;  %v12662_v54 = vpack.c.bf16 %v957_v45, %v952_v44  ;;  %v12822_v56 = vpack.c.bf16 %v959_v50, %v954_v49  ;;  %v1008_v49 = vld [vmem:[%s23907_s0 + $0x8a0] sm:$0xff] }
 0x143   :  { %v12664_v59 = vpack.c.bf16 %v968_v51, %v963_v20  ;;  %v12824_v61 = vpack.c.bf16 %v970_v53, %v965_v52  ;;  %v982_v27 = vld [vmem:[%s23907_s0 + $0x7d0] sm:$0xff]  ;;  %v987_v28 = vld [vmem:[%s23907_s0 + $0x7f8] sm:$0xff]  ;;  %v12836_v44 = vpack.c.bf16 %v1000_v38, %v995_v36  ;;  %v1005_v50 = vld [vmem:[%s23907_s0 + $0x888] sm:$0xff] }
 0x144   :  { %1267 = vmatprep.mubr.f32.mxu1 %v16610_v26  ;;  %1480 = vmatprep.mubr.f32.mxu0 %v16610_v26  ;;  %v12674_v39 = vpack.c.bf16 %v987_v28, %v982_v27  ;;  %v994_v45 = vld [vmem:[%s23907_s0 + $0x830] sm:$0xff]  ;;  %v1035_v27 = vld [vmem:[%s23907_s0 + $0x978] sm:$0xff]  ;;  %v1040_v28 = vld [vmem:[%s23907_s0 + $0x9a0] sm:$0xff] }
 0x145   :  { %12647 = vmatpush1.bf16.msra.mxu1 %v12646_v62  ;;  %12807 = vmatpush1.bf16.msra.mxu0 %v12806_v63  ;;  %v969_v62 = vld [vmem:[%s23907_s0 + $0x768] sm:$0xff]  ;;  %v1010_v20 = vld [vmem:[%s23907_s0 + $0x8b0] sm:$0xff]  ;;  %v1039_v38 = vld [vmem:[%s23907_s0 + $0x998] sm:$0xff] }
 0x146   :  { %12649 = vmatprep.subr.bf16.mxu1 %v12648_v2  ;;  %12809 = vmatprep.subr.bf16.mxu0 %v12808_v3  ;;  %v973_v63 = vld [vmem:[%s23907_s0 + $0x788] sm:$0xff]  ;;  %v980_v2 = vld [vmem:[%s23907_s0 + $0x7c0] sm:$0xff]  ;;  %v12666_v3 = vpack.c.bf16 %v967_v58, %v962_v57  ;;  %v12826_v4 = vpack.c.bf16 %v969_v62, %v964_v11  ;;  %v1002_v53 = vld [vmem:[%s23907_s0 + $0x870] sm:$0xff]  ;;  %v12840_v57 = vpack.c.bf16 %v1010_v20, %v1005_v50 }
 0x147   :  { %v12668_v8 = vpack.c.bf16 %v978_v0, %v973_v63  ;;  %v12828_v9 = vpack.c.bf16 %v980_v2, %v975_v1  ;;  %v1004_v58 = vld [vmem:[%s23907_s0 + $0x880] sm:$0xff]  ;;  %v1018_v11 = vld [vmem:[%s23907_s0 + $0x8f0] sm:$0xff]  ;;  %v1015_v62 = vld [vmem:[%s23907_s0 + $0x8d8] sm:$0xff] }
 0x148   :  { %v1020_v63 = vld [vmem:[%s23907_s0 + $0x900] sm:$0xff]  ;;  %v1034_v36 = vld [vmem:[%s23907_s0 + $0x970] sm:$0xff]  ;;  %v1049_v20 = vld [vmem:[%s23907_s0 + $0x9e8] sm:$0xff] }
 0x149   :  { %12651 = vmatpush1.bf16.msra.mxu1 %v12650_v10  ;;  %12811 = vmatpush1.bf16.msra.mxu0 %v12810_v12  ;;  %v974_v10 = vld [vmem:[%s23907_s0 + $0x790] sm:$0xff]  ;;  %v979_v12 = vld [vmem:[%s23907_s0 + $0x7b8] sm:$0xff]  ;;  %v1012_v2 = vld [vmem:[%s23907_s0 + $0x8c0] sm:$0xff]  ;;  %v12844_v5 = vpack.c.bf16 %v1020_v63, %v1015_v62 }
 0x14a   :  { %12653 = vmatprep.subr.bf16.mxu1 %v12652_v15  ;;  %12813 = vmatprep.subr.bf16.mxu0 %v12812_v16  ;;  %v988_v16 = vld [vmem:[%s23907_s0 + $0x800] sm:$0xff]  ;;  %v12830_v25 = vpack.c.bf16 %v979_v12, %v974_v10  ;;  %v1025_v10 = vld [vmem:[%s23907_s0 + $0x928] sm:$0xff]  ;;  %v1030_v12 = vld [vmem:[%s23907_s0 + $0x950] sm:$0xff] }
 0x14b   :  { %v12848_v18 = vpack.c.bf16 %v1030_v12, %v1025_v10  ;;  %v1044_v50 = vld [vmem:[%s23907_s0 + $0x9c0] sm:$0xff]  ;;  %v1054_v63 = vld [vmem:[%s23907_s0 + $0xa10] sm:$0xff] }
 0x14d   :  { %12655 = vmatpush1.bf16.msra.mxu1 %v12654_v30  ;;  %12815 = vmatpush1.bf16.msra.mxu0 %v12814_v29  ;;  %v12672_v29 = vpack.c.bf16 %v988_v16, %v983_v13  ;;  %v1027_v16 = vld [vmem:[%s23907_s0 + $0x938] sm:$0xff] }
 0x14e   :  { %12657 = vmatprep.subr.bf16.mxu1 %v12656_v33  ;;  %12817 = vmatprep.subr.bf16.mxu0 %v12816_v34  ;;  %v989_v33 = vld [vmem:[%s23907_s0 + $0x808] sm:$0xff] }
 0x14f   :  { %v993_v34 = vld [vmem:[%s23907_s0 + $0x828] sm:$0xff]  ;;  %v12834_v40 = vpack.c.bf16 %v989_v33, %v984_v32  ;;  %v1032_v32 = vld [vmem:[%s23907_s0 + $0x960] sm:$0xff] }
 0x150   :  { %v1037_v33 = vld [vmem:[%s23907_s0 + $0x988] sm:$0xff] }
 0x151   :  { %12659 = vmatpush1.bf16.msra.mxu1 %v12658_v42  ;;  %12819 = vmatpush1.bf16.msra.mxu0 %v12818_v43  ;;  %v997_v42 = vld [vmem:[%s23907_s0 + $0x848] sm:$0xff]  ;;  %v12676_v43 = vpack.c.bf16 %v998_v35, %v993_v34  ;;  %v12852_v35 = vpack.c.bf16 %v1040_v28, %v1035_v27  ;;  %v1074_v28 = vld [vmem:[%s23907_s0 + $0xab0] sm:$0xff] }
 0x152   :  { %12661 = vmatprep.subr.bf16.mxu1 %v12660_v46  ;;  %12821 = vmatprep.subr.bf16.mxu0 %v12820_v47  ;;  %v999_v46 = vld [vmem:[%s23907_s0 + $0x858] sm:$0xff]  ;;  %v12678_v51 = vpack.c.bf16 %v997_v42, %v992_v41  ;;  %v1045_v41 = vld [vmem:[%s23907_s0 + $0x9c8] sm:$0xff]  ;;  %v1050_v42 = vld [vmem:[%s23907_s0 + $0x9f0] sm:$0xff] }
 0x153   :  { %v718_v15 = vpop.f32.mrb[2].mxu1  ;;  %v1003_v47 = vld [vmem:[%s23907_s0 + $0x878] sm:$0xff]  ;;  %v12838_v52 = vpack.c.bf16 %v999_v46, %v994_v45  ;;  %v1042_v45 = vld [vmem:[%s23907_s0 + $0x9b0] sm:$0xff] }
 0x154   :  { %v11786_v23 = vpop.f32.mrb[3].mxu1  ;;  %v1047_v46 = vld [vmem:[%s23907_s0 + $0x9d8] sm:$0xff] }
 0x155   :  { %12663 = vmatpush1.bf16.msra.mxu1 %v12662_v54  ;;  %12823 = vmatpush1.bf16.msra.mxu0 %v12822_v56  ;;  %v10568_v7 = vpop.f32.mrb[2].mxu0  ;;  %v1007_v54 = vld [vmem:[%s23907_s0 + $0x898] sm:$0xff]  ;;  %v12680_v56 = vpack.c.bf16 %v1008_v49, %v1003_v47  ;;  %v1029_v23 = vld [vmem:[%s23907_s0 + $0x948] sm:$0xff]  ;;  %v12856_v49 = vpack.c.bf16 %v1050_v42, %v1045_v41  ;;  %v1084_v42 = vld [vmem:[%s23907_s0 + $0xb00] sm:$0xff] }
 0x156   :  { %12665 = vmatprep.subr.bf16.mxu1 %v12664_v59  ;;  %12825 = vmatprep.subr.bf16.mxu0 %v12824_v61  ;;  %v10569_v14 = vpop.f32.mrb[3].mxu0  ;;  %v1009_v59 = vld [vmem:[%s23907_s0 + $0x8a8] sm:$0xff]  ;;  %v12682_v0 = vpack.c.bf16 %v1007_v54, %v1002_v53  ;;  %v1055_v53 = vld [vmem:[%s23907_s0 + $0xa18] sm:$0xff]  ;;  %v1060_v54 = vld [vmem:[%s23907_s0 + $0xa40] sm:$0xff] }
 0x157   :  { %v10570_v21 = vadd.f32 %v10569_v14, %v10568_v7  ;;  %v1013_v61 = vld [vmem:[%s23907_s0 + $0x8c8] sm:$0xff]  ;;  %v12842_v1 = vpack.c.bf16 %v1009_v59, %v1004_v58  ;;  %v1019_v7 = vld [vmem:[%s23907_s0 + $0x8f8] sm:$0xff]  ;;  %v1052_v58 = vld [vmem:[%s23907_s0 + $0xa00] sm:$0xff]  ;;  %v12860_v62 = vpack.c.bf16 %v1060_v54, %v1055_v53 }
 0x158   :  { %v12846_v14 = vpack.c.bf16 %v1019_v7, %v1014_v6  ;;  %v1057_v59 = vld [vmem:[%s23907_s0 + $0xa28] sm:$0xff]  ;;  %v1062_v7 = vld [vmem:[%s23907_s0 + $0xa50] sm:$0xff] }
 0x159   :  { %12667 = vmatpush1.bf16.msra.mxu1 %v12666_v3  ;;  %12827 = vmatpush1.bf16.msra.mxu0 %v12826_v4  ;;  %v16701_v30 = vadd.f32 %v10570_v21, %v718_v15  ;;  %v1017_v3 = vld [vmem:[%s23907_s0 + $0x8e8] sm:$0xff]  ;;  %v12684_v4 = vpack.c.bf16 %v1018_v11, %v1013_v61  ;;  %v1022_v15 = vld [vmem:[%s23907_s0 + $0x910] sm:$0xff]  ;;  %v1024_v21 = vld [vmem:[%s23907_s0 + $0x920] sm:$0xff]  ;;  %v724_v61 = vmul.f32 0.2, %v16584_v22 }
 0x15a   :  { %12669 = vmatprep.subr.bf16.mxu1 %v12668_v8  ;;  %12829 = vmatprep.subr.bf16.mxu0 %v12828_v9  ;;  %v1023_v8 = vld [vmem:[%s23907_s0 + $0x918] sm:$0xff]  ;;  %v1028_v9 = vld [vmem:[%s23907_s0 + $0x940] sm:$0xff]  ;;  %v12686_v13 = vpack.c.bf16 %v1017_v3, %v1012_v2  ;;  %v1065_v3 = vld [vmem:[%s23907_s0 + $0xa68] sm:$0xff] }
 0x15b   :  { %v12688_v17 = vpack.c.bf16 %v1028_v9, %v1023_v8  ;;  %v1068_v2 = vld [vmem:[%s23907_s0 + $0xa80] sm:$0xff]  ;;  %v1067_v8 = vld [vmem:[%s23907_s0 + $0xa78] sm:$0xff]  ;;  %v16897_v9 = vmax.f32 %v16584_v22, %v724_v61  ;;  %v1078_v22 = vld [vmem:[%s23907_s0 + $0xad0] sm:$0xff] }
 0x15c   :  { %v1094_v54 = vld [vmem:[%s23907_s0 + $0xb50] sm:$0xff] }
 0x15d   :  { %12671 = vmatpush1.bf16.msra.mxu1 %v12670_v24  ;;  %12831 = vmatpush1.bf16.msra.mxu0 %v12830_v25  ;;  %v1033_v24 = vld [vmem:[%s23907_s0 + $0x968] sm:$0xff]  ;;  %v1038_v25 = vld [vmem:[%s23907_s0 + $0x990] sm:$0xff] }
 0x15e   :  { %12673 = vmatprep.subr.bf16.mxu1 %v12672_v29  ;;  %12833 = vmatprep.subr.bf16.mxu0 %v12832_v31  ;;  %v12690_v29 = vpack.c.bf16 %v1027_v16, %v1022_v15  ;;  %v12850_v31 = vpack.c.bf16 %v1029_v23, %v1024_v21  ;;  %v12692_v34 = vpack.c.bf16 %v1038_v25, %v1033_v24  ;;  %v1073_v15 = vld [vmem:[%s23907_s0 + $0xaa8] sm:$0xff]  ;;  %v1075_v16 = vld [vmem:[%s23907_s0 + $0xab8] sm:$0xff]  ;;  %v1072_v23 = vld [vmem:[%s23907_s0 + $0xaa0] sm:$0xff] }
 0x15f   :  { %v1077_v24 = vld [vmem:[%s23907_s0 + $0xac8] sm:$0xff]  ;;  %v12708_v25 = vpack.c.bf16 %v1078_v22, %v1073_v15  ;;  %v1110_v61 = vld [vmem:[%s23907_s0 + $0xbd0] sm:$0xff] }
 0x161   :  { %12675 = vmatpush1.bf16.msra.mxu1 %v12674_v39  ;;  %12835 = vmatpush1.bf16.msra.mxu0 %v12834_v40  ;;  %v1043_v39 = vld [vmem:[%s23907_s0 + $0x9b8] sm:$0xff]  ;;  %v1048_v40 = vld [vmem:[%s23907_s0 + $0x9e0] sm:$0xff] }
 0x162   :  { %12677 = vmatprep.subr.bf16.mxu1 %v12676_v43  ;;  %12837 = vmatprep.subr.bf16.mxu0 %v12836_v44  ;;  %v12694_v43 = vpack.c.bf16 %v1037_v33, %v1032_v32  ;;  %v12854_v44 = vpack.c.bf16 %v1039_v38, %v1034_v36  ;;  %v12696_v47 = vpack.c.bf16 %v1048_v40, %v1043_v39  ;;  %v1088_v32 = vld [vmem:[%s23907_s0 + $0xb20] sm:$0xff]  ;;  %v1085_v33 = vld [vmem:[%s23907_s0 + $0xb08] sm:$0xff]  ;;  %v1082_v38 = vld [vmem:[%s23907_s0 + $0xaf0] sm:$0xff] }
 0x163   :  { %v1087_v39 = vld [vmem:[%s23907_s0 + $0xb18] sm:$0xff] }
 0x165   :  { %12679 = vmatpush1.bf16.msra.mxu1 %v12678_v51  ;;  %12839 = vmatpush1.bf16.msra.mxu0 %v12838_v52  ;;  %v1053_v51 = vld [vmem:[%s23907_s0 + $0xa08] sm:$0xff]  ;;  %v1058_v52 = vld [vmem:[%s23907_s0 + $0xa30] sm:$0xff] }
 0x166   :  { %12681 = vmatprep.subr.bf16.mxu1 %v12680_v56  ;;  %12841 = vmatprep.subr.bf16.mxu0 %v12840_v57  ;;  %v12698_v56 = vpack.c.bf16 %v1047_v46, %v1042_v45  ;;  %v12858_v57 = vpack.c.bf16 %v1049_v20, %v1044_v50  ;;  %v12700_v11 = vpack.c.bf16 %v1058_v52, %v1053_v51  ;;  %v1098_v45 = vld [vmem:[%s23907_s0 + $0xb70] sm:$0xff]  ;;  %v1095_v46 = vld [vmem:[%s23907_s0 + $0xb58] sm:$0xff]  ;;  %v1092_v20 = vld [vmem:[%s23907_s0 + $0xb40] sm:$0xff] }
 0x167   :  { %v1097_v51 = vld [vmem:[%s23907_s0 + $0xb68] sm:$0xff] }
 0x169   :  { %12683 = vmatpush1.bf16.msra.mxu1 %v12682_v0  ;;  %12843 = vmatpush1.bf16.msra.mxu0 %v12842_v1  ;;  %v1059_v0 = vld [vmem:[%s23907_s0 + $0xa38] sm:$0xff] }
 0x16a   :  { %12685 = vmatprep.subr.bf16.mxu1 %v12684_v4  ;;  %12845 = vmatprep.subr.bf16.mxu0 %v12844_v5  ;;  %v1063_v1 = vld [vmem:[%s23907_s0 + $0xa58] sm:$0xff]  ;;  %v1070_v4 = vld [vmem:[%s23907_s0 + $0xa90] sm:$0xff]  ;;  %v12702_v5 = vpack.c.bf16 %v1057_v59, %v1052_v58  ;;  %v12862_v6 = vpack.c.bf16 %v1059_v0, %v1054_v63  ;;  %v1108_v58 = vld [vmem:[%s23907_s0 + $0xbc0] sm:$0xff] }
 0x16b   :  { %v12704_v10 = vpack.c.bf16 %v1068_v2, %v1063_v1  ;;  %v12864_v12 = vpack.c.bf16 %v1070_v4, %v1065_v3  ;;  %v1105_v59 = vld [vmem:[%s23907_s0 + $0xba8] sm:$0xff]  ;;  %v1102_v63 = vld [vmem:[%s23907_s0 + $0xb90] sm:$0xff]  ;;  %v1107_v0 = vld [vmem:[%s23907_s0 + $0xbb8] sm:$0xff] }
 0x16c   :  { %v12880_v2 = vpack.c.bf16 %v1110_v61, %v1105_v59  ;;  %v1104_v3 = vld [vmem:[%s23907_s0 + $0xba0] sm:$0xff]  ;;  %v1109_v4 = vld [vmem:[%s23907_s0 + $0xbc8] sm:$0xff]  ;;  %v906_v59 = vld [vmem:[%s23907_s0 + $0x570] sm:$0xff] }
 0x16d   :  { %12687 = vmatpush1.bf16.msra.mxu1 %v12686_v13  ;;  %12847 = vmatpush1.bf16.msra.mxu0 %v12846_v14  ;;  %v1064_v13 = vld [vmem:[%s23907_s0 + $0xa60] sm:$0xff]  ;;  %v1069_v14 = vld [vmem:[%s23907_s0 + $0xa88] sm:$0xff] }
 0x16e   :  { %12689 = vmatprep.subr.bf16.mxu1 %v12688_v17  ;;  %12849 = vmatprep.subr.bf16.mxu0 %v12848_v18  ;;  %v1080_v17 = vld [vmem:[%s23907_s0 + $0xae0] sm:$0xff]  ;;  %v12706_v18 = vpack.c.bf16 %v1067_v8, %v1062_v7  ;;  %v12866_v21 = vpack.c.bf16 %v1069_v14, %v1064_v13  ;;  %v1115_v7 = vld [vmem:[%s23907_s0 + $0xbf8] sm:$0xff]  ;;  %v1117_v14 = vld [vmem:[%s23907_s0 + $0xc08] sm:$0xff] }
 0x16f   :  { %v12868_v27 = vpack.c.bf16 %v1080_v17, %v1075_v16  ;;  %v1120_v8 = vld [vmem:[%s23907_s0 + $0xc20] sm:$0xff]  ;;  %v1114_v16 = vld [vmem:[%s23907_s0 + $0xbf0] sm:$0xff]  ;;  %v1119_v17 = vld [vmem:[%s23907_s0 + $0xc18] sm:$0xff] }
 0x170   :  { %v1112_v13 = vld [vmem:[%s23907_s0 + $0xbe0] sm:$0xff]  ;;  %v12884_v22 = vpack.c.bf16 %v1120_v8, %v1115_v7  ;;  %v846_v8 = vld [vmem:[%s23907_s0 + $0x390] sm:$0xff] }
 0x171   :  { %12691 = vmatpush1.bf16.msra.mxu1 %v12690_v29  ;;  %12851 = vmatpush1.bf16.msra.mxu0 %v12850_v31  ;;  %v1079_v29 = vld [vmem:[%s23907_s0 + $0xad8] sm:$0xff]  ;;  %v916_v7 = vld [vmem:[%s23907_s0 + $0x5c0] sm:$0xff] }
 0x172   :  { %12693 = vmatprep.subr.bf16.mxu1 %v12692_v34  ;;  %12853 = vmatprep.subr.bf16.mxu0 %v12852_v35  ;;  %v1083_v31 = vld [vmem:[%s23907_s0 + $0xaf8] sm:$0xff]  ;;  %v1090_v34 = vld [vmem:[%s23907_s0 + $0xb30] sm:$0xff]  ;;  %v12710_v35 = vpack.c.bf16 %v1077_v24, %v1072_v23  ;;  %v12870_v36 = vpack.c.bf16 %v1079_v29, %v1074_v28  ;;  %v1125_v23 = vld [vmem:[%s23907_s0 + $0xc48] sm:$0xff] }
 0x173   :  { %v12712_v40 = vpack.c.bf16 %v1088_v32, %v1083_v31  ;;  %v12872_v41 = vpack.c.bf16 %v1090_v34, %v1085_v33  ;;  %v1130_v24 = vld [vmem:[%s23907_s0 + $0xc70] sm:$0xff]  ;;  %v1127_v29 = vld [vmem:[%s23907_s0 + $0xc58] sm:$0xff]  ;;  %v1124_v33 = vld [vmem:[%s23907_s0 + $0xc40] sm:$0xff] }
 0x174   :  { %v1122_v28 = vld [vmem:[%s23907_s0 + $0xc30] sm:$0xff]  ;;  %v12888_v32 = vpack.c.bf16 %v1130_v24, %v1125_v23  ;;  %v1129_v34 = vld [vmem:[%s23907_s0 + $0xc68] sm:$0xff]  ;;  %v931_v23 = vld [vmem:[%s23907_s0 + $0x638] sm:$0xff] }
 0x175   :  { %12695 = vmatpush1.bf16.msra.mxu1 %v12694_v43  ;;  %12855 = vmatpush1.bf16.msra.mxu0 %v12854_v44  ;;  %v1089_v43 = vld [vmem:[%s23907_s0 + $0xb28] sm:$0xff]  ;;  %v856_v24 = vld [vmem:[%s23907_s0 + $0x3e0] sm:$0xff] }
 0x176   :  { %12697 = vmatprep.subr.bf16.mxu1 %v12696_v47  ;;  %12857 = vmatprep.subr.bf16.mxu0 %v12856_v49  ;;  %v1093_v44 = vld [vmem:[%s23907_s0 + $0xb48] sm:$0xff]  ;;  %v1100_v47 = vld [vmem:[%s23907_s0 + $0xb80] sm:$0xff]  ;;  %v12714_v49 = vpack.c.bf16 %v1087_v39, %v1082_v38  ;;  %v12874_v50 = vpack.c.bf16 %v1089_v43, %v1084_v42  ;;  %v726_v42 = vmul.f32 0.2, %v16701_v30 }
 0x177   :  { %v12716_v52 = vpack.c.bf16 %v1098_v45, %v1093_v44  ;;  %v12876_v53 = vpack.c.bf16 %v1100_v47, %v1095_v46  ;;  %v976_v38 = vld [vmem:[%s23907_s0 + $0x7a0] sm:$0xff]  ;;  %v981_v39 = vld [vmem:[%s23907_s0 + $0x7c8] sm:$0xff] }
 0x178   :  { %v12924_v44 = vpack.c.bf16 %v981_v39, %v976_v38  ;;  %v736_v45 = vld [vmem:[%s23907_s0 + $0x20] sm:$0xff]  ;;  %v741_v46 = vld [vmem:[%s23907_s0 + $0x48] sm:$0xff]  ;;  %v866_v39 = vld [vmem:[%s23907_s0 + $0x430] sm:$0xff] }
 0x179   :  { %12699 = vmatpush1.bf16.msra.mxu1 %v12698_v56  ;;  %12859 = vmatpush1.bf16.msra.mxu0 %v12858_v57  ;;  %v1099_v56 = vld [vmem:[%s23907_s0 + $0xb78] sm:$0xff]  ;;  %v896_v47 = vld [vmem:[%s23907_s0 + $0x520] sm:$0xff]  ;;  %v941_v38 = vld [vmem:[%s23907_s0 + $0x688] sm:$0xff] }
 0x17a   :  { %12701 = vmatprep.subr.bf16.mxu1 %v12700_v11  ;;  %12861 = vmatprep.subr.bf16.mxu0 %v12860_v62  ;;  %v1103_v57 = vld [vmem:[%s23907_s0 + $0xb98] sm:$0xff]  ;;  %v12718_v11 = vpack.c.bf16 %v1097_v51, %v1092_v20  ;;  %v12878_v62 = vpack.c.bf16 %v1099_v56, %v1094_v54  ;;  %v986_v51 = vld [vmem:[%s23907_s0 + $0x7f0] sm:$0xff]  ;;  %v17091_v54 = vmax.f32 %v16701_v30, %v726_v42 }
 0x17b   :  { %v12720_v1 = vpack.c.bf16 %v1108_v58, %v1103_v57  ;;  %v831_v20 = vld [vmem:[%s23907_s0 + $0x318] sm:$0xff]  ;;  %v746_v57 = vld [vmem:[%s23907_s0 + $0x70] sm:$0xff] }
 0x17c   :  { %1268 = vmatmul.mubr.f32.vlgmr.msra.gmra.mrb[4].mxu1 %v16897_v9  ;;  %1481 = vmatmul.mubr.f32.vlgmr.msra.gmra.mrb[4].mxu0 %v16897_v9  ;;  %v751_v58 = vld [vmem:[%s23907_s0 + $0x98] sm:$0xff] }
 0x17d   :  { %12703 = vmatpush1.bf16.msra.mxu1 %v12702_v5  ;;  %12863 = vmatpush1.bf16.msra.mxu0 %v12862_v6  ;;  %v1113_v5 = vld [vmem:[%s23907_s0 + $0xbe8] sm:$0xff]  ;;  %v1118_v6 = vld [vmem:[%s23907_s0 + $0xc10] sm:$0xff]  ;;  %v911_v30 = vld [vmem:[%s23907_s0 + $0x598] sm:$0xff] }
 0x17e   :  { %12705 = vmatprep.subr.bf16.mxu1 %v12704_v10  ;;  %12865 = vmatprep.subr.bf16.mxu0 %v12864_v12  ;;  %v12722_v10 = vpack.c.bf16 %v1107_v0, %v1102_v63  ;;  %v12882_v12 = vpack.c.bf16 %v1109_v4, %v1104_v3  ;;  %v12724_v15 = vpack.c.bf16 %v1118_v6, %v1113_v5  ;;  %v841_v63 = vld [vmem:[%s23907_s0 + $0x368] sm:$0xff]  ;;  %v996_v0 = vld [vmem:[%s23907_s0 + $0x840] sm:$0xff]  ;;  %v1031_v42 = vld [vmem:[%s23907_s0 + $0x958] sm:$0xff] }
 0x17f   :  { %1338 = vmatprep.mubr.f32.mxu1 %v23873_v19  ;;  %1551 = vmatprep.mubr.f32.mxu0 %v23873_v19  ;;  %v12930_v3 = vpack.c.bf16 %v911_v30, %v906_v59  ;;  %v756_v5 = vld [vmem:[%s23907_s0 + $0xc0] sm:$0xff]  ;;  %v761_v6 = vld [vmem:[%s23907_s0 + $0xe8] sm:$0xff] }
 0x180   :  { %v956_v30 = vld [vmem:[%s23907_s0 + $0x700] sm:$0xff] }
 0x181   :  { %12707 = vmatpush1.bf16.msra.mxu1 %v12706_v18  ;;  %12867 = vmatpush1.bf16.msra.mxu0 %v12866_v21  ;;  %v1123_v18 = vld [vmem:[%s23907_s0 + $0xc38] sm:$0xff]  ;;  %v1128_v21 = vld [vmem:[%s23907_s0 + $0xc60] sm:$0xff] }
 0x182   :  { %12709 = vmatprep.subr.bf16.mxu1 %v12708_v25  ;;  %12869 = vmatprep.subr.bf16.mxu0 %v12868_v27  ;;  %v12726_v25 = vpack.c.bf16 %v1117_v14, %v1112_v13  ;;  %v12886_v27 = vpack.c.bf16 %v1119_v17, %v1114_v16  ;;  %v12728_v31 = vpack.c.bf16 %v1128_v21, %v1123_v18  ;;  %v1011_v13 = vld [vmem:[%s23907_s0 + $0x8b8] sm:$0xff]  ;;  %v766_v16 = vld [vmem:[%s23907_s0 + $0x110] sm:$0xff] }
 0x183   :  { %v12902_v14 = vpack.c.bf16 %v761_v6, %v756_v5  ;;  %v771_v17 = vld [vmem:[%s23907_s0 + $0x138] sm:$0xff]  ;;  %v926_v18 = vld [vmem:[%s23907_s0 + $0x610] sm:$0xff] }
 0x185   :  { %12711 = vmatpush1.bf16.msra.mxu1 %v12710_v35  ;;  %12871 = vmatpush1.bf16.msra.mxu0 %v12870_v36  ;;  %v816_v35 = vld [vmem:[%s23907_s0 + $0x2a0] sm:$0xff]  ;;  %v821_v36 = vld [vmem:[%s23907_s0 + $0x2c8] sm:$0xff] }
 0x186   :  { %12713 = vmatprep.subr.bf16.mxu1 %v12712_v40  ;;  %12873 = vmatprep.subr.bf16.mxu0 %v12872_v41  ;;  %v12730_v40 = vpack.c.bf16 %v1127_v29, %v1122_v28  ;;  %v12890_v41 = vpack.c.bf16 %v1129_v34, %v1124_v33  ;;  %v12892_v43 = vpack.c.bf16 %v821_v36, %v816_v35  ;;  %v1021_v28 = vld [vmem:[%s23907_s0 + $0x908] sm:$0xff]  ;;  %v776_v33 = vld [vmem:[%s23907_s0 + $0x160] sm:$0xff] }
 0x187   :  { %v12906_v29 = vpack.c.bf16 %v771_v17, %v766_v16  ;;  %v781_v34 = vld [vmem:[%s23907_s0 + $0x188] sm:$0xff]  ;;  %v936_v35 = vld [vmem:[%s23907_s0 + $0x660] sm:$0xff] }
 0x188   :  { %v1061_v16 = vld [vmem:[%s23907_s0 + $0xa48] sm:$0xff] }
 0x189   :  { %12715 = vmatpush1.bf16.msra.mxu1 %v12714_v49  ;;  %12875 = vmatpush1.bf16.msra.mxu0 %v12874_v50  ;;  %v901_v49 = vld [vmem:[%s23907_s0 + $0x548] sm:$0xff]  ;;  %v826_v50 = vld [vmem:[%s23907_s0 + $0x2f0] sm:$0xff] }
 0x18a   :  { %12717 = vmatprep.subr.bf16.mxu1 %v12716_v52  ;;  %12877 = vmatprep.subr.bf16.mxu0 %v12876_v53  ;;  %v991_v52 = vld [vmem:[%s23907_s0 + $0x818] sm:$0xff]  ;;  %v12894_v53 = vpack.c.bf16 %v741_v46, %v736_v45  ;;  %v12926_v56 = vpack.c.bf16 %v901_v49, %v896_v47  ;;  %v12896_v61 = vpack.c.bf16 %v831_v20, %v826_v50  ;;  %v786_v46 = vld [vmem:[%s23907_s0 + $0x1b0] sm:$0xff] }
 0x18b   :  { %v791_v47 = vld [vmem:[%s23907_s0 + $0x1d8] sm:$0xff]  ;;  %v946_v49 = vld [vmem:[%s23907_s0 + $0x6b0] sm:$0xff] }
 0x18c   :  { %v951_v20 = vld [vmem:[%s23907_s0 + $0x6d8] sm:$0xff] }
 0x18d   :  { %12719 = vmatpush1.bf16.msra.mxu1 %v12718_v11  ;;  %12879 = vmatpush1.bf16.msra.mxu0 %v12878_v62  ;;  %v12928_v11 = vpack.c.bf16 %v991_v52, %v986_v51  ;;  %v836_v62 = vld [vmem:[%s23907_s0 + $0x340] sm:$0xff]  ;;  %v881_v52 = vld [vmem:[%s23907_s0 + $0x4a8] sm:$0xff] }
 0x18e   :  { %12721 = vmatprep.subr.bf16.mxu1 %v12720_v1  ;;  %12881 = vmatprep.subr.bf16.mxu0 %v12880_v2  ;;  %v1001_v1 = vld [vmem:[%s23907_s0 + $0x868] sm:$0xff]  ;;  %v12898_v2 = vpack.c.bf16 %v751_v58, %v746_v57  ;;  %v12900_v4 = vpack.c.bf16 %v841_v63, %v836_v62  ;;  %v876_v51 = vld [vmem:[%s23907_s0 + $0x480] sm:$0xff]  ;;  %v12914_v57 = vpack.c.bf16 %v791_v47, %v786_v46  ;;  %v1091_v46 = vld [vmem:[%s23907_s0 + $0xb38] sm:$0xff] }
 0x18f   :  { %v12946_v58 = vpack.c.bf16 %v951_v20, %v946_v49  ;;  %v12916_v59 = vpack.c.bf16 %v881_v52, %v876_v51  ;;  %v961_v63 = vld [vmem:[%s23907_s0 + $0x728] sm:$0xff]  ;;  %v1811_v20 = vld [vmem:[%s23908_s29 + $0x38] sm:$0xff]  ;;  %v1096_v52 = vld [vmem:[%s23907_s0 + $0xb60] sm:$0xff] }
 0x190   :  { %v12950_v5 = vpack.c.bf16 %v961_v63, %v956_v30  ;;  %v1121_v30 = vld [vmem:[%s23907_s0 + $0xc28] sm:$0xff]  ;;  %v1126_v63 = vld [vmem:[%s23907_s0 + $0xc50] sm:$0xff] }
 0x191   :  { %12723 = vmatpush1.bf16.msra.mxu1 %v12722_v10  ;;  %12883 = vmatpush1.bf16.msra.mxu0 %v12882_v12  ;;  %v851_v10 = vld [vmem:[%s23907_s0 + $0x3b8] sm:$0xff]  ;;  %v1006_v12 = vld [vmem:[%s23907_s0 + $0x890] sm:$0xff] }
 0x192   :  { %12725 = vmatprep.subr.bf16.mxu1 %v12724_v15  ;;  %12885 = vmatprep.subr.bf16.mxu0 %v12884_v22  ;;  %v12904_v22 = vpack.c.bf16 %v851_v10, %v846_v8  ;;  %v12936_v21 = vpack.c.bf16 %v1011_v13, %v1006_v12  ;;  %v966_v8 = vld [vmem:[%s23907_s0 + $0x750] sm:$0xff]  ;;  %v971_v10 = vld [vmem:[%s23907_s0 + $0x778] sm:$0xff]  ;;  %v1820_v12 = vld [vmem:[%s23908_s29 + $0x80] sm:$0xff] }
 0x193   :  { %v1821_v13 = vld [vmem:[%s23908_s29 + $0x88] sm:$0xff] }
 0x194   :  { %v17265_v17 = vpack.c.bf16 %v1821_v13, %v1820_v12  ;;  %v1839_v12 = vld [vmem:[%s23908_s29 + $0x118] sm:$0xff]  ;;  %v1856_v13 = vld [vmem:[%s23908_s29 + $0x1a0] sm:$0xff] }
 0x195   :  { %12727 = vmatpush1.bf16.msra.mxu1 %v12726_v25  ;;  %12887 = vmatpush1.bf16.msra.mxu0 %v12886_v27  ;;  %v861_v25 = vld [vmem:[%s23907_s0 + $0x408] sm:$0xff]  ;;  %v1016_v27 = vld [vmem:[%s23907_s0 + $0x8e0] sm:$0xff] }
 0x196   :  { %12729 = vmatprep.subr.bf16.mxu1 %v12728_v31  ;;  %12889 = vmatprep.subr.bf16.mxu0 %v12888_v32  ;;  %v12938_v31 = vpack.c.bf16 %v931_v23, %v926_v18  ;;  %v12908_v32 = vpack.c.bf16 %v861_v25, %v856_v24  ;;  %v12940_v36 = vpack.c.bf16 %v1021_v28, %v1016_v27  ;;  %v1804_v18 = vld [vmem:[%s23908_s29] sm:$0xff]  ;;  %v1822_v24 = vld [vmem:[%s23908_s29 + $0x90] sm:$0xff]  ;;  %v1823_v25 = vld [vmem:[%s23908_s29 + $0x98] sm:$0xff] }
 0x197   :  { %v1066_v27 = vld [vmem:[%s23907_s0 + $0xa70] sm:$0xff]  ;;  %v1071_v28 = vld [vmem:[%s23907_s0 + $0xa98] sm:$0xff] }
 0x199   :  { %12731 = vmatpush1.bf16.msra.mxu1 %v12730_v40  ;;  %12891 = vmatpush1.bf16.msra.mxu0 %v12890_v41  ;;  %v871_v40 = vld [vmem:[%s23907_s0 + $0x458] sm:$0xff]  ;;  %v1026_v41 = vld [vmem:[%s23907_s0 + $0x930] sm:$0xff] }
 0x19a   :  { %12893 = vmatprep.subr.bf16.mxu1 %v12892_v43  ;;  %12925 = vmatprep.subr.bf16.mxu0 %v12924_v44  ;;  %v12910_v43 = vpack.c.bf16 %v781_v34, %v776_v33  ;;  %v12942_v44 = vpack.c.bf16 %v941_v38, %v936_v35  ;;  %v12912_v45 = vpack.c.bf16 %v871_v40, %v866_v39  ;;  %v1807_v33 = vld [vmem:[%s23908_s29 + $0x18] sm:$0xff]  ;;  %v1824_v35 = vld [vmem:[%s23908_s29 + $0xa0] sm:$0xff] }
 0x19b   :  { %v12944_v50 = vpack.c.bf16 %v1031_v42, %v1026_v41  ;;  %v12960_v34 = vpack.c.bf16 %v1071_v28, %v1066_v27  ;;  %v1808_v40 = vld [vmem:[%s23908_s29 + $0x20] sm:$0xff]  ;;  %v1809_v41 = vld [vmem:[%s23908_s29 + $0x28] sm:$0xff]  ;;  %v1843_v27 = vld [vmem:[%s23908_s29 + $0x138] sm:$0xff] }
 0x19c   :  { %1339 = vmatmul.mubr.f32.vlgmr.msra.gmra.mrb[4].mxu1 %v17091_v54  ;;  %1552 = vmatmul.mubr.f32.vlgmr.msra.gmra.mrb[4].mxu0 %v17091_v54  ;;  %v17340_v47 = vpack.c.bf16 %v1809_v41, %v1808_v40 }
 0x19d   :  { %12895 = vmatpush3.bf16.msra.mxu1 %v12894_v53  ;;  %1622 = vmatprep.mubr.f32.mxu1 %v16489_v37  ;;  %v12932_v37 = vpack.c.bf16 %v1001_v1, %v996_v0  ;;  %v1036_v53 = vld [vmem:[%s23907_s0 + $0x980] sm:$0xff]  ;;  %v886_v0 = vld [vmem:[%s23907_s0 + $0x4d0] sm:$0xff]  ;;  %v891_v1 = vld [vmem:[%s23907_s0 + $0x4f8] sm:$0xff] }
 0x19e   :  { %12927 = vmatpush3.bf16.msra.mxu0 %v12926_v56  ;;  %1692 = vmatprep.mubr.f32.mxu0 %v16610_v26  ;;  %v921_v26 = vld [vmem:[%s23907_s0 + $0x5e8] sm:$0xff]  ;;  %v12920_v6 = vpack.c.bf16 %v891_v1, %v886_v0  ;;  %v1131_v0 = vld [vmem:[%s23907_s0 + $0xc78] sm:$0xff]  ;;  %v1852_v1 = vld [vmem:[%s23908_s29 + $0x180] sm:$0xff] }
 0x19f   :  { %12897 = vmatprep.subr.bf16.mxu1 %v12896_v61  ;;  %12929 = vmatprep.subr.bf16.mxu0 %v12928_v11  ;;  %v12934_v15 = vpack.c.bf16 %v921_v26, %v916_v7  ;;  %v1041_v56 = vld [vmem:[%s23907_s0 + $0x9a8] sm:$0xff]  ;;  %v796_v61 = vld [vmem:[%s23907_s0 + $0x200] sm:$0xff]  ;;  %v806_v7 = vld [vmem:[%s23907_s0 + $0x250] sm:$0xff] }
 0x1a0   :  { %v801_v11 = vld [vmem:[%s23907_s0 + $0x228] sm:$0xff]  ;;  %v12948_v62 = vpack.c.bf16 %v1041_v56, %v1036_v53 }
 0x1a1   :  { %12899 = vmatpush3.bf16.msra.mxu1 %v12898_v2  ;;  %v1046_v2 = vld [vmem:[%s23907_s0 + $0x9d0] sm:$0xff]  ;;  %v1101_v53 = vld [vmem:[%s23907_s0 + $0xb88] sm:$0xff] }
 0x1a2   :  { %12931 = vmatpush3.bf16.msra.mxu0 %v12930_v3  ;;  %12901 = vmatprep.subr.bf16.mxu1 %v12900_v4  ;;  %v1051_v3 = vld [vmem:[%s23907_s0 + $0x9f8] sm:$0xff]  ;;  %v12918_v4 = vpack.c.bf16 %v801_v11, %v796_v61  ;;  %v1116_v11 = vld [vmem:[%s23907_s0 + $0xc00] sm:$0xff] }
 0x1a3   :  { %12933 = vmatprep.subr.bf16.mxu0 %v12932_v37  ;;  %v811_v37 = vld [vmem:[%s23907_s0 + $0x278] sm:$0xff]  ;;  %v12952_v26 = vpack.c.bf16 %v1051_v3, %v1046_v2  ;;  %v1853_v2 = vld [vmem:[%s23908_s29 + $0x188] sm:$0xff]  ;;  %v12978_v3 = vpack.c.bf16 %v1131_v0, %v1126_v63  ;;  %v1864_v63 = vld [vmem:[%s23908_s29 + $0x1e0] sm:$0xff] }
 0x1a5   :  { %12903 = vmatpush3.bf16.msra.mxu1 %v12902_v14  ;;  %v12922_v14 = vpack.c.bf16 %v811_v37, %v806_v7  ;;  %v1854_v7 = vld [vmem:[%s23908_s29 + $0x190] sm:$0xff]  ;;  %v1855_v37 = vld [vmem:[%s23908_s29 + $0x198] sm:$0xff] }
 0x1a6   :  { %12935 = vmatpush3.bf16.msra.mxu0 %v12934_v15  ;;  %12905 = vmatprep.subr.bf16.mxu1 %v12904_v22  ;;  %v12954_v15 = vpack.c.bf16 %v971_v10, %v966_v8  ;;  %v1056_v22 = vld [vmem:[%s23907_s0 + $0xa20] sm:$0xff]  ;;  %v17408_v8 = vpack.c.bf16 %v1855_v37, %v1854_v7  ;;  %v1838_v10 = vld [vmem:[%s23908_s29 + $0x110] sm:$0xff]  ;;  %v1849_v37 = vld [vmem:[%s23908_s29 + $0x168] sm:$0xff] }
 0x1a7   :  { %12937 = vmatprep.subr.bf16.mxu0 %v12936_v21  ;;  %v1805_v21 = vld [vmem:[%s23908_s29 + $0x8] sm:$0xff]  ;;  %v12957_v23 = vpack.c.bf16 %v1061_v16, %v1056_v22  ;;  %v1840_v16 = vld [vmem:[%s23908_s29 + $0x120] sm:$0xff] }
 0x1a8   :  { %v1848_v7 = vld [vmem:[%s23908_s29 + $0x160] sm:$0xff] }
 0x1a9   :  { %12907 = vmatpush3.bf16.msra.mxu1 %v12906_v29  ;;  %v17287_v29 = vpack.c.bf16 %v1805_v21, %v1804_v18  ;;  %v1841_v18 = vld [vmem:[%s23908_s29 + $0x128] sm:$0xff]  ;;  %v1859_v21 = vld [vmem:[%s23908_s29 + $0x1b8] sm:$0xff] }
 0x1aa   :  { %12939 = vmatpush3.bf16.msra.mxu0 %v12938_v31  ;;  %12909 = vmatprep.subr.bf16.mxu1 %v12908_v32  ;;  %v17290_v31 = vpack.c.bf16 %v1823_v25, %v1822_v24  ;;  %v1806_v32 = vld [vmem:[%s23908_s29 + $0x10] sm:$0xff] }
 0x1ab   :  { %12941 = vmatprep.subr.bf16.mxu0 %v12940_v36  ;;  %v1076_v36 = vld [vmem:[%s23907_s0 + $0xac0] sm:$0xff]  ;;  %v17315_v38 = vpack.c.bf16 %v1807_v33, %v1806_v32  ;;  %v1842_v25 = vld [vmem:[%s23908_s29 + $0x130] sm:$0xff]  ;;  %v1829_v33 = vld [vmem:[%s23908_s29 + $0xc8] sm:$0xff] }
 0x1ac   :  { %v17454_v28 = vpack.c.bf16 %v1843_v27, %v1842_v25  ;;  %v1828_v32 = vld [vmem:[%s23908_s29 + $0xc0] sm:$0xff] }
 0x1ad   :  { %12911 = vmatpush3.bf16.msra.mxu1 %v12910_v43  ;;  %v1826_v43 = vld [vmem:[%s23908_s29 + $0xb0] sm:$0xff] }
 0x1ae   :  { %12943 = vmatpush3.bf16.msra.mxu0 %v12942_v44  ;;  %12913 = vmatprep.subr.bf16.mxu1 %v12912_v45  ;;  %v1827_v44 = vld [vmem:[%s23908_s29 + $0xb8] sm:$0xff]  ;;  %v1086_v45 = vld [vmem:[%s23907_s0 + $0xb10] sm:$0xff] }
 0x1af   :  { %12945 = vmatprep.subr.bf16.mxu0 %v12944_v50  ;;  %v17343_v49 = vpack.c.bf16 %v1827_v44, %v1826_v43  ;;  %v1810_v50 = vld [vmem:[%s23908_s29 + $0x30] sm:$0xff]  ;;  %v12966_v51 = vpack.c.bf16 %v1091_v46, %v1086_v45  ;;  %v1845_v43 = vld [vmem:[%s23908_s29 + $0x148] sm:$0xff]  ;;  %v1831_v46 = vld [vmem:[%s23908_s29 + $0xd8] sm:$0xff] }
 0x1b0   :  { %v17359_v56 = vpack.c.bf16 %v1811_v20, %v1810_v50  ;;  %v1830_v45 = vld [vmem:[%s23908_s29 + $0xd0] sm:$0xff] }
 0x1b1   :  { %12915 = vmatpush3.bf16.msra.mxu1 %v12914_v57  ;;  %v12969_v57 = vpack.c.bf16 %v1101_v53, %v1096_v52  ;;  %v1862_v50 = vld [vmem:[%s23908_s29 + $0x1d0] sm:$0xff]  ;;  %v17503_v20 = vpack.c.bf16 %v1831_v46, %v1830_v45  ;;  %v1815_v53 = vld [vmem:[%s23908_s29 + $0x58] sm:$0xff] }
 0x1b2   :  { %12947 = vmatpush3.bf16.msra.mxu0 %v12946_v58  ;;  %12917 = vmatprep.subr.bf16.mxu1 %v12916_v59  ;;  %v1106_v58 = vld [vmem:[%s23907_s0 + $0xbb0] sm:$0xff]  ;;  %v1111_v59 = vld [vmem:[%s23907_s0 + $0xbd8] sm:$0xff] }
 0x1b3   :  { %12949 = vmatprep.subr.bf16.mxu0 %v12948_v62  ;;  %v12972_v61 = vpack.c.bf16 %v1111_v59, %v1106_v58  ;;  %v12975_v62 = vpack.c.bf16 %v1121_v30, %v1116_v11  ;;  %v1814_v52 = vld [vmem:[%s23908_s29 + $0x50] sm:$0xff]  ;;  %v1832_v30 = vld [vmem:[%s23908_s29 + $0xe0] sm:$0xff] }
 0x1b4   :  { %v17516_v58 = vpack.c.bf16 %v1815_v53, %v1814_v52  ;;  %v1846_v59 = vld [vmem:[%s23908_s29 + $0x150] sm:$0xff] }
 0x1b5   :  { %12919 = vmatpush3.bf16.msra.mxu1 %v12918_v4  ;;  %v17391_v4 = vpack.c.bf16 %v1853_v2, %v1852_v1  ;;  %v1865_v1 = vld [vmem:[%s23908_s29 + $0x1e8] sm:$0xff]  ;;  %v1816_v2 = vld [vmem:[%s23908_s29 + $0x60] sm:$0xff] }
 0x1b6   :  { %12951 = vmatpush3.bf16.msra.mxu0 %v12950_v5  ;;  %12921 = vmatprep.subr.bf16.mxu1 %v12920_v6  ;;  %v1836_v5 = vld [vmem:[%s23908_s29 + $0x100] sm:$0xff]  ;;  %v1837_v6 = vld [vmem:[%s23908_s29 + $0x108] sm:$0xff] }
 0x1b7   :  { %12953 = vmatprep.subr.bf16.mxu0 %v12952_v26  ;;  %v17405_v26 = vpack.c.bf16 %v1837_v6, %v1836_v5  ;;  %v17550_v5 = vpack.c.bf16 %v1865_v1, %v1864_v63 }
 0x1b9   :  { %12923 = vmatpush3.bf16.msra.mxu1 %v12922_v14  ;;  %v1857_v14 = vld [vmem:[%s23908_s29 + $0x1a8] sm:$0xff] }
 0x1ba   :  { %12955 = vmatpush3.bf16.msra.mxu0 %v12954_v15  ;;  %12956 = vmatprep.subr.bf16.mxu1 %v23871_v48  ;;  %v17424_v15 = vpack.c.bf16 %v1839_v12, %v1838_v10  ;;  %v17427_v22 = vpack.c.bf16 %v1857_v14, %v1856_v13  ;;  %v17561_v10 = vpack.c.bf16 %v1849_v37, %v1848_v7  ;;  %v1834_v12 = vld [vmem:[%s23908_s29 + $0xf0] sm:$0xff]  ;;  %v1835_v13 = vld [vmem:[%s23908_s29 + $0xf8] sm:$0xff] }
 0x1bb   :  { %12981 = vmatprep.subr.bf16.mxu0 %v17265_v17  ;;  %v1866_v14 = vld [vmem:[%s23908_s29 + $0x1f0] sm:$0xff] }
 0x1bc   :  { %1623 = vmatmul.mubr.f32.vlgmr.msra.gmra.mrb[6].mxu1 %v16497_v55  ;;  %v1825_v55 = vld [vmem:[%s23908_s29 + $0xa8] sm:$0xff] }
 0x1bd   :  { %1693 = vmatmul.mubr.f32.vlgmr.msra.gmra.mrb[6].mxu0 %v16897_v9  ;;  %12958 = vmatpush3.bf16.msra.mxu1 %v12957_v23  ;;  %v1081_v9 = vld [vmem:[%s23907_s0 + $0xae8] sm:$0xff]  ;;  %v17318_v39 = vpack.c.bf16 %v1825_v55, %v1824_v35  ;;  %v17442_v23 = vpack.c.bf16 %v1841_v18, %v1840_v16  ;;  %v17467_v35 = vpack.c.bf16 %v1829_v33, %v1828_v32  ;;  %v1867_v18 = vld [vmem:[%s23908_s29 + $0x1f8] sm:$0xff]  ;;  %v1850_v32 = vld [vmem:[%s23908_s29 + $0x170] sm:$0xff]  ;;  %s23912_s0 = sld [smem:[#allocation24_spill]] }
 0x1be   :  { %12959 = vmatprep.subr.bf16.mxu1 %v23871_v48  ;;  %11819 = vmatprep.mubr.msk.f32.mxu1 %vm15304_vm1, %v23873_v19  ;;  %v12963_v42 = vpack.c.bf16 %v1081_v9, %v1076_v36  ;;  %v1861_v55 = vld [vmem:[%s23908_s29 + $0x1c8] sm:$0xff]  ;;  %v1812_v36 = vld [vmem:[%s23908_s29 + $0x40] sm:$0xff]  ;;  %v17575_v16 = vpack.c.bf16 %v1835_v13, %v1834_v12  ;;  %v17586_v25 = vpack.c.bf16 %v1867_v18, %v1866_v14  ;;  %v1851_v33 = vld [vmem:[%s23908_s29 + $0x178] sm:$0xff] }
 0x1bf   :  { %12983 = vmatpush3.bf16.msra.mxu0 %v17287_v29  ;;  %v1813_v9 = vld [vmem:[%s23908_s29 + $0x48] sm:$0xff] }
 0x1c0   :  { %12985 = vmatprep.subr.bf16.mxu0 %v17290_v31  ;;  %v17480_v41 = vpack.c.bf16 %v1813_v9, %v1812_v36 }
 0x1c1   :  { %12961 = vmatpush3.bf16.msra.mxu1 %v12960_v34  ;;  %v1860_v34 = vld [vmem:[%s23908_s29 + $0x1c0] sm:$0xff] }
 0x1c2   :  { %12962 = vmatprep.subr.bf16.mxu1 %v23871_v48  ;;  %v17478_v40 = vpack.c.bf16 %v1861_v55, %v1860_v34  ;;  %v17597_v34 = vpack.c.bf16 %v1851_v33, %v1850_v32  ;;  %v1869_v32 = vld [vmem:[%s23908_s29 + $0x208] sm:$0xff] }
 0x1c3   :  { %12987 = vmatpush3.bf16.msra.mxu0 %v17315_v38 }
 0x1c4   :  { %12989 = vmatprep.subr.bf16.mxu0 %v17318_v39 }
 0x1c5   :  { %12964 = vmatpush3.bf16.msra.mxu1 %v12963_v42  ;;  %v1844_v42 = vld [vmem:[%s23908_s29 + $0x140] sm:$0xff] }
 0x1c6   :  { %12965 = vmatprep.subr.bf16.mxu1 %v23871_v48  ;;  %v17489_v44 = vpack.c.bf16 %v1845_v43, %v1844_v42 }
 0x1c7   :  { %12991 = vmatpush3.bf16.msra.mxu0 %v17340_v47 }
 0x1c8   :  { %12993 = vmatprep.subr.bf16.mxu0 %v17343_v49 }
 0x1c9   :  { %12967 = vmatpush3.bf16.msra.mxu1 %v12966_v51  ;;  %v1863_v51 = vld [vmem:[%s23908_s29 + $0x1d8] sm:$0xff] }
 0x1ca   :  { %12968 = vmatprep.subr.bf16.mxu1 %v23871_v48 }
 0x1cb   :  { %12995 = vmatpush3.bf16.msra.mxu0 %v17359_v56 }
 0x1cc   :  { %12997 = vmatprep.subr.bf16.mxu0 %v17467_v35 }
 0x1cd   :  { %12970 = vmatpush3.bf16.msra.mxu1 %v12969_v57  ;;  %v17514_v57 = vpack.c.bf16 %v1863_v51, %v1862_v50 }
 0x1ce   :  { %12971 = vmatprep.subr.bf16.mxu1 %v23871_v48 }
 0x1cf   :  { %12999 = vmatpush3.bf16.msra.mxu0 %v17480_v41 }
 0x1d0   :  { %13001 = vmatprep.subr.bf16.mxu0 %v17503_v20 }
 0x1d1   :  { %12973 = vmatpush3.bf16.msra.mxu1 %v12972_v61  ;;  %v1847_v61 = vld [vmem:[%s23908_s29 + $0x158] sm:$0xff] }
 0x1d2   :  { %12974 = vmatprep.subr.bf16.mxu1 %v23871_v48  ;;  %v17525_v11 = vpack.c.bf16 %v1847_v61, %v1846_v59 }
 0x1d3   :  { %13003 = vmatpush3.bf16.msra.mxu0 %v17516_v58 }
 0x1d5   :  { %12976 = vmatpush3.bf16.msra.mxu1 %v12975_v62  ;;  %v1833_v62 = vld [vmem:[%s23908_s29 + $0xe8] sm:$0xff] }
 0x1d6   :  { %12977 = vmatprep.subr.bf16.mxu1 %v23871_v48  ;;  %v17539_v0 = vpack.c.bf16 %v1833_v62, %v1832_v30 }
 0x1d8   :  { %13005 = vmatprep.subr.bf16.mxu0 %v17539_v0 }
 0x1d9   :  { %12979 = vmatpush3.bf16.msra.mxu1 %v12978_v3  ;;  %v1817_v3 = vld [vmem:[%s23908_s29 + $0x68] sm:$0xff] }
 0x1da   :  { %13013 = vmatprep.subr.bf16.mxu1 %v17391_v4  ;;  %v17552_v6 = vpack.c.bf16 %v1817_v3, %v1816_v2 }
 0x1dc   :  { %11820 = vmatmul.mubr.f32.vlgmr.msra.gmra.mrb[8].mxu1 %v17091_v54  ;;  %v1858_v54 = vld [vmem:[%s23908_s29 + $0x1b0] sm:$0xff]  ;;  %13007 = vmatpush3.bf16.msra.mxu0 %v17552_v6 }
 0x1dd   :  { %13015 = vmatpush3.bf16.msra.mxu1 %v17405_v26  ;;  %v17445_v24 = vpack.c.bf16 %v1859_v21, %v1858_v54  ;;  %v1818_v54 = vld [vmem:[%s23908_s29 + $0x70] sm:$0xff]  ;;  %v1819_v21 = vld [vmem:[%s23908_s29 + $0x78] sm:$0xff]  ;;  %13009 = vmatprep.subr.bf16.mxu0 %v17575_v16 }
 0x1de   :  { %13017 = vmatprep.subr.bf16.mxu1 %v17408_v8  ;;  %v17588_v27 = vpack.c.bf16 %v1819_v21, %v1818_v54  ;;  %v1868_v21 = vld [vmem:[%s23908_s29 + $0x200] sm:$0xff] }
 0x1e0   :  { %13011 = vmatpush3.bf16.msra.mxu0 %v17588_v27 }
 0x1e1   :  { %13019 = vmatpush3.bf16.msra.mxu1 %v17424_v15  ;;  %13044 = vmatprep.subr.bf16.mxu0 %v23871_v48 }
 0x1e2   :  { %13021 = vmatprep.subr.bf16.mxu1 %v17427_v22 }
 0x1e5   :  { %13023 = vmatpush3.bf16.msra.mxu1 %v17442_v23 }
 0x1e6   :  { %13025 = vmatprep.subr.bf16.mxu1 %v17445_v24 }
 0x1e9   :  { %13027 = vmatpush3.bf16.msra.mxu1 %v17454_v28 }
 0x1ea   :  { %13029 = vmatprep.subr.bf16.mxu1 %v17478_v40 }
 0x1ed   :  { %13031 = vmatpush3.bf16.msra.mxu1 %v17489_v44 }
 0x1ee   :  { %13033 = vmatprep.subr.bf16.mxu1 %v17514_v57 }
 0x1f1   :  { %13035 = vmatpush3.bf16.msra.mxu1 %v17525_v11 }
 0x1f2   :  { %13037 = vmatprep.subr.bf16.mxu1 %v17550_v5 }
 0x1f5   :  { %13039 = vmatpush3.bf16.msra.mxu1 %v17561_v10 }
 0x1f6   :  { %13041 = vmatprep.subr.bf16.mxu1 %v17586_v25 }
 0x1f9   :  { %13043 = vmatpush3.bf16.msra.mxu1 %v17597_v34 }
 0x26f   :  { %v17603_v55 = vpop.f32.mrb[4].mxu1  ;;  %v17605_v36 = vpop.f32.mrb[4].mxu0 }
 0x270   :  { %v1769_v9 = vsel %vm1768_vm2, %v17603_v55, 0.0  ;;  %v1783_v42 = vsel %vm1768_vm2, %v17605_v36, 0.0  ;;  %v17611_v43 = vpop.f32.mrb[5].mxu1  ;;  %v17613_v45 = vpop.f32.mrb[5].mxu0 }
 0x271   :  { %v1770_v46 = vrot.slane %v1769_v9, 4  ;;  %v1784_v50 = vrot.slane %v1783_v42, 4  ;;  %v1776_v51 = vsel %vm1768_vm2, %v17611_v43, 0.0  ;;  %v1790_v52 = vsel %vm1768_vm2, %v17613_v45, 0.0 }
 0x272   :  { %v1777_v53 = vrot.slane %v1776_v51, 4  ;;  %v1791_v59 = vrot.slane %v1790_v52, 4 }
 0x273   :  { %v1771_v61 = vadd.f32 %v1770_v46, %v1769_v9  ;;  %v1785_v30 = vadd.f32 %v1784_v50, %v1783_v42  ;;  %v17625_v50 = vpack.c.bf16 %v1869_v32, %v1868_v21 }
 0x274   :  { %v1778_v62 = vadd.f32 %v1777_v53, %v1776_v51  ;;  %v1792_v63 = vadd.f32 %v1791_v59, %v1790_v52  ;;  %v1870_v53 = vld [vmem:[%s23908_s29 + $0x210] sm:$0xff]  ;;  %v1871_v59 = vld [vmem:[%s23908_s29 + $0x218] sm:$0xff] }
 0x275   :  { %v1772_v1 = vrot.slane %v1771_v61, 2  ;;  %v1786_v2 = vrot.slane %v1785_v30, 2 }
 0x276   :  { %v1779_v3 = vrot.slane %v1778_v62, 2  ;;  %v1793_v7 = vrot.slane %v1792_v63, 2 }
 0x277   :  { %v1773_v37 = vadd.f32 %v1772_v1, %v1771_v61  ;;  %v1787_v12 = vadd.f32 %v1786_v2, %v1785_v30  ;;  %v17634_v61 = vpack.c.bf16 %v1871_v59, %v1870_v53  ;;  %v1872_v30 = vld [vmem:[%s23908_s29 + $0x220] sm:$0xff]  ;;  %v1874_v1 = vld [vmem:[%s23908_s29 + $0x230] sm:$0xff]  ;;  %v1875_v2 = vld [vmem:[%s23908_s29 + $0x238] sm:$0xff] }
 0x278   :  { %v1780_v13 = vadd.f32 %v1779_v3, %v1778_v62  ;;  %v1794_v14 = vadd.f32 %v1793_v7, %v1792_v63  ;;  %v1873_v62 = vld [vmem:[%s23908_s29 + $0x228] sm:$0xff]  ;;  %v17657_v3 = vpack.c.bf16 %v1875_v2, %v1874_v1  ;;  %v1876_v7 = vld [vmem:[%s23908_s29 + $0x240] sm:$0xff]  ;;  %v1882_v59 = vld [vmem:[%s23908_s29 + $0x270] sm:$0xff] }
 0x279   :  { %v1774_v18 = vrot.slane %v1773_v37, 1  ;;  %v1788_v54 = vrot.slane %v1787_v12, 1  ;;  %v17647_v63 = vpack.c.bf16 %v1873_v62, %v1872_v30  ;;  %v1883_v30 = vld [vmem:[%s23908_s29 + $0x278] sm:$0xff] }
 0x27a   :  { %v1781_v33 = vrot.slane %v1780_v13, 1  ;;  %v1795_v9 = vrot.slane %v1794_v14, 1  ;;  %v17697_v62 = vpack.c.bf16 %v1883_v30, %v1882_v59 }
 0x27b   :  { %v1775_v51 = vadd.f32 %v1774_v18, %v1773_v37  ;;  %v1789_v52 = vadd.f32 %v1788_v54, %v1787_v12  ;;  %v1877_v37 = vld [vmem:[%s23908_s29 + $0x248] sm:$0xff] }
 0x27c   :  { %v1782_v42 = vadd.f32 %v1781_v33, %v1780_v13  ;;  %v1796_v46 = vadd.f32 %v1795_v9, %v1794_v14  ;;  %v17667_v12 = vpack.c.bf16 %v1877_v37, %v1876_v7  ;;  %v1878_v13 = vld [vmem:[%s23908_s29 + $0x250] sm:$0xff]  ;;  %v1879_v14 = vld [vmem:[%s23908_s29 + $0x258] sm:$0xff] }
 0x27d   :  { %v17677_v32 = vpack.c.bf16 %v1879_v14, %v1878_v13 }
 0x27e   :  { %1948 = vmatprep.mubr.f32.mxu0 %v1782_v42  ;;  %2018 = vmatprep.mubr.f32.mxu1 %v1796_v46  ;;  %v1880_v42 = vld [vmem:[%s23908_s29 + $0x260] sm:$0xff]  ;;  %v1881_v46 = vld [vmem:[%s23908_s29 + $0x268] sm:$0xff] }
 0x27f   :  { %1949 = vmatmul.mubr.f32.vlgmr.msra.gmra.mrb[8].mxu0 %v1775_v51  ;;  %2019 = vmatmul.mubr.f32.vlgmr.msra.gmra.mrb[10].mxu1 %v1789_v52  ;;  %v17687_v53 = vpack.c.bf16 %v1881_v46, %v1880_v42 }
 0x280   :  { %13046 = vmatpush3.bf16.msra.mxu0 %v17625_v50  ;;  %11854 = vmatprep.mubr.msk.f32.mxu0 %vm15304_vm1, %v23873_v19 }
 0x281   :  { %13047 = vmatprep.subr.bf16.mxu0 %v23871_v48  ;;  %2167 = vmatprep.mubr.f32.mxu1 %v23873_v19 }
 0x284   :  { %13049 = vmatpush3.bf16.msra.mxu0 %v17634_v61 }
 0x285   :  { %13050 = vmatprep.subr.bf16.mxu0 %v23871_v48 }
 0x288   :  { %13052 = vmatpush3.bf16.msra.mxu0 %v17647_v63 }
 0x289   :  { %13053 = vmatprep.subr.bf16.mxu0 %v23871_v48 }
 0x28c   :  { %13055 = vmatpush3.bf16.msra.mxu0 %v17657_v3 }
 0x28d   :  { %13056 = vmatprep.subr.bf16.mxu0 %v23871_v48 }
 0x28f   :  { %v10612_v18 = vpop.f32.mrb[6].mxu1 }
 0x290   :  { %v10647_v54 = vpop.f32.mrb[6].mxu0  ;;  %v10613_v21 = vpop.f32.mrb[7].mxu1  ;;  %13058 = vmatpush3.bf16.msra.mxu0 %v17667_v12 }
 0x291   :  { %v10614_v33 = vadd.f32 %v10613_v21, %v10612_v18  ;;  %v10648_v9 = vpop.f32.mrb[7].mxu0  ;;  %13059 = vmatprep.subr.bf16.mxu0 %v23871_v48 }
 0x292   :  { %v10649_v51 = vadd.f32 %v10648_v9, %v10647_v54 }
 0x294   :  { %v1695_v52 = vadd.f32 %v10649_v51, %v10614_v33  ;;  %13061 = vmatpush3.bf16.msra.mxu0 %v17677_v32 }
 0x295   :  { %13062 = vmatprep.subr.bf16.mxu0 %v23871_v48 }
 0x298   :  { %13064 = vmatpush3.bf16.msra.mxu0 %v17687_v53 }
 0x299   :  { %13065 = vmatprep.subr.bf16.mxu0 %v23871_v48 }
 0x29c   :  { %13067 = vmatpush3.bf16.msra.mxu0 %v17697_v62 }
 0x29d   :  { %13101 = vmatprep.subr.bf16.mxu0 %v17391_v4  ;;  %v17719_v4 = vld [vmem:[%s23909_s3 + $0x8] sm:$0xff] }
 0x29e   :  { %2103 = vmatprep.subr.mxu1 %v17719_v4 }
 0x2af   :  { %v1764_v1 = vpop.f32.mrb[8].mxu1 }
 0x2b0   :  { %v17702_v2 = vadd.f32 %v1764_v1, %v1695_v52  ;;  %v11821_v7 = vpop.f32.mrb[9].mxu1 }
 0x2b2   :  { %v1797_v37 = vsel %vm1768_vm2, %v17702_v2, 0.0 }
 0x2b3   :  { %v1798_v13 = vrot.slane %v1797_v37, 4 }
 0x2b5   :  { %v1799_v14 = vadd.f32 %v1798_v13, %v1797_v37 }
 0x2b7   :  { %v1800_v18 = vrot.slane %v1799_v14, 2 }
 0x2b9   :  { %v1801_v54 = vadd.f32 %v1800_v18, %v1799_v14 }
 0x2bb   :  { %v1802_v21 = vrot.slane %v1801_v54, 1 }
 0x2bd   :  { %v1803_v33 = vadd.f32 %v1802_v21, %v1801_v54 }
 0x2bf   :  { %11855 = vmatmul.mubr.f32.vlgmr.msra.gmra.mrb[10].mxu0 %v1803_v33 }
 0x2c0   :  { %13103 = vmatpush3.bf16.msra.mxu0 %v17405_v26  ;;  %v17724_v26 = vld [vmem:[%s23909_s3] sm:$0xff] }
 0x2c1   :  { %13105 = vmatprep.subr.bf16.mxu0 %v17408_v8  ;;  %2104 = vmatpush1.msra.mxu1 %v17724_v26  ;;  %v17737_v8 = vld [vmem:[%s23909_s3 + $0x18] sm:$0xff] }
 0x2c2   :  { %2174 = vmatprep.subr.mxu1 %v17737_v8 }
 0x2c4   :  { %13107 = vmatpush3.bf16.msra.mxu0 %v17424_v15 }
 0x2c5   :  { %13109 = vmatprep.subr.bf16.mxu0 %v17427_v22 }
 0x2c8   :  { %13111 = vmatpush3.bf16.msra.mxu0 %v17442_v23 }
 0x2c9   :  { %13113 = vmatprep.subr.bf16.mxu0 %v17445_v24 }
 0x2cc   :  { %13115 = vmatpush3.bf16.msra.mxu0 %v17454_v28 }
 0x2cd   :  { %13117 = vmatprep.subr.bf16.mxu0 %v17478_v40 }
 0x2d0   :  { %13119 = vmatpush3.bf16.msra.mxu0 %v17489_v44 }
 0x2d1   :  { %13121 = vmatprep.subr.bf16.mxu0 %v17514_v57 }
 0x2d4   :  { %13123 = vmatpush3.bf16.msra.mxu0 %v17525_v11 }
 0x2d5   :  { %13125 = vmatprep.subr.bf16.mxu0 %v17550_v5 }
 0x2d8   :  { %13127 = vmatpush3.bf16.msra.mxu0 %v17561_v10  ;;  %v17743_v10 = vld [vmem:[%s23909_s3 + $0x10] sm:$0xff] }
 0x2d9   :  { %13129 = vmatprep.subr.bf16.mxu0 %v17586_v25  ;;  %v17752_v25 = vld [vmem:[%s23909_s3 + $0x20] sm:$0xff] }
 0x2dc   :  { %13131 = vmatpush3.bf16.msra.mxu0 %v17597_v34 }
 0x2dd   :  { %2596 = vmatprep.subr.mxu0 %v17719_v4 }
 0x352   :  { %v10699_v15 = vpop.f32.mrb[8].mxu0  ;;  %v10734_v22 = vpop.f32.mrb[10].mxu1 }
 0x353   :  { %v10700_v23 = vpop.f32.mrb[9].mxu0  ;;  %v10735_v24 = vpop.f32.mrb[11].mxu1 }
 0x354   :  { %v10701_v28 = vadd.f32 %v10700_v23, %v10699_v15  ;;  %v10736_v40 = vadd.f32 %v10735_v24, %v10734_v22 }
 0x356   :  { %v2021_v44 = vadd.f32 %v10736_v40, %v10701_v28 }
 0x392   :  { %v2090_v57 = vpop.f32.mrb[10].mxu0 }
 0x393   :  { %v2091_v11 = vadd.f32 %v2090_v57, %v2021_v44  ;;  %v11856_v5 = vpop.f32.mrb[11].mxu0 }
 0x395   :  { %10500 = vmatmul.mubr.msk.f32.vlgmr.msra.gmra.mrb[12].mxu1 %vm2099_vm3, %v2091_v11 }
 0x396   :  { %2175 = vmatpush1.msra.mxu1 %v17743_v10  ;;  %2238 = vmatprep.mubr.f32.mxu1 %v23873_v19 }
 0x397   :  { %11857 = vmatprep.subr.mxu1 %v23873_v19 }
 0x399   :  { %10501 = vmatmul.mubr.msk.f32.vlgmr.msra.gmra.mrb[14].mxu1 %vm2099_vm3, %v2091_v11 }
 0x39a   :  { %11858 = vmatpush3.msra.mxu1 %v17752_v25  ;;  %11859 = vmatprep.mubr.msk.f32.mxu1 %vm15304_vm1, %v23873_v19 }
 0x39b   :  { %13069 = vmatprep.subr.bf16.mxu1 %v17265_v17  ;;  %v17777_v17 = vsub.s32 0, %v15543_v60 }
 0x39d   :  { %11860 = vmatmul.mubr.msk.f32.vlgmr.msra.gmra.mrb[16].mxu1 %vm2099_vm3, %v2091_v11 }
 0x39e   :  { %13071 = vmatpush3.bf16.msra.mxu1 %v17287_v29 }
 0x39f   :  { %13073 = vmatprep.subr.bf16.mxu1 %v17290_v31 }
 0x3a2   :  { %13075 = vmatpush3.bf16.msra.mxu1 %v17315_v38 }
 0x3a3   :  { %13077 = vmatprep.subr.bf16.mxu1 %v17318_v39 }
 0x3a6   :  { %13079 = vmatpush3.bf16.msra.mxu1 %v17340_v47 }
 0x3a7   :  { %13081 = vmatprep.subr.bf16.mxu1 %v17343_v49 }
 0x3aa   :  { %13083 = vmatpush3.bf16.msra.mxu1 %v17359_v56 }
 0x3ab   :  { %13085 = vmatprep.subr.bf16.mxu1 %v17467_v35 }
 0x3ae   :  { %13087 = vmatpush3.bf16.msra.mxu1 %v17480_v41 }
 0x3af   :  { %13089 = vmatprep.subr.bf16.mxu1 %v17503_v20 }
 0x3b2   :  { %13091 = vmatpush3.bf16.msra.mxu1 %v17516_v58 }
 0x3b3   :  { %13093 = vmatprep.subr.bf16.mxu1 %v17539_v0 }
 0x3b6   :  { %13095 = vmatpush3.bf16.msra.mxu1 %v17552_v6 }
 0x3b7   :  { %13097 = vmatprep.subr.bf16.mxu1 %v17575_v16 }
 0x3ba   :  { %13099 = vmatpush3.bf16.msra.mxu1 %v17588_v27 }
 0x3bb   :  { %13132 = vmatprep.subr.bf16.mxu1 %v23871_v48 }
 0x468   :  { %v2169_v29 = vpop.f32.mrb[12].mxu1 }
 0x469   :  { %v2318_v31 = vrot.slane %v2169_v29, %v17777_v17  ;;  %v2171_v38 = vpop.f32.mrb[13].mxu1 }
 0x46a   :  { %v2322_v39 = vrot.slane %v2171_v38, %v17777_v17 }
 0x46b   :  { %v17782_v47 = vsub.f32 %v17603_v55, %v2318_v31 }
 0x46c   :  { %v17785_v49 = vsub.f32 %v17611_v43, %v2322_v39  ;;  %v2240_v56 = vpop.f32.mrb[14].mxu1 }
 0x46d   :  { %v2340_v35 = vmul.f32 %v17782_v47, %v17782_v47  ;;  %v2326_v41 = vrot.slane %v2240_v56, %v17777_v17  ;;  %v2242_v60 = vpop.f32.mrb[15].mxu1 }
 0x46e   :  { %v2341_v20 = vmul.f32 %v17785_v49, %v17785_v49  ;;  %v2330_v58 = vrot.slane %v2242_v60, %v17777_v17  ;;  %v3102_v60 = vld [vmem:[%s23910_s27 + $0x90] sm:$0xff] }
 0x46f   :  { %v2345_v0 = vsel %vm1768_vm2, %v2340_v35, 0.0  ;;  %v17795_v6 = vsub.f32 %v17605_v36, %v2326_v41  ;;  %v3091_v35 = vld [vmem:[%s23910_s27 + $0x38] sm:$0xff]  ;;  %v3097_v41 = vld [vmem:[%s23910_s27 + $0x68] sm:$0xff] }
 0x470   :  { %v2346_v16 = vrot.slane %v2345_v0, 4  ;;  %v2352_v27 = vsel %vm1768_vm2, %v2341_v20, 0.0  ;;  %v17799_v34 = vsub.f32 %v17613_v45, %v2330_v58  ;;  %v2311_v55 = vpop.f32.mrb[16].mxu1  ;;  %v13320_v20 = vpack.c.bf16 %v3102_v60, %v3097_v41  ;;  %v3096_v58 = vld [vmem:[%s23910_s27 + $0x60] sm:$0xff]  ;;  %v3181_v60 = vld [vmem:[%s23910_s27 + $0x308] sm:$0xff] }
 0x471   :  { %v2353_v43 = vrot.slane %v2352_v27, 4  ;;  %v2342_v9 = vmul.f32 %v17795_v6, %v17795_v6  ;;  %v11861_v42 = vpop.f32.mrb[17].mxu1  ;;  %v2334_v33 = vrot.slane %v2311_v55, %v17777_v17  ;;  %v3112_v55 = vld [vmem:[%s23910_s27 + $0xe0] sm:$0xff] }
 0x472   :  { %v2347_v46 = vadd.f32 %v2346_v16, %v2345_v0  ;;  %v2343_v51 = vmul.f32 %v17799_v34, %v17799_v34  ;;  %v3101_v0 = vld [vmem:[%s23910_s27 + $0x88] sm:$0xff]  ;;  %v3111_v42 = vld [vmem:[%s23910_s27 + $0xd8] sm:$0xff]  ;;  %v3176_v41 = vld [vmem:[%s23910_s27 + $0x2e0] sm:$0xff] }
 0x473   :  { %v2354_v52 = vadd.f32 %v2353_v43, %v2352_v27  ;;  %v2359_v36 = vsel %vm1768_vm2, %v2342_v9, 0.0  ;;  %v17809_v57 = vsub.f32 %v17702_v2, %v2334_v33  ;;  %v13322_v16 = vpack.c.bf16 %v3101_v0, %v3096_v58  ;;  %v3107_v27 = vld [vmem:[%s23910_s27 + $0xb8] sm:$0xff]  ;;  %v3106_v9 = vld [vmem:[%s23910_s27 + $0xb0] sm:$0xff]  ;;  %v3192_v0 = vld [vmem:[%s23910_s27 + $0x360] sm:$0xff] }
 0x474   :  { %v2348_v59 = vrot.slane %v2347_v46, 2  ;;  %v2360_v30 = vrot.slane %v2359_v36, 4  ;;  %v2366_v1 = vsel %vm1768_vm2, %v2343_v51, 0.0  ;;  %v13324_v43 = vpack.c.bf16 %v3112_v55, %v3107_v27  ;;  %v3117_v51 = vld [vmem:[%s23910_s27 + $0x108] sm:$0xff]  ;;  %v3187_v58 = vld [vmem:[%s23910_s27 + $0x338] sm:$0xff]  ;;  %v3186_v27 = vld [vmem:[%s23910_s27 + $0x330] sm:$0xff] }
 0x475   :  { %v2367_v7 = vrot.slane %v2366_v1, 4  ;;  %v2355_v45 = vrot.slane %v2354_v52, 2  ;;  %v2344_v31 = vmul.f32 %v17809_v57, %v17809_v57  ;;  %v3191_v55 = vld [vmem:[%s23910_s27 + $0x358] sm:$0xff] }
 0x476   :  { %v2361_v37 = vadd.f32 %v2360_v30, %v2359_v36  ;;  %v2349_v13 = vadd.f32 %v2348_v59, %v2347_v46  ;;  %v13326_v46 = vpack.c.bf16 %v3111_v42, %v3106_v9  ;;  %v3116_v59 = vld [vmem:[%s23910_s27 + $0x100] sm:$0xff]  ;;  %v3121_v30 = vld [vmem:[%s23910_s27 + $0x128] sm:$0xff] }
 0x477   :  { %v2368_v14 = vadd.f32 %v2367_v7, %v2366_v1  ;;  %v2356_v18 = vadd.f32 %v2355_v45, %v2354_v52  ;;  %v3122_v52 = vld [vmem:[%s23910_s27 + $0x130] sm:$0xff]  ;;  %v13330_v1 = vpack.c.bf16 %v3121_v30, %v3116_v59  ;;  %v3127_v7 = vld [vmem:[%s23910_s27 + $0x158] sm:$0xff]  ;;  %v3132_v45 = vld [vmem:[%s23910_s27 + $0x180] sm:$0xff] }
 0x478   :  { %v2362_v54 = vrot.slane %v2361_v37, 2  ;;  %v2350_v21 = vrot.slane %v2349_v13, 1  ;;  %v13328_v36 = vpack.c.bf16 %v3122_v52, %v3117_v51 }
 0x479   :  { %v2357_v15 = vrot.slane %v2356_v18, 1  ;;  %v2369_v22 = vrot.slane %v2368_v14, 2 }
 0x47a   :  { %v2363_v23 = vadd.f32 %v2362_v54, %v2361_v37  ;;  %v2351_v40 = vadd.f32 %v2350_v21, %v2349_v13  ;;  %v13332_v37 = vpack.c.bf16 %v3132_v45, %v3127_v7  ;;  %v3126_v13 = vld [vmem:[%s23910_s27 + $0x150] sm:$0xff]  ;;  %v3137_v54 = vld [vmem:[%s23910_s27 + $0x1a8] sm:$0xff] }
 0x47b   :  { %v2358_v24 = vadd.f32 %v2357_v15, %v2356_v18  ;;  %v2370_v28 = vadd.f32 %v2369_v22, %v2368_v14  ;;  %v3131_v14 = vld [vmem:[%s23910_s27 + $0x178] sm:$0xff]  ;;  %v3142_v21 = vld [vmem:[%s23910_s27 + $0x1d0] sm:$0xff]  ;;  %v3136_v15 = vld [vmem:[%s23910_s27 + $0x1a0] sm:$0xff] }
 0x47c   :  { %v2364_v44 = vrot.slane %v2363_v23, 1  ;;  %v13334_v18 = vpack.c.bf16 %v3131_v14, %v3126_v13  ;;  %v13336_v33 = vpack.c.bf16 %v3142_v21, %v3137_v54  ;;  %v3141_v22 = vld [vmem:[%s23910_s27 + $0x1c8] sm:$0xff] }
 0x47d   :  { %2445 = vmatprep.mubr.f32.mxu1 %v2358_v24  ;;  %v2371_v11 = vrot.slane %v2370_v28, 1  ;;  %v3147_v24 = vld [vmem:[%s23910_s27 + $0x1f8] sm:$0xff]  ;;  %v3085_v54 = vld [vmem:[%s23910_s27 + $0x8] sm:$0xff] }
 0x47e   :  { %2446 = vmatmul.mubr.f32.vlgmr.msra.gmra.mrb[18].mxu1 %v2351_v40  ;;  %v2365_v29 = vadd.f32 %v2364_v44, %v2363_v23  ;;  %v13338_v23 = vpack.c.bf16 %v3141_v22, %v3136_v15  ;;  %v3146_v44 = vld [vmem:[%s23910_s27 + $0x1f0] sm:$0xff]  ;;  %v3089_v21 = vld [vmem:[%s23910_s27 + $0x28] sm:$0xff] }
 0x47f   :  { %13134 = vmatpush3.bf16.msra.mxu1 %v17625_v50  ;;  %v2372_v5 = vadd.f32 %v2371_v11, %v2370_v28  ;;  %11894 = vmatprep.mubr.msk.f32.mxu1 %vm15304_vm1, %v23873_v19  ;;  %v2373_v50 = vsel %vm1768_vm2, %v2344_v31, 0.0  ;;  %v3152_v28 = vld [vmem:[%s23910_s27 + $0x220] sm:$0xff]  ;;  %v3151_v11 = vld [vmem:[%s23910_s27 + $0x218] sm:$0xff]  ;;  %v3162_v31 = vld [vmem:[%s23910_s27 + $0x270] sm:$0xff] }
 0x480   :  { %13135 = vmatprep.subr.bf16.mxu1 %v23871_v48  ;;  %v2374_v2 = vrot.slane %v2373_v50, 4  ;;  %v13340_v40 = vpack.c.bf16 %v3152_v28, %v3147_v24  ;;  %v3099_v24 = vld [vmem:[%s23910_s27 + $0x78] sm:$0xff]  ;;  %v3105_v28 = vld [vmem:[%s23910_s27 + $0xa8] sm:$0xff] }
 0x481   :  { %2515 = vmatprep.mubr.f32.mxu0 %v2372_v5  ;;  %v13342_v5 = vpack.c.bf16 %v3151_v11, %v3146_v44  ;;  %v3104_v11 = vld [vmem:[%s23910_s27 + $0xa0] sm:$0xff] }
 0x482   :  { %2516 = vmatmul.mubr.f32.vlgmr.msra.gmra.mrb[12].mxu0 %v2365_v29  ;;  %v2375_v38 = vadd.f32 %v2374_v2, %v2373_v50  ;;  %v3157_v29 = vld [vmem:[%s23910_s27 + $0x248] sm:$0xff]  ;;  %v3156_v2 = vld [vmem:[%s23910_s27 + $0x240] sm:$0xff] }
 0x483   :  { %13137 = vmatpush3.bf16.msra.mxu1 %v17634_v61  ;;  %2597 = vmatpush1.msra.mxu0 %v17724_v26  ;;  %v13344_v50 = vpack.c.bf16 %v3162_v31, %v3157_v29  ;;  %v3115_v29 = vld [vmem:[%s23910_s27 + $0xf8] sm:$0xff]  ;;  %v3120_v31 = vld [vmem:[%s23910_s27 + $0x120] sm:$0xff] }
 0x484   :  { %13138 = vmatprep.subr.bf16.mxu1 %v23871_v48  ;;  %2660 = vmatprep.mubr.f32.mxu0 %v23873_v19  ;;  %v2376_v61 = vrot.slane %v2375_v38, 2 }
 0x485   :  { %2667 = vmatprep.subr.mxu0 %v17737_v8 }
 0x486   :  { %v2377_v39 = vadd.f32 %v2376_v61, %v2375_v38  ;;  %v3161_v38 = vld [vmem:[%s23910_s27 + $0x268] sm:$0xff] }
 0x487   :  { %13140 = vmatpush3.bf16.msra.mxu1 %v17647_v63  ;;  %v13346_v61 = vpack.c.bf16 %v3161_v38, %v3156_v2  ;;  %v13168_v2 = vpack.c.bf16 %v3120_v31, %v3115_v29  ;;  %v3114_v38 = vld [vmem:[%s23910_s27 + $0xf0] sm:$0xff] }
 0x488   :  { %13141 = vmatprep.subr.bf16.mxu1 %v23871_v48  ;;  %v2378_v63 = vrot.slane %v2377_v39, 1 }
 0x48b   :  { %13143 = vmatpush3.bf16.msra.mxu1 %v17657_v3  ;;  %v2379_v3 = vadd.f32 %v2378_v63, %v2377_v39  ;;  %v3167_v39 = vld [vmem:[%s23910_s27 + $0x298] sm:$0xff]  ;;  %v3172_v63 = vld [vmem:[%s23910_s27 + $0x2c0] sm:$0xff] }
 0x48c   :  { %13144 = vmatprep.subr.bf16.mxu1 %v23871_v48 }
 0x48f   :  { %13146 = vmatpush3.bf16.msra.mxu1 %v17667_v12  ;;  %v3087_v12 = vld [vmem:[%s23910_s27 + $0x18] sm:$0xff] }
 0x490   :  { %13147 = vmatprep.subr.bf16.mxu1 %v23871_v48 }
 0x493   :  { %13149 = vmatpush3.bf16.msra.mxu1 %v17677_v32  ;;  %v3092_v32 = vld [vmem:[%s23910_s27 + $0x40] sm:$0xff] }
 0x494   :  { %13150 = vmatprep.subr.bf16.mxu1 %v23871_v48  ;;  %v13316_v56 = vpack.c.bf16 %v3092_v32, %v3087_v12  ;;  %v3166_v12 = vld [vmem:[%s23910_s27 + $0x290] sm:$0xff]  ;;  %v3171_v32 = vld [vmem:[%s23910_s27 + $0x2b8] sm:$0xff] }
 0x497   :  { %13152 = vmatpush3.bf16.msra.mxu1 %v17687_v53  ;;  %v3086_v53 = vld [vmem:[%s23910_s27 + $0x10] sm:$0xff] }
 0x498   :  { %13153 = vmatprep.subr.bf16.mxu1 %v23871_v48 }
 0x49b   :  { %13155 = vmatpush3.bf16.msra.mxu1 %v17697_v62  ;;  %v13318_v62 = vpack.c.bf16 %v3091_v35, %v3086_v53  ;;  %v3177_v53 = vld [vmem:[%s23910_s27 + $0x2e8] sm:$0xff]  ;;  %v3182_v35 = vld [vmem:[%s23910_s27 + $0x310] sm:$0xff] }
 0x49c   :  { %13317 = vmatprep.subr.bf16.mxu1 %v13316_v56  ;;  %v13350_v56 = vpack.c.bf16 %v3171_v32, %v3166_v12  ;;  %v3124_v32 = vld [vmem:[%s23910_s27 + $0x140] sm:$0xff] }
 0x49e   :  { %11895 = vmatmul.mubr.f32.vlgmr.msra.gmra.mrb[20].mxu1 %v2379_v3  ;;  %v13348_v3 = vpack.c.bf16 %v3172_v63, %v3167_v39  ;;  %v3125_v39 = vld [vmem:[%s23910_s27 + $0x148] sm:$0xff]  ;;  %v3130_v63 = vld [vmem:[%s23910_s27 + $0x170] sm:$0xff] }
 0x49f   :  { %13319 = vmatpush1.bf16.msra.mxu1 %v13318_v62  ;;  %v13352_v62 = vpack.c.bf16 %v3182_v35, %v3177_v53  ;;  %v13172_v12 = vpack.c.bf16 %v3130_v63, %v3125_v39  ;;  %v3135_v53 = vld [vmem:[%s23910_s27 + $0x198] sm:$0xff]  ;;  %v3140_v35 = vld [vmem:[%s23910_s27 + $0x1c0] sm:$0xff]  ;;  %v3210_v39 = vld [vmem:[%s23910_s27 + $0x3f0] sm:$0xff] }
 0x4a0   :  { %13321 = vmatprep.subr.bf16.mxu1 %v13320_v20  ;;  %v13354_v20 = vpack.c.bf16 %v3181_v60, %v3176_v41  ;;  %v13176_v41 = vpack.c.bf16 %v3140_v35, %v3135_v53  ;;  %v3134_v60 = vld [vmem:[%s23910_s27 + $0x190] sm:$0xff]  ;;  %v3207_v63 = vld [vmem:[%s23910_s27 + $0x3d8] sm:$0xff] }
 0x4a3   :  { %13323 = vmatpush1.bf16.msra.mxu1 %v13322_v16  ;;  %v13356_v16 = vpack.c.bf16 %v3192_v0, %v3187_v58  ;;  %v3145_v58 = vld [vmem:[%s23910_s27 + $0x1e8] sm:$0xff]  ;;  %v3150_v0 = vld [vmem:[%s23910_s27 + $0x210] sm:$0xff] }
 0x4a4   :  { %13325 = vmatprep.subr.bf16.mxu1 %v13324_v43  ;;  %v13358_v43 = vpack.c.bf16 %v3191_v55, %v3186_v27  ;;  %v13180_v27 = vpack.c.bf16 %v3150_v0, %v3145_v58  ;;  %v3144_v55 = vld [vmem:[%s23910_s27 + $0x1e0] sm:$0xff]  ;;  %v3217_v0 = vld [vmem:[%s23910_s27 + $0x428] sm:$0xff] }
 0x4a5   :  { %v3220_v58 = vld [vmem:[%s23910_s27 + $0x440] sm:$0xff] }
 0x4a7   :  { %13327 = vmatpush1.bf16.msra.mxu1 %v13326_v46 }
 0x4a8   :  { %13329 = vmatprep.subr.bf16.mxu1 %v13328_v36 }
 0x4ab   :  { %13331 = vmatpush1.bf16.msra.mxu1 %v13330_v1 }
 0x4ac   :  { %13333 = vmatprep.subr.bf16.mxu1 %v13332_v37  ;;  %v2380_v37 = vld [vmem:[%s23911_s4] sm:$0x1] }
 0x4af   :  { %13335 = vmatpush1.bf16.msra.mxu1 %v13334_v18  ;;  %v2808_v18 = vld [vmem:[%s23912_s0] sm:$0x1] }
 0x4b0   :  { %13337 = vmatprep.subr.bf16.mxu1 %v13336_v33  ;;  %v3095_v33 = vld [vmem:[%s23910_s27 + $0x58] sm:$0xff] }
 0x4b3   :  { %13339 = vmatpush1.bf16.msra.mxu1 %v13338_v23  ;;  %v3094_v23 = vld [vmem:[%s23910_s27 + $0x50] sm:$0xff] }
 0x4b4   :  { %13341 = vmatprep.subr.bf16.mxu1 %v13340_v40  ;;  %v13162_v40 = vpack.c.bf16 %v3099_v24, %v3094_v23  ;;  %v3195_v24 = vld [vmem:[%s23910_s27 + $0x378] sm:$0xff] }
 0x4b7   :  { %13343 = vmatpush1.bf16.msra.mxu1 %v13342_v5  ;;  %v3109_v5 = vld [vmem:[%s23910_s27 + $0xc8] sm:$0xff] }
 0x4b8   :  { %13345 = vmatprep.subr.bf16.mxu1 %v13344_v50  ;;  %v13166_v50 = vpack.c.bf16 %v3109_v5, %v3104_v11  ;;  %v3194_v11 = vld [vmem:[%s23910_s27 + $0x370] sm:$0xff]  ;;  %v3199_v5 = vld [vmem:[%s23910_s27 + $0x398] sm:$0xff] }
 0x4b9   :  { %v13202_v31 = vpack.c.bf16 %v3199_v5, %v3194_v11  ;;  %v3250_v11 = vld [vmem:[%s23910_s27 + $0x530] sm:$0xff]  ;;  %v3247_v5 = vld [vmem:[%s23910_s27 + $0x518] sm:$0xff] }
 0x4bb   :  { %13347 = vmatpush1.bf16.msra.mxu1 %v13346_v61  ;;  %v3119_v61 = vld [vmem:[%s23910_s27 + $0x118] sm:$0xff] }
 0x4bc   :  { %13349 = vmatprep.subr.bf16.mxu1 %v13348_v3  ;;  %v13170_v3 = vpack.c.bf16 %v3119_v61, %v3114_v38  ;;  %v3205_v61 = vld [vmem:[%s23910_s27 + $0x3c8] sm:$0xff] }
 0x4bf   :  { %13351 = vmatpush1.bf16.msra.mxu1 %v13350_v56  ;;  %v3129_v56 = vld [vmem:[%s23910_s27 + $0x168] sm:$0xff] }
 0x4c0   :  { %13353 = vmatprep.subr.bf16.mxu1 %v13352_v62  ;;  %v13174_v62 = vpack.c.bf16 %v3129_v56, %v3124_v32  ;;  %v3204_v32 = vld [vmem:[%s23910_s27 + $0x3c0] sm:$0xff]  ;;  %v3209_v56 = vld [vmem:[%s23910_s27 + $0x3e8] sm:$0xff] }
 0x4c1   :  { %v13206_v35 = vpack.c.bf16 %v3209_v56, %v3204_v32 }
 0x4c3   :  { %13355 = vmatpush1.bf16.msra.mxu1 %v13354_v20  ;;  %v3139_v20 = vld [vmem:[%s23910_s27 + $0x1b8] sm:$0xff] }
 0x4c4   :  { %13357 = vmatprep.subr.bf16.mxu1 %v13356_v16  ;;  %v13178_v16 = vpack.c.bf16 %v3139_v20, %v3134_v60  ;;  %v3215_v20 = vld [vmem:[%s23910_s27 + $0x418] sm:$0xff] }
 0x4c7   :  { %13359 = vmatpush1.bf16.msra.mxu1 %v13358_v43  ;;  %v3149_v43 = vld [vmem:[%s23910_s27 + $0x208] sm:$0xff] }
 0x551   :  { %v10788_v9 = vpop.f32.mrb[18].mxu1 }
 0x552   :  { %v10789_v42 = vpop.f32.mrb[19].mxu1 }
 0x553   :  { %v10790_v46 = vadd.f32 %v10789_v42, %v10788_v9  ;;  %v3155_v9 = vld [vmem:[%s23910_s27 + $0x238] sm:$0xff]  ;;  %v3160_v42 = vld [vmem:[%s23910_s27 + $0x260] sm:$0xff] }
 0x555   :  { %v10823_v51 = vpop.f32.mrb[12].mxu0  ;;  %v2448_v36 = vadd.f32 1e-05, %v10790_v46  ;;  %v13182_v46 = vpack.c.bf16 %v3149_v43, %v3144_v55  ;;  %v3214_v55 = vld [vmem:[%s23910_s27 + $0x410] sm:$0xff]  ;;  %v3219_v43 = vld [vmem:[%s23910_s27 + $0x438] sm:$0xff] }
 0x556   :  { %v10824_v52 = vpop.f32.mrb[13].mxu0 }
 0x557   :  { %v10825_v59 = vadd.f32 %v10824_v52, %v10823_v51  ;;  %v13184_v51 = vpack.c.bf16 %v3160_v42, %v3155_v9  ;;  %v3154_v52 = vld [vmem:[%s23910_s27 + $0x230] sm:$0xff]  ;;  %v13210_v42 = vpack.c.bf16 %v3219_v43, %v3214_v55  ;;  %v3244_v55 = vld [vmem:[%s23910_s27 + $0x500] sm:$0xff] }
 0x558   :  { %v3246_v43 = vld [vmem:[%s23910_s27 + $0x510] sm:$0xff] }
 0x559   :  { %v2518_v30 = vadd.f32 %v10825_v59, %v2448_v36  ;;  %v3159_v36 = vld [vmem:[%s23910_s27 + $0x258] sm:$0xff]  ;;  %v3165_v59 = vld [vmem:[%s23910_s27 + $0x288] sm:$0xff] }
 0x571   :  { %v2587_v1 = vpop.f32.mrb[20].mxu1 }
 0x572   :  { %v2588_v7 = vadd.f32 %v2587_v1, %v2518_v30  ;;  %v11896_v45 = vpop.f32.mrb[21].mxu1  ;;  %v3170_v30 = vld [vmem:[%s23910_s27 + $0x2b0] sm:$0xff]  ;;  %v13186_v1 = vpack.c.bf16 %v3159_v36, %v3154_v52  ;;  %v3225_v36 = vld [vmem:[%s23910_s27 + $0x468] sm:$0xff] }
 0x573   :  { %v3164_v45 = vld [vmem:[%s23910_s27 + $0x280] sm:$0xff] }
 0x574   :  { %15269 = vrsqrt.f32 %v2588_v7  ;;  %v13188_v7 = vpack.c.bf16 %v3170_v30, %v3165_v59  ;;  %v3230_v59 = vld [vmem:[%s23910_s27 + $0x490] sm:$0xff]  ;;  %v3227_v30 = vld [vmem:[%s23910_s27 + $0x478] sm:$0xff] }
 0x57e   :  { %v15270_v13 = vpop.eup %15269 }
 0x57f   :  { %v2592_v14 = vmul.f32 %v15270_v13, %v2380_v37  ;;  %v3169_v37 = vld [vmem:[%s23910_s27 + $0x2a8] sm:$0xff]  ;;  %v3175_v13 = vld [vmem:[%s23910_s27 + $0x2d8] sm:$0xff] }
 0x581   :  { %10503 = vmatmul.mubr.msk.f32.vlgmr.msra.gmra.mrb[14].mxu0 %vm2099_vm3, %v2592_v14 }
 0x582   :  { %2668 = vmatpush1.msra.mxu0 %v17743_v10  ;;  %2731 = vmatprep.mubr.f32.mxu0 %v23873_v19 }
 0x583   :  { %11897 = vmatprep.subr.mxu0 %v23873_v19 }
 0x585   :  { %10504 = vmatmul.mubr.msk.f32.vlgmr.msra.gmra.mrb[16].mxu0 %vm2099_vm3, %v2592_v14 }
 0x586   :  { %11898 = vmatpush3.msra.mxu0 %v17752_v25  ;;  %11899 = vmatprep.mubr.msk.f32.mxu0 %vm15304_vm1, %v23873_v19 }
 0x587   :  { %2812 = vmatprep.subr.mxu0 %v17719_v4  ;;  %v3090_v4 = vld [vmem:[%s23910_s27 + $0x30] sm:$0xff] }
 0x589   :  { %11900 = vmatmul.mubr.msk.f32.vlgmr.msra.gmra.mrb[18].mxu0 %vm2099_vm3, %v2592_v14  ;;  %v3180_v14 = vld [vmem:[%s23910_s27 + $0x300] sm:$0xff] }
 0x58a   :  { %2813 = vmatpush1.msra.mxu0 %v17724_v26  ;;  %2876 = vmatprep.mubr.f32.mxu0 %v23873_v19  ;;  %v13156_v26 = vpack.c.bf16 %v3090_v4, %v3085_v54  ;;  %v13192_v54 = vpack.c.bf16 %v3180_v14, %v3175_v13  ;;  %v3174_v4 = vld [vmem:[%s23910_s27 + $0x2d0] sm:$0xff] }
 0x58b   :  { %2883 = vmatprep.subr.mxu0 %v17737_v8  ;;  %v3084_v8 = vld [vmem:[%s23910_s27] sm:$0xff] }
 0x58c   :  { %v13158_v15 = vpack.c.bf16 %v3089_v21, %v3084_v8  ;;  %v3185_v8 = vld [vmem:[%s23910_s27 + $0x328] sm:$0xff]  ;;  %v3190_v21 = vld [vmem:[%s23910_s27 + $0x350] sm:$0xff] }
 0x58d   :  { %10506 = vmatmul.mubr.msk.f32.vlgmr.msra.gmra.mrb[20].mxu0 %vm2099_vm3, %v2808_v18 }
 0x58e   :  { %2884 = vmatpush1.msra.mxu0 %v17743_v10  ;;  %2947 = vmatprep.mubr.f32.mxu0 %v23873_v19  ;;  %v3100_v10 = vld [vmem:[%s23910_s27 + $0x80] sm:$0xff] }
 0x58f   :  { %11902 = vmatprep.subr.mxu0 %v23873_v19  ;;  %v13160_v22 = vpack.c.bf16 %v3100_v10, %v3095_v33  ;;  %v13196_v10 = vpack.c.bf16 %v3190_v21, %v3185_v8  ;;  %v3240_v8 = vld [vmem:[%s23910_s27 + $0x4e0] sm:$0xff]  ;;  %v3237_v21 = vld [vmem:[%s23910_s27 + $0x4c8] sm:$0xff] }
 0x591   :  { %10507 = vmatmul.mubr.msk.f32.vlgmr.msra.gmra.mrb[22].mxu0 %vm2099_vm3, %v2808_v18 }
 0x592   :  { %11903 = vmatpush3.msra.mxu0 %v17752_v25  ;;  %11904 = vmatprep.mubr.msk.f32.mxu0 %vm15304_vm1, %v23873_v19  ;;  %v3110_v25 = vld [vmem:[%s23910_s27 + $0xd0] sm:$0xff] }
 0x593   :  { %13157 = vmatprep.subr.bf16.mxu0 %v13156_v26  ;;  %v13164_v44 = vpack.c.bf16 %v3110_v25, %v3105_v28  ;;  %v3179_v26 = vld [vmem:[%s23910_s27 + $0x2f8] sm:$0xff]  ;;  %v3200_v28 = vld [vmem:[%s23910_s27 + $0x3a0] sm:$0xff]  ;;  %v3197_v25 = vld [vmem:[%s23910_s27 + $0x388] sm:$0xff] }
 0x594   :  { %v13194_v33 = vpack.c.bf16 %v3179_v26, %v3174_v4  ;;  %v3235_v26 = vld [vmem:[%s23910_s27 + $0x4b8] sm:$0xff] }
 0x595   :  { %11905 = vmatmul.mubr.msk.f32.vlgmr.msra.gmra.mrb[24].mxu0 %vm2099_vm3, %v2808_v18  ;;  %v13190_v18 = vpack.c.bf16 %v3169_v37, %v3164_v45  ;;  %v3224_v45 = vld [vmem:[%s23910_s27 + $0x460] sm:$0xff]  ;;  %v3229_v37 = vld [vmem:[%s23910_s27 + $0x488] sm:$0xff] }
 0x596   :  { %13159 = vmatpush1.bf16.msra.mxu0 %v13158_v15  ;;  %v3184_v15 = vld [vmem:[%s23910_s27 + $0x320] sm:$0xff]  ;;  %v13214_v14 = vpack.c.bf16 %v3229_v37, %v3224_v45  ;;  %v3262_v45 = vld [vmem:[%s23910_s27 + $0x590] sm:$0xff] }
 0x597   :  { %13161 = vmatprep.subr.bf16.mxu0 %v13160_v22  ;;  %v3189_v22 = vld [vmem:[%s23910_s27 + $0x348] sm:$0xff] }
 0x598   :  { %v13198_v23 = vpack.c.bf16 %v3189_v22, %v3184_v15  ;;  %v3234_v15 = vld [vmem:[%s23910_s27 + $0x4b0] sm:$0xff]  ;;  %v3239_v22 = vld [vmem:[%s23910_s27 + $0x4d8] sm:$0xff] }
 0x59a   :  { %13163 = vmatpush1.bf16.msra.mxu0 %v13162_v40  ;;  %v13200_v40 = vpack.c.bf16 %v3200_v28, %v3195_v24  ;;  %v13218_v24 = vpack.c.bf16 %v3239_v22, %v3234_v15  ;;  %v3236_v28 = vld [vmem:[%s23910_s27 + $0x4c0] sm:$0xff] }
 0x59b   :  { %13165 = vmatprep.subr.bf16.mxu0 %v13164_v44  ;;  %v3202_v44 = vld [vmem:[%s23910_s27 + $0x3b0] sm:$0xff]  ;;  %v3256_v22 = vld [vmem:[%s23910_s27 + $0x560] sm:$0xff] }
 0x59c   :  { %v13360_v29 = vpack.c.bf16 %v3202_v44, %v3197_v25  ;;  %v3241_v25 = vld [vmem:[%s23910_s27 + $0x4e8] sm:$0xff] }
 0x59d   :  { %v3245_v44 = vld [vmem:[%s23910_s27 + $0x508] sm:$0xff] }
 0x59e   :  { %13167 = vmatpush1.bf16.msra.mxu0 %v13166_v50  ;;  %v3196_v50 = vld [vmem:[%s23910_s27 + $0x380] sm:$0xff]  ;;  %13361 = vmatprep.subr.bf16.mxu1 %v13360_v29  ;;  %v13220_v29 = vpack.c.bf16 %v3250_v11, %v3245_v44 }
 0x59f   :  { %13169 = vmatprep.subr.bf16.mxu0 %v13168_v2  ;;  %v3201_v2 = vld [vmem:[%s23910_s27 + $0x3a8] sm:$0xff]  ;;  %v3272_v44 = vld [vmem:[%s23910_s27 + $0x5e0] sm:$0xff] }
 0x5a0   :  { %v13362_v38 = vpack.c.bf16 %v3201_v2, %v3196_v50 }
 0x5a2   :  { %13171 = vmatpush1.bf16.msra.mxu0 %v13170_v3  ;;  %13363 = vmatpush1.bf16.msra.mxu1 %v13362_v38  ;;  %v13204_v3 = vpack.c.bf16 %v3210_v39, %v3205_v61 }
 0x5a3   :  { %13173 = vmatprep.subr.bf16.mxu0 %v13172_v12  ;;  %v3212_v12 = vld [vmem:[%s23910_s27 + $0x400] sm:$0xff] }
 0x5a4   :  { %v13364_v53 = vpack.c.bf16 %v3212_v12, %v3207_v63 }
 0x5a6   :  { %13175 = vmatpush1.bf16.msra.mxu0 %v13174_v62  ;;  %v3206_v62 = vld [vmem:[%s23910_s27 + $0x3d0] sm:$0xff]  ;;  %13365 = vmatprep.subr.bf16.mxu1 %v13364_v53 }
 0x5a7   :  { %13177 = vmatprep.subr.bf16.mxu0 %v13176_v41  ;;  %v3211_v41 = vld [vmem:[%s23910_s27 + $0x3f8] sm:$0xff] }
 0x5a8   :  { %v13366_v60 = vpack.c.bf16 %v3211_v41, %v3206_v62 }
 0x5aa   :  { %13179 = vmatpush1.bf16.msra.mxu0 %v13178_v16  ;;  %13367 = vmatpush1.bf16.msra.mxu1 %v13366_v60  ;;  %v13208_v16 = vpack.c.bf16 %v3220_v58, %v3215_v20 }
 0x5ab   :  { %13181 = vmatprep.subr.bf16.mxu0 %v13180_v27  ;;  %v3222_v27 = vld [vmem:[%s23910_s27 + $0x450] sm:$0xff] }
 0x5ac   :  { %v13368_v9 = vpack.c.bf16 %v3222_v27, %v3217_v0 }
 0x5ae   :  { %13183 = vmatpush1.bf16.msra.mxu0 %v13182_v46  ;;  %v3216_v46 = vld [vmem:[%s23910_s27 + $0x420] sm:$0xff]  ;;  %13369 = vmatprep.subr.bf16.mxu1 %v13368_v9 }
 0x5af   :  { %13185 = vmatprep.subr.bf16.mxu0 %v13184_v51  ;;  %v3221_v51 = vld [vmem:[%s23910_s27 + $0x448] sm:$0xff] }
 0x5b0   :  { %v13370_v52 = vpack.c.bf16 %v3221_v51, %v3216_v46 }
 0x5b2   :  { %13187 = vmatpush1.bf16.msra.mxu0 %v13186_v1  ;;  %13371 = vmatpush1.bf16.msra.mxu1 %v13370_v52  ;;  %v13212_v1 = vpack.c.bf16 %v3230_v59, %v3225_v36  ;;  %v3251_v52 = vld [vmem:[%s23910_s27 + $0x538] sm:$0xff]  ;;  %v3260_v59 = vld [vmem:[%s23910_s27 + $0x580] sm:$0xff] }
 0x5b3   :  { %13189 = vmatprep.subr.bf16.mxu0 %v13188_v7  ;;  %v3232_v7 = vld [vmem:[%s23910_s27 + $0x4a0] sm:$0xff]  ;;  %v3255_v36 = vld [vmem:[%s23910_s27 + $0x558] sm:$0xff] }
 0x5b4   :  { %v13372_v13 = vpack.c.bf16 %v3232_v7, %v3227_v30  ;;  %v3257_v7 = vld [vmem:[%s23910_s27 + $0x568] sm:$0xff] }
 0x5b5   :  { %v13384_v15 = vpack.c.bf16 %v3262_v45, %v3257_v7 }
 0x5b6   :  { %13191 = vmatpush1.bf16.msra.mxu0 %v13190_v18  ;;  %v3226_v18 = vld [vmem:[%s23910_s27 + $0x470] sm:$0xff]  ;;  %13373 = vmatprep.subr.bf16.mxu1 %v13372_v13 }
 0x5b7   :  { %13193 = vmatprep.subr.bf16.mxu0 %v13192_v54  ;;  %v3231_v54 = vld [vmem:[%s23910_s27 + $0x498] sm:$0xff] }
 0x5b8   :  { %v13374_v4 = vpack.c.bf16 %v3231_v54, %v3226_v18 }
 0x5ba   :  { %13195 = vmatpush1.bf16.msra.mxu0 %v13194_v33  ;;  %13375 = vmatpush1.bf16.msra.mxu1 %v13374_v4  ;;  %v13216_v33 = vpack.c.bf16 %v3240_v8, %v3235_v26  ;;  %v13382_v4 = vpack.c.bf16 %v3251_v52, %v3246_v43  ;;  %v3254_v26 = vld [vmem:[%s23910_s27 + $0x550] sm:$0xff]  ;;  %v3259_v8 = vld [vmem:[%s23910_s27 + $0x578] sm:$0xff] }
 0x5bb   :  { %13197 = vmatprep.subr.bf16.mxu0 %v13196_v10  ;;  %v3242_v10 = vld [vmem:[%s23910_s27 + $0x4f0] sm:$0xff] }
 0x5bc   :  { %v3286_v52 = vld [vmem:[%s23910_s27 + $0x650] sm:$0xff] }
 0x5be   :  { %13199 = vmatpush1.bf16.msra.mxu0 %v13198_v23  ;;  %v13376_v23 = vpack.c.bf16 %v3242_v10, %v3237_v21 }
 0x5bf   :  { %13201 = vmatprep.subr.bf16.mxu0 %v13200_v40  ;;  %v13378_v40 = vpack.c.bf16 %v3241_v25, %v3236_v28 }
 0x5c0   :  { %13377 = vmatprep.subr.bf16.mxu1 %v13376_v23  ;;  %v3261_v23 = vld [vmem:[%s23910_s27 + $0x588] sm:$0xff] }
 0x5c1   :  { %13379 = vmatpush1.bf16.msra.mxu1 %v13378_v40  ;;  %v3267_v40 = vld [vmem:[%s23910_s27 + $0x5b8] sm:$0xff] }
 0x5c2   :  { %13203 = vmatpush1.bf16.msra.mxu0 %v13202_v31  ;;  %v3252_v31 = vld [vmem:[%s23910_s27 + $0x540] sm:$0xff] }
 0x5c3   :  { %13205 = vmatprep.subr.bf16.mxu0 %v13204_v3  ;;  %v13380_v50 = vpack.c.bf16 %v3252_v31, %v3247_v5  ;;  %v13386_v31 = vpack.c.bf16 %v3261_v23, %v3256_v22 }
 0x5c5   :  { %13381 = vmatprep.subr.bf16.mxu1 %v13380_v50  ;;  %v3264_v50 = vld [vmem:[%s23910_s27 + $0x5a0] sm:$0xff] }
 0x5c6   :  { %13207 = vmatpush1.bf16.msra.mxu0 %v13206_v35 }
 0x5c7   :  { %13209 = vmatprep.subr.bf16.mxu0 %v13208_v16 }
 0x5ca   :  { %13211 = vmatpush1.bf16.msra.mxu0 %v13210_v42 }
 0x5cb   :  { %13213 = vmatprep.subr.bf16.mxu0 %v13212_v1 }
 0x5ce   :  { %13215 = vmatpush1.bf16.msra.mxu0 %v13214_v14 }
 0x5cf   :  { %13217 = vmatprep.subr.bf16.mxu0 %v13216_v33 }
 0x5d2   :  { %13219 = vmatpush1.bf16.msra.mxu0 %v13218_v24  ;;  %v3265_v24 = vld [vmem:[%s23910_s27 + $0x5a8] sm:$0xff] }
 0x5d3   :  { %13221 = vmatprep.subr.bf16.mxu0 %v13220_v29  ;;  %v13226_v29 = vpack.c.bf16 %v3259_v8, %v3254_v26  ;;  %v3301_v26 = vld [vmem:[%s23910_s27 + $0x6c8] sm:$0xff] }
 0x5d4   :  { %v3305_v8 = vld [vmem:[%s23910_s27 + $0x6e8] sm:$0xff] }
 0x654   :  { %v2662_v2 = vpop.f32.mrb[14].mxu0 }
 0x655   :  { %v2664_v38 = vpop.f32.mrb[15].mxu0  ;;  %v3027_v3 = vrot.slane %v2662_v2, %v17777_v17  ;;  %v3269_v2 = vld [vmem:[%s23910_s27 + $0x5c8] sm:$0xff] }
 0x656   :  { %v3031_v32 = vrot.slane %v2664_v38, %v17777_v17 }
 0x657   :  { %v3044_v53 = vmul.f32 %v3027_v3, %v17782_v47  ;;  %v3249_v47 = vld [vmem:[%s23910_s27 + $0x528] sm:$0xff]  ;;  %v3275_v3 = vld [vmem:[%s23910_s27 + $0x5f8] sm:$0xff] }
 0x658   :  { %v2733_v61 = vpop.f32.mrb[16].mxu0  ;;  %v3045_v60 = vmul.f32 %v3031_v32, %v17785_v49  ;;  %v13222_v13 = vpack.c.bf16 %v3249_v47, %v3244_v55  ;;  %v3277_v32 = vld [vmem:[%s23910_s27 + $0x608] sm:$0xff]  ;;  %v3287_v55 = vld [vmem:[%s23910_s27 + $0x658] sm:$0xff]  ;;  %v3292_v47 = vld [vmem:[%s23910_s27 + $0x680] sm:$0xff] }
 0x659   :  { %v2735_v39 = vpop.f32.mrb[17].mxu0  ;;  %v3035_v35 = vrot.slane %v2733_v61, %v17777_v17  ;;  %v13388_v61 = vpack.c.bf16 %v3272_v44, %v3267_v40  ;;  %v3306_v40 = vld [vmem:[%s23910_s27 + $0x6f0] sm:$0xff]  ;;  %v3311_v44 = vld [vmem:[%s23910_s27 + $0x718] sm:$0xff] }
 0x65a   :  { %v3039_v20 = vrot.slane %v2735_v39, %v17777_v17  ;;  %v3266_v39 = vld [vmem:[%s23910_s27 + $0x5b0] sm:$0xff] }
 0x65b   :  { %v3046_v49 = vmul.f32 %v3035_v35, %v17795_v6 }
 0x65c   :  { %v2804_v63 = vpop.f32.mrb[18].mxu0  ;;  %v3047_v6 = vmul.f32 %v3039_v20, %v17799_v34  ;;  %v13224_v34 = vpack.c.bf16 %v3260_v59, %v3255_v36  ;;  %v3291_v36 = vld [vmem:[%s23910_s27 + $0x678] sm:$0xff] }
 0x65d   :  { %v11901_v12 = vpop.f32.mrb[19].mxu0  ;;  %v3043_v9 = vrot.slane %v2804_v63, %v17777_v17  ;;  %v3271_v63 = vld [vmem:[%s23910_s27 + $0x5d8] sm:$0xff]  ;;  %v13398_v45 = vpack.c.bf16 %v3291_v36, %v3286_v52  ;;  %v3334_v52 = vld [vmem:[%s23910_s27 + $0x7d0] sm:$0xff] }
 0x65e   :  { %v3280_v12 = vld [vmem:[%s23910_s27 + $0x620] sm:$0xff]  ;;  %v13390_v35 = vpack.c.bf16 %v3271_v63, %v3266_v39  ;;  %v3295_v59 = vld [vmem:[%s23910_s27 + $0x698] sm:$0xff]  ;;  %v3314_v39 = vld [vmem:[%s23910_s27 + $0x730] sm:$0xff] }
 0x65f   :  { %v3048_v21 = vmul.f32 %v3043_v9, %v17809_v57  ;;  %v3270_v57 = vld [vmem:[%s23910_s27 + $0x5d0] sm:$0xff]  ;;  %v3284_v9 = vld [vmem:[%s23910_s27 + $0x640] sm:$0xff]  ;;  %v3319_v63 = vld [vmem:[%s23910_s27 + $0x758] sm:$0xff] }
 0x660   :  { %v2878_v56 = vpop.f32.mrb[20].mxu0  ;;  %v13228_v38 = vpack.c.bf16 %v3270_v57, %v3265_v24  ;;  %v3304_v24 = vld [vmem:[%s23910_s27 + $0x6e0] sm:$0xff]  ;;  %v3339_v36 = vld [vmem:[%s23910_s27 + $0x7f8] sm:$0xff] }
 0x661   :  { %v3052_v62 = vrot.slane %v2878_v56, %v17777_v17  ;;  %v2880_v41 = vpop.f32.mrb[21].mxu0  ;;  %v3282_v56 = vld [vmem:[%s23910_s27 + $0x630] sm:$0xff] }
 0x662   :  { %v3056_v58 = vrot.slane %v2880_v41, %v17777_v17  ;;  %v3279_v41 = vld [vmem:[%s23910_s27 + $0x618] sm:$0xff]  ;;  %v13392_v20 = vpack.c.bf16 %v3282_v56, %v3277_v32  ;;  %v3316_v32 = vld [vmem:[%s23910_s27 + $0x740] sm:$0xff]  ;;  %v3321_v56 = vld [vmem:[%s23910_s27 + $0x768] sm:$0xff] }
 0x663   :  { %v3069_v0 = vadd.f32 %v3052_v62, %v3044_v53  ;;  %v13230_v53 = vpack.c.bf16 %v3269_v2, %v3264_v50  ;;  %v3274_v62 = vld [vmem:[%s23910_s27 + $0x5f0] sm:$0xff]  ;;  %v3317_v50 = vld [vmem:[%s23910_s27 + $0x748] sm:$0xff] }
 0x664   :  { %v3070_v16 = vadd.f32 %v3056_v58, %v3045_v60  ;;  %v2949_v27 = vpop.f32.mrb[22].mxu0  ;;  %v13232_v60 = vpack.c.bf16 %v3280_v12, %v3275_v3  ;;  %v3276_v58 = vld [vmem:[%s23910_s27 + $0x600] sm:$0xff]  ;;  %v13234_v43 = vpack.c.bf16 %v3279_v41, %v3274_v62  ;;  %v3322_v2 = vld [vmem:[%s23910_s27 + $0x770] sm:$0xff]  ;;  %v3327_v62 = vld [vmem:[%s23910_s27 + $0x798] sm:$0xff] }
 0x665   :  { %v3074_v42 = vmul.f32 0.2, %v3069_v0  ;;  %v3060_v46 = vrot.slane %v2949_v27, %v17777_v17  ;;  %v2951_v51 = vpop.f32.mrb[23].mxu0  ;;  %v3290_v27 = vld [vmem:[%s23910_s27 + $0x670] sm:$0xff]  ;;  %v13408_v12 = vpack.c.bf16 %v3322_v2, %v3317_v50  ;;  %v3332_v41 = vld [vmem:[%s23910_s27 + $0x7c0] sm:$0xff]  ;;  %v3361_v2 = vld [vmem:[%s23910_s27 + $0x8a8] sm:$0xff] }
 0x666   :  { %v3075_v30 = vmul.f32 0.2, %v3070_v16  ;;  %v3064_v1 = vrot.slane %v2951_v51, %v17777_v17  ;;  %v13396_v51 = vpack.c.bf16 %v3292_v47, %v3287_v55  ;;  %v3326_v55 = vld [vmem:[%s23910_s27 + $0x790] sm:$0xff]  ;;  %v3331_v47 = vld [vmem:[%s23910_s27 + $0x7b8] sm:$0xff]  ;;  %v3356_v50 = vld [vmem:[%s23910_s27 + $0x880] sm:$0xff] }
 0x667   :  { %v18295_v37 = vadd.f32 %v3060_v46, %v3046_v49  ;;  %v18306_v33 = vmax.f32 %v3069_v0, %v3074_v42  ;;  %v3281_v0 = vld [vmem:[%s23910_s27 + $0x628] sm:$0xff] }
 0x668   :  { %v3072_v14 = vadd.f32 %v3064_v1, %v3047_v6  ;;  %v3020_v18 = vpop.f32.mrb[24].mxu0  ;;  %v18297_v54 = vmax.f32 %v3070_v16, %v3075_v30  ;;  %v3285_v16 = vld [vmem:[%s23910_s27 + $0x648] sm:$0xff]  ;;  %v13394_v49 = vpack.c.bf16 %v3281_v0, %v3276_v58  ;;  %v3300_v6 = vld [vmem:[%s23910_s27 + $0x6c0] sm:$0xff]  ;;  %v3302_v1 = vld [vmem:[%s23910_s27 + $0x6d0] sm:$0xff] }
 0x669   :  { %v3068_v10 = vrot.slane %v3020_v18, %v17777_v17  ;;  %v11906_v28 = vpop.f32.mrb[25].mxu0  ;;  %v3289_v42 = vld [vmem:[%s23910_s27 + $0x668] sm:$0xff]  ;;  %v13236_v46 = vpack.c.bf16 %v3290_v27, %v3285_v16  ;;  %v13240_v18 = vpack.c.bf16 %v3300_v6, %v3295_v59  ;;  %v3324_v58 = vld [vmem:[%s23910_s27 + $0x780] sm:$0xff]  ;;  %v13412_v27 = vpack.c.bf16 %v3332_v41, %v3327_v62  ;;  %v3366_v62 = vld [vmem:[%s23910_s27 + $0x8d0] sm:$0xff] }
 0x66a   :  { %v3077_v25 = vmul.f32 0.2, %v3072_v14  ;;  %3548 = vmatprep.mubr.f32.mxu0 %v18297_v54  ;;  %3761 = vmatprep.mubr.f32.mxu1 %v18297_v54  ;;  %v3297_v30 = vld [vmem:[%s23910_s27 + $0x6a8] sm:$0xff]  ;;  %v13238_v7 = vpack.c.bf16 %v3289_v42, %v3284_v9  ;;  %v3342_v42 = vld [vmem:[%s23910_s27 + $0x810] sm:$0xff]  ;;  %v3371_v41 = vld [vmem:[%s23910_s27 + $0x8f8] sm:$0xff] }
 0x66b   :  { %v18329_v11 = vadd.f32 %v3068_v10, %v3048_v21  ;;  %3549 = vmatmul.mubr.f32.vlgmr.msra.gmra.mrb[26].mxu0 %v18306_v33  ;;  %3762 = vmatmul.mubr.f32.vlgmr.msra.gmra.mrb[22].mxu1 %v18306_v33  ;;  %v3310_v21 = vld [vmem:[%s23910_s27 + $0x710] sm:$0xff]  ;;  %v3307_v10 = vld [vmem:[%s23910_s27 + $0x6f8] sm:$0xff]  ;;  %v3309_v28 = vld [vmem:[%s23910_s27 + $0x708] sm:$0xff] }
 0x66c   :  { %13223 = vmatpush1.bf16.msra.mxu0 %v13222_v13  ;;  %13383 = vmatpush1.bf16.msra.mxu1 %v13382_v4  ;;  %v18333_v5 = vmax.f32 %v3072_v14, %v3077_v25  ;;  %v3294_v13 = vld [vmem:[%s23910_s27 + $0x690] sm:$0xff]  ;;  %v3299_v14 = vld [vmem:[%s23910_s27 + $0x6b8] sm:$0xff]  ;;  %v13400_v4 = vpack.c.bf16 %v3302_v1, %v3297_v30  ;;  %v13244_v25 = vpack.c.bf16 %v3310_v21, %v3305_v8  ;;  %v3329_v0 = vld [vmem:[%s23910_s27 + $0x7a8] sm:$0xff] }
 0x66d   :  { %13225 = vmatprep.subr.bf16.mxu0 %v13224_v34  ;;  %13385 = vmatprep.subr.bf16.mxu1 %v13384_v15  ;;  %v3296_v34 = vld [vmem:[%s23910_s27 + $0x6a0] sm:$0xff]  ;;  %v13242_v22 = vpack.c.bf16 %v3299_v14, %v3294_v13  ;;  %v3337_v9 = vld [vmem:[%s23910_s27 + $0x7e8] sm:$0xff]  ;;  %v3347_v13 = vld [vmem:[%s23910_s27 + $0x838] sm:$0xff] }
 0x66e   :  { %3619 = vmatprep.mubr.f32.mxu0 %v18333_v5  ;;  %3832 = vmatprep.mubr.f32.mxu1 %v18333_v5  ;;  %v3312_v15 = vld [vmem:[%s23910_s27 + $0x720] sm:$0xff]  ;;  %v13402_v23 = vpack.c.bf16 %v3301_v26, %v3296_v34  ;;  %v13416_v6 = vpack.c.bf16 %v3342_v42, %v3337_v9  ;;  %v3341_v1 = vld [vmem:[%s23910_s27 + $0x808] sm:$0xff] }
 0x66f   :  { %v13404_v57 = vpack.c.bf16 %v3312_v15, %v3307_v10  ;;  %v3336_v30 = vld [vmem:[%s23910_s27 + $0x7e0] sm:$0xff]  ;;  %v3349_v26 = vld [vmem:[%s23910_s27 + $0x848] sm:$0xff]  ;;  %v3346_v10 = vld [vmem:[%s23910_s27 + $0x830] sm:$0xff] }
 0x670   :  { %13227 = vmatpush1.bf16.msra.mxu0 %v13226_v29  ;;  %13387 = vmatpush1.bf16.msra.mxu1 %v13386_v31  ;;  %v3315_v29 = vld [vmem:[%s23910_s27 + $0x738] sm:$0xff]  ;;  %v3320_v31 = vld [vmem:[%s23910_s27 + $0x760] sm:$0xff]  ;;  %v3381_v42 = vld [vmem:[%s23910_s27 + $0x948] sm:$0xff] }
 0x671   :  { %13229 = vmatprep.subr.bf16.mxu0 %v13228_v38  ;;  %13389 = vmatprep.subr.bf16.mxu1 %v13388_v61  ;;  %v13246_v38 = vpack.c.bf16 %v3309_v28, %v3304_v24  ;;  %v13406_v61 = vpack.c.bf16 %v3311_v44, %v3306_v40  ;;  %v13248_v3 = vpack.c.bf16 %v3320_v31, %v3315_v29  ;;  %v3352_v14 = vld [vmem:[%s23910_s27 + $0x860] sm:$0xff]  ;;  %v3351_v15 = vld [vmem:[%s23910_s27 + $0x858] sm:$0xff]  ;;  %v3357_v24 = vld [vmem:[%s23910_s27 + $0x888] sm:$0xff] }
 0x672   :  { %v3344_v34 = vld [vmem:[%s23910_s27 + $0x820] sm:$0xff]  ;;  %v13420_v21 = vpack.c.bf16 %v3352_v14, %v3347_v13  ;;  %v3362_v28 = vld [vmem:[%s23910_s27 + $0x8b0] sm:$0xff]  ;;  %v3359_v44 = vld [vmem:[%s23910_s27 + $0x898] sm:$0xff] }
 0x673   :  { %v3354_v40 = vld [vmem:[%s23910_s27 + $0x870] sm:$0xff]  ;;  %v13424_v31 = vpack.c.bf16 %v3362_v28, %v3357_v24  ;;  %v3376_v9 = vld [vmem:[%s23910_s27 + $0x920] sm:$0xff]  ;;  %v3391_v14 = vld [vmem:[%s23910_s27 + $0x998] sm:$0xff] }
 0x674   :  { %13231 = vmatpush1.bf16.msra.mxu0 %v13230_v53  ;;  %13391 = vmatpush1.bf16.msra.mxu1 %v13390_v35  ;;  %v3325_v53 = vld [vmem:[%s23910_s27 + $0x788] sm:$0xff]  ;;  %v3330_v35 = vld [vmem:[%s23910_s27 + $0x7b0] sm:$0xff]  ;;  %v3396_v24 = vld [vmem:[%s23910_s27 + $0x9c0] sm:$0xff] }
 0x675   :  { %13233 = vmatprep.subr.bf16.mxu0 %v13232_v60  ;;  %13393 = vmatprep.subr.bf16.mxu1 %v13392_v20  ;;  %v13250_v60 = vpack.c.bf16 %v3319_v63, %v3314_v39  ;;  %v13410_v20 = vpack.c.bf16 %v3321_v56, %v3316_v32  ;;  %v13252_v16 = vpack.c.bf16 %v3330_v35, %v3325_v53  ;;  %v3367_v39 = vld [vmem:[%s23910_s27 + $0x8d8] sm:$0xff]  ;;  %v3372_v63 = vld [vmem:[%s23910_s27 + $0x900] sm:$0xff]  ;;  %v3369_v56 = vld [vmem:[%s23910_s27 + $0x8e8] sm:$0xff] }
 0x676   :  { %v3364_v32 = vld [vmem:[%s23910_s27 + $0x8c0] sm:$0xff]  ;;  %v13428_v35 = vpack.c.bf16 %v3372_v63, %v3367_v39  ;;  %v3386_v13 = vld [vmem:[%s23910_s27 + $0x970] sm:$0xff]  ;;  %v3401_v28 = vld [vmem:[%s23910_s27 + $0x9e8] sm:$0xff] }
 0x677   :  { %v3406_v63 = vld [vmem:[%s23910_s27 + $0xa10] sm:$0xff] }
 0x678   :  { %13235 = vmatpush1.bf16.msra.mxu0 %v13234_v43  ;;  %13395 = vmatpush1.bf16.msra.mxu1 %v13394_v49  ;;  %v3335_v43 = vld [vmem:[%s23910_s27 + $0x7d8] sm:$0xff]  ;;  %v3340_v49 = vld [vmem:[%s23910_s27 + $0x800] sm:$0xff] }
 0x679   :  { %13237 = vmatprep.subr.bf16.mxu0 %v13236_v46  ;;  %13397 = vmatprep.subr.bf16.mxu1 %v13396_v51  ;;  %v13254_v46 = vpack.c.bf16 %v3329_v0, %v3324_v58  ;;  %v13414_v51 = vpack.c.bf16 %v3331_v47, %v3326_v55  ;;  %v13256_v59 = vpack.c.bf16 %v3340_v49, %v3335_v43  ;;  %v3377_v58 = vld [vmem:[%s23910_s27 + $0x928] sm:$0xff]  ;;  %v3382_v0 = vld [vmem:[%s23910_s27 + $0x950] sm:$0xff]  ;;  %v3379_v47 = vld [vmem:[%s23910_s27 + $0x938] sm:$0xff] }
 0x67a   :  { %v3374_v55 = vld [vmem:[%s23910_s27 + $0x910] sm:$0xff]  ;;  %v13432_v49 = vpack.c.bf16 %v3382_v0, %v3377_v58 }
 0x67c   :  { %13239 = vmatpush1.bf16.msra.mxu0 %v13238_v7  ;;  %13399 = vmatpush1.bf16.msra.mxu1 %v13398_v45  ;;  %v3345_v7 = vld [vmem:[%s23910_s27 + $0x828] sm:$0xff]  ;;  %v3350_v45 = vld [vmem:[%s23910_s27 + $0x850] sm:$0xff] }
 0x67d   :  { %13241 = vmatprep.subr.bf16.mxu0 %v13240_v18  ;;  %13401 = vmatprep.subr.bf16.mxu1 %v13400_v4  ;;  %v13258_v18 = vpack.c.bf16 %v3339_v36, %v3334_v52  ;;  %v13418_v4 = vpack.c.bf16 %v3341_v1, %v3336_v30  ;;  %v13260_v8 = vpack.c.bf16 %v3350_v45, %v3345_v7  ;;  %v3387_v52 = vld [vmem:[%s23910_s27 + $0x978] sm:$0xff]  ;;  %v3392_v36 = vld [vmem:[%s23910_s27 + $0x9a0] sm:$0xff]  ;;  %v3389_v1 = vld [vmem:[%s23910_s27 + $0x988] sm:$0xff] }
 0x67e   :  { %v3384_v30 = vld [vmem:[%s23910_s27 + $0x960] sm:$0xff]  ;;  %v13436_v45 = vpack.c.bf16 %v3392_v36, %v3387_v52  ;;  %v3426_v36 = vld [vmem:[%s23910_s27 + $0xab0] sm:$0xff] }
 0x680   :  { %13243 = vmatpush1.bf16.msra.mxu0 %v13242_v22  ;;  %13403 = vmatpush1.bf16.msra.mxu1 %v13402_v23  ;;  %v3355_v22 = vld [vmem:[%s23910_s27 + $0x878] sm:$0xff]  ;;  %v3360_v23 = vld [vmem:[%s23910_s27 + $0x8a0] sm:$0xff] }
 0x681   :  { %13245 = vmatprep.subr.bf16.mxu0 %v13244_v25  ;;  %13405 = vmatprep.subr.bf16.mxu1 %v13404_v57  ;;  %v13262_v25 = vpack.c.bf16 %v3349_v26, %v3344_v34  ;;  %v13422_v57 = vpack.c.bf16 %v3351_v15, %v3346_v10  ;;  %v13264_v29 = vpack.c.bf16 %v3360_v23, %v3355_v22  ;;  %v3397_v34 = vld [vmem:[%s23910_s27 + $0x9c8] sm:$0xff]  ;;  %v3402_v26 = vld [vmem:[%s23910_s27 + $0x9f0] sm:$0xff]  ;;  %v3399_v15 = vld [vmem:[%s23910_s27 + $0x9d8] sm:$0xff] }
 0x682   :  { %v3394_v10 = vld [vmem:[%s23910_s27 + $0x9b0] sm:$0xff]  ;;  %v13440_v23 = vpack.c.bf16 %v3402_v26, %v3397_v34  ;;  %v3436_v26 = vld [vmem:[%s23910_s27 + $0xb00] sm:$0xff] }
 0x684   :  { %13247 = vmatpush1.bf16.msra.mxu0 %v13246_v38  ;;  %13407 = vmatpush1.bf16.msra.mxu1 %v13406_v61  ;;  %v3365_v38 = vld [vmem:[%s23910_s27 + $0x8c8] sm:$0xff]  ;;  %v3370_v61 = vld [vmem:[%s23910_s27 + $0x8f0] sm:$0xff] }
 0x685   :  { %13249 = vmatprep.subr.bf16.mxu0 %v13248_v3  ;;  %13409 = vmatprep.subr.bf16.mxu1 %v13408_v12  ;;  %v13266_v3 = vpack.c.bf16 %v3359_v44, %v3354_v40  ;;  %v13426_v12 = vpack.c.bf16 %v3361_v2, %v3356_v50  ;;  %v13268_v53 = vpack.c.bf16 %v3370_v61, %v3365_v38  ;;  %v3407_v40 = vld [vmem:[%s23910_s27 + $0xa18] sm:$0xff]  ;;  %v3412_v44 = vld [vmem:[%s23910_s27 + $0xa40] sm:$0xff]  ;;  %v3409_v2 = vld [vmem:[%s23910_s27 + $0xa28] sm:$0xff]  ;;  %v3076_v38 = vmul.f32 0.2, %v18295_v37 }
 0x686   :  { %v3404_v50 = vld [vmem:[%s23910_s27 + $0xa00] sm:$0xff]  ;;  %v13444_v39 = vpack.c.bf16 %v3412_v44, %v3407_v40  ;;  %v3446_v44 = vld [vmem:[%s23910_s27 + $0xb50] sm:$0xff] }
 0x688   :  { %13251 = vmatpush1.bf16.msra.mxu0 %v13250_v60  ;;  %13411 = vmatpush1.bf16.msra.mxu1 %v13410_v20  ;;  %v3375_v60 = vld [vmem:[%s23910_s27 + $0x918] sm:$0xff]  ;;  %v3380_v20 = vld [vmem:[%s23910_s27 + $0x940] sm:$0xff] }
 0x689   :  { %13253 = vmatprep.subr.bf16.mxu0 %v13252_v16  ;;  %13413 = vmatprep.subr.bf16.mxu1 %v13412_v27  ;;  %v13270_v16 = vpack.c.bf16 %v3369_v56, %v3364_v32  ;;  %v13430_v27 = vpack.c.bf16 %v3371_v41, %v3366_v62  ;;  %v13272_v43 = vpack.c.bf16 %v3380_v20, %v3375_v60  ;;  %v3420_v32 = vld [vmem:[%s23910_s27 + $0xa80] sm:$0xff]  ;;  %v3417_v56 = vld [vmem:[%s23910_s27 + $0xa68] sm:$0xff]  ;;  %v3414_v41 = vld [vmem:[%s23910_s27 + $0xa50] sm:$0xff] }
 0x68a   :  { %v3419_v60 = vld [vmem:[%s23910_s27 + $0xa78] sm:$0xff]  ;;  %v18705_v20 = vmax.f32 %v18295_v37, %v3076_v38  ;;  %v3430_v37 = vld [vmem:[%s23910_s27 + $0xad0] sm:$0xff] }
 0x68b   :  { %v3462_v38 = vld [vmem:[%s23910_s27 + $0xbd0] sm:$0xff] }
 0x68c   :  { %13255 = vmatpush1.bf16.msra.mxu0 %v13254_v46  ;;  %13415 = vmatpush1.bf16.msra.mxu1 %v13414_v51  ;;  %v3385_v46 = vld [vmem:[%s23910_s27 + $0x968] sm:$0xff]  ;;  %v3390_v51 = vld [vmem:[%s23910_s27 + $0x990] sm:$0xff] }
 0x68d   :  { %13257 = vmatprep.subr.bf16.mxu0 %v13256_v59  ;;  %13417 = vmatprep.subr.bf16.mxu1 %v13416_v6  ;;  %v13274_v59 = vpack.c.bf16 %v3379_v47, %v3374_v55  ;;  %v13434_v6 = vpack.c.bf16 %v3381_v42, %v3376_v9  ;;  %v13276_v7 = vpack.c.bf16 %v3390_v51, %v3385_v46  ;;  %v3425_v55 = vld [vmem:[%s23910_s27 + $0xaa8] sm:$0xff]  ;;  %v3427_v47 = vld [vmem:[%s23910_s27 + $0xab8] sm:$0xff]  ;;  %v3424_v42 = vld [vmem:[%s23910_s27 + $0xaa0] sm:$0xff] }
 0x68e   :  { %v3429_v46 = vld [vmem:[%s23910_s27 + $0xac8] sm:$0xff]  ;;  %v13292_v51 = vpack.c.bf16 %v3430_v37, %v3425_v55 }
 0x690   :  { %13259 = vmatpush1.bf16.msra.mxu0 %v13258_v18  ;;  %13419 = vmatpush1.bf16.msra.mxu1 %v13418_v4  ;;  %v3395_v18 = vld [vmem:[%s23910_s27 + $0x9b8] sm:$0xff]  ;;  %v3400_v4 = vld [vmem:[%s23910_s27 + $0x9e0] sm:$0xff] }
 0x691   :  { %13261 = vmatprep.subr.bf16.mxu0 %v13260_v8  ;;  %13421 = vmatprep.subr.bf16.mxu1 %v13420_v21  ;;  %v13278_v8 = vpack.c.bf16 %v3389_v1, %v3384_v30  ;;  %v13438_v21 = vpack.c.bf16 %v3391_v14, %v3386_v13  ;;  %v13280_v22 = vpack.c.bf16 %v3400_v4, %v3395_v18  ;;  %v3440_v30 = vld [vmem:[%s23910_s27 + $0xb20] sm:$0xff]  ;;  %v3437_v1 = vld [vmem:[%s23910_s27 + $0xb08] sm:$0xff]  ;;  %v3434_v14 = vld [vmem:[%s23910_s27 + $0xaf0] sm:$0xff] }
 0x692   :  { %v3439_v18 = vld [vmem:[%s23910_s27 + $0xb18] sm:$0xff] }
 0x694   :  { %13263 = vmatpush1.bf16.msra.mxu0 %v13262_v25  ;;  %13423 = vmatpush1.bf16.msra.mxu1 %v13422_v57  ;;  %v3405_v25 = vld [vmem:[%s23910_s27 + $0xa08] sm:$0xff]  ;;  %v3410_v57 = vld [vmem:[%s23910_s27 + $0xa30] sm:$0xff] }
 0x695   :  { %13265 = vmatprep.subr.bf16.mxu0 %v13264_v29  ;;  %13425 = vmatprep.subr.bf16.mxu1 %v13424_v31  ;;  %v13282_v29 = vpack.c.bf16 %v3399_v15, %v3394_v10  ;;  %v13442_v31 = vpack.c.bf16 %v3401_v28, %v3396_v24  ;;  %v13284_v61 = vpack.c.bf16 %v3410_v57, %v3405_v25  ;;  %v3450_v10 = vld [vmem:[%s23910_s27 + $0xb70] sm:$0xff]  ;;  %v3447_v15 = vld [vmem:[%s23910_s27 + $0xb58] sm:$0xff]  ;;  %v3444_v28 = vld [vmem:[%s23910_s27 + $0xb40] sm:$0xff] }
 0x696   :  { %v3449_v25 = vld [vmem:[%s23910_s27 + $0xb68] sm:$0xff] }
 0x698   :  { %13267 = vmatpush1.bf16.msra.mxu0 %v13266_v3  ;;  %13427 = vmatpush1.bf16.msra.mxu1 %v13426_v12  ;;  %v3411_v3 = vld [vmem:[%s23910_s27 + $0xa38] sm:$0xff] }
 0x699   :  { %13269 = vmatprep.subr.bf16.mxu0 %v13268_v53  ;;  %13429 = vmatprep.subr.bf16.mxu1 %v13428_v35  ;;  %v3415_v12 = vld [vmem:[%s23910_s27 + $0xa58] sm:$0xff]  ;;  %v3422_v53 = vld [vmem:[%s23910_s27 + $0xa90] sm:$0xff]  ;;  %v13286_v35 = vpack.c.bf16 %v3409_v2, %v3404_v50  ;;  %v13446_v62 = vpack.c.bf16 %v3411_v3, %v3406_v63  ;;  %v3460_v50 = vld [vmem:[%s23910_s27 + $0xbc0] sm:$0xff] }
 0x69a   :  { %v13288_v58 = vpack.c.bf16 %v3420_v32, %v3415_v12  ;;  %v13448_v0 = vpack.c.bf16 %v3422_v53, %v3417_v56  ;;  %v3457_v2 = vld [vmem:[%s23910_s27 + $0xba8] sm:$0xff]  ;;  %v3454_v63 = vld [vmem:[%s23910_s27 + $0xb90] sm:$0xff]  ;;  %v3459_v3 = vld [vmem:[%s23910_s27 + $0xbb8] sm:$0xff] }
 0x69b   :  { %v13464_v32 = vpack.c.bf16 %v3462_v38, %v3457_v2  ;;  %v3456_v56 = vld [vmem:[%s23910_s27 + $0xba0] sm:$0xff]  ;;  %v3461_v53 = vld [vmem:[%s23910_s27 + $0xbc8] sm:$0xff]  ;;  %v3258_v2 = vld [vmem:[%s23910_s27 + $0x570] sm:$0xff] }
 0x69c   :  { %13271 = vmatpush1.bf16.msra.mxu0 %v13270_v16  ;;  %13431 = vmatpush1.bf16.msra.mxu1 %v13430_v27  ;;  %v3416_v16 = vld [vmem:[%s23910_s27 + $0xa60] sm:$0xff]  ;;  %v3421_v27 = vld [vmem:[%s23910_s27 + $0xa88] sm:$0xff] }
 0x69d   :  { %13273 = vmatprep.subr.bf16.mxu0 %v13272_v43  ;;  %13433 = vmatprep.subr.bf16.mxu1 %v13432_v49  ;;  %v3432_v43 = vld [vmem:[%s23910_s27 + $0xae0] sm:$0xff]  ;;  %v13290_v49 = vpack.c.bf16 %v3419_v60, %v3414_v41  ;;  %v13450_v9 = vpack.c.bf16 %v3421_v27, %v3416_v16  ;;  %v3467_v41 = vld [vmem:[%s23910_s27 + $0xbf8] sm:$0xff]  ;;  %v3469_v27 = vld [vmem:[%s23910_s27 + $0xc08] sm:$0xff] }
 0x69e   :  { %v13452_v52 = vpack.c.bf16 %v3432_v43, %v3427_v47  ;;  %v3472_v60 = vld [vmem:[%s23910_s27 + $0xc20] sm:$0xff]  ;;  %v3466_v47 = vld [vmem:[%s23910_s27 + $0xbf0] sm:$0xff]  ;;  %v3471_v43 = vld [vmem:[%s23910_s27 + $0xc18] sm:$0xff] }
 0x69f   :  { %v3464_v16 = vld [vmem:[%s23910_s27 + $0xbe0] sm:$0xff]  ;;  %v13468_v37 = vpack.c.bf16 %v3472_v60, %v3467_v41  ;;  %v3198_v60 = vld [vmem:[%s23910_s27 + $0x390] sm:$0xff] }
 0x6a0   :  { %13275 = vmatpush1.bf16.msra.mxu0 %v13274_v59  ;;  %13435 = vmatpush1.bf16.msra.mxu1 %v13434_v6  ;;  %v3431_v59 = vld [vmem:[%s23910_s27 + $0xad8] sm:$0xff]  ;;  %v3268_v41 = vld [vmem:[%s23910_s27 + $0x5c0] sm:$0xff] }
 0x6a1   :  { %13277 = vmatprep.subr.bf16.mxu0 %v13276_v7  ;;  %13437 = vmatprep.subr.bf16.mxu1 %v13436_v45  ;;  %v3435_v6 = vld [vmem:[%s23910_s27 + $0xaf8] sm:$0xff]  ;;  %v3442_v7 = vld [vmem:[%s23910_s27 + $0xb30] sm:$0xff]  ;;  %v13294_v45 = vpack.c.bf16 %v3429_v46, %v3424_v42  ;;  %v13454_v13 = vpack.c.bf16 %v3431_v59, %v3426_v36  ;;  %v3477_v42 = vld [vmem:[%s23910_s27 + $0xc48] sm:$0xff] }
 0x6a2   :  { %v13296_v4 = vpack.c.bf16 %v3440_v30, %v3435_v6  ;;  %v13456_v34 = vpack.c.bf16 %v3442_v7, %v3437_v1  ;;  %v3482_v46 = vld [vmem:[%s23910_s27 + $0xc70] sm:$0xff]  ;;  %v3479_v59 = vld [vmem:[%s23910_s27 + $0xc58] sm:$0xff]  ;;  %v3476_v1 = vld [vmem:[%s23910_s27 + $0xc40] sm:$0xff] }
 0x6a3   :  { %v3474_v36 = vld [vmem:[%s23910_s27 + $0xc30] sm:$0xff]  ;;  %v13472_v30 = vpack.c.bf16 %v3482_v46, %v3477_v42  ;;  %v3481_v7 = vld [vmem:[%s23910_s27 + $0xc68] sm:$0xff]  ;;  %v3283_v42 = vld [vmem:[%s23910_s27 + $0x638] sm:$0xff] }
 0x6a4   :  { %13279 = vmatpush1.bf16.msra.mxu0 %v13278_v8  ;;  %13439 = vmatpush1.bf16.msra.mxu1 %v13438_v21  ;;  %v3441_v8 = vld [vmem:[%s23910_s27 + $0xb28] sm:$0xff]  ;;  %v3208_v46 = vld [vmem:[%s23910_s27 + $0x3e0] sm:$0xff] }
 0x6a5   :  { %13281 = vmatprep.subr.bf16.mxu0 %v13280_v22  ;;  %13441 = vmatprep.subr.bf16.mxu1 %v13440_v23  ;;  %v3445_v21 = vld [vmem:[%s23910_s27 + $0xb48] sm:$0xff]  ;;  %v3452_v22 = vld [vmem:[%s23910_s27 + $0xb80] sm:$0xff]  ;;  %v13298_v23 = vpack.c.bf16 %v3439_v18, %v3434_v14  ;;  %v13458_v24 = vpack.c.bf16 %v3441_v8, %v3436_v26  ;;  %v3078_v26 = vmul.f32 0.2, %v18329_v11 }
 0x6a6   :  { %v13300_v57 = vpack.c.bf16 %v3450_v10, %v3445_v21  ;;  %v13460_v40 = vpack.c.bf16 %v3452_v22, %v3447_v15  ;;  %v3328_v14 = vld [vmem:[%s23910_s27 + $0x7a0] sm:$0xff]  ;;  %v3333_v18 = vld [vmem:[%s23910_s27 + $0x7c8] sm:$0xff] }
 0x6a7   :  { %v13508_v21 = vpack.c.bf16 %v3333_v18, %v3328_v14  ;;  %v3088_v10 = vld [vmem:[%s23910_s27 + $0x20] sm:$0xff]  ;;  %v3093_v15 = vld [vmem:[%s23910_s27 + $0x48] sm:$0xff]  ;;  %v3218_v18 = vld [vmem:[%s23910_s27 + $0x430] sm:$0xff] }
 0x6a8   :  { %13283 = vmatpush1.bf16.msra.mxu0 %v13282_v29  ;;  %13443 = vmatpush1.bf16.msra.mxu1 %v13442_v31  ;;  %v3451_v29 = vld [vmem:[%s23910_s27 + $0xb78] sm:$0xff]  ;;  %v3248_v22 = vld [vmem:[%s23910_s27 + $0x520] sm:$0xff]  ;;  %v3293_v14 = vld [vmem:[%s23910_s27 + $0x688] sm:$0xff] }
 0x6a9   :  { %13285 = vmatprep.subr.bf16.mxu0 %v13284_v61  ;;  %13445 = vmatprep.subr.bf16.mxu1 %v13444_v39  ;;  %v3455_v31 = vld [vmem:[%s23910_s27 + $0xb98] sm:$0xff]  ;;  %v13302_v61 = vpack.c.bf16 %v3449_v25, %v3444_v28  ;;  %v13462_v39 = vpack.c.bf16 %v3451_v29, %v3446_v44  ;;  %v3338_v25 = vld [vmem:[%s23910_s27 + $0x7f0] sm:$0xff]  ;;  %v18899_v44 = vmax.f32 %v18329_v11, %v3078_v26 }
 0x6aa   :  { %v13304_v12 = vpack.c.bf16 %v3460_v50, %v3455_v31  ;;  %v3183_v28 = vld [vmem:[%s23910_s27 + $0x318] sm:$0xff]  ;;  %v3098_v31 = vld [vmem:[%s23910_s27 + $0x70] sm:$0xff] }
 0x6ab   :  { %3620 = vmatmul.mubr.f32.vlgmr.msra.gmra.mrb[26].mxu0 %v18705_v20  ;;  %3833 = vmatmul.mubr.f32.vlgmr.msra.gmra.mrb[22].mxu1 %v18705_v20  ;;  %v3103_v50 = vld [vmem:[%s23910_s27 + $0x98] sm:$0xff] }
 0x6ac   :  { %13287 = vmatpush1.bf16.msra.mxu0 %v13286_v35  ;;  %13447 = vmatpush1.bf16.msra.mxu1 %v13446_v62  ;;  %v3465_v35 = vld [vmem:[%s23910_s27 + $0xbe8] sm:$0xff]  ;;  %v3470_v62 = vld [vmem:[%s23910_s27 + $0xc10] sm:$0xff]  ;;  %v3263_v11 = vld [vmem:[%s23910_s27 + $0x598] sm:$0xff] }
 0x6ad   :  { %13289 = vmatprep.subr.bf16.mxu0 %v13288_v58  ;;  %13449 = vmatprep.subr.bf16.mxu1 %v13448_v0  ;;  %v13306_v58 = vpack.c.bf16 %v3459_v3, %v3454_v63  ;;  %v13466_v0 = vpack.c.bf16 %v3461_v53, %v3456_v56  ;;  %v13308_v55 = vpack.c.bf16 %v3470_v62, %v3465_v35  ;;  %v3193_v63 = vld [vmem:[%s23910_s27 + $0x368] sm:$0xff]  ;;  %v3348_v3 = vld [vmem:[%s23910_s27 + $0x840] sm:$0xff]  ;;  %v3383_v26 = vld [vmem:[%s23910_s27 + $0x958] sm:$0xff] }
 0x6ae   :  { %3690 = vmatprep.mubr.f32.mxu0 %v23873_v19  ;;  %3903 = vmatprep.mubr.f32.mxu1 %v23873_v19  ;;  %v13514_v56 = vpack.c.bf16 %v3263_v11, %v3258_v2  ;;  %v3108_v35 = vld [vmem:[%s23910_s27 + $0xc0] sm:$0xff]  ;;  %v3113_v62 = vld [vmem:[%s23910_s27 + $0xe8] sm:$0xff] }
 0x6af   :  { %v3308_v11 = vld [vmem:[%s23910_s27 + $0x700] sm:$0xff] }
 0x6b0   :  { %13291 = vmatpush1.bf16.msra.mxu0 %v13290_v49  ;;  %13451 = vmatpush1.bf16.msra.mxu1 %v13450_v9  ;;  %v3475_v49 = vld [vmem:[%s23910_s27 + $0xc38] sm:$0xff]  ;;  %v3480_v9 = vld [vmem:[%s23910_s27 + $0xc60] sm:$0xff] }
 0x6b1   :  { %13293 = vmatprep.subr.bf16.mxu0 %v13292_v51  ;;  %13453 = vmatprep.subr.bf16.mxu1 %v13452_v52  ;;  %v13310_v51 = vpack.c.bf16 %v3469_v27, %v3464_v16  ;;  %v13470_v52 = vpack.c.bf16 %v3471_v43, %v3466_v47  ;;  %v13312_v6 = vpack.c.bf16 %v3480_v9, %v3475_v49  ;;  %v3363_v16 = vld [vmem:[%s23910_s27 + $0x8b8] sm:$0xff]  ;;  %v3118_v47 = vld [vmem:[%s23910_s27 + $0x110] sm:$0xff] }
 0x6b2   :  { %v13486_v27 = vpack.c.bf16 %v3113_v62, %v3108_v35  ;;  %v3123_v43 = vld [vmem:[%s23910_s27 + $0x138] sm:$0xff]  ;;  %v3278_v49 = vld [vmem:[%s23910_s27 + $0x610] sm:$0xff] }
 0x6b4   :  { %13295 = vmatpush1.bf16.msra.mxu0 %v13294_v45  ;;  %13455 = vmatpush1.bf16.msra.mxu1 %v13454_v13  ;;  %v3168_v45 = vld [vmem:[%s23910_s27 + $0x2a0] sm:$0xff]  ;;  %v3173_v13 = vld [vmem:[%s23910_s27 + $0x2c8] sm:$0xff] }
 0x6b5   :  { %13297 = vmatprep.subr.bf16.mxu0 %v13296_v4  ;;  %13457 = vmatprep.subr.bf16.mxu1 %v13456_v34  ;;  %v13314_v4 = vpack.c.bf16 %v3479_v59, %v3474_v36  ;;  %v13474_v34 = vpack.c.bf16 %v3481_v7, %v3476_v1  ;;  %v13476_v8 = vpack.c.bf16 %v3173_v13, %v3168_v45  ;;  %v3373_v36 = vld [vmem:[%s23910_s27 + $0x908] sm:$0xff]  ;;  %v3128_v1 = vld [vmem:[%s23910_s27 + $0x160] sm:$0xff] }
 0x6b6   :  { %v13490_v59 = vpack.c.bf16 %v3123_v43, %v3118_v47  ;;  %v3133_v7 = vld [vmem:[%s23910_s27 + $0x188] sm:$0xff]  ;;  %v3288_v45 = vld [vmem:[%s23910_s27 + $0x660] sm:$0xff] }
 0x6b7   :  { %v3413_v47 = vld [vmem:[%s23910_s27 + $0xa48] sm:$0xff] }
 0x6b8   :  { %13299 = vmatpush1.bf16.msra.mxu0 %v13298_v23  ;;  %13459 = vmatpush1.bf16.msra.mxu1 %v13458_v24  ;;  %v3253_v23 = vld [vmem:[%s23910_s27 + $0x548] sm:$0xff]  ;;  %v3178_v24 = vld [vmem:[%s23910_s27 + $0x2f0] sm:$0xff] }
 0x6b9   :  { %13301 = vmatprep.subr.bf16.mxu0 %v13300_v57  ;;  %13461 = vmatprep.subr.bf16.mxu1 %v13460_v40  ;;  %v3343_v57 = vld [vmem:[%s23910_s27 + $0x818] sm:$0xff]  ;;  %v13478_v40 = vpack.c.bf16 %v3093_v15, %v3088_v10  ;;  %v13510_v29 = vpack.c.bf16 %v3253_v23, %v3248_v22  ;;  %v13480_v38 = vpack.c.bf16 %v3183_v28, %v3178_v24  ;;  %v3138_v15 = vld [vmem:[%s23910_s27 + $0x1b0] sm:$0xff] }
 0x6ba   :  { %v3143_v22 = vld [vmem:[%s23910_s27 + $0x1d8] sm:$0xff]  ;;  %v3298_v23 = vld [vmem:[%s23910_s27 + $0x6b0] sm:$0xff] }
 0x6bb   :  { %v3303_v28 = vld [vmem:[%s23910_s27 + $0x6d8] sm:$0xff] }
 0x6bc   :  { %13303 = vmatpush1.bf16.msra.mxu0 %v13302_v61  ;;  %13463 = vmatpush1.bf16.msra.mxu1 %v13462_v39  ;;  %v13512_v61 = vpack.c.bf16 %v3343_v57, %v3338_v25  ;;  %v3188_v39 = vld [vmem:[%s23910_s27 + $0x340] sm:$0xff]  ;;  %v3233_v57 = vld [vmem:[%s23910_s27 + $0x4a8] sm:$0xff] }
 0x6bd   :  { %13305 = vmatprep.subr.bf16.mxu0 %v13304_v12  ;;  %13465 = vmatprep.subr.bf16.mxu1 %v13464_v32  ;;  %v3353_v12 = vld [vmem:[%s23910_s27 + $0x868] sm:$0xff]  ;;  %v13482_v32 = vpack.c.bf16 %v3103_v50, %v3098_v31  ;;  %v13484_v53 = vpack.c.bf16 %v3193_v63, %v3188_v39  ;;  %v3228_v25 = vld [vmem:[%s23910_s27 + $0x480] sm:$0xff]  ;;  %v13498_v31 = vpack.c.bf16 %v3143_v22, %v3138_v15  ;;  %v3443_v15 = vld [vmem:[%s23910_s27 + $0xb38] sm:$0xff] }
 0x6be   :  { %v13530_v50 = vpack.c.bf16 %v3303_v28, %v3298_v23  ;;  %v13500_v2 = vpack.c.bf16 %v3233_v57, %v3228_v25  ;;  %v3313_v63 = vld [vmem:[%s23910_s27 + $0x728] sm:$0xff]  ;;  %v4162_v28 = vld [vmem:[%s23850_s8 + $0x38] sm:$0xff]  ;;  %v3448_v57 = vld [vmem:[%s23910_s27 + $0xb60] sm:$0xff] }
 0x6bf   :  { %v13534_v35 = vpack.c.bf16 %v3313_v63, %v3308_v11  ;;  %v3473_v11 = vld [vmem:[%s23910_s27 + $0xc28] sm:$0xff]  ;;  %v3478_v63 = vld [vmem:[%s23910_s27 + $0xc50] sm:$0xff] }
 0x6c0   :  { %13307 = vmatpush1.bf16.msra.mxu0 %v13306_v58  ;;  %13467 = vmatpush1.bf16.msra.mxu1 %v13466_v0  ;;  %v3203_v58 = vld [vmem:[%s23910_s27 + $0x3b8] sm:$0xff]  ;;  %v3358_v0 = vld [vmem:[%s23910_s27 + $0x890] sm:$0xff] }
 0x6c1   :  { %13309 = vmatprep.subr.bf16.mxu0 %v13308_v55  ;;  %13469 = vmatprep.subr.bf16.mxu1 %v13468_v37  ;;  %v13488_v37 = vpack.c.bf16 %v3203_v58, %v3198_v60  ;;  %v13520_v9 = vpack.c.bf16 %v3363_v16, %v3358_v0  ;;  %v3318_v60 = vld [vmem:[%s23910_s27 + $0x750] sm:$0xff]  ;;  %v3323_v58 = vld [vmem:[%s23910_s27 + $0x778] sm:$0xff]  ;;  %v4171_v0 = vld [vmem:[%s23850_s8 + $0x80] sm:$0xff] }
 0x6c2   :  { %v4172_v16 = vld [vmem:[%s23850_s8 + $0x88] sm:$0xff] }
 0x6c3   :  { %v19073_v43 = vpack.c.bf16 %v4172_v16, %v4171_v0  ;;  %v4190_v0 = vld [vmem:[%s23850_s8 + $0x118] sm:$0xff]  ;;  %v4207_v16 = vld [vmem:[%s23850_s8 + $0x1a0] sm:$0xff] }
 0x6c4   :  { %13311 = vmatpush1.bf16.msra.mxu0 %v13310_v51  ;;  %13471 = vmatpush1.bf16.msra.mxu1 %v13470_v52  ;;  %v3213_v51 = vld [vmem:[%s23910_s27 + $0x408] sm:$0xff]  ;;  %v3368_v52 = vld [vmem:[%s23910_s27 + $0x8e0] sm:$0xff] }
 0x6c5   :  { %13313 = vmatprep.subr.bf16.mxu0 %v13312_v6  ;;  %13473 = vmatprep.subr.bf16.mxu1 %v13472_v30  ;;  %v13522_v6 = vpack.c.bf16 %v3283_v42, %v3278_v49  ;;  %v13492_v30 = vpack.c.bf16 %v3213_v51, %v3208_v46  ;;  %v13524_v13 = vpack.c.bf16 %v3373_v36, %v3368_v52  ;;  %v4155_v49 = vld [vmem:[%s23850_s8] sm:$0xff]  ;;  %v4173_v46 = vld [vmem:[%s23850_s8 + $0x90] sm:$0xff]  ;;  %v4174_v51 = vld [vmem:[%s23850_s8 + $0x98] sm:$0xff] }
 0x6c6   :  { %v3418_v52 = vld [vmem:[%s23910_s27 + $0xa70] sm:$0xff]  ;;  %v3423_v36 = vld [vmem:[%s23910_s27 + $0xa98] sm:$0xff] }
 0x6c8   :  { %13315 = vmatpush1.bf16.msra.mxu0 %v13314_v4  ;;  %13475 = vmatpush1.bf16.msra.mxu1 %v13474_v34  ;;  %v3223_v4 = vld [vmem:[%s23910_s27 + $0x458] sm:$0xff]  ;;  %v3378_v34 = vld [vmem:[%s23910_s27 + $0x930] sm:$0xff] }
 0x6c9   :  { %13477 = vmatprep.subr.bf16.mxu0 %v13476_v8  ;;  %13509 = vmatprep.subr.bf16.mxu1 %v13508_v21  ;;  %v13494_v8 = vpack.c.bf16 %v3133_v7, %v3128_v1  ;;  %v13526_v21 = vpack.c.bf16 %v3293_v14, %v3288_v45  ;;  %v13496_v10 = vpack.c.bf16 %v3223_v4, %v3218_v18  ;;  %v4158_v1 = vld [vmem:[%s23850_s8 + $0x18] sm:$0xff]  ;;  %v4175_v45 = vld [vmem:[%s23850_s8 + $0xa0] sm:$0xff] }
 0x6ca   :  { %v13528_v24 = vpack.c.bf16 %v3383_v26, %v3378_v34  ;;  %v13544_v7 = vpack.c.bf16 %v3423_v36, %v3418_v52  ;;  %v4159_v4 = vld [vmem:[%s23850_s8 + $0x20] sm:$0xff]  ;;  %v4160_v34 = vld [vmem:[%s23850_s8 + $0x28] sm:$0xff]  ;;  %v4194_v52 = vld [vmem:[%s23850_s8 + $0x138] sm:$0xff] }
 0x6cb   :  { %3691 = vmatmul.mubr.f32.vlgmr.msra.gmra.mrb[26].mxu0 %v18899_v44  ;;  %3904 = vmatmul.mubr.f32.vlgmr.msra.gmra.mrb[22].mxu1 %v18899_v44  ;;  %v19148_v22 = vpack.c.bf16 %v4160_v34, %v4159_v4 }
 0x6cc   :  { %13479 = vmatpush3.bf16.msra.mxu0 %v13478_v40  ;;  %3974 = vmatprep.mubr.f32.mxu0 %v18297_v54  ;;  %v13516_v54 = vpack.c.bf16 %v3353_v12, %v3348_v3  ;;  %v3388_v40 = vld [vmem:[%s23910_s27 + $0x980] sm:$0xff]  ;;  %v3238_v3 = vld [vmem:[%s23910_s27 + $0x4d0] sm:$0xff]  ;;  %v3243_v12 = vld [vmem:[%s23910_s27 + $0x4f8] sm:$0xff] }
 0x6cd   :  { %13511 = vmatpush3.bf16.msra.mxu1 %v13510_v29  ;;  %4044 = vmatprep.mubr.f32.mxu1 %v18333_v5  ;;  %v3273_v5 = vld [vmem:[%s23910_s27 + $0x5e8] sm:$0xff]  ;;  %v13504_v62 = vpack.c.bf16 %v3243_v12, %v3238_v3  ;;  %v3483_v3 = vld [vmem:[%s23910_s27 + $0xc78] sm:$0xff]  ;;  %v4203_v12 = vld [vmem:[%s23850_s8 + $0x180] sm:$0xff] }
 0x6ce   :  { %13481 = vmatprep.subr.bf16.mxu0 %v13480_v38  ;;  %13513 = vmatprep.subr.bf16.mxu1 %v13512_v61  ;;  %v13518_v55 = vpack.c.bf16 %v3273_v5, %v3268_v41  ;;  %v3393_v29 = vld [vmem:[%s23910_s27 + $0x9a8] sm:$0xff]  ;;  %v3148_v38 = vld [vmem:[%s23910_s27 + $0x200] sm:$0xff]  ;;  %v3158_v41 = vld [vmem:[%s23910_s27 + $0x250] sm:$0xff] }
 0x6cf   :  { %v3153_v61 = vld [vmem:[%s23910_s27 + $0x228] sm:$0xff]  ;;  %v13532_v39 = vpack.c.bf16 %v3393_v29, %v3388_v40 }
 0x6d0   :  { %13483 = vmatpush3.bf16.msra.mxu0 %v13482_v32  ;;  %v3398_v32 = vld [vmem:[%s23910_s27 + $0x9d0] sm:$0xff]  ;;  %v3453_v40 = vld [vmem:[%s23910_s27 + $0xb88] sm:$0xff] }
 0x6d1   :  { %13515 = vmatpush3.bf16.msra.mxu1 %v13514_v56  ;;  %13485 = vmatprep.subr.bf16.mxu0 %v13484_v53  ;;  %v3403_v56 = vld [vmem:[%s23910_s27 + $0x9f8] sm:$0xff]  ;;  %v13502_v53 = vpack.c.bf16 %v3153_v61, %v3148_v38  ;;  %v3468_v61 = vld [vmem:[%s23910_s27 + $0xc00] sm:$0xff] }
 0x6d2   :  { %13517 = vmatprep.subr.bf16.mxu1 %v13516_v54  ;;  %v3163_v54 = vld [vmem:[%s23910_s27 + $0x278] sm:$0xff]  ;;  %v13536_v5 = vpack.c.bf16 %v3403_v56, %v3398_v32  ;;  %v4204_v32 = vld [vmem:[%s23850_s8 + $0x188] sm:$0xff]  ;;  %v13562_v56 = vpack.c.bf16 %v3483_v3, %v3478_v63  ;;  %v4215_v63 = vld [vmem:[%s23850_s8 + $0x1e0] sm:$0xff] }
 0x6d4   :  { %13487 = vmatpush3.bf16.msra.mxu0 %v13486_v27  ;;  %v13506_v27 = vpack.c.bf16 %v3163_v54, %v3158_v41  ;;  %v4205_v41 = vld [vmem:[%s23850_s8 + $0x190] sm:$0xff]  ;;  %v4206_v54 = vld [vmem:[%s23850_s8 + $0x198] sm:$0xff] }
 0x6d5   :  { %13519 = vmatpush3.bf16.msra.mxu1 %v13518_v55  ;;  %13489 = vmatprep.subr.bf16.mxu0 %v13488_v37  ;;  %v13538_v55 = vpack.c.bf16 %v3323_v58, %v3318_v60  ;;  %v3408_v37 = vld [vmem:[%s23910_s27 + $0xa20] sm:$0xff]  ;;  %v19216_v60 = vpack.c.bf16 %v4206_v54, %v4205_v41  ;;  %v4189_v58 = vld [vmem:[%s23850_s8 + $0x110] sm:$0xff]  ;;  %v4200_v54 = vld [vmem:[%s23850_s8 + $0x168] sm:$0xff] }
 0x6d6   :  { %13521 = vmatprep.subr.bf16.mxu1 %v13520_v9  ;;  %v4156_v9 = vld [vmem:[%s23850_s8 + $0x8] sm:$0xff]  ;;  %v13541_v42 = vpack.c.bf16 %v3413_v47, %v3408_v37  ;;  %v4191_v47 = vld [vmem:[%s23850_s8 + $0x120] sm:$0xff] }
 0x6d7   :  { %v4199_v41 = vld [vmem:[%s23850_s8 + $0x160] sm:$0xff] }
 0x6d8   :  { %13491 = vmatpush3.bf16.msra.mxu0 %v13490_v59  ;;  %v19095_v59 = vpack.c.bf16 %v4156_v9, %v4155_v49  ;;  %v4192_v49 = vld [vmem:[%s23850_s8 + $0x128] sm:$0xff]  ;;  %v4210_v9 = vld [vmem:[%s23850_s8 + $0x1b8] sm:$0xff] }
 0x6d9   :  { %13523 = vmatpush3.bf16.msra.mxu1 %v13522_v6  ;;  %13493 = vmatprep.subr.bf16.mxu0 %v13492_v30  ;;  %v19098_v6 = vpack.c.bf16 %v4174_v51, %v4173_v46  ;;  %v4157_v30 = vld [vmem:[%s23850_s8 + $0x10] sm:$0xff] }
 0x6da   :  { %13525 = vmatprep.subr.bf16.mxu1 %v13524_v13  ;;  %v3428_v13 = vld [vmem:[%s23910_s27 + $0xac0] sm:$0xff]  ;;  %v19123_v14 = vpack.c.bf16 %v4158_v1, %v4157_v30  ;;  %v4193_v51 = vld [vmem:[%s23850_s8 + $0x130] sm:$0xff]  ;;  %v4180_v1 = vld [vmem:[%s23850_s8 + $0xc8] sm:$0xff] }
 0x6db   :  { %v19262_v36 = vpack.c.bf16 %v4194_v52, %v4193_v51  ;;  %v4179_v30 = vld [vmem:[%s23850_s8 + $0xc0] sm:$0xff] }
 0x6dc   :  { %13495 = vmatpush3.bf16.msra.mxu0 %v13494_v8  ;;  %v4177_v8 = vld [vmem:[%s23850_s8 + $0xb0] sm:$0xff] }
 0x6dd   :  { %13527 = vmatpush3.bf16.msra.mxu1 %v13526_v21  ;;  %13497 = vmatprep.subr.bf16.mxu0 %v13496_v10  ;;  %v4178_v21 = vld [vmem:[%s23850_s8 + $0xb8] sm:$0xff]  ;;  %v3438_v10 = vld [vmem:[%s23910_s27 + $0xb10] sm:$0xff] }
 0x6de   :  { %13529 = vmatprep.subr.bf16.mxu1 %v13528_v24  ;;  %v19151_v23 = vpack.c.bf16 %v4178_v21, %v4177_v8  ;;  %v4161_v24 = vld [vmem:[%s23850_s8 + $0x30] sm:$0xff]  ;;  %v13550_v25 = vpack.c.bf16 %v3443_v15, %v3438_v10  ;;  %v4196_v8 = vld [vmem:[%s23850_s8 + $0x148] sm:$0xff]  ;;  %v4182_v15 = vld [vmem:[%s23850_s8 + $0xd8] sm:$0xff] }
 0x6df   :  { %v19167_v29 = vpack.c.bf16 %v4162_v28, %v4161_v24  ;;  %v4181_v10 = vld [vmem:[%s23850_s8 + $0xd0] sm:$0xff] }
 0x6e0   :  { %13499 = vmatpush3.bf16.msra.mxu0 %v13498_v31  ;;  %v13553_v31 = vpack.c.bf16 %v3453_v40, %v3448_v57  ;;  %v4213_v24 = vld [vmem:[%s23850_s8 + $0x1d0] sm:$0xff]  ;;  %v19311_v28 = vpack.c.bf16 %v4182_v15, %v4181_v10  ;;  %v4166_v40 = vld [vmem:[%s23850_s8 + $0x58] sm:$0xff] }
 0x6e1   :  { %13531 = vmatpush3.bf16.msra.mxu1 %v13530_v50  ;;  %13501 = vmatprep.subr.bf16.mxu0 %v13500_v2  ;;  %v3458_v50 = vld [vmem:[%s23910_s27 + $0xbb0] sm:$0xff]  ;;  %v3463_v2 = vld [vmem:[%s23910_s27 + $0xbd8] sm:$0xff] }
 0x6e2   :  { %13533 = vmatprep.subr.bf16.mxu1 %v13532_v39  ;;  %v13556_v38 = vpack.c.bf16 %v3463_v2, %v3458_v50  ;;  %v13559_v39 = vpack.c.bf16 %v3473_v11, %v3468_v61  ;;  %v4165_v57 = vld [vmem:[%s23850_s8 + $0x50] sm:$0xff]  ;;  %v4183_v11 = vld [vmem:[%s23850_s8 + $0xe0] sm:$0xff] }
 0x6e3   :  { %v19324_v50 = vpack.c.bf16 %v4166_v40, %v4165_v57  ;;  %v4197_v2 = vld [vmem:[%s23850_s8 + $0x150] sm:$0xff] }
 0x6e4   :  { %13503 = vmatpush3.bf16.msra.mxu0 %v13502_v53  ;;  %v19199_v53 = vpack.c.bf16 %v4204_v32, %v4203_v12  ;;  %v4216_v12 = vld [vmem:[%s23850_s8 + $0x1e8] sm:$0xff]  ;;  %v4167_v32 = vld [vmem:[%s23850_s8 + $0x60] sm:$0xff] }
 0x6e5   :  { %13535 = vmatpush3.bf16.msra.mxu1 %v13534_v35  ;;  %13505 = vmatprep.subr.bf16.mxu0 %v13504_v62  ;;  %v4187_v35 = vld [vmem:[%s23850_s8 + $0x100] sm:$0xff]  ;;  %v4188_v62 = vld [vmem:[%s23850_s8 + $0x108] sm:$0xff] }
 0x6e6   :  { %13537 = vmatprep.subr.bf16.mxu1 %v13536_v5  ;;  %v19213_v5 = vpack.c.bf16 %v4188_v62, %v4187_v35  ;;  %v19358_v35 = vpack.c.bf16 %v4216_v12, %v4215_v63 }
 0x6e8   :  { %13507 = vmatpush3.bf16.msra.mxu0 %v13506_v27  ;;  %v4208_v27 = vld [vmem:[%s23850_s8 + $0x1a8] sm:$0xff] }
 0x6e9   :  { %13539 = vmatpush3.bf16.msra.mxu1 %v13538_v55  ;;  %13540 = vmatprep.subr.bf16.mxu0 %v23871_v48  ;;  %v19232_v55 = vpack.c.bf16 %v4190_v0, %v4189_v58  ;;  %v19235_v37 = vpack.c.bf16 %v4208_v27, %v4207_v16  ;;  %v19369_v58 = vpack.c.bf16 %v4200_v54, %v4199_v41  ;;  %v4185_v0 = vld [vmem:[%s23850_s8 + $0xf0] sm:$0xff]  ;;  %v4186_v16 = vld [vmem:[%s23850_s8 + $0xf8] sm:$0xff] }
 0x6ea   :  { %13565 = vmatprep.subr.bf16.mxu1 %v19073_v43  ;;  %v4217_v27 = vld [vmem:[%s23850_s8 + $0x1f0] sm:$0xff] }
 0x6eb   :  { %3975 = vmatmul.mubr.f32.vlgmr.msra.gmra.mrb[28].mxu0 %v18306_v33  ;;  %v4176_v33 = vld [vmem:[%s23850_s8 + $0xa8] sm:$0xff] }
 0x6ec   :  { %4045 = vmatmul.mubr.f32.vlgmr.msra.gmra.mrb[24].mxu1 %v18705_v20  ;;  %13542 = vmatpush3.bf16.msra.mxu0 %v13541_v42  ;;  %v3433_v20 = vld [vmem:[%s23910_s27 + $0xae8] sm:$0xff]  ;;  %v19126_v18 = vpack.c.bf16 %v4176_v33, %v4175_v45  ;;  %v19250_v42 = vpack.c.bf16 %v4192_v49, %v4191_v47  ;;  %v19275_v45 = vpack.c.bf16 %v4180_v1, %v4179_v30  ;;  %v4218_v49 = vld [vmem:[%s23850_s8 + $0x1f8] sm:$0xff]  ;;  %v4201_v30 = vld [vmem:[%s23850_s8 + $0x170] sm:$0xff] }
 0x6ed   :  { %13543 = vmatprep.subr.bf16.mxu0 %v23871_v48  ;;  %11939 = vmatprep.mubr.msk.f32.mxu0 %vm15304_vm1, %v23873_v19  ;;  %v13547_v26 = vpack.c.bf16 %v3433_v20, %v3428_v13  ;;  %v4212_v33 = vld [vmem:[%s23850_s8 + $0x1c8] sm:$0xff]  ;;  %v4163_v13 = vld [vmem:[%s23850_s8 + $0x40] sm:$0xff]  ;;  %v19383_v47 = vpack.c.bf16 %v4186_v16, %v4185_v0  ;;  %v19394_v51 = vpack.c.bf16 %v4218_v49, %v4217_v27  ;;  %v4202_v1 = vld [vmem:[%s23850_s8 + $0x178] sm:$0xff] }
 0x6ee   :  { %13567 = vmatpush3.bf16.msra.mxu1 %v19095_v59  ;;  %v4164_v20 = vld [vmem:[%s23850_s8 + $0x48] sm:$0xff] }
 0x6ef   :  { %13569 = vmatprep.subr.bf16.mxu1 %v19098_v6  ;;  %v19288_v34 = vpack.c.bf16 %v4164_v20, %v4163_v13 }
 0x6f0   :  { %13545 = vmatpush3.bf16.msra.mxu0 %v13544_v7  ;;  %v4211_v7 = vld [vmem:[%s23850_s8 + $0x1c0] sm:$0xff] }
 0x6f1   :  { %13546 = vmatprep.subr.bf16.mxu0 %v23871_v48  ;;  %v19286_v4 = vpack.c.bf16 %v4212_v33, %v4211_v7  ;;  %v19405_v7 = vpack.c.bf16 %v4202_v1, %v4201_v30  ;;  %v4220_v30 = vld [vmem:[%s23850_s8 + $0x208] sm:$0xff] }
 0x6f2   :  { %13571 = vmatpush3.bf16.msra.mxu1 %v19123_v14 }
 0x6f3   :  { %13573 = vmatprep.subr.bf16.mxu1 %v19126_v18 }
 0x6f4   :  { %13548 = vmatpush3.bf16.msra.mxu0 %v13547_v26  ;;  %v4195_v26 = vld [vmem:[%s23850_s8 + $0x140] sm:$0xff] }
 0x6f5   :  { %13549 = vmatprep.subr.bf16.mxu0 %v23871_v48  ;;  %v19297_v21 = vpack.c.bf16 %v4196_v8, %v4195_v26 }
 0x6f6   :  { %13575 = vmatpush3.bf16.msra.mxu1 %v19148_v22 }
 0x6f7   :  { %13577 = vmatprep.subr.bf16.mxu1 %v19151_v23 }
 0x6f8   :  { %13551 = vmatpush3.bf16.msra.mxu0 %v13550_v25  ;;  %v4214_v25 = vld [vmem:[%s23850_s8 + $0x1d8] sm:$0xff] }
 0x6f9   :  { %13552 = vmatprep.subr.bf16.mxu0 %v23871_v48 }
 0x6fa   :  { %13579 = vmatpush3.bf16.msra.mxu1 %v19167_v29 }
 0x6fb   :  { %13581 = vmatprep.subr.bf16.mxu1 %v19275_v45 }
 0x6fc   :  { %13554 = vmatpush3.bf16.msra.mxu0 %v13553_v31  ;;  %v19322_v31 = vpack.c.bf16 %v4214_v25, %v4213_v24 }
 0x6fd   :  { %13555 = vmatprep.subr.bf16.mxu0 %v23871_v48 }
 0x6fe   :  { %13583 = vmatpush3.bf16.msra.mxu1 %v19288_v34 }
 0x6ff   :  { %13585 = vmatprep.subr.bf16.mxu1 %v19311_v28 }
 0x700   :  { %13557 = vmatpush3.bf16.msra.mxu0 %v13556_v38  ;;  %v4198_v38 = vld [vmem:[%s23850_s8 + $0x158] sm:$0xff] }
 0x701   :  { %13558 = vmatprep.subr.bf16.mxu0 %v23871_v48  ;;  %v19333_v61 = vpack.c.bf16 %v4198_v38, %v4197_v2 }
 0x702   :  { %13587 = vmatpush3.bf16.msra.mxu1 %v19324_v50 }
 0x704   :  { %13560 = vmatpush3.bf16.msra.mxu0 %v13559_v39  ;;  %v4184_v39 = vld [vmem:[%s23850_s8 + $0xe8] sm:$0xff] }
 0x705   :  { %13561 = vmatprep.subr.bf16.mxu0 %v23871_v48  ;;  %v19347_v3 = vpack.c.bf16 %v4184_v39, %v4183_v11 }
 0x707   :  { %13589 = vmatprep.subr.bf16.mxu1 %v19347_v3 }
 0x708   :  { %13563 = vmatpush3.bf16.msra.mxu0 %v13562_v56  ;;  %v4168_v56 = vld [vmem:[%s23850_s8 + $0x68] sm:$0xff] }
 0x709   :  { %13597 = vmatprep.subr.bf16.mxu0 %v19199_v53  ;;  %v19360_v62 = vpack.c.bf16 %v4168_v56, %v4167_v32 }
 0x70b   :  { %11940 = vmatmul.mubr.f32.vlgmr.msra.gmra.mrb[30].mxu0 %v18899_v44  ;;  %v4209_v44 = vld [vmem:[%s23850_s8 + $0x1b0] sm:$0xff]  ;;  %13591 = vmatpush3.bf16.msra.mxu1 %v19360_v62 }
 0x70c   :  { %13599 = vmatpush3.bf16.msra.mxu0 %v19213_v5  ;;  %v19253_v46 = vpack.c.bf16 %v4210_v9, %v4209_v44  ;;  %v4169_v44 = vld [vmem:[%s23850_s8 + $0x70] sm:$0xff]  ;;  %v4170_v9 = vld [vmem:[%s23850_s8 + $0x78] sm:$0xff]  ;;  %13593 = vmatprep.subr.bf16.mxu1 %v19383_v47 }
 0x70d   :  { %13601 = vmatprep.subr.bf16.mxu0 %v19216_v60  ;;  %v19396_v52 = vpack.c.bf16 %v4170_v9, %v4169_v44  ;;  %v4219_v9 = vld [vmem:[%s23850_s8 + $0x200] sm:$0xff] }
 0x70f   :  { %13595 = vmatpush3.bf16.msra.mxu1 %v19396_v52 }
 0x710   :  { %13603 = vmatpush3.bf16.msra.mxu0 %v19232_v55  ;;  %13628 = vmatprep.subr.bf16.mxu1 %v23871_v48 }
 0x711   :  { %13605 = vmatprep.subr.bf16.mxu0 %v19235_v37 }
 0x714   :  { %13607 = vmatpush3.bf16.msra.mxu0 %v19250_v42 }
 0x715   :  { %13609 = vmatprep.subr.bf16.mxu0 %v19253_v46 }
 0x718   :  { %13611 = vmatpush3.bf16.msra.mxu0 %v19262_v36 }
 0x719   :  { %13613 = vmatprep.subr.bf16.mxu0 %v19286_v4 }
 0x71c   :  { %13615 = vmatpush3.bf16.msra.mxu0 %v19297_v21 }
 0x71d   :  { %13617 = vmatprep.subr.bf16.mxu0 %v19322_v31 }
 0x720   :  { %13619 = vmatpush3.bf16.msra.mxu0 %v19333_v61 }
 0x721   :  { %13621 = vmatprep.subr.bf16.mxu0 %v19358_v35 }
 0x724   :  { %13623 = vmatpush3.bf16.msra.mxu0 %v19369_v58 }
 0x725   :  { %13625 = vmatprep.subr.bf16.mxu0 %v19394_v51 }
 0x728   :  { %13627 = vmatpush3.bf16.msra.mxu0 %v19405_v7 }
 0x79e   :  { %v19411_v33 = vpop.f32.mrb[26].mxu0  ;;  %v19413_v13 = vpop.f32.mrb[22].mxu1 }
 0x79f   :  { %v4120_v20 = vsel %vm1768_vm2, %v19411_v33, 0.0  ;;  %v4134_v26 = vsel %vm1768_vm2, %v19413_v13, 0.0  ;;  %v19419_v8 = vpop.f32.mrb[27].mxu0  ;;  %v19421_v10 = vpop.f32.mrb[23].mxu1 }
 0x7a0   :  { %v4121_v15 = vrot.slane %v4120_v20, 4  ;;  %v4135_v24 = vrot.slane %v4134_v26, 4  ;;  %v4127_v25 = vsel %vm1768_vm2, %v19419_v8, 0.0  ;;  %v4141_v57 = vsel %vm1768_vm2, %v19421_v10, 0.0 }
 0x7a1   :  { %v4128_v40 = vrot.slane %v4127_v25, 4  ;;  %v4142_v2 = vrot.slane %v4141_v57, 4 }
 0x7a2   :  { %v4122_v38 = vadd.f32 %v4121_v15, %v4120_v20  ;;  %v4136_v11 = vadd.f32 %v4135_v24, %v4134_v26  ;;  %v19433_v24 = vpack.c.bf16 %v4220_v30, %v4219_v9 }
 0x7a3   :  { %v4129_v39 = vadd.f32 %v4128_v40, %v4127_v25  ;;  %v4143_v63 = vadd.f32 %v4142_v2, %v4141_v57  ;;  %v4221_v40 = vld [vmem:[%s23850_s8 + $0x210] sm:$0xff]  ;;  %v4222_v2 = vld [vmem:[%s23850_s8 + $0x218] sm:$0xff] }
 0x7a4   :  { %v4123_v12 = vrot.slane %v4122_v38, 2  ;;  %v4137_v32 = vrot.slane %v4136_v11, 2 }
 0x7a5   :  { %v4130_v56 = vrot.slane %v4129_v39, 2  ;;  %v4144_v41 = vrot.slane %v4143_v63, 2 }
 0x7a6   :  { %v4124_v54 = vadd.f32 %v4123_v12, %v4122_v38  ;;  %v4138_v0 = vadd.f32 %v4137_v32, %v4136_v11  ;;  %v19442_v38 = vpack.c.bf16 %v4222_v2, %v4221_v40  ;;  %v4223_v11 = vld [vmem:[%s23850_s8 + $0x220] sm:$0xff]  ;;  %v4225_v12 = vld [vmem:[%s23850_s8 + $0x230] sm:$0xff]  ;;  %v4226_v32 = vld [vmem:[%s23850_s8 + $0x238] sm:$0xff] }
 0x7a7   :  { %v4131_v16 = vadd.f32 %v4130_v56, %v4129_v39  ;;  %v4145_v27 = vadd.f32 %v4144_v41, %v4143_v63  ;;  %v4224_v39 = vld [vmem:[%s23850_s8 + $0x228] sm:$0xff]  ;;  %v19465_v56 = vpack.c.bf16 %v4226_v32, %v4225_v12  ;;  %v4227_v41 = vld [vmem:[%s23850_s8 + $0x240] sm:$0xff]  ;;  %v4233_v2 = vld [vmem:[%s23850_s8 + $0x270] sm:$0xff] }
 0x7a8   :  { %v4125_v49 = vrot.slane %v4124_v54, 1  ;;  %v4139_v44 = vrot.slane %v4138_v0, 1  ;;  %v19455_v63 = vpack.c.bf16 %v4224_v39, %v4223_v11  ;;  %v4234_v11 = vld [vmem:[%s23850_s8 + $0x278] sm:$0xff] }
 0x7a9   :  { %v4132_v1 = vrot.slane %v4131_v16, 1  ;;  %v4146_v20 = vrot.slane %v4145_v27, 1  ;;  %v19505_v39 = vpack.c.bf16 %v4234_v11, %v4233_v2  ;;  %v4449_v11 = vld [vmem:[%s23851_s9 + $0x20] sm:$0xff] }
 0x7aa   :  { %v4126_v25 = vadd.f32 %v4125_v49, %v4124_v54  ;;  %v4140_v57 = vadd.f32 %v4139_v44, %v4138_v0  ;;  %v4228_v54 = vld [vmem:[%s23850_s8 + $0x248] sm:$0xff] }
 0x7ab   :  { %v4133_v26 = vadd.f32 %v4132_v1, %v4131_v16  ;;  %v4147_v15 = vadd.f32 %v4146_v20, %v4145_v27  ;;  %v19475_v0 = vpack.c.bf16 %v4228_v54, %v4227_v41  ;;  %v4229_v16 = vld [vmem:[%s23850_s8 + $0x250] sm:$0xff]  ;;  %v4230_v27 = vld [vmem:[%s23850_s8 + $0x258] sm:$0xff] }
 0x7ac   :  { %v19485_v30 = vpack.c.bf16 %v4230_v27, %v4229_v16 }
 0x7ad   :  { %4299 = vmatprep.mubr.f32.mxu1 %v4133_v26  ;;  %4369 = vmatprep.mubr.f32.mxu0 %v4147_v15  ;;  %v4231_v26 = vld [vmem:[%s23850_s8 + $0x260] sm:$0xff]  ;;  %v4232_v15 = vld [vmem:[%s23850_s8 + $0x268] sm:$0xff] }
 0x7ae   :  { %4300 = vmatmul.mubr.f32.vlgmr.msra.gmra.mrb[26].mxu1 %v4126_v25  ;;  %4370 = vmatmul.mubr.f32.vlgmr.msra.gmra.mrb[32].mxu0 %v4140_v57  ;;  %v19495_v40 = vpack.c.bf16 %v4232_v15, %v4231_v26  ;;  %v4451_v26 = vld [vmem:[%s23851_s9 + $0x30] sm:$0xff]  ;;  %v4445_v15 = vld [vmem:[%s23851_s9] sm:$0xff] }
 0x7af   :  { %13630 = vmatpush3.bf16.msra.mxu1 %v19433_v24  ;;  %11974 = vmatprep.mubr.msk.f32.mxu1 %vm15304_vm1, %v23873_v19 }
 0x7b0   :  { %13631 = vmatprep.subr.bf16.mxu1 %v23871_v48  ;;  %4523 = vmatprep.mubr.f32.mxu0 %v23873_v19 }
 0x7b3   :  { %13633 = vmatpush3.bf16.msra.mxu1 %v19442_v38 }
 0x7b4   :  { %13634 = vmatprep.subr.bf16.mxu1 %v23871_v48 }
 0x7b7   :  { %13636 = vmatpush3.bf16.msra.mxu1 %v19455_v63 }
 0x7b8   :  { %13637 = vmatprep.subr.bf16.mxu1 %v23871_v48 }
 0x7bb   :  { %13639 = vmatpush3.bf16.msra.mxu1 %v19465_v56 }
 0x7bc   :  { %13640 = vmatprep.subr.bf16.mxu1 %v23871_v48 }
 0x7be   :  { %v10879_v49 = vpop.f32.mrb[28].mxu0 }
 0x7bf   :  { %v10914_v44 = vpop.f32.mrb[24].mxu1  ;;  %v10880_v9 = vpop.f32.mrb[29].mxu0  ;;  %13642 = vmatpush3.bf16.msra.mxu1 %v19475_v0 }
 0x7c0   :  { %v10881_v1 = vadd.f32 %v10880_v9, %v10879_v49  ;;  %v10915_v20 = vpop.f32.mrb[25].mxu1  ;;  %13643 = vmatprep.subr.bf16.mxu1 %v23871_v48 }
 0x7c1   :  { %v10916_v25 = vadd.f32 %v10915_v20, %v10914_v44  ;;  %v4446_v20 = vld [vmem:[%s23851_s9 + $0x8] sm:$0xff] }
 0x7c3   :  { %v4047_v57 = vadd.f32 %v10916_v25, %v10881_v1  ;;  %13645 = vmatpush3.bf16.msra.mxu1 %v19485_v30  ;;  %v19525_v25 = vpack.c.bf16 %v4451_v26, %v4446_v20 }
 0x7c4   :  { %13646 = vmatprep.subr.bf16.mxu1 %v23871_v48 }
 0x7c5   :  { %13653 = vmatprep.subr.bf16.mxu0 %v19525_v25 }
 0x7c7   :  { %13648 = vmatpush3.bf16.msra.mxu1 %v19495_v40 }
 0x7c8   :  { %13649 = vmatprep.subr.bf16.mxu1 %v23871_v48 }
 0x7cb   :  { %13651 = vmatpush3.bf16.msra.mxu1 %v19505_v39 }
 0x7cc   :  { %13660 = vmatprep.subr.bf16.mxu1 %v23871_v48 }
 0x7de   :  { %v4116_v12 = vpop.f32.mrb[30].mxu0 }
 0x7df   :  { %v19510_v32 = vadd.f32 %v4116_v12, %v4047_v57  ;;  %v11941_v41 = vpop.f32.mrb[31].mxu0  ;;  %v4450_v57 = vld [vmem:[%s23851_s9 + $0x28] sm:$0xff] }
 0x7e0   :  { %v19530_v2 = vpack.c.bf16 %v4450_v57, %v4445_v15  ;;  %v4454_v12 = vld [vmem:[%s23851_s9 + $0x48] sm:$0xff]  ;;  %v4447_v57 = vld [vmem:[%s23851_s9 + $0x10] sm:$0xff] }
 0x7e1   :  { %v4148_v54 = vsel %vm1768_vm2, %v19510_v32, 0.0  ;;  %v19540_v41 = vpack.c.bf16 %v4454_v12, %v4449_v11  ;;  %v4452_v11 = vld [vmem:[%s23851_s9 + $0x38] sm:$0xff] }
 0x7e2   :  { %v4149_v16 = vrot.slane %v4148_v54, 4  ;;  %13655 = vmatpush1.bf16.msra.mxu0 %v19530_v2 }
 0x7e4   :  { %v4150_v27 = vadd.f32 %v4149_v16, %v4148_v54  ;;  %v4448_v54 = vld [vmem:[%s23851_s9 + $0x18] sm:$0xff]  ;;  %v4453_v16 = vld [vmem:[%s23851_s9 + $0x40] sm:$0xff] }
 0x7e6   :  { %v4151_v49 = vrot.slane %v4150_v27, 2 }
 0x7e8   :  { %v4152_v44 = vadd.f32 %v4151_v49, %v4150_v27  ;;  %v19549_v27 = vpack.c.bf16 %v4453_v16, %v4448_v54 }
 0x7ea   :  { %v4153_v9 = vrot.slane %v4152_v44, 1  ;;  %13657 = vmatprep.subr.bf16.mxu0 %v19549_v27 }
 0x7ec   :  { %v4154_v1 = vadd.f32 %v4153_v9, %v4152_v44 }
 0x7ee   :  { %11975 = vmatmul.mubr.f32.vlgmr.msra.gmra.mrb[28].mxu1 %v4154_v1 }
 0x7ef   :  { %11981 = vmatprep.mubr.msk.f32.mxu1 %vm15304_vm1, %v23873_v19  ;;  %13662 = vmatpush3.bf16.msra.mxu1 %v19540_v41 }
 0x7f0   :  { %13696 = vmatprep.subr.bf16.mxu1 %v19199_v53  ;;  %v19559_v53 = vpack.c.bf16 %v4452_v11, %v4447_v57 }
 0x881   :  { %v10966_v49 = vpop.f32.mrb[26].mxu1  ;;  %v11001_v44 = vpop.f32.mrb[32].mxu0 }
 0x882   :  { %v10967_v9 = vpop.f32.mrb[27].mxu1  ;;  %v11002_v1 = vpop.f32.mrb[33].mxu0 }
 0x883   :  { %v10968_v20 = vadd.f32 %v10967_v9, %v10966_v49  ;;  %v11003_v26 = vadd.f32 %v11002_v1, %v11001_v44 }
 0x885   :  { %v4372_v15 = vadd.f32 %v11003_v26, %v10968_v20 }
 0x8c1   :  { %v4441_v12 = vpop.f32.mrb[28].mxu1 }
 0x8c2   :  { %v4442_v54 = vadd.f32 %v4441_v12, %v4372_v15  ;;  %v11976_v16 = vpop.f32.mrb[29].mxu1 }
 0x8c4   :  { %10509 = vmatmul.mubr.msk.f32.vlgmr.msra.gmra.mrb[34].mxu0 %vm4455_vm4, %v4442_v54  ;;  %11982 = vmatmul.mubr.msk.f32.vlgmr.msra.gmra.mrb[30].mxu1 %vm4455_vm4, %v4442_v54 }
 0x8c5   :  { %13659 = vmatpush1.bf16.msra.mxu0 %v19559_v53  ;;  %4594 = vmatprep.mubr.f32.mxu0 %v23873_v19 }
 0x8c6   :  { %13664 = vmatprep.subr.bf16.mxu0 %v19073_v43  ;;  %13698 = vmatpush3.bf16.msra.mxu1 %v19213_v5 }
 0x8c7   :  { %13700 = vmatprep.subr.bf16.mxu1 %v19216_v60 }
 0x8c8   :  { %10510 = vmatmul.mubr.msk.f32.vlgmr.msra.gmra.mrb[36].mxu0 %vm4455_vm4, %v4442_v54 }
 0x8c9   :  { %13666 = vmatpush3.bf16.msra.mxu0 %v19095_v59 }
 0x8ca   :  { %13668 = vmatprep.subr.bf16.mxu0 %v19098_v6  ;;  %13702 = vmatpush3.bf16.msra.mxu1 %v19232_v55 }
 0x8cb   :  { %13704 = vmatprep.subr.bf16.mxu1 %v19235_v37 }
 0x8cd   :  { %13670 = vmatpush3.bf16.msra.mxu0 %v19123_v14 }
 0x8ce   :  { %13672 = vmatprep.subr.bf16.mxu0 %v19126_v18  ;;  %13706 = vmatpush3.bf16.msra.mxu1 %v19250_v42 }
 0x8cf   :  { %13708 = vmatprep.subr.bf16.mxu1 %v19253_v46 }
 0x8d1   :  { %13674 = vmatpush3.bf16.msra.mxu0 %v19148_v22 }
 0x8d2   :  { %13676 = vmatprep.subr.bf16.mxu0 %v19151_v23  ;;  %13710 = vmatpush3.bf16.msra.mxu1 %v19262_v36 }
 0x8d3   :  { %13712 = vmatprep.subr.bf16.mxu1 %v19286_v4 }
 0x8d5   :  { %13678 = vmatpush3.bf16.msra.mxu0 %v19167_v29 }
 0x8d6   :  { %13680 = vmatprep.subr.bf16.mxu0 %v19275_v45  ;;  %13714 = vmatpush3.bf16.msra.mxu1 %v19297_v21 }
 0x8d7   :  { %13716 = vmatprep.subr.bf16.mxu1 %v19322_v31 }
 0x8d9   :  { %13682 = vmatpush3.bf16.msra.mxu0 %v19288_v34 }
 0x8da   :  { %13684 = vmatprep.subr.bf16.mxu0 %v19311_v28  ;;  %13718 = vmatpush3.bf16.msra.mxu1 %v19333_v61 }
 0x8db   :  { %13720 = vmatprep.subr.bf16.mxu1 %v19358_v35 }
 0x8dd   :  { %13686 = vmatpush3.bf16.msra.mxu0 %v19324_v50 }
 0x8de   :  { %13688 = vmatprep.subr.bf16.mxu0 %v19347_v3  ;;  %13722 = vmatpush3.bf16.msra.mxu1 %v19369_v58 }
 0x8df   :  { %13724 = vmatprep.subr.bf16.mxu1 %v19394_v51 }
 0x8e1   :  { %13690 = vmatpush3.bf16.msra.mxu0 %v19360_v62 }
 0x8e2   :  { %13692 = vmatprep.subr.bf16.mxu0 %v19383_v47  ;;  %13726 = vmatpush3.bf16.msra.mxu1 %v19405_v7 }
 0x8e3   :  { %13752 = vmatprep.subr.bf16.mxu1 %v19525_v25 }
 0x8e5   :  { %13694 = vmatpush3.bf16.msra.mxu0 %v19396_v52 }
 0x8e6   :  { %13727 = vmatprep.subr.bf16.mxu0 %v23871_v48 }
 0x997   :  { %v4525_v43 = vpop.f32.mrb[34].mxu0  ;;  %v4667_v59 = vpop.f32.mrb[30].mxu1 }
 0x998   :  { %v4674_v6 = vrot.slane %v4525_v43, %v17777_v17  ;;  %v4527_v14 = vpop.f32.mrb[35].mxu0  ;;  %v11983_v18 = vpop.f32.mrb[31].mxu1  ;;  %v4690_v44 = vrot.slane %v4667_v59, %v17777_v17 }
 0x999   :  { %v4678_v22 = vrot.slane %v4527_v14, %v17777_v17 }
 0x99a   :  { %v19602_v23 = vsub.f32 %v19411_v33, %v4674_v6  ;;  %v19629_v12 = vsub.f32 %v19510_v32, %v4690_v44 }
 0x99b   :  { %v19605_v29 = vsub.f32 %v19419_v8, %v4678_v22  ;;  %v4596_v5 = vpop.f32.mrb[36].mxu0  ;;  %v5447_v22 = vld [vmem:[%s23854_s12 + $0x38] sm:$0xff] }
 0x99c   :  { %v4696_v60 = vmul.f32 %v19602_v23, %v19602_v23  ;;  %v4682_v55 = vrot.slane %v4596_v5, %v17777_v17  ;;  %v4598_v37 = vpop.f32.mrb[37].mxu0  ;;  %v4700_v59 = vmul.f32 %v19629_v12, %v19629_v12  ;;  %v5453_v5 = vld [vmem:[%s23854_s12 + $0x68] sm:$0xff] }
 0x99d   :  { %v4697_v42 = vmul.f32 %v19605_v29, %v19605_v29  ;;  %v4686_v46 = vrot.slane %v4598_v37, %v17777_v17  ;;  %v5452_v37 = vld [vmem:[%s23854_s12 + $0x60] sm:$0xff] }
 0x99e   :  { %v4701_v36 = vsel %vm1768_vm2, %v4696_v60, 0.0  ;;  %v19615_v45 = vsub.f32 %v19413_v13, %v4682_v55  ;;  %v5458_v60 = vld [vmem:[%s23854_s12 + $0x90] sm:$0xff] }
 0x99f   :  { %v4702_v4 = vrot.slane %v4701_v36, 4  ;;  %v4708_v34 = vsel %vm1768_vm2, %v4697_v42, 0.0  ;;  %v19619_v21 = vsub.f32 %v19421_v10, %v4686_v46  ;;  %v13937_v55 = vpack.c.bf16 %v5458_v60, %v5453_v5  ;;  %v5457_v42 = vld [vmem:[%s23854_s12 + $0x88] sm:$0xff]  ;;  %v5532_v5 = vld [vmem:[%s23854_s12 + $0x2e0] sm:$0xff] }
 0x9a0   :  { %v4709_v28 = vrot.slane %v4708_v34, 4  ;;  %v4698_v31 = vmul.f32 %v19615_v45, %v19615_v45  ;;  %v13939_v46 = vpack.c.bf16 %v5457_v42, %v5452_v37  ;;  %v5537_v60 = vld [vmem:[%s23854_s12 + $0x308] sm:$0xff]  ;;  %v5543_v37 = vld [vmem:[%s23854_s12 + $0x338] sm:$0xff]  ;;  %v5548_v42 = vld [vmem:[%s23854_s12 + $0x360] sm:$0xff] }
 0x9a1   :  { %v4703_v50 = vadd.f32 %v4702_v4, %v4701_v36  ;;  %v4699_v61 = vmul.f32 %v19619_v21, %v19619_v21  ;;  %v5463_v36 = vld [vmem:[%s23854_s12 + $0xb8] sm:$0xff]  ;;  %v5468_v4 = vld [vmem:[%s23854_s12 + $0xe0] sm:$0xff] }
 0x9a2   :  { %v4710_v3 = vadd.f32 %v4709_v28, %v4708_v34  ;;  %v4715_v35 = vsel %vm1768_vm2, %v4698_v31, 0.0  ;;  %v13941_v34 = vpack.c.bf16 %v5468_v4, %v5463_v36  ;;  %v5462_v28 = vld [vmem:[%s23854_s12 + $0xb0] sm:$0xff]  ;;  %v5467_v31 = vld [vmem:[%s23854_s12 + $0xd8] sm:$0xff] }
 0x9a3   :  { %v4704_v62 = vrot.slane %v4703_v50, 2  ;;  %v4716_v58 = vrot.slane %v4715_v35, 4  ;;  %v4722_v47 = vsel %vm1768_vm2, %v4699_v61, 0.0  ;;  %v5473_v61 = vld [vmem:[%s23854_s12 + $0x108] sm:$0xff]  ;;  %v5542_v36 = vld [vmem:[%s23854_s12 + $0x330] sm:$0xff]  ;;  %v5547_v4 = vld [vmem:[%s23854_s12 + $0x358] sm:$0xff] }
 0x9a4   :  { %v4723_v51 = vrot.slane %v4722_v47, 4  ;;  %v4711_v52 = vrot.slane %v4710_v3, 2 }
 0x9a5   :  { %v4717_v7 = vadd.f32 %v4716_v58, %v4715_v35  ;;  %v4705_v33 = vadd.f32 %v4704_v62, %v4703_v50  ;;  %v13943_v50 = vpack.c.bf16 %v5467_v31, %v5462_v28  ;;  %v5472_v62 = vld [vmem:[%s23854_s12 + $0x100] sm:$0xff]  ;;  %v5477_v58 = vld [vmem:[%s23854_s12 + $0x128] sm:$0xff] }
 0x9a6   :  { %v4724_v13 = vadd.f32 %v4723_v51, %v4722_v47  ;;  %v4712_v8 = vadd.f32 %v4711_v52, %v4710_v3  ;;  %v5478_v3 = vld [vmem:[%s23854_s12 + $0x130] sm:$0xff]  ;;  %v13947_v47 = vpack.c.bf16 %v5477_v58, %v5472_v62  ;;  %v5483_v51 = vld [vmem:[%s23854_s12 + $0x158] sm:$0xff]  ;;  %v5488_v52 = vld [vmem:[%s23854_s12 + $0x180] sm:$0xff] }
 0x9a7   :  { %v4718_v10 = vrot.slane %v4717_v7, 2  ;;  %v4706_v49 = vrot.slane %v4705_v33, 1  ;;  %v13945_v35 = vpack.c.bf16 %v5478_v3, %v5473_v61 }
 0x9a8   :  { %v4713_v9 = vrot.slane %v4712_v8, 1  ;;  %v4725_v1 = vrot.slane %v4724_v13, 2 }
 0x9a9   :  { %v4719_v20 = vadd.f32 %v4718_v10, %v4717_v7  ;;  %v4707_v57 = vadd.f32 %v4706_v49, %v4705_v33  ;;  %v13949_v7 = vpack.c.bf16 %v5488_v52, %v5483_v51  ;;  %v5482_v33 = vld [vmem:[%s23854_s12 + $0x150] sm:$0xff]  ;;  %v5493_v10 = vld [vmem:[%s23854_s12 + $0x1a8] sm:$0xff] }
 0x9aa   :  { %v4714_v26 = vadd.f32 %v4713_v9, %v4712_v8  ;;  %v4726_v15 = vadd.f32 %v4725_v1, %v4724_v13  ;;  %v5487_v13 = vld [vmem:[%s23854_s12 + $0x178] sm:$0xff]  ;;  %v5498_v49 = vld [vmem:[%s23854_s12 + $0x1d0] sm:$0xff]  ;;  %v5492_v9 = vld [vmem:[%s23854_s12 + $0x1a0] sm:$0xff] }
 0x9ab   :  { %v4720_v11 = vrot.slane %v4719_v20, 1  ;;  %v13951_v8 = vpack.c.bf16 %v5487_v13, %v5482_v33  ;;  %v13953_v44 = vpack.c.bf16 %v5498_v49, %v5493_v10  ;;  %v5497_v1 = vld [vmem:[%s23854_s12 + $0x1c8] sm:$0xff] }
 0x9ac   :  { %4801 = vmatprep.mubr.f32.mxu0 %v4714_v26  ;;  %v4727_v54 = vrot.slane %v4726_v15, 1  ;;  %v5503_v26 = vld [vmem:[%s23854_s12 + $0x1f8] sm:$0xff]  ;;  %v5441_v10 = vld [vmem:[%s23854_s12 + $0x8] sm:$0xff] }
 0x9ad   :  { %4802 = vmatmul.mubr.f32.vlgmr.msra.gmra.mrb[38].mxu0 %v4707_v57  ;;  %v4721_v43 = vadd.f32 %v4720_v11, %v4719_v20  ;;  %v13955_v20 = vpack.c.bf16 %v5497_v1, %v5492_v9  ;;  %v5502_v11 = vld [vmem:[%s23854_s12 + $0x1f0] sm:$0xff]  ;;  %v5445_v49 = vld [vmem:[%s23854_s12 + $0x28] sm:$0xff] }
 0x9ae   :  { %13729 = vmatpush3.bf16.msra.mxu0 %v19433_v24  ;;  %v4728_v16 = vadd.f32 %v4727_v54, %v4726_v15  ;;  %12016 = vmatprep.mubr.msk.f32.mxu0 %vm15304_vm1, %v23873_v19  ;;  %v4729_v24 = vsel %vm1768_vm2, %v4700_v59, 0.0  ;;  %v5508_v15 = vld [vmem:[%s23854_s12 + $0x220] sm:$0xff]  ;;  %v5507_v54 = vld [vmem:[%s23854_s12 + $0x218] sm:$0xff]  ;;  %v5518_v59 = vld [vmem:[%s23854_s12 + $0x270] sm:$0xff] }
 0x9af   :  { %13730 = vmatprep.subr.bf16.mxu0 %v23871_v48  ;;  %v4730_v32 = vrot.slane %v4729_v24, 4  ;;  %v13957_v57 = vpack.c.bf16 %v5508_v15, %v5503_v26  ;;  %v5455_v26 = vld [vmem:[%s23854_s12 + $0x78] sm:$0xff]  ;;  %v5461_v15 = vld [vmem:[%s23854_s12 + $0xa8] sm:$0xff] }
 0x9b0   :  { %4871 = vmatprep.mubr.f32.mxu1 %v4728_v16  ;;  %v13959_v16 = vpack.c.bf16 %v5507_v54, %v5502_v11  ;;  %v5460_v54 = vld [vmem:[%s23854_s12 + $0xa0] sm:$0xff] }
 0x9b1   :  { %4872 = vmatmul.mubr.f32.vlgmr.msra.gmra.mrb[32].mxu1 %v4721_v43  ;;  %v4731_v6 = vadd.f32 %v4730_v32, %v4729_v24  ;;  %v5513_v43 = vld [vmem:[%s23854_s12 + $0x248] sm:$0xff]  ;;  %v5512_v32 = vld [vmem:[%s23854_s12 + $0x240] sm:$0xff] }
 0x9b2   :  { %13732 = vmatpush3.bf16.msra.mxu0 %v19442_v38  ;;  %13754 = vmatpush1.bf16.msra.mxu1 %v19530_v2  ;;  %v13961_v24 = vpack.c.bf16 %v5518_v59, %v5513_v43  ;;  %v5471_v43 = vld [vmem:[%s23854_s12 + $0xf8] sm:$0xff]  ;;  %v5476_v59 = vld [vmem:[%s23854_s12 + $0x120] sm:$0xff] }
 0x9b3   :  { %13733 = vmatprep.subr.bf16.mxu0 %v23871_v48  ;;  %5016 = vmatprep.mubr.f32.mxu1 %v23873_v19  ;;  %v4732_v38 = vrot.slane %v4731_v6, 2 }
 0x9b4   :  { %13756 = vmatprep.subr.bf16.mxu1 %v19549_v27 }
 0x9b5   :  { %v4733_v14 = vadd.f32 %v4732_v38, %v4731_v6  ;;  %v5517_v6 = vld [vmem:[%s23854_s12 + $0x268] sm:$0xff] }
 0x9b6   :  { %13735 = vmatpush3.bf16.msra.mxu0 %v19455_v63  ;;  %v13963_v38 = vpack.c.bf16 %v5517_v6, %v5512_v32  ;;  %v13785_v32 = vpack.c.bf16 %v5476_v59, %v5471_v43  ;;  %v5470_v6 = vld [vmem:[%s23854_s12 + $0xf0] sm:$0xff] }
 0x9b7   :  { %13736 = vmatprep.subr.bf16.mxu0 %v23871_v48  ;;  %v4734_v63 = vrot.slane %v4733_v14, 1 }
 0x9ba   :  { %13738 = vmatpush3.bf16.msra.mxu0 %v19465_v56  ;;  %v4735_v56 = vadd.f32 %v4734_v63, %v4733_v14  ;;  %v5523_v14 = vld [vmem:[%s23854_s12 + $0x298] sm:$0xff]  ;;  %v5528_v63 = vld [vmem:[%s23854_s12 + $0x2c0] sm:$0xff] }
 0x9bb   :  { %13739 = vmatprep.subr.bf16.mxu0 %v23871_v48 }
 0x9be   :  { %13741 = vmatpush3.bf16.msra.mxu0 %v19475_v0  ;;  %v5443_v0 = vld [vmem:[%s23854_s12 + $0x18] sm:$0xff] }
 0x9bf   :  { %13742 = vmatprep.subr.bf16.mxu0 %v23871_v48 }
 0x9c2   :  { %13744 = vmatpush3.bf16.msra.mxu0 %v19485_v30  ;;  %v5448_v30 = vld [vmem:[%s23854_s12 + $0x40] sm:$0xff] }
 0x9c3   :  { %13745 = vmatprep.subr.bf16.mxu0 %v23871_v48  ;;  %v13933_v18 = vpack.c.bf16 %v5448_v30, %v5443_v0  ;;  %v5522_v0 = vld [vmem:[%s23854_s12 + $0x290] sm:$0xff]  ;;  %v5527_v30 = vld [vmem:[%s23854_s12 + $0x2b8] sm:$0xff] }
 0x9c6   :  { %13747 = vmatpush3.bf16.msra.mxu0 %v19495_v40  ;;  %v5442_v40 = vld [vmem:[%s23854_s12 + $0x10] sm:$0xff] }
 0x9c7   :  { %13748 = vmatprep.subr.bf16.mxu0 %v23871_v48 }
 0x9ca   :  { %13750 = vmatpush3.bf16.msra.mxu0 %v19505_v39  ;;  %v13935_v39 = vpack.c.bf16 %v5447_v22, %v5442_v40  ;;  %v5533_v40 = vld [vmem:[%s23854_s12 + $0x2e8] sm:$0xff]  ;;  %v5538_v22 = vld [vmem:[%s23854_s12 + $0x310] sm:$0xff] }
 0x9cb   :  { %13934 = vmatprep.subr.bf16.mxu0 %v13933_v18  ;;  %v13967_v18 = vpack.c.bf16 %v5527_v30, %v5522_v0  ;;  %v5480_v30 = vld [vmem:[%s23854_s12 + $0x140] sm:$0xff] }
 0x9cd   :  { %12017 = vmatmul.mubr.f32.vlgmr.msra.gmra.mrb[40].mxu0 %v4735_v56  ;;  %v13965_v56 = vpack.c.bf16 %v5528_v63, %v5523_v14  ;;  %v5481_v14 = vld [vmem:[%s23854_s12 + $0x148] sm:$0xff]  ;;  %v5486_v63 = vld [vmem:[%s23854_s12 + $0x170] sm:$0xff] }
 0x9ce   :  { %13936 = vmatpush1.bf16.msra.mxu0 %v13935_v39  ;;  %v13969_v39 = vpack.c.bf16 %v5538_v22, %v5533_v40  ;;  %v13789_v0 = vpack.c.bf16 %v5486_v63, %v5481_v14  ;;  %v5491_v40 = vld [vmem:[%s23854_s12 + $0x198] sm:$0xff]  ;;  %v5496_v22 = vld [vmem:[%s23854_s12 + $0x1c0] sm:$0xff]  ;;  %v5566_v14 = vld [vmem:[%s23854_s12 + $0x3f0] sm:$0xff] }
 0x9cf   :  { %13938 = vmatprep.subr.bf16.mxu0 %v13937_v55  ;;  %v13971_v55 = vpack.c.bf16 %v5537_v60, %v5532_v5  ;;  %v13793_v5 = vpack.c.bf16 %v5496_v22, %v5491_v40  ;;  %v5490_v60 = vld [vmem:[%s23854_s12 + $0x190] sm:$0xff]  ;;  %v5563_v63 = vld [vmem:[%s23854_s12 + $0x3d8] sm:$0xff] }
 0x9d2   :  { %13940 = vmatpush1.bf16.msra.mxu0 %v13939_v46  ;;  %v13973_v46 = vpack.c.bf16 %v5548_v42, %v5543_v37  ;;  %v5501_v37 = vld [vmem:[%s23854_s12 + $0x1e8] sm:$0xff]  ;;  %v5506_v42 = vld [vmem:[%s23854_s12 + $0x210] sm:$0xff] }
 0x9d3   :  { %13942 = vmatprep.subr.bf16.mxu0 %v13941_v34  ;;  %v13975_v34 = vpack.c.bf16 %v5547_v4, %v5542_v36  ;;  %v13797_v36 = vpack.c.bf16 %v5506_v42, %v5501_v37  ;;  %v5500_v4 = vld [vmem:[%s23854_s12 + $0x1e0] sm:$0xff]  ;;  %v5573_v42 = vld [vmem:[%s23854_s12 + $0x428] sm:$0xff] }
 0x9d4   :  { %v5576_v37 = vld [vmem:[%s23854_s12 + $0x440] sm:$0xff] }
 0x9d6   :  { %13944 = vmatpush1.bf16.msra.mxu0 %v13943_v50 }
 0x9d7   :  { %13946 = vmatprep.subr.bf16.mxu0 %v13945_v35 }
 0x9da   :  { %13948 = vmatpush1.bf16.msra.mxu0 %v13947_v47 }
 0x9db   :  { %13950 = vmatprep.subr.bf16.mxu0 %v13949_v7  ;;  %v4736_v7 = vld [vmem:[%s23852_s10] sm:$0x1] }
 0x9de   :  { %13952 = vmatpush1.bf16.msra.mxu0 %v13951_v8  ;;  %v5164_v8 = vld [vmem:[%s23853_s11] sm:$0x1]  ;;  %s10489_s11 = sshll.u32 %s15305_s7, 4  ;;  %s10490_s11 = int_to_ptr.vmem [resolvable:$true] %s10489_s11 }
 0x9df   :  { %13954 = vmatprep.subr.bf16.mxu0 %v13953_v44  ;;  %v5451_v44 = vld [vmem:[%s23854_s12 + $0x58] sm:$0xff]  ;;  %p15282_p1 = scmp.lt.s32.totalorder %s10490_s11, %s10490_s11 }
 0x9e2   :  { %13956 = vmatpush1.bf16.msra.mxu0 %v13955_v20  ;;  %v5450_v20 = vld [vmem:[%s23854_s12 + $0x50] sm:$0xff] }
 0x9e3   :  { %13958 = vmatprep.subr.bf16.mxu0 %v13957_v57  ;;  %v13779_v57 = vpack.c.bf16 %v5455_v26, %v5450_v20  ;;  %v5551_v26 = vld [vmem:[%s23854_s12 + $0x378] sm:$0xff] }
 0x9e6   :  { %13960 = vmatpush1.bf16.msra.mxu0 %v13959_v16  ;;  %v5465_v16 = vld [vmem:[%s23854_s12 + $0xc8] sm:$0xff] }
 0x9e7   :  { %13962 = vmatprep.subr.bf16.mxu0 %v13961_v24  ;;  %v13783_v24 = vpack.c.bf16 %v5465_v16, %v5460_v54  ;;  %v5550_v54 = vld [vmem:[%s23854_s12 + $0x370] sm:$0xff]  ;;  %v5555_v16 = vld [vmem:[%s23854_s12 + $0x398] sm:$0xff] }
 0x9e8   :  { %v13819_v59 = vpack.c.bf16 %v5555_v16, %v5550_v54  ;;  %v5606_v54 = vld [vmem:[%s23854_s12 + $0x530] sm:$0xff]  ;;  %v5603_v16 = vld [vmem:[%s23854_s12 + $0x518] sm:$0xff] }
 0x9ea   :  { %13964 = vmatpush1.bf16.msra.mxu0 %v13963_v38  ;;  %v5475_v38 = vld [vmem:[%s23854_s12 + $0x118] sm:$0xff] }
 0x9eb   :  { %13966 = vmatprep.subr.bf16.mxu0 %v13965_v56  ;;  %v13787_v56 = vpack.c.bf16 %v5475_v38, %v5470_v6  ;;  %v5561_v38 = vld [vmem:[%s23854_s12 + $0x3c8] sm:$0xff] }
 0x9ee   :  { %13968 = vmatpush1.bf16.msra.mxu0 %v13967_v18  ;;  %v5485_v18 = vld [vmem:[%s23854_s12 + $0x168] sm:$0xff] }
 0x9ef   :  { %13970 = vmatprep.subr.bf16.mxu0 %v13969_v39  ;;  %v13791_v39 = vpack.c.bf16 %v5485_v18, %v5480_v30  ;;  %v5560_v30 = vld [vmem:[%s23854_s12 + $0x3c0] sm:$0xff]  ;;  %v5565_v18 = vld [vmem:[%s23854_s12 + $0x3e8] sm:$0xff] }
 0x9f0   :  { %v13823_v22 = vpack.c.bf16 %v5565_v18, %v5560_v30 }
 0x9f2   :  { %13972 = vmatpush1.bf16.msra.mxu0 %v13971_v55  ;;  %v5495_v55 = vld [vmem:[%s23854_s12 + $0x1b8] sm:$0xff] }
 0x9f3   :  { %13974 = vmatprep.subr.bf16.mxu0 %v13973_v46  ;;  %v13795_v46 = vpack.c.bf16 %v5495_v55, %v5490_v60  ;;  %v5571_v55 = vld [vmem:[%s23854_s12 + $0x418] sm:$0xff] }
 0x9f6   :  { %13976 = vmatpush1.bf16.msra.mxu0 %v13975_v34  ;;  %v5505_v34 = vld [vmem:[%s23854_s12 + $0x208] sm:$0xff] }
 0xa80   :  { %v11056_v28 = vpop.f32.mrb[38].mxu0 }
 0xa81   :  { %v11057_v31 = vpop.f32.mrb[39].mxu0 }
 0xa82   :  { %v11058_v50 = vadd.f32 %v11057_v31, %v11056_v28  ;;  %v5511_v28 = vld [vmem:[%s23854_s12 + $0x238] sm:$0xff]  ;;  %v5516_v31 = vld [vmem:[%s23854_s12 + $0x260] sm:$0xff] }
 0xa84   :  { %v11091_v61 = vpop.f32.mrb[32].mxu1  ;;  %v4804_v35 = vadd.f32 1e-05, %v11058_v50  ;;  %v13799_v50 = vpack.c.bf16 %v5505_v34, %v5500_v4  ;;  %v5570_v4 = vld [vmem:[%s23854_s12 + $0x410] sm:$0xff]  ;;  %v5575_v34 = vld [vmem:[%s23854_s12 + $0x438] sm:$0xff] }
 0xa85   :  { %v11092_v3 = vpop.f32.mrb[33].mxu1 }
 0xa86   :  { %v11093_v62 = vadd.f32 %v11092_v3, %v11091_v61  ;;  %v13801_v61 = vpack.c.bf16 %v5516_v31, %v5511_v28  ;;  %v5510_v3 = vld [vmem:[%s23854_s12 + $0x230] sm:$0xff]  ;;  %v13827_v31 = vpack.c.bf16 %v5575_v34, %v5570_v4  ;;  %v5600_v4 = vld [vmem:[%s23854_s12 + $0x500] sm:$0xff] }
 0xa87   :  { %v5602_v34 = vld [vmem:[%s23854_s12 + $0x510] sm:$0xff] }
 0xa88   :  { %v4874_v58 = vadd.f32 %v11093_v62, %v4804_v35  ;;  %v5515_v35 = vld [vmem:[%s23854_s12 + $0x258] sm:$0xff]  ;;  %v5521_v62 = vld [vmem:[%s23854_s12 + $0x288] sm:$0xff] }
 0xaa0   :  { %v4943_v47 = vpop.f32.mrb[40].mxu0 }
 0xaa1   :  { %v4944_v51 = vadd.f32 %v4943_v47, %v4874_v58  ;;  %v12018_v52 = vpop.f32.mrb[41].mxu0  ;;  %v5526_v58 = vld [vmem:[%s23854_s12 + $0x2b0] sm:$0xff]  ;;  %v13803_v47 = vpack.c.bf16 %v5515_v35, %v5510_v3  ;;  %v5581_v35 = vld [vmem:[%s23854_s12 + $0x468] sm:$0xff] }
 0xaa2   :  { %v5520_v52 = vld [vmem:[%s23854_s12 + $0x280] sm:$0xff] }
 0xaa3   :  { %15271 = vrsqrt.f32 %v4944_v51  ;;  %v13805_v51 = vpack.c.bf16 %v5526_v58, %v5521_v62  ;;  %v5586_v62 = vld [vmem:[%s23854_s12 + $0x490] sm:$0xff]  ;;  %v5583_v58 = vld [vmem:[%s23854_s12 + $0x478] sm:$0xff] }
 0xaad   :  { %v15272_v33 = vpop.eup %15271 }
 0xaae   :  { %v4948_v13 = vmul.f32 %v15272_v33, %v4736_v7  ;;  %v5525_v7 = vld [vmem:[%s23854_s12 + $0x2a8] sm:$0xff]  ;;  %v5531_v33 = vld [vmem:[%s23854_s12 + $0x2d8] sm:$0xff] }
 0xab0   :  { %10512 = vmatmul.mubr.msk.f32.vlgmr.msra.gmra.mrb[34].mxu1 %vm4455_vm4, %v4948_v13 }
 0xab1   :  { %13758 = vmatpush1.bf16.msra.mxu1 %v19559_v53  ;;  %5087 = vmatprep.mubr.f32.mxu1 %v23873_v19 }
 0xab2   :  { %13759 = vmatprep.subr.bf16.mxu1 %v23871_v48 }
 0xab4   :  { %10513 = vmatmul.mubr.msk.f32.vlgmr.msra.gmra.mrb[36].mxu1 %vm4455_vm4, %v4948_v13 }
 0xab5   :  { %13761 = vmatpush3.bf16.msra.mxu1 %v19540_v41  ;;  %12023 = vmatprep.mubr.msk.f32.mxu1 %vm15304_vm1, %v23873_v19 }
 0xab6   :  { %13763 = vmatprep.subr.bf16.mxu1 %v19525_v25  ;;  %v5446_v25 = vld [vmem:[%s23854_s12 + $0x30] sm:$0xff] }
 0xab8   :  { %12024 = vmatmul.mubr.msk.f32.vlgmr.msra.gmra.mrb[38].mxu1 %vm4455_vm4, %v4948_v13  ;;  %v5536_v13 = vld [vmem:[%s23854_s12 + $0x300] sm:$0xff] }
 0xab9   :  { %13765 = vmatpush1.bf16.msra.mxu1 %v19530_v2  ;;  %5232 = vmatprep.mubr.f32.mxu1 %v23873_v19  ;;  %v13773_v2 = vpack.c.bf16 %v5446_v25, %v5441_v10  ;;  %v13809_v10 = vpack.c.bf16 %v5536_v13, %v5531_v33  ;;  %v5530_v25 = vld [vmem:[%s23854_s12 + $0x2d0] sm:$0xff] }
 0xaba   :  { %13767 = vmatprep.subr.bf16.mxu1 %v19549_v27  ;;  %v5440_v27 = vld [vmem:[%s23854_s12] sm:$0xff] }
 0xabb   :  { %v13775_v9 = vpack.c.bf16 %v5445_v49, %v5440_v27  ;;  %v5541_v27 = vld [vmem:[%s23854_s12 + $0x328] sm:$0xff]  ;;  %v5546_v49 = vld [vmem:[%s23854_s12 + $0x350] sm:$0xff] }
 0xabc   :  { %10515 = vmatmul.mubr.msk.f32.vlgmr.msra.gmra.mrb[40].mxu1 %vm4455_vm4, %v5164_v8 }
 0xabd   :  { %13769 = vmatpush1.bf16.msra.mxu1 %v19559_v53  ;;  %5303 = vmatprep.mubr.f32.mxu1 %v23873_v19  ;;  %v5456_v53 = vld [vmem:[%s23854_s12 + $0x80] sm:$0xff] }
 0xabe   :  { %13770 = vmatprep.subr.bf16.mxu1 %v23871_v48  ;;  %v13777_v1 = vpack.c.bf16 %v5456_v53, %v5451_v44  ;;  %v13813_v53 = vpack.c.bf16 %v5546_v49, %v5541_v27  ;;  %v5596_v27 = vld [vmem:[%s23854_s12 + $0x4e0] sm:$0xff]  ;;  %v5593_v49 = vld [vmem:[%s23854_s12 + $0x4c8] sm:$0xff] }
 0xac0   :  { %10516 = vmatmul.mubr.msk.f32.vlgmr.msra.gmra.mrb[42].mxu1 %vm4455_vm4, %v5164_v8 }
 0xac1   :  { %13772 = vmatpush3.bf16.msra.mxu1 %v19540_v41  ;;  %12030 = vmatprep.mubr.msk.f32.mxu1 %vm15304_vm1, %v23873_v19  ;;  %v5466_v41 = vld [vmem:[%s23854_s12 + $0xd0] sm:$0xff] }
 0xac2   :  { %13774 = vmatprep.subr.bf16.mxu1 %v13773_v2  ;;  %v13781_v11 = vpack.c.bf16 %v5466_v41, %v5461_v15  ;;  %v5535_v2 = vld [vmem:[%s23854_s12 + $0x2f8] sm:$0xff]  ;;  %v5556_v15 = vld [vmem:[%s23854_s12 + $0x3a0] sm:$0xff]  ;;  %v5553_v41 = vld [vmem:[%s23854_s12 + $0x388] sm:$0xff] }
 0xac3   :  { %v13811_v44 = vpack.c.bf16 %v5535_v2, %v5530_v25  ;;  %v5591_v2 = vld [vmem:[%s23854_s12 + $0x4b8] sm:$0xff] }
 0xac4   :  { %12031 = vmatmul.mubr.msk.f32.vlgmr.msra.gmra.mrb[44].mxu1 %vm4455_vm4, %v5164_v8  ;;  %v13807_v8 = vpack.c.bf16 %v5525_v7, %v5520_v52  ;;  %v5580_v52 = vld [vmem:[%s23854_s12 + $0x460] sm:$0xff]  ;;  %v5585_v7 = vld [vmem:[%s23854_s12 + $0x488] sm:$0xff] }
 0xac5   :  { %13776 = vmatpush1.bf16.msra.mxu1 %v13775_v9  ;;  %v5540_v9 = vld [vmem:[%s23854_s12 + $0x320] sm:$0xff]  ;;  %v13831_v13 = vpack.c.bf16 %v5585_v7, %v5580_v52  ;;  %v5618_v52 = vld [vmem:[%s23854_s12 + $0x590] sm:$0xff] }
 0xac6   :  { %13778 = vmatprep.subr.bf16.mxu1 %v13777_v1  ;;  %v5545_v1 = vld [vmem:[%s23854_s12 + $0x348] sm:$0xff] }
 0xac7   :  { %v13815_v20 = vpack.c.bf16 %v5545_v1, %v5540_v9  ;;  %v5590_v9 = vld [vmem:[%s23854_s12 + $0x4b0] sm:$0xff]  ;;  %v5595_v1 = vld [vmem:[%s23854_s12 + $0x4d8] sm:$0xff] }
 0xac9   :  { %13780 = vmatpush1.bf16.msra.mxu1 %v13779_v57  ;;  %v13817_v57 = vpack.c.bf16 %v5556_v15, %v5551_v26  ;;  %v13835_v26 = vpack.c.bf16 %v5595_v1, %v5590_v9  ;;  %v5592_v15 = vld [vmem:[%s23854_s12 + $0x4c0] sm:$0xff] }
 0xaca   :  { %13782 = vmatprep.subr.bf16.mxu1 %v13781_v11  ;;  %v5558_v11 = vld [vmem:[%s23854_s12 + $0x3b0] sm:$0xff]  ;;  %v5612_v1 = vld [vmem:[%s23854_s12 + $0x560] sm:$0xff] }
 0xacb   :  { %v13977_v43 = vpack.c.bf16 %v5558_v11, %v5553_v41  ;;  %v5597_v41 = vld [vmem:[%s23854_s12 + $0x4e8] sm:$0xff] }
 0xacc   :  { %v5601_v11 = vld [vmem:[%s23854_s12 + $0x508] sm:$0xff] }
 0xacd   :  { %13784 = vmatpush1.bf16.msra.mxu1 %v13783_v24  ;;  %v5552_v24 = vld [vmem:[%s23854_s12 + $0x380] sm:$0xff]  ;;  %13978 = vmatprep.subr.bf16.mxu0 %v13977_v43  ;;  %v13837_v43 = vpack.c.bf16 %v5606_v54, %v5601_v11 }
 0xace   :  { %13786 = vmatprep.subr.bf16.mxu1 %v13785_v32  ;;  %v5557_v32 = vld [vmem:[%s23854_s12 + $0x3a8] sm:$0xff]  ;;  %v5628_v11 = vld [vmem:[%s23854_s12 + $0x5e0] sm:$0xff] }
 0xacf   :  { %v13979_v6 = vpack.c.bf16 %v5557_v32, %v5552_v24 }
 0xad1   :  { %13788 = vmatpush1.bf16.msra.mxu1 %v13787_v56  ;;  %13980 = vmatpush1.bf16.msra.mxu0 %v13979_v6  ;;  %v13821_v56 = vpack.c.bf16 %v5566_v14, %v5561_v38 }
 0xad2   :  { %13790 = vmatprep.subr.bf16.mxu1 %v13789_v0  ;;  %v5568_v0 = vld [vmem:[%s23854_s12 + $0x400] sm:$0xff] }
 0xad3   :  { %v13981_v40 = vpack.c.bf16 %v5568_v0, %v5563_v63 }
 0xad5   :  { %13792 = vmatpush1.bf16.msra.mxu1 %v13791_v39  ;;  %v5562_v39 = vld [vmem:[%s23854_s12 + $0x3d0] sm:$0xff]  ;;  %13982 = vmatprep.subr.bf16.mxu0 %v13981_v40 }
 0xad6   :  { %13794 = vmatprep.subr.bf16.mxu1 %v13793_v5  ;;  %v5567_v5 = vld [vmem:[%s23854_s12 + $0x3f8] sm:$0xff] }
 0xad7   :  { %v13983_v60 = vpack.c.bf16 %v5567_v5, %v5562_v39 }
 0xad9   :  { %13796 = vmatpush1.bf16.msra.mxu1 %v13795_v46  ;;  %13984 = vmatpush1.bf16.msra.mxu0 %v13983_v60  ;;  %v13825_v46 = vpack.c.bf16 %v5576_v37, %v5571_v55 }
 0xada   :  { %13798 = vmatprep.subr.bf16.mxu1 %v13797_v36  ;;  %v5578_v36 = vld [vmem:[%s23854_s12 + $0x450] sm:$0xff] }
 0xadb   :  { %v13985_v28 = vpack.c.bf16 %v5578_v36, %v5573_v42 }
 0xadd   :  { %13800 = vmatpush1.bf16.msra.mxu1 %v13799_v50  ;;  %v5572_v50 = vld [vmem:[%s23854_s12 + $0x420] sm:$0xff]  ;;  %13986 = vmatprep.subr.bf16.mxu0 %v13985_v28 }
 0xade   :  { %13802 = vmatprep.subr.bf16.mxu1 %v13801_v61  ;;  %v5577_v61 = vld [vmem:[%s23854_s12 + $0x448] sm:$0xff] }
 0xadf   :  { %v13987_v3 = vpack.c.bf16 %v5577_v61, %v5572_v50 }
 0xae1   :  { %13804 = vmatpush1.bf16.msra.mxu1 %v13803_v47  ;;  %13988 = vmatpush1.bf16.msra.mxu0 %v13987_v3  ;;  %v13829_v47 = vpack.c.bf16 %v5586_v62, %v5581_v35  ;;  %v5607_v3 = vld [vmem:[%s23854_s12 + $0x538] sm:$0xff]  ;;  %v5616_v62 = vld [vmem:[%s23854_s12 + $0x580] sm:$0xff] }
 0xae2   :  { %13806 = vmatprep.subr.bf16.mxu1 %v13805_v51  ;;  %v5588_v51 = vld [vmem:[%s23854_s12 + $0x4a0] sm:$0xff]  ;;  %v5611_v35 = vld [vmem:[%s23854_s12 + $0x558] sm:$0xff] }
 0xae3   :  { %v13989_v33 = vpack.c.bf16 %v5588_v51, %v5583_v58  ;;  %v5613_v51 = vld [vmem:[%s23854_s12 + $0x568] sm:$0xff] }
 0xae4   :  { %v14001_v9 = vpack.c.bf16 %v5618_v52, %v5613_v51 }
 0xae5   :  { %13808 = vmatpush1.bf16.msra.mxu1 %v13807_v8  ;;  %v5582_v8 = vld [vmem:[%s23854_s12 + $0x470] sm:$0xff]  ;;  %13990 = vmatprep.subr.bf16.mxu0 %v13989_v33 }
 0xae6   :  { %13810 = vmatprep.subr.bf16.mxu1 %v13809_v10  ;;  %v5587_v10 = vld [vmem:[%s23854_s12 + $0x498] sm:$0xff] }
 0xae7   :  { %v13991_v25 = vpack.c.bf16 %v5587_v10, %v5582_v8 }
 0xae9   :  { %13812 = vmatpush1.bf16.msra.mxu1 %v13811_v44  ;;  %13992 = vmatpush1.bf16.msra.mxu0 %v13991_v25  ;;  %v13833_v44 = vpack.c.bf16 %v5596_v27, %v5591_v2  ;;  %v13999_v25 = vpack.c.bf16 %v5607_v3, %v5602_v34  ;;  %v5610_v2 = vld [vmem:[%s23854_s12 + $0x550] sm:$0xff]  ;;  %v5615_v27 = vld [vmem:[%s23854_s12 + $0x578] sm:$0xff] }
 0xaea   :  { %13814 = vmatprep.subr.bf16.mxu1 %v13813_v53  ;;  %v5598_v53 = vld [vmem:[%s23854_s12 + $0x4f0] sm:$0xff] }
 0xaeb   :  { %v5642_v3 = vld [vmem:[%s23854_s12 + $0x650] sm:$0xff] }
 0xaed   :  { %13816 = vmatpush1.bf16.msra.mxu1 %v13815_v20  ;;  %v13993_v20 = vpack.c.bf16 %v5598_v53, %v5593_v49 }
 0xaee   :  { %13818 = vmatprep.subr.bf16.mxu1 %v13817_v57  ;;  %v13995_v57 = vpack.c.bf16 %v5597_v41, %v5592_v15 }
 0xaef   :  { %13994 = vmatprep.subr.bf16.mxu0 %v13993_v20  ;;  %v5617_v20 = vld [vmem:[%s23854_s12 + $0x588] sm:$0xff] }
 0xaf0   :  { %13996 = vmatpush1.bf16.msra.mxu0 %v13995_v57  ;;  %v5623_v57 = vld [vmem:[%s23854_s12 + $0x5b8] sm:$0xff] }
 0xaf1   :  { %13820 = vmatpush1.bf16.msra.mxu1 %v13819_v59  ;;  %v5608_v59 = vld [vmem:[%s23854_s12 + $0x540] sm:$0xff] }
 0xaf2   :  { %13822 = vmatprep.subr.bf16.mxu1 %v13821_v56  ;;  %v13997_v24 = vpack.c.bf16 %v5608_v59, %v5603_v16  ;;  %v14003_v59 = vpack.c.bf16 %v5617_v20, %v5612_v1 }
 0xaf4   :  { %13998 = vmatprep.subr.bf16.mxu0 %v13997_v24  ;;  %v5620_v24 = vld [vmem:[%s23854_s12 + $0x5a0] sm:$0xff] }
 0xaf5   :  { %13824 = vmatpush1.bf16.msra.mxu1 %v13823_v22 }
 0xaf6   :  { %13826 = vmatprep.subr.bf16.mxu1 %v13825_v46 }
 0xaf9   :  { %13828 = vmatpush1.bf16.msra.mxu1 %v13827_v31 }
 0xafa   :  { %13830 = vmatprep.subr.bf16.mxu1 %v13829_v47 }
 0xafd   :  { %13832 = vmatpush1.bf16.msra.mxu1 %v13831_v13 }
 0xafe   :  { %13834 = vmatprep.subr.bf16.mxu1 %v13833_v44 }
 0xb01   :  { %13836 = vmatpush1.bf16.msra.mxu1 %v13835_v26  ;;  %v5621_v26 = vld [vmem:[%s23854_s12 + $0x5a8] sm:$0xff] }
 0xb02   :  { %13838 = vmatprep.subr.bf16.mxu1 %v13837_v43  ;;  %v13843_v43 = vpack.c.bf16 %v5615_v27, %v5610_v2  ;;  %v5657_v2 = vld [vmem:[%s23854_s12 + $0x6c8] sm:$0xff] }
 0xb03   :  { %v5661_v27 = vld [vmem:[%s23854_s12 + $0x6e8] sm:$0xff] }
 0xb83   :  { %v5018_v32 = vpop.f32.mrb[34].mxu1 }
 0xb84   :  { %v5020_v6 = vpop.f32.mrb[35].mxu1  ;;  %v5383_v56 = vrot.slane %v5018_v32, %v17777_v17  ;;  %v5625_v32 = vld [vmem:[%s23854_s12 + $0x5c8] sm:$0xff] }
 0xb85   :  { %v5387_v30 = vrot.slane %v5020_v6, %v17777_v17 }
 0xb86   :  { %v5400_v40 = vmul.f32 %v5383_v56, %v19602_v23  ;;  %v5605_v23 = vld [vmem:[%s23854_s12 + $0x528] sm:$0xff]  ;;  %v5631_v56 = vld [vmem:[%s23854_s12 + $0x5f8] sm:$0xff] }
 0xb87   :  { %v5089_v38 = vpop.f32.mrb[36].mxu1  ;;  %v5401_v60 = vmul.f32 %v5387_v30, %v19605_v29  ;;  %v13839_v33 = vpack.c.bf16 %v5605_v23, %v5600_v4  ;;  %v5633_v30 = vld [vmem:[%s23854_s12 + $0x608] sm:$0xff]  ;;  %v5643_v4 = vld [vmem:[%s23854_s12 + $0x658] sm:$0xff]  ;;  %v5648_v23 = vld [vmem:[%s23854_s12 + $0x680] sm:$0xff] }
 0xb88   :  { %v5091_v14 = vpop.f32.mrb[37].mxu1  ;;  %v5391_v22 = vrot.slane %v5089_v38, %v17777_v17  ;;  %v14005_v38 = vpack.c.bf16 %v5628_v11, %v5623_v57  ;;  %v5662_v57 = vld [vmem:[%s23854_s12 + $0x6f0] sm:$0xff]  ;;  %v5667_v11 = vld [vmem:[%s23854_s12 + $0x718] sm:$0xff] }
 0xb89   :  { %v5395_v55 = vrot.slane %v5091_v14, %v17777_v17  ;;  %v5622_v14 = vld [vmem:[%s23854_s12 + $0x5b0] sm:$0xff] }
 0xb8a   :  { %v5402_v29 = vmul.f32 %v5391_v22, %v19615_v45 }
 0xb8b   :  { %v5160_v63 = vpop.f32.mrb[38].mxu1  ;;  %v5403_v45 = vmul.f32 %v5395_v55, %v19619_v21  ;;  %v13841_v21 = vpack.c.bf16 %v5616_v62, %v5611_v35  ;;  %v5647_v35 = vld [vmem:[%s23854_s12 + $0x678] sm:$0xff] }
 0xb8c   :  { %v12025_v0 = vpop.f32.mrb[39].mxu1  ;;  %v5399_v28 = vrot.slane %v5160_v63, %v17777_v17  ;;  %v5627_v63 = vld [vmem:[%s23854_s12 + $0x5d8] sm:$0xff]  ;;  %v14015_v52 = vpack.c.bf16 %v5647_v35, %v5642_v3  ;;  %v5690_v3 = vld [vmem:[%s23854_s12 + $0x7d0] sm:$0xff] }
 0xb8d   :  { %v5636_v0 = vld [vmem:[%s23854_s12 + $0x620] sm:$0xff]  ;;  %v14007_v22 = vpack.c.bf16 %v5627_v63, %v5622_v14  ;;  %v5651_v62 = vld [vmem:[%s23854_s12 + $0x698] sm:$0xff]  ;;  %v5670_v14 = vld [vmem:[%s23854_s12 + $0x730] sm:$0xff] }
 0xb8e   :  { %v5404_v49 = vmul.f32 %v5399_v28, %v19629_v12  ;;  %v5626_v12 = vld [vmem:[%s23854_s12 + $0x5d0] sm:$0xff]  ;;  %v5640_v28 = vld [vmem:[%s23854_s12 + $0x640] sm:$0xff]  ;;  %v5675_v63 = vld [vmem:[%s23854_s12 + $0x758] sm:$0xff] }
 0xb8f   :  { %v5234_v18 = vpop.f32.mrb[40].mxu1  ;;  %v13845_v6 = vpack.c.bf16 %v5626_v12, %v5621_v26  ;;  %v5660_v26 = vld [vmem:[%s23854_s12 + $0x6e0] sm:$0xff]  ;;  %v5695_v35 = vld [vmem:[%s23854_s12 + $0x7f8] sm:$0xff] }
 0xb90   :  { %v5408_v39 = vrot.slane %v5234_v18, %v17777_v17  ;;  %v5236_v5 = vpop.f32.mrb[41].mxu1  ;;  %v5638_v18 = vld [vmem:[%s23854_s12 + $0x630] sm:$0xff] }
 0xb91   :  { %v5412_v37 = vrot.slane %v5236_v5, %v17777_v17  ;;  %v5635_v5 = vld [vmem:[%s23854_s12 + $0x618] sm:$0xff]  ;;  %v14009_v55 = vpack.c.bf16 %v5638_v18, %v5633_v30  ;;  %v5672_v30 = vld [vmem:[%s23854_s12 + $0x740] sm:$0xff]  ;;  %v5677_v18 = vld [vmem:[%s23854_s12 + $0x768] sm:$0xff] }
 0xb92   :  { %v5425_v42 = vadd.f32 %v5408_v39, %v5400_v40  ;;  %v13847_v40 = vpack.c.bf16 %v5625_v32, %v5620_v24  ;;  %v5630_v39 = vld [vmem:[%s23854_s12 + $0x5f0] sm:$0xff]  ;;  %v5673_v24 = vld [vmem:[%s23854_s12 + $0x748] sm:$0xff] }
 0xb93   :  { %v5426_v46 = vadd.f32 %v5412_v37, %v5401_v60  ;;  %v5305_v36 = vpop.f32.mrb[42].mxu1  ;;  %v13849_v60 = vpack.c.bf16 %v5636_v0, %v5631_v56  ;;  %v5632_v37 = vld [vmem:[%s23854_s12 + $0x600] sm:$0xff]  ;;  %v13851_v34 = vpack.c.bf16 %v5635_v5, %v5630_v39  ;;  %v5678_v32 = vld [vmem:[%s23854_s12 + $0x770] sm:$0xff]  ;;  %v5683_v39 = vld [vmem:[%s23854_s12 + $0x798] sm:$0xff] }
 0xb94   :  { %v5430_v31 = vmul.f32 0.2, %v5425_v42  ;;  %v5416_v50 = vrot.slane %v5305_v36, %v17777_v17  ;;  %v5307_v61 = vpop.f32.mrb[43].mxu1  ;;  %v5646_v36 = vld [vmem:[%s23854_s12 + $0x670] sm:$0xff]  ;;  %v14025_v0 = vpack.c.bf16 %v5678_v32, %v5673_v24  ;;  %v5688_v5 = vld [vmem:[%s23854_s12 + $0x7c0] sm:$0xff]  ;;  %v5717_v32 = vld [vmem:[%s23854_s12 + $0x8a8] sm:$0xff] }
 0xb95   :  { %v5431_v58 = vmul.f32 0.2, %v5426_v46  ;;  %v5420_v47 = vrot.slane %v5307_v61, %v17777_v17  ;;  %v14013_v61 = vpack.c.bf16 %v5648_v23, %v5643_v4  ;;  %v5682_v4 = vld [vmem:[%s23854_s12 + $0x790] sm:$0xff]  ;;  %v5687_v23 = vld [vmem:[%s23854_s12 + $0x7b8] sm:$0xff]  ;;  %v5712_v24 = vld [vmem:[%s23854_s12 + $0x880] sm:$0xff] }
 0xb96   :  { %v20115_v7 = vadd.f32 %v5416_v50, %v5402_v29  ;;  %v20126_v44 = vmax.f32 %v5425_v42, %v5430_v31  ;;  %v5637_v42 = vld [vmem:[%s23854_s12 + $0x628] sm:$0xff] }
 0xb97   :  { %v5428_v13 = vadd.f32 %v5420_v47, %v5403_v45  ;;  %v5376_v8 = vpop.f32.mrb[44].mxu1  ;;  %v20117_v10 = vmax.f32 %v5426_v46, %v5431_v58  ;;  %v5641_v46 = vld [vmem:[%s23854_s12 + $0x648] sm:$0xff]  ;;  %v14011_v29 = vpack.c.bf16 %v5637_v42, %v5632_v37  ;;  %v5656_v45 = vld [vmem:[%s23854_s12 + $0x6c0] sm:$0xff]  ;;  %v5658_v47 = vld [vmem:[%s23854_s12 + $0x6d0] sm:$0xff] }
 0xb98   :  { %v5424_v53 = vrot.slane %v5376_v8, %v17777_v17  ;;  %v12032_v15 = vpop.f32.mrb[45].mxu1  ;;  %v5645_v31 = vld [vmem:[%s23854_s12 + $0x668] sm:$0xff]  ;;  %v13853_v50 = vpack.c.bf16 %v5646_v36, %v5641_v46  ;;  %v13857_v8 = vpack.c.bf16 %v5656_v45, %v5651_v62  ;;  %v5680_v37 = vld [vmem:[%s23854_s12 + $0x780] sm:$0xff]  ;;  %v14029_v36 = vpack.c.bf16 %v5688_v5, %v5683_v39  ;;  %v5722_v39 = vld [vmem:[%s23854_s12 + $0x8d0] sm:$0xff] }
 0xb99   :  { %v5433_v41 = vmul.f32 0.2, %v5428_v13  ;;  %5904 = vmatprep.mubr.f32.mxu1 %v20117_v10  ;;  %6117 = vmatprep.mubr.f32.mxu0 %v20117_v10  ;;  %v5653_v58 = vld [vmem:[%s23854_s12 + $0x6a8] sm:$0xff]  ;;  %v13855_v51 = vpack.c.bf16 %v5645_v31, %v5640_v28  ;;  %v5698_v31 = vld [vmem:[%s23854_s12 + $0x810] sm:$0xff]  ;;  %v5727_v5 = vld [vmem:[%s23854_s12 + $0x8f8] sm:$0xff] }
 0xb9a   :  { %v20149_v54 = vadd.f32 %v5424_v53, %v5404_v49  ;;  %5905 = vmatmul.mubr.f32.vlgmr.msra.gmra.mrb[46].mxu1 %v20126_v44  ;;  %6118 = vmatmul.mubr.f32.vlgmr.msra.gmra.mrb[42].mxu0 %v20126_v44  ;;  %v5666_v49 = vld [vmem:[%s23854_s12 + $0x710] sm:$0xff]  ;;  %v5663_v53 = vld [vmem:[%s23854_s12 + $0x6f8] sm:$0xff]  ;;  %v5665_v15 = vld [vmem:[%s23854_s12 + $0x708] sm:$0xff] }
 0xb9b   :  { %13840 = vmatpush1.bf16.msra.mxu1 %v13839_v33  ;;  %14000 = vmatpush1.bf16.msra.mxu0 %v13999_v25  ;;  %v20153_v16 = vmax.f32 %v5428_v13, %v5433_v41  ;;  %v5650_v33 = vld [vmem:[%s23854_s12 + $0x690] sm:$0xff]  ;;  %v5655_v13 = vld [vmem:[%s23854_s12 + $0x6b8] sm:$0xff]  ;;  %v14017_v25 = vpack.c.bf16 %v5658_v47, %v5653_v58  ;;  %v13861_v41 = vpack.c.bf16 %v5666_v49, %v5661_v27  ;;  %v5685_v42 = vld [vmem:[%s23854_s12 + $0x7a8] sm:$0xff] }
 0xb9c   :  { %13842 = vmatprep.subr.bf16.mxu1 %v13841_v21  ;;  %14002 = vmatprep.subr.bf16.mxu0 %v14001_v9  ;;  %v5652_v21 = vld [vmem:[%s23854_s12 + $0x6a0] sm:$0xff]  ;;  %v13859_v1 = vpack.c.bf16 %v5655_v13, %v5650_v33  ;;  %v5693_v28 = vld [vmem:[%s23854_s12 + $0x7e8] sm:$0xff]  ;;  %v5703_v33 = vld [vmem:[%s23854_s12 + $0x838] sm:$0xff] }
 0xb9d   :  { %5975 = vmatprep.mubr.f32.mxu1 %v20153_v16  ;;  %6188 = vmatprep.mubr.f32.mxu0 %v20153_v16  ;;  %v5668_v9 = vld [vmem:[%s23854_s12 + $0x720] sm:$0xff]  ;;  %v14019_v20 = vpack.c.bf16 %v5657_v2, %v5652_v21  ;;  %v14033_v45 = vpack.c.bf16 %v5698_v31, %v5693_v28  ;;  %v5697_v47 = vld [vmem:[%s23854_s12 + $0x808] sm:$0xff] }
 0xb9e   :  { %v14021_v12 = vpack.c.bf16 %v5668_v9, %v5663_v53  ;;  %v5692_v58 = vld [vmem:[%s23854_s12 + $0x7e0] sm:$0xff]  ;;  %v5705_v2 = vld [vmem:[%s23854_s12 + $0x848] sm:$0xff]  ;;  %v5702_v53 = vld [vmem:[%s23854_s12 + $0x830] sm:$0xff] }
 0xb9f   :  { %13844 = vmatpush1.bf16.msra.mxu1 %v13843_v43  ;;  %14004 = vmatpush1.bf16.msra.mxu0 %v14003_v59  ;;  %v5671_v43 = vld [vmem:[%s23854_s12 + $0x738] sm:$0xff]  ;;  %v5676_v59 = vld [vmem:[%s23854_s12 + $0x760] sm:$0xff]  ;;  %v5737_v31 = vld [vmem:[%s23854_s12 + $0x948] sm:$0xff] }
 0xba0   :  { %13846 = vmatprep.subr.bf16.mxu1 %v13845_v6  ;;  %14006 = vmatprep.subr.bf16.mxu0 %v14005_v38  ;;  %v13863_v6 = vpack.c.bf16 %v5665_v15, %v5660_v26  ;;  %v14023_v38 = vpack.c.bf16 %v5667_v11, %v5662_v57  ;;  %v13865_v56 = vpack.c.bf16 %v5676_v59, %v5671_v43  ;;  %v5708_v13 = vld [vmem:[%s23854_s12 + $0x860] sm:$0xff]  ;;  %v5707_v9 = vld [vmem:[%s23854_s12 + $0x858] sm:$0xff]  ;;  %v5713_v26 = vld [vmem:[%s23854_s12 + $0x888] sm:$0xff] }
 0xba1   :  { %v5700_v21 = vld [vmem:[%s23854_s12 + $0x820] sm:$0xff]  ;;  %v14037_v49 = vpack.c.bf16 %v5708_v13, %v5703_v33  ;;  %v5718_v15 = vld [vmem:[%s23854_s12 + $0x8b0] sm:$0xff]  ;;  %v5715_v11 = vld [vmem:[%s23854_s12 + $0x898] sm:$0xff] }
 0xba2   :  { %v5710_v57 = vld [vmem:[%s23854_s12 + $0x870] sm:$0xff]  ;;  %v14041_v59 = vpack.c.bf16 %v5718_v15, %v5713_v26  ;;  %v5732_v28 = vld [vmem:[%s23854_s12 + $0x920] sm:$0xff]  ;;  %v5747_v13 = vld [vmem:[%s23854_s12 + $0x998] sm:$0xff] }
 0xba3   :  { %13848 = vmatpush1.bf16.msra.mxu1 %v13847_v40  ;;  %14008 = vmatpush1.bf16.msra.mxu0 %v14007_v22  ;;  %v5681_v40 = vld [vmem:[%s23854_s12 + $0x788] sm:$0xff]  ;;  %v5686_v22 = vld [vmem:[%s23854_s12 + $0x7b0] sm:$0xff]  ;;  %v5752_v26 = vld [vmem:[%s23854_s12 + $0x9c0] sm:$0xff] }
 0xba4   :  { %13850 = vmatprep.subr.bf16.mxu1 %v13849_v60  ;;  %14010 = vmatprep.subr.bf16.mxu0 %v14009_v55  ;;  %v13867_v60 = vpack.c.bf16 %v5675_v63, %v5670_v14  ;;  %v14027_v55 = vpack.c.bf16 %v5677_v18, %v5672_v30  ;;  %v13869_v46 = vpack.c.bf16 %v5686_v22, %v5681_v40  ;;  %v5723_v14 = vld [vmem:[%s23854_s12 + $0x8d8] sm:$0xff]  ;;  %v5728_v63 = vld [vmem:[%s23854_s12 + $0x900] sm:$0xff]  ;;  %v5725_v18 = vld [vmem:[%s23854_s12 + $0x8e8] sm:$0xff] }
 0xba5   :  { %v5720_v30 = vld [vmem:[%s23854_s12 + $0x8c0] sm:$0xff]  ;;  %v14045_v22 = vpack.c.bf16 %v5728_v63, %v5723_v14  ;;  %v5742_v33 = vld [vmem:[%s23854_s12 + $0x970] sm:$0xff]  ;;  %v5757_v15 = vld [vmem:[%s23854_s12 + $0x9e8] sm:$0xff] }
 0xba6   :  { %v5762_v63 = vld [vmem:[%s23854_s12 + $0xa10] sm:$0xff] }
 0xba7   :  { %13852 = vmatpush1.bf16.msra.mxu1 %v13851_v34  ;;  %14012 = vmatpush1.bf16.msra.mxu0 %v14011_v29  ;;  %v5691_v34 = vld [vmem:[%s23854_s12 + $0x7d8] sm:$0xff]  ;;  %v5696_v29 = vld [vmem:[%s23854_s12 + $0x800] sm:$0xff] }
 0xba8   :  { %13854 = vmatprep.subr.bf16.mxu1 %v13853_v50  ;;  %14014 = vmatprep.subr.bf16.mxu0 %v14013_v61  ;;  %v13871_v50 = vpack.c.bf16 %v5685_v42, %v5680_v37  ;;  %v14031_v61 = vpack.c.bf16 %v5687_v23, %v5682_v4  ;;  %v13873_v62 = vpack.c.bf16 %v5696_v29, %v5691_v34  ;;  %v5733_v37 = vld [vmem:[%s23854_s12 + $0x928] sm:$0xff]  ;;  %v5738_v42 = vld [vmem:[%s23854_s12 + $0x950] sm:$0xff]  ;;  %v5735_v23 = vld [vmem:[%s23854_s12 + $0x938] sm:$0xff] }
 0xba9   :  { %v5730_v4 = vld [vmem:[%s23854_s12 + $0x910] sm:$0xff]  ;;  %v14049_v29 = vpack.c.bf16 %v5738_v42, %v5733_v37 }
 0xbab   :  { %13856 = vmatpush1.bf16.msra.mxu1 %v13855_v51  ;;  %14016 = vmatpush1.bf16.msra.mxu0 %v14015_v52  ;;  %v5701_v51 = vld [vmem:[%s23854_s12 + $0x828] sm:$0xff]  ;;  %v5706_v52 = vld [vmem:[%s23854_s12 + $0x850] sm:$0xff] }
 0xbac   :  { %13858 = vmatprep.subr.bf16.mxu1 %v13857_v8  ;;  %14018 = vmatprep.subr.bf16.mxu0 %v14017_v25  ;;  %v13875_v8 = vpack.c.bf16 %v5695_v35, %v5690_v3  ;;  %v14035_v25 = vpack.c.bf16 %v5697_v47, %v5692_v58  ;;  %v13877_v27 = vpack.c.bf16 %v5706_v52, %v5701_v51  ;;  %v5743_v3 = vld [vmem:[%s23854_s12 + $0x978] sm:$0xff]  ;;  %v5748_v35 = vld [vmem:[%s23854_s12 + $0x9a0] sm:$0xff]  ;;  %v5745_v47 = vld [vmem:[%s23854_s12 + $0x988] sm:$0xff] }
 0xbad   :  { %v5740_v58 = vld [vmem:[%s23854_s12 + $0x960] sm:$0xff]  ;;  %v14053_v52 = vpack.c.bf16 %v5748_v35, %v5743_v3  ;;  %v5782_v35 = vld [vmem:[%s23854_s12 + $0xab0] sm:$0xff] }
 0xbaf   :  { %13860 = vmatpush1.bf16.msra.mxu1 %v13859_v1  ;;  %14020 = vmatpush1.bf16.msra.mxu0 %v14019_v20  ;;  %v5711_v1 = vld [vmem:[%s23854_s12 + $0x878] sm:$0xff]  ;;  %v5716_v20 = vld [vmem:[%s23854_s12 + $0x8a0] sm:$0xff] }
 0xbb0   :  { %13862 = vmatprep.subr.bf16.mxu1 %v13861_v41  ;;  %14022 = vmatprep.subr.bf16.mxu0 %v14021_v12  ;;  %v13879_v41 = vpack.c.bf16 %v5705_v2, %v5700_v21  ;;  %v14039_v12 = vpack.c.bf16 %v5707_v9, %v5702_v53  ;;  %v13881_v43 = vpack.c.bf16 %v5716_v20, %v5711_v1  ;;  %v5753_v21 = vld [vmem:[%s23854_s12 + $0x9c8] sm:$0xff]  ;;  %v5758_v2 = vld [vmem:[%s23854_s12 + $0x9f0] sm:$0xff]  ;;  %v5755_v9 = vld [vmem:[%s23854_s12 + $0x9d8] sm:$0xff] }
 0xbb1   :  { %v5750_v53 = vld [vmem:[%s23854_s12 + $0x9b0] sm:$0xff]  ;;  %v14057_v20 = vpack.c.bf16 %v5758_v2, %v5753_v21  ;;  %v5792_v2 = vld [vmem:[%s23854_s12 + $0xb00] sm:$0xff] }
 0xbb3   :  { %13864 = vmatpush1.bf16.msra.mxu1 %v13863_v6  ;;  %14024 = vmatpush1.bf16.msra.mxu0 %v14023_v38  ;;  %v5721_v6 = vld [vmem:[%s23854_s12 + $0x8c8] sm:$0xff]  ;;  %v5726_v38 = vld [vmem:[%s23854_s12 + $0x8f0] sm:$0xff] }
 0xbb4   :  { %13866 = vmatprep.subr.bf16.mxu1 %v13865_v56  ;;  %14026 = vmatprep.subr.bf16.mxu0 %v14025_v0  ;;  %v13883_v56 = vpack.c.bf16 %v5715_v11, %v5710_v57  ;;  %v14043_v0 = vpack.c.bf16 %v5717_v32, %v5712_v24  ;;  %v13885_v40 = vpack.c.bf16 %v5726_v38, %v5721_v6  ;;  %v5763_v57 = vld [vmem:[%s23854_s12 + $0xa18] sm:$0xff]  ;;  %v5768_v11 = vld [vmem:[%s23854_s12 + $0xa40] sm:$0xff]  ;;  %v5765_v32 = vld [vmem:[%s23854_s12 + $0xa28] sm:$0xff]  ;;  %v5432_v6 = vmul.f32 0.2, %v20115_v7 }
 0xbb5   :  { %v5760_v24 = vld [vmem:[%s23854_s12 + $0xa00] sm:$0xff]  ;;  %v14061_v14 = vpack.c.bf16 %v5768_v11, %v5763_v57  ;;  %v5802_v11 = vld [vmem:[%s23854_s12 + $0xb50] sm:$0xff] }
 0xbb7   :  { %13868 = vmatpush1.bf16.msra.mxu1 %v13867_v60  ;;  %14028 = vmatpush1.bf16.msra.mxu0 %v14027_v55  ;;  %v5731_v60 = vld [vmem:[%s23854_s12 + $0x918] sm:$0xff]  ;;  %v5736_v55 = vld [vmem:[%s23854_s12 + $0x940] sm:$0xff] }
 0xbb8   :  { %13870 = vmatprep.subr.bf16.mxu1 %v13869_v46  ;;  %14030 = vmatprep.subr.bf16.mxu0 %v14029_v36  ;;  %v13887_v46 = vpack.c.bf16 %v5725_v18, %v5720_v30  ;;  %v14047_v36 = vpack.c.bf16 %v5727_v5, %v5722_v39  ;;  %v13889_v34 = vpack.c.bf16 %v5736_v55, %v5731_v60  ;;  %v5776_v30 = vld [vmem:[%s23854_s12 + $0xa80] sm:$0xff]  ;;  %v5773_v18 = vld [vmem:[%s23854_s12 + $0xa68] sm:$0xff]  ;;  %v5770_v5 = vld [vmem:[%s23854_s12 + $0xa50] sm:$0xff] }
 0xbb9   :  { %v5775_v60 = vld [vmem:[%s23854_s12 + $0xa78] sm:$0xff]  ;;  %v20525_v55 = vmax.f32 %v20115_v7, %v5432_v6  ;;  %v5786_v7 = vld [vmem:[%s23854_s12 + $0xad0] sm:$0xff] }
 0xbba   :  { %v5818_v6 = vld [vmem:[%s23854_s12 + $0xbd0] sm:$0xff] }
 0xbbb   :  { %13872 = vmatpush1.bf16.msra.mxu1 %v13871_v50  ;;  %14032 = vmatpush1.bf16.msra.mxu0 %v14031_v61  ;;  %v5741_v50 = vld [vmem:[%s23854_s12 + $0x968] sm:$0xff]  ;;  %v5746_v61 = vld [vmem:[%s23854_s12 + $0x990] sm:$0xff] }
 0xbbc   :  { %13874 = vmatprep.subr.bf16.mxu1 %v13873_v62  ;;  %14034 = vmatprep.subr.bf16.mxu0 %v14033_v45  ;;  %v13891_v62 = vpack.c.bf16 %v5735_v23, %v5730_v4  ;;  %v14051_v45 = vpack.c.bf16 %v5737_v31, %v5732_v28  ;;  %v13893_v51 = vpack.c.bf16 %v5746_v61, %v5741_v50  ;;  %v5781_v4 = vld [vmem:[%s23854_s12 + $0xaa8] sm:$0xff]  ;;  %v5783_v23 = vld [vmem:[%s23854_s12 + $0xab8] sm:$0xff]  ;;  %v5780_v31 = vld [vmem:[%s23854_s12 + $0xaa0] sm:$0xff] }
 0xbbd   :  { %v5785_v50 = vld [vmem:[%s23854_s12 + $0xac8] sm:$0xff]  ;;  %v13909_v61 = vpack.c.bf16 %v5786_v7, %v5781_v4 }
 0xbbf   :  { %13876 = vmatpush1.bf16.msra.mxu1 %v13875_v8  ;;  %14036 = vmatpush1.bf16.msra.mxu0 %v14035_v25  ;;  %v5751_v8 = vld [vmem:[%s23854_s12 + $0x9b8] sm:$0xff]  ;;  %v5756_v25 = vld [vmem:[%s23854_s12 + $0x9e0] sm:$0xff] }
 0xbc0   :  { %13878 = vmatprep.subr.bf16.mxu1 %v13877_v27  ;;  %14038 = vmatprep.subr.bf16.mxu0 %v14037_v49  ;;  %v13895_v27 = vpack.c.bf16 %v5745_v47, %v5740_v58  ;;  %v14055_v49 = vpack.c.bf16 %v5747_v13, %v5742_v33  ;;  %v13897_v1 = vpack.c.bf16 %v5756_v25, %v5751_v8  ;;  %v5796_v58 = vld [vmem:[%s23854_s12 + $0xb20] sm:$0xff]  ;;  %v5793_v47 = vld [vmem:[%s23854_s12 + $0xb08] sm:$0xff]  ;;  %v5790_v13 = vld [vmem:[%s23854_s12 + $0xaf0] sm:$0xff] }
 0xbc1   :  { %v5795_v8 = vld [vmem:[%s23854_s12 + $0xb18] sm:$0xff] }
 0xbc3   :  { %13880 = vmatpush1.bf16.msra.mxu1 %v13879_v41  ;;  %14040 = vmatpush1.bf16.msra.mxu0 %v14039_v12  ;;  %v5761_v41 = vld [vmem:[%s23854_s12 + $0xa08] sm:$0xff]  ;;  %v5766_v12 = vld [vmem:[%s23854_s12 + $0xa30] sm:$0xff] }
 0xbc4   :  { %13882 = vmatprep.subr.bf16.mxu1 %v13881_v43  ;;  %14042 = vmatprep.subr.bf16.mxu0 %v14041_v59  ;;  %v13899_v43 = vpack.c.bf16 %v5755_v9, %v5750_v53  ;;  %v14059_v59 = vpack.c.bf16 %v5757_v15, %v5752_v26  ;;  %v13901_v38 = vpack.c.bf16 %v5766_v12, %v5761_v41  ;;  %v5806_v53 = vld [vmem:[%s23854_s12 + $0xb70] sm:$0xff]  ;;  %v5803_v9 = vld [vmem:[%s23854_s12 + $0xb58] sm:$0xff]  ;;  %v5800_v15 = vld [vmem:[%s23854_s12 + $0xb40] sm:$0xff] }
 0xbc5   :  { %v5805_v41 = vld [vmem:[%s23854_s12 + $0xb68] sm:$0xff] }
 0xbc7   :  { %13884 = vmatpush1.bf16.msra.mxu1 %v13883_v56  ;;  %14044 = vmatpush1.bf16.msra.mxu0 %v14043_v0  ;;  %v5767_v56 = vld [vmem:[%s23854_s12 + $0xa38] sm:$0xff] }
 0xbc8   :  { %13886 = vmatprep.subr.bf16.mxu1 %v13885_v40  ;;  %14046 = vmatprep.subr.bf16.mxu0 %v14045_v22  ;;  %v5771_v0 = vld [vmem:[%s23854_s12 + $0xa58] sm:$0xff]  ;;  %v5778_v40 = vld [vmem:[%s23854_s12 + $0xa90] sm:$0xff]  ;;  %v13903_v22 = vpack.c.bf16 %v5765_v32, %v5760_v24  ;;  %v14063_v39 = vpack.c.bf16 %v5767_v56, %v5762_v63  ;;  %v5816_v24 = vld [vmem:[%s23854_s12 + $0xbc0] sm:$0xff] }
 0xbc9   :  { %v13905_v37 = vpack.c.bf16 %v5776_v30, %v5771_v0  ;;  %v14065_v42 = vpack.c.bf16 %v5778_v40, %v5773_v18  ;;  %v5813_v32 = vld [vmem:[%s23854_s12 + $0xba8] sm:$0xff]  ;;  %v5810_v63 = vld [vmem:[%s23854_s12 + $0xb90] sm:$0xff]  ;;  %v5815_v56 = vld [vmem:[%s23854_s12 + $0xbb8] sm:$0xff] }
 0xbca   :  { %v14081_v30 = vpack.c.bf16 %v5818_v6, %v5813_v32  ;;  %v5812_v18 = vld [vmem:[%s23854_s12 + $0xba0] sm:$0xff]  ;;  %v5817_v40 = vld [vmem:[%s23854_s12 + $0xbc8] sm:$0xff]  ;;  %v5614_v32 = vld [vmem:[%s23854_s12 + $0x570] sm:$0xff] }
 0xbcb   :  { %13888 = vmatpush1.bf16.msra.mxu1 %v13887_v46  ;;  %14048 = vmatpush1.bf16.msra.mxu0 %v14047_v36  ;;  %v5772_v46 = vld [vmem:[%s23854_s12 + $0xa60] sm:$0xff]  ;;  %v5777_v36 = vld [vmem:[%s23854_s12 + $0xa88] sm:$0xff] }
 0xbcc   :  { %13890 = vmatprep.subr.bf16.mxu1 %v13889_v34  ;;  %14050 = vmatprep.subr.bf16.mxu0 %v14049_v29  ;;  %v5788_v34 = vld [vmem:[%s23854_s12 + $0xae0] sm:$0xff]  ;;  %v13907_v29 = vpack.c.bf16 %v5775_v60, %v5770_v5  ;;  %v14067_v28 = vpack.c.bf16 %v5777_v36, %v5772_v46  ;;  %v5823_v5 = vld [vmem:[%s23854_s12 + $0xbf8] sm:$0xff]  ;;  %v5825_v36 = vld [vmem:[%s23854_s12 + $0xc08] sm:$0xff] }
 0xbcd   :  { %v14069_v3 = vpack.c.bf16 %v5788_v34, %v5783_v23  ;;  %v5828_v60 = vld [vmem:[%s23854_s12 + $0xc20] sm:$0xff]  ;;  %v5822_v23 = vld [vmem:[%s23854_s12 + $0xbf0] sm:$0xff]  ;;  %v5827_v34 = vld [vmem:[%s23854_s12 + $0xc18] sm:$0xff] }
 0xbce   :  { %v5820_v46 = vld [vmem:[%s23854_s12 + $0xbe0] sm:$0xff]  ;;  %v14085_v7 = vpack.c.bf16 %v5828_v60, %v5823_v5  ;;  %v5554_v60 = vld [vmem:[%s23854_s12 + $0x390] sm:$0xff] }
 0xbcf   :  { %13892 = vmatpush1.bf16.msra.mxu1 %v13891_v62  ;;  %14052 = vmatpush1.bf16.msra.mxu0 %v14051_v45  ;;  %v5787_v62 = vld [vmem:[%s23854_s12 + $0xad8] sm:$0xff]  ;;  %v5624_v5 = vld [vmem:[%s23854_s12 + $0x5c0] sm:$0xff] }
 0xbd0   :  { %13894 = vmatprep.subr.bf16.mxu1 %v13893_v51  ;;  %14054 = vmatprep.subr.bf16.mxu0 %v14053_v52  ;;  %v5791_v45 = vld [vmem:[%s23854_s12 + $0xaf8] sm:$0xff]  ;;  %v5798_v51 = vld [vmem:[%s23854_s12 + $0xb30] sm:$0xff]  ;;  %v13911_v52 = vpack.c.bf16 %v5785_v50, %v5780_v31  ;;  %v14071_v33 = vpack.c.bf16 %v5787_v62, %v5782_v35  ;;  %v5833_v31 = vld [vmem:[%s23854_s12 + $0xc48] sm:$0xff] }
 0xbd1   :  { %v13913_v25 = vpack.c.bf16 %v5796_v58, %v5791_v45  ;;  %v14073_v21 = vpack.c.bf16 %v5798_v51, %v5793_v47  ;;  %v5838_v50 = vld [vmem:[%s23854_s12 + $0xc70] sm:$0xff]  ;;  %v5835_v62 = vld [vmem:[%s23854_s12 + $0xc58] sm:$0xff]  ;;  %v5832_v47 = vld [vmem:[%s23854_s12 + $0xc40] sm:$0xff] }
 0xbd2   :  { %v5830_v35 = vld [vmem:[%s23854_s12 + $0xc30] sm:$0xff]  ;;  %v14089_v58 = vpack.c.bf16 %v5838_v50, %v5833_v31  ;;  %v5837_v51 = vld [vmem:[%s23854_s12 + $0xc68] sm:$0xff]  ;;  %v5639_v31 = vld [vmem:[%s23854_s12 + $0x638] sm:$0xff] }
 0xbd3   :  { %13896 = vmatpush1.bf16.msra.mxu1 %v13895_v27  ;;  %14056 = vmatpush1.bf16.msra.mxu0 %v14055_v49  ;;  %v5797_v27 = vld [vmem:[%s23854_s12 + $0xb28] sm:$0xff]  ;;  %v5564_v50 = vld [vmem:[%s23854_s12 + $0x3e0] sm:$0xff] }
 0xbd4   :  { %13898 = vmatprep.subr.bf16.mxu1 %v13897_v1  ;;  %14058 = vmatprep.subr.bf16.mxu0 %v14057_v20  ;;  %v5801_v49 = vld [vmem:[%s23854_s12 + $0xb48] sm:$0xff]  ;;  %v5808_v1 = vld [vmem:[%s23854_s12 + $0xb80] sm:$0xff]  ;;  %v13915_v20 = vpack.c.bf16 %v5795_v8, %v5790_v13  ;;  %v14075_v26 = vpack.c.bf16 %v5797_v27, %v5792_v2  ;;  %v5434_v2 = vmul.f32 0.2, %v20149_v54 }
 0xbd5   :  { %v13917_v12 = vpack.c.bf16 %v5806_v53, %v5801_v49  ;;  %v14077_v57 = vpack.c.bf16 %v5808_v1, %v5803_v9  ;;  %v5684_v13 = vld [vmem:[%s23854_s12 + $0x7a0] sm:$0xff]  ;;  %v5689_v8 = vld [vmem:[%s23854_s12 + $0x7c8] sm:$0xff] }
 0xbd6   :  { %v14125_v49 = vpack.c.bf16 %v5689_v8, %v5684_v13  ;;  %v5444_v53 = vld [vmem:[%s23854_s12 + $0x20] sm:$0xff]  ;;  %v5449_v9 = vld [vmem:[%s23854_s12 + $0x48] sm:$0xff]  ;;  %v5574_v8 = vld [vmem:[%s23854_s12 + $0x430] sm:$0xff] }
 0xbd7   :  { %13900 = vmatpush1.bf16.msra.mxu1 %v13899_v43  ;;  %14060 = vmatpush1.bf16.msra.mxu0 %v14059_v59  ;;  %v5807_v43 = vld [vmem:[%s23854_s12 + $0xb78] sm:$0xff]  ;;  %v5604_v1 = vld [vmem:[%s23854_s12 + $0x520] sm:$0xff]  ;;  %v5649_v13 = vld [vmem:[%s23854_s12 + $0x688] sm:$0xff] }
 0xbd8   :  { %13902 = vmatprep.subr.bf16.mxu1 %v13901_v38  ;;  %14062 = vmatprep.subr.bf16.mxu0 %v14061_v14  ;;  %v5811_v59 = vld [vmem:[%s23854_s12 + $0xb98] sm:$0xff]  ;;  %v13919_v38 = vpack.c.bf16 %v5805_v41, %v5800_v15  ;;  %v14079_v14 = vpack.c.bf16 %v5807_v43, %v5802_v11  ;;  %v5694_v41 = vld [vmem:[%s23854_s12 + $0x7f0] sm:$0xff]  ;;  %v20719_v11 = vmax.f32 %v20149_v54, %v5434_v2 }
 0xbd9   :  { %v13921_v0 = vpack.c.bf16 %v5816_v24, %v5811_v59  ;;  %v5539_v15 = vld [vmem:[%s23854_s12 + $0x318] sm:$0xff]  ;;  %v5454_v59 = vld [vmem:[%s23854_s12 + $0x70] sm:$0xff] }
 0xbda   :  { %5976 = vmatmul.mubr.f32.vlgmr.msra.gmra.mrb[46].mxu1 %v20525_v55  ;;  %6189 = vmatmul.mubr.f32.vlgmr.msra.gmra.mrb[42].mxu0 %v20525_v55  ;;  %v5459_v24 = vld [vmem:[%s23854_s12 + $0x98] sm:$0xff] }
 0xbdb   :  { %13904 = vmatpush1.bf16.msra.mxu1 %v13903_v22  ;;  %14064 = vmatpush1.bf16.msra.mxu0 %v14063_v39  ;;  %v5821_v22 = vld [vmem:[%s23854_s12 + $0xbe8] sm:$0xff]  ;;  %v5826_v39 = vld [vmem:[%s23854_s12 + $0xc10] sm:$0xff]  ;;  %v5619_v54 = vld [vmem:[%s23854_s12 + $0x598] sm:$0xff] }
 0xbdc   :  { %13906 = vmatprep.subr.bf16.mxu1 %v13905_v37  ;;  %14066 = vmatprep.subr.bf16.mxu0 %v14065_v42  ;;  %v13923_v37 = vpack.c.bf16 %v5815_v56, %v5810_v63  ;;  %v14083_v42 = vpack.c.bf16 %v5817_v40, %v5812_v18  ;;  %v13925_v4 = vpack.c.bf16 %v5826_v39, %v5821_v22  ;;  %v5549_v63 = vld [vmem:[%s23854_s12 + $0x368] sm:$0xff]  ;;  %v5704_v56 = vld [vmem:[%s23854_s12 + $0x840] sm:$0xff]  ;;  %v5739_v2 = vld [vmem:[%s23854_s12 + $0x958] sm:$0xff] }
 0xbdd   :  { %6046 = vmatprep.mubr.f32.mxu1 %v23873_v19  ;;  %6259 = vmatprep.mubr.f32.mxu0 %v23873_v19  ;;  %v14131_v18 = vpack.c.bf16 %v5619_v54, %v5614_v32  ;;  %v5464_v22 = vld [vmem:[%s23854_s12 + $0xc0] sm:$0xff]  ;;  %v5469_v39 = vld [vmem:[%s23854_s12 + $0xe8] sm:$0xff] }
 0xbde   :  { %v5664_v54 = vld [vmem:[%s23854_s12 + $0x700] sm:$0xff] }
 0xbdf   :  { %13908 = vmatpush1.bf16.msra.mxu1 %v13907_v29  ;;  %14068 = vmatpush1.bf16.msra.mxu0 %v14067_v28  ;;  %v5831_v29 = vld [vmem:[%s23854_s12 + $0xc38] sm:$0xff]  ;;  %v5836_v28 = vld [vmem:[%s23854_s12 + $0xc60] sm:$0xff] }
 0xbe0   :  { %13910 = vmatprep.subr.bf16.mxu1 %v13909_v61  ;;  %14070 = vmatprep.subr.bf16.mxu0 %v14069_v3  ;;  %v13927_v61 = vpack.c.bf16 %v5825_v36, %v5820_v46  ;;  %v14087_v3 = vpack.c.bf16 %v5827_v34, %v5822_v23  ;;  %v13929_v45 = vpack.c.bf16 %v5836_v28, %v5831_v29  ;;  %v5719_v46 = vld [vmem:[%s23854_s12 + $0x8b8] sm:$0xff]  ;;  %v5474_v23 = vld [vmem:[%s23854_s12 + $0x110] sm:$0xff] }
 0xbe1   :  { %v14103_v36 = vpack.c.bf16 %v5469_v39, %v5464_v22  ;;  %v5479_v34 = vld [vmem:[%s23854_s12 + $0x138] sm:$0xff]  ;;  %v5634_v29 = vld [vmem:[%s23854_s12 + $0x610] sm:$0xff] }
 0xbe3   :  { %13912 = vmatpush1.bf16.msra.mxu1 %v13911_v52  ;;  %14072 = vmatpush1.bf16.msra.mxu0 %v14071_v33  ;;  %v5524_v52 = vld [vmem:[%s23854_s12 + $0x2a0] sm:$0xff]  ;;  %v5529_v33 = vld [vmem:[%s23854_s12 + $0x2c8] sm:$0xff] }
 0xbe4   :  { %13914 = vmatprep.subr.bf16.mxu1 %v13913_v25  ;;  %14074 = vmatprep.subr.bf16.mxu0 %v14073_v21  ;;  %v13931_v25 = vpack.c.bf16 %v5835_v62, %v5830_v35  ;;  %v14091_v21 = vpack.c.bf16 %v5837_v51, %v5832_v47  ;;  %v14093_v27 = vpack.c.bf16 %v5529_v33, %v5524_v52  ;;  %v5729_v35 = vld [vmem:[%s23854_s12 + $0x908] sm:$0xff]  ;;  %v5484_v47 = vld [vmem:[%s23854_s12 + $0x160] sm:$0xff] }
 0xbe5   :  { %v14107_v62 = vpack.c.bf16 %v5479_v34, %v5474_v23  ;;  %v5489_v51 = vld [vmem:[%s23854_s12 + $0x188] sm:$0xff]  ;;  %v5644_v52 = vld [vmem:[%s23854_s12 + $0x660] sm:$0xff] }
 0xbe6   :  { %v5769_v23 = vld [vmem:[%s23854_s12 + $0xa48] sm:$0xff] }
 0xbe7   :  { %13916 = vmatpush1.bf16.msra.mxu1 %v13915_v20  ;;  %14076 = vmatpush1.bf16.msra.mxu0 %v14075_v26  ;;  %v5609_v20 = vld [vmem:[%s23854_s12 + $0x548] sm:$0xff]  ;;  %v5534_v26 = vld [vmem:[%s23854_s12 + $0x2f0] sm:$0xff] }
 0xbe8   :  { %13918 = vmatprep.subr.bf16.mxu1 %v13917_v12  ;;  %14078 = vmatprep.subr.bf16.mxu0 %v14077_v57  ;;  %v5699_v12 = vld [vmem:[%s23854_s12 + $0x818] sm:$0xff]  ;;  %v14095_v57 = vpack.c.bf16 %v5449_v9, %v5444_v53  ;;  %v14127_v43 = vpack.c.bf16 %v5609_v20, %v5604_v1  ;;  %v14097_v6 = vpack.c.bf16 %v5539_v15, %v5534_v26  ;;  %v5494_v9 = vld [vmem:[%s23854_s12 + $0x1b0] sm:$0xff] }
 0xbe9   :  { %v5499_v1 = vld [vmem:[%s23854_s12 + $0x1d8] sm:$0xff]  ;;  %v5654_v20 = vld [vmem:[%s23854_s12 + $0x6b0] sm:$0xff] }
 0xbea   :  { %v5659_v15 = vld [vmem:[%s23854_s12 + $0x6d8] sm:$0xff] }
 0xbeb   :  { %13920 = vmatpush1.bf16.msra.mxu1 %v13919_v38  ;;  %14080 = vmatpush1.bf16.msra.mxu0 %v14079_v14  ;;  %v14129_v38 = vpack.c.bf16 %v5699_v12, %v5694_v41  ;;  %v5544_v14 = vld [vmem:[%s23854_s12 + $0x340] sm:$0xff]  ;;  %v5589_v12 = vld [vmem:[%s23854_s12 + $0x4a8] sm:$0xff] }
 0xbec   :  { %13922 = vmatprep.subr.bf16.mxu1 %v13921_v0  ;;  %14082 = vmatprep.subr.bf16.mxu0 %v14081_v30  ;;  %v5709_v0 = vld [vmem:[%s23854_s12 + $0x868] sm:$0xff]  ;;  %v14099_v30 = vpack.c.bf16 %v5459_v24, %v5454_v59  ;;  %v14101_v40 = vpack.c.bf16 %v5549_v63, %v5544_v14  ;;  %v5584_v41 = vld [vmem:[%s23854_s12 + $0x480] sm:$0xff]  ;;  %v14115_v59 = vpack.c.bf16 %v5499_v1, %v5494_v9  ;;  %v5799_v9 = vld [vmem:[%s23854_s12 + $0xb38] sm:$0xff] }
 0xbed   :  { %v14147_v24 = vpack.c.bf16 %v5659_v15, %v5654_v20  ;;  %v14117_v32 = vpack.c.bf16 %v5589_v12, %v5584_v41  ;;  %v5669_v63 = vld [vmem:[%s23854_s12 + $0x728] sm:$0xff]  ;;  %v6518_v15 = vld [vmem:[%s23855_s13 + $0x38] sm:$0xff]  ;;  %v5804_v12 = vld [vmem:[%s23854_s12 + $0xb60] sm:$0xff] }
 0xbee   :  { %v14151_v22 = vpack.c.bf16 %v5669_v63, %v5664_v54  ;;  %v5829_v54 = vld [vmem:[%s23854_s12 + $0xc28] sm:$0xff]  ;;  %v5834_v63 = vld [vmem:[%s23854_s12 + $0xc50] sm:$0xff] }
 0xbef   :  { %13924 = vmatpush1.bf16.msra.mxu1 %v13923_v37  ;;  %14084 = vmatpush1.bf16.msra.mxu0 %v14083_v42  ;;  %v5559_v37 = vld [vmem:[%s23854_s12 + $0x3b8] sm:$0xff]  ;;  %v5714_v42 = vld [vmem:[%s23854_s12 + $0x890] sm:$0xff] }
 0xbf0   :  { %13926 = vmatprep.subr.bf16.mxu1 %v13925_v4  ;;  %14086 = vmatprep.subr.bf16.mxu0 %v14085_v7  ;;  %v14105_v7 = vpack.c.bf16 %v5559_v37, %v5554_v60  ;;  %v14137_v28 = vpack.c.bf16 %v5719_v46, %v5714_v42  ;;  %v5674_v60 = vld [vmem:[%s23854_s12 + $0x750] sm:$0xff]  ;;  %v5679_v37 = vld [vmem:[%s23854_s12 + $0x778] sm:$0xff]  ;;  %v6527_v42 = vld [vmem:[%s23855_s13 + $0x80] sm:$0xff] }
 0xbf1   :  { %v6528_v46 = vld [vmem:[%s23855_s13 + $0x88] sm:$0xff] }
 0xbf2   :  { %v20893_v34 = vpack.c.bf16 %v6528_v46, %v6527_v42  ;;  %v6546_v42 = vld [vmem:[%s23855_s13 + $0x118] sm:$0xff]  ;;  %v6563_v46 = vld [vmem:[%s23855_s13 + $0x1a0] sm:$0xff] }
 0xbf3   :  { %13928 = vmatpush1.bf16.msra.mxu1 %v13927_v61  ;;  %14088 = vmatpush1.bf16.msra.mxu0 %v14087_v3  ;;  %v5569_v61 = vld [vmem:[%s23854_s12 + $0x408] sm:$0xff]  ;;  %v5724_v3 = vld [vmem:[%s23854_s12 + $0x8e0] sm:$0xff] }
 0xbf4   :  { %13930 = vmatprep.subr.bf16.mxu1 %v13929_v45  ;;  %14090 = vmatprep.subr.bf16.mxu0 %v14089_v58  ;;  %v14139_v45 = vpack.c.bf16 %v5639_v31, %v5634_v29  ;;  %v14109_v58 = vpack.c.bf16 %v5569_v61, %v5564_v50  ;;  %v14141_v33 = vpack.c.bf16 %v5729_v35, %v5724_v3  ;;  %v6511_v29 = vld [vmem:[%s23855_s13] sm:$0xff]  ;;  %v6529_v50 = vld [vmem:[%s23855_s13 + $0x90] sm:$0xff]  ;;  %v6530_v61 = vld [vmem:[%s23855_s13 + $0x98] sm:$0xff] }
 0xbf5   :  { %v5774_v3 = vld [vmem:[%s23854_s12 + $0xa70] sm:$0xff]  ;;  %v5779_v35 = vld [vmem:[%s23854_s12 + $0xa98] sm:$0xff] }
 0xbf7   :  { %13932 = vmatpush1.bf16.msra.mxu1 %v13931_v25  ;;  %14092 = vmatpush1.bf16.msra.mxu0 %v14091_v21  ;;  %v5579_v25 = vld [vmem:[%s23854_s12 + $0x458] sm:$0xff]  ;;  %v5734_v21 = vld [vmem:[%s23854_s12 + $0x930] sm:$0xff] }
 0xbf8   :  { %14094 = vmatprep.subr.bf16.mxu1 %v14093_v27  ;;  %14126 = vmatprep.subr.bf16.mxu0 %v14125_v49  ;;  %v14111_v27 = vpack.c.bf16 %v5489_v51, %v5484_v47  ;;  %v14143_v49 = vpack.c.bf16 %v5649_v13, %v5644_v52  ;;  %v14113_v53 = vpack.c.bf16 %v5579_v25, %v5574_v8  ;;  %v6514_v47 = vld [vmem:[%s23855_s13 + $0x18] sm:$0xff]  ;;  %v6531_v52 = vld [vmem:[%s23855_s13 + $0xa0] sm:$0xff] }
 0xbf9   :  { %v14145_v26 = vpack.c.bf16 %v5739_v2, %v5734_v21  ;;  %v14161_v51 = vpack.c.bf16 %v5779_v35, %v5774_v3  ;;  %v6515_v25 = vld [vmem:[%s23855_s13 + $0x20] sm:$0xff]  ;;  %v6516_v21 = vld [vmem:[%s23855_s13 + $0x28] sm:$0xff]  ;;  %v6550_v3 = vld [vmem:[%s23855_s13 + $0x138] sm:$0xff] }
 0xbfa   :  { %6047 = vmatmul.mubr.f32.vlgmr.msra.gmra.mrb[46].mxu1 %v20719_v11  ;;  %6260 = vmatmul.mubr.f32.vlgmr.msra.gmra.mrb[42].mxu0 %v20719_v11  ;;  %v20968_v1 = vpack.c.bf16 %v6516_v21, %v6515_v25 }
 0xbfb   :  { %14096 = vmatpush3.bf16.msra.mxu1 %v14095_v57  ;;  %6330 = vmatprep.mubr.f32.mxu1 %v20117_v10  ;;  %v14133_v10 = vpack.c.bf16 %v5709_v0, %v5704_v56  ;;  %v5744_v57 = vld [vmem:[%s23854_s12 + $0x980] sm:$0xff]  ;;  %v5594_v56 = vld [vmem:[%s23854_s12 + $0x4d0] sm:$0xff]  ;;  %v5599_v0 = vld [vmem:[%s23854_s12 + $0x4f8] sm:$0xff] }
 0xbfc   :  { %14128 = vmatpush3.bf16.msra.mxu0 %v14127_v43  ;;  %6400 = vmatprep.mubr.f32.mxu0 %v20153_v16  ;;  %v5629_v16 = vld [vmem:[%s23854_s12 + $0x5e8] sm:$0xff]  ;;  %v14121_v39 = vpack.c.bf16 %v5599_v0, %v5594_v56  ;;  %v5839_v56 = vld [vmem:[%s23854_s12 + $0xc78] sm:$0xff]  ;;  %v6559_v0 = vld [vmem:[%s23855_s13 + $0x180] sm:$0xff] }
 0xbfd   :  { %14098 = vmatprep.subr.bf16.mxu1 %v14097_v6  ;;  %14130 = vmatprep.subr.bf16.mxu0 %v14129_v38  ;;  %v14135_v4 = vpack.c.bf16 %v5629_v16, %v5624_v5  ;;  %v5749_v43 = vld [vmem:[%s23854_s12 + $0x9a8] sm:$0xff]  ;;  %v5504_v6 = vld [vmem:[%s23854_s12 + $0x200] sm:$0xff]  ;;  %v5514_v5 = vld [vmem:[%s23854_s12 + $0x250] sm:$0xff] }
 0xbfe   :  { %v5509_v38 = vld [vmem:[%s23854_s12 + $0x228] sm:$0xff]  ;;  %v14149_v14 = vpack.c.bf16 %v5749_v43, %v5744_v57 }
 0xbff   :  { %14100 = vmatpush3.bf16.msra.mxu1 %v14099_v30  ;;  %v5754_v30 = vld [vmem:[%s23854_s12 + $0x9d0] sm:$0xff]  ;;  %v5809_v57 = vld [vmem:[%s23854_s12 + $0xb88] sm:$0xff] }
 0xc00   :  { %14132 = vmatpush3.bf16.msra.mxu0 %v14131_v18  ;;  %14102 = vmatprep.subr.bf16.mxu1 %v14101_v40  ;;  %v5759_v18 = vld [vmem:[%s23854_s12 + $0x9f8] sm:$0xff]  ;;  %v14119_v40 = vpack.c.bf16 %v5509_v38, %v5504_v6  ;;  %v5824_v38 = vld [vmem:[%s23854_s12 + $0xc00] sm:$0xff] }
 0xc01   :  { %14134 = vmatprep.subr.bf16.mxu0 %v14133_v10  ;;  %v5519_v10 = vld [vmem:[%s23854_s12 + $0x278] sm:$0xff]  ;;  %v14153_v16 = vpack.c.bf16 %v5759_v18, %v5754_v30  ;;  %v6560_v30 = vld [vmem:[%s23855_s13 + $0x188] sm:$0xff]  ;;  %v14179_v18 = vpack.c.bf16 %v5839_v56, %v5834_v63  ;;  %v6571_v63 = vld [vmem:[%s23855_s13 + $0x1e0] sm:$0xff] }
 0xc03   :  { %14104 = vmatpush3.bf16.msra.mxu1 %v14103_v36  ;;  %v14123_v36 = vpack.c.bf16 %v5519_v10, %v5514_v5  ;;  %v6561_v5 = vld [vmem:[%s23855_s13 + $0x190] sm:$0xff]  ;;  %v6562_v10 = vld [vmem:[%s23855_s13 + $0x198] sm:$0xff] }
 0xc04   :  { %14136 = vmatpush3.bf16.msra.mxu0 %v14135_v4  ;;  %14106 = vmatprep.subr.bf16.mxu1 %v14105_v7  ;;  %v14155_v4 = vpack.c.bf16 %v5679_v37, %v5674_v60  ;;  %v5764_v7 = vld [vmem:[%s23854_s12 + $0xa20] sm:$0xff]  ;;  %v21036_v60 = vpack.c.bf16 %v6562_v10, %v6561_v5  ;;  %v6545_v37 = vld [vmem:[%s23855_s13 + $0x110] sm:$0xff]  ;;  %v6556_v10 = vld [vmem:[%s23855_s13 + $0x168] sm:$0xff] }
 0xc05   :  { %14138 = vmatprep.subr.bf16.mxu0 %v14137_v28  ;;  %v6512_v28 = vld [vmem:[%s23855_s13 + $0x8] sm:$0xff]  ;;  %v14158_v31 = vpack.c.bf16 %v5769_v23, %v5764_v7  ;;  %v6547_v23 = vld [vmem:[%s23855_s13 + $0x120] sm:$0xff] }
 0xc06   :  { %v6555_v5 = vld [vmem:[%s23855_s13 + $0x160] sm:$0xff] }
 0xc07   :  { %14108 = vmatpush3.bf16.msra.mxu1 %v14107_v62  ;;  %v20915_v62 = vpack.c.bf16 %v6512_v28, %v6511_v29  ;;  %v6548_v29 = vld [vmem:[%s23855_s13 + $0x128] sm:$0xff]  ;;  %v6566_v28 = vld [vmem:[%s23855_s13 + $0x1b8] sm:$0xff] }
 0xc08   :  { %14140 = vmatpush3.bf16.msra.mxu0 %v14139_v45  ;;  %14110 = vmatprep.subr.bf16.mxu1 %v14109_v58  ;;  %v20918_v45 = vpack.c.bf16 %v6530_v61, %v6529_v50  ;;  %v6513_v58 = vld [vmem:[%s23855_s13 + $0x10] sm:$0xff] }
 0xc09   :  { %14142 = vmatprep.subr.bf16.mxu0 %v14141_v33  ;;  %v5784_v33 = vld [vmem:[%s23854_s12 + $0xac0] sm:$0xff]  ;;  %v20943_v13 = vpack.c.bf16 %v6514_v47, %v6513_v58  ;;  %v6549_v61 = vld [vmem:[%s23855_s13 + $0x130] sm:$0xff]  ;;  %v6536_v47 = vld [vmem:[%s23855_s13 + $0xc8] sm:$0xff] }
 0xc0a   :  { %v21082_v35 = vpack.c.bf16 %v6550_v3, %v6549_v61  ;;  %v6535_v58 = vld [vmem:[%s23855_s13 + $0xc0] sm:$0xff] }
 0xc0b   :  { %14112 = vmatpush3.bf16.msra.mxu1 %v14111_v27  ;;  %v6533_v27 = vld [vmem:[%s23855_s13 + $0xb0] sm:$0xff] }
 0xc0c   :  { %14144 = vmatpush3.bf16.msra.mxu0 %v14143_v49  ;;  %14114 = vmatprep.subr.bf16.mxu1 %v14113_v53  ;;  %v6534_v49 = vld [vmem:[%s23855_s13 + $0xb8] sm:$0xff]  ;;  %v5794_v53 = vld [vmem:[%s23854_s12 + $0xb10] sm:$0xff] }
 0xc0d   :  { %14146 = vmatprep.subr.bf16.mxu0 %v14145_v26  ;;  %v20971_v20 = vpack.c.bf16 %v6534_v49, %v6533_v27  ;;  %v6517_v26 = vld [vmem:[%s23855_s13 + $0x30] sm:$0xff]  ;;  %v14167_v41 = vpack.c.bf16 %v5799_v9, %v5794_v53  ;;  %v6552_v27 = vld [vmem:[%s23855_s13 + $0x148] sm:$0xff]  ;;  %v6538_v9 = vld [vmem:[%s23855_s13 + $0xd8] sm:$0xff] }
 0xc0e   :  { %v20987_v43 = vpack.c.bf16 %v6518_v15, %v6517_v26  ;;  %v6537_v53 = vld [vmem:[%s23855_s13 + $0xd0] sm:$0xff] }
 0xc0f   :  { %14116 = vmatpush3.bf16.msra.mxu1 %v14115_v59  ;;  %v14170_v59 = vpack.c.bf16 %v5809_v57, %v5804_v12  ;;  %v6569_v26 = vld [vmem:[%s23855_s13 + $0x1d0] sm:$0xff]  ;;  %v21131_v15 = vpack.c.bf16 %v6538_v9, %v6537_v53  ;;  %v6522_v57 = vld [vmem:[%s23855_s13 + $0x58] sm:$0xff] }
 0xc10   :  { %14148 = vmatpush3.bf16.msra.mxu0 %v14147_v24  ;;  %14118 = vmatprep.subr.bf16.mxu1 %v14117_v32  ;;  %v5814_v24 = vld [vmem:[%s23854_s12 + $0xbb0] sm:$0xff]  ;;  %v5819_v32 = vld [vmem:[%s23854_s12 + $0xbd8] sm:$0xff] }
 0xc11   :  { %14150 = vmatprep.subr.bf16.mxu0 %v14149_v14  ;;  %v14173_v6 = vpack.c.bf16 %v5819_v32, %v5814_v24  ;;  %v14176_v14 = vpack.c.bf16 %v5829_v54, %v5824_v38  ;;  %v6521_v12 = vld [vmem:[%s23855_s13 + $0x50] sm:$0xff]  ;;  %v6539_v54 = vld [vmem:[%s23855_s13 + $0xe0] sm:$0xff] }
 0xc12   :  { %v21144_v24 = vpack.c.bf16 %v6522_v57, %v6521_v12  ;;  %v6553_v32 = vld [vmem:[%s23855_s13 + $0x150] sm:$0xff] }
 0xc13   :  { %14120 = vmatpush3.bf16.msra.mxu1 %v14119_v40  ;;  %v21019_v40 = vpack.c.bf16 %v6560_v30, %v6559_v0  ;;  %v6572_v0 = vld [vmem:[%s23855_s13 + $0x1e8] sm:$0xff]  ;;  %v6523_v30 = vld [vmem:[%s23855_s13 + $0x60] sm:$0xff] }
 0xc14   :  { %14152 = vmatpush3.bf16.msra.mxu0 %v14151_v22  ;;  %14122 = vmatprep.subr.bf16.mxu1 %v14121_v39  ;;  %v6543_v22 = vld [vmem:[%s23855_s13 + $0x100] sm:$0xff]  ;;  %v6544_v39 = vld [vmem:[%s23855_s13 + $0x108] sm:$0xff] }
 0xc15   :  { %14154 = vmatprep.subr.bf16.mxu0 %v14153_v16  ;;  %v21033_v16 = vpack.c.bf16 %v6544_v39, %v6543_v22  ;;  %v21178_v22 = vpack.c.bf16 %v6572_v0, %v6571_v63 }
 0xc17   :  { %14124 = vmatpush3.bf16.msra.mxu1 %v14123_v36  ;;  %v6564_v36 = vld [vmem:[%s23855_s13 + $0x1a8] sm:$0xff] }
 0xc18   :  { %14156 = vmatpush3.bf16.msra.mxu0 %v14155_v4  ;;  %14157 = vmatprep.subr.bf16.mxu1 %v23871_v48  ;;  %v21052_v4 = vpack.c.bf16 %v6546_v42, %v6545_v37  ;;  %v21055_v7 = vpack.c.bf16 %v6564_v36, %v6563_v46  ;;  %v21189_v37 = vpack.c.bf16 %v6556_v10, %v6555_v5  ;;  %v6541_v42 = vld [vmem:[%s23855_s13 + $0xf0] sm:$0xff]  ;;  %v6542_v46 = vld [vmem:[%s23855_s13 + $0xf8] sm:$0xff] }
 0xc19   :  { %14182 = vmatprep.subr.bf16.mxu0 %v20893_v34  ;;  %v6573_v36 = vld [vmem:[%s23855_s13 + $0x1f0] sm:$0xff] }
 0xc1a   :  { %6331 = vmatmul.mubr.f32.vlgmr.msra.gmra.mrb[48].mxu1 %v20126_v44  ;;  %v6532_v44 = vld [vmem:[%s23855_s13 + $0xa8] sm:$0xff] }
 0xc1b   :  { %6401 = vmatmul.mubr.f32.vlgmr.msra.gmra.mrb[44].mxu0 %v20525_v55  ;;  %14159 = vmatpush3.bf16.msra.mxu1 %v14158_v31  ;;  %v5789_v55 = vld [vmem:[%s23854_s12 + $0xae8] sm:$0xff]  ;;  %v20946_v8 = vpack.c.bf16 %v6532_v44, %v6531_v52  ;;  %v21070_v31 = vpack.c.bf16 %v6548_v29, %v6547_v23  ;;  %v21095_v52 = vpack.c.bf16 %v6536_v47, %v6535_v58  ;;  %v6574_v29 = vld [vmem:[%s23855_s13 + $0x1f8] sm:$0xff]  ;;  %v6557_v58 = vld [vmem:[%s23855_s13 + $0x170] sm:$0xff] }
 0xc1c   :  { %14160 = vmatprep.subr.bf16.mxu1 %v23871_v48  ;;  %12065 = vmatprep.mubr.msk.f32.mxu1 %vm15304_vm1, %v23873_v19  ;;  %v14164_v2 = vpack.c.bf16 %v5789_v55, %v5784_v33  ;;  %v6568_v44 = vld [vmem:[%s23855_s13 + $0x1c8] sm:$0xff]  ;;  %v6519_v33 = vld [vmem:[%s23855_s13 + $0x40] sm:$0xff]  ;;  %v21203_v23 = vpack.c.bf16 %v6542_v46, %v6541_v42  ;;  %v21214_v61 = vpack.c.bf16 %v6574_v29, %v6573_v36  ;;  %v6558_v47 = vld [vmem:[%s23855_s13 + $0x178] sm:$0xff] }
 0xc1d   :  { %14184 = vmatpush3.bf16.msra.mxu0 %v20915_v62  ;;  %v6520_v55 = vld [vmem:[%s23855_s13 + $0x48] sm:$0xff] }
 0xc1e   :  { %14186 = vmatprep.subr.bf16.mxu0 %v20918_v45  ;;  %v21108_v21 = vpack.c.bf16 %v6520_v55, %v6519_v33 }
 0xc1f   :  { %14162 = vmatpush3.bf16.msra.mxu1 %v14161_v51  ;;  %v6567_v51 = vld [vmem:[%s23855_s13 + $0x1c0] sm:$0xff] }
 0xc20   :  { %14163 = vmatprep.subr.bf16.mxu1 %v23871_v48  ;;  %v21106_v25 = vpack.c.bf16 %v6568_v44, %v6567_v51  ;;  %v21225_v51 = vpack.c.bf16 %v6558_v47, %v6557_v58  ;;  %v6576_v58 = vld [vmem:[%s23855_s13 + $0x208] sm:$0xff] }
 0xc21   :  { %14188 = vmatpush3.bf16.msra.mxu0 %v20943_v13 }
 0xc22   :  { %14190 = vmatprep.subr.bf16.mxu0 %v20946_v8 }
 0xc23   :  { %14165 = vmatpush3.bf16.msra.mxu1 %v14164_v2  ;;  %v6551_v2 = vld [vmem:[%s23855_s13 + $0x140] sm:$0xff] }
 0xc24   :  { %14166 = vmatprep.subr.bf16.mxu1 %v23871_v48  ;;  %v21117_v49 = vpack.c.bf16 %v6552_v27, %v6551_v2 }
 0xc25   :  { %14192 = vmatpush3.bf16.msra.mxu0 %v20968_v1 }
 0xc26   :  { %14194 = vmatprep.subr.bf16.mxu0 %v20971_v20 }
 0xc27   :  { %14168 = vmatpush3.bf16.msra.mxu1 %v14167_v41  ;;  %v6570_v41 = vld [vmem:[%s23855_s13 + $0x1d8] sm:$0xff] }
 0xc28   :  { %14169 = vmatprep.subr.bf16.mxu1 %v23871_v48 }
 0xc29   :  { %14196 = vmatpush3.bf16.msra.mxu0 %v20987_v43 }
 0xc2a   :  { %14198 = vmatprep.subr.bf16.mxu0 %v21095_v52 }
 0xc2b   :  { %14171 = vmatpush3.bf16.msra.mxu1 %v14170_v59  ;;  %v21142_v59 = vpack.c.bf16 %v6570_v41, %v6569_v26 }
 0xc2c   :  { %14172 = vmatprep.subr.bf16.mxu1 %v23871_v48 }
 0xc2d   :  { %14200 = vmatpush3.bf16.msra.mxu0 %v21108_v21 }
 0xc2e   :  { %14202 = vmatprep.subr.bf16.mxu0 %v21131_v15 }
 0xc2f   :  { %14174 = vmatpush3.bf16.msra.mxu1 %v14173_v6  ;;  %v6554_v6 = vld [vmem:[%s23855_s13 + $0x158] sm:$0xff] }
 0xc30   :  { %14175 = vmatprep.subr.bf16.mxu1 %v23871_v48  ;;  %v21153_v38 = vpack.c.bf16 %v6554_v6, %v6553_v32 }
 0xc31   :  { %14204 = vmatpush3.bf16.msra.mxu0 %v21144_v24 }
 0xc33   :  { %14177 = vmatpush3.bf16.msra.mxu1 %v14176_v14  ;;  %v6540_v14 = vld [vmem:[%s23855_s13 + $0xe8] sm:$0xff] }
 0xc34   :  { %14178 = vmatprep.subr.bf16.mxu1 %v23871_v48  ;;  %v21167_v56 = vpack.c.bf16 %v6540_v14, %v6539_v54 }
 0xc36   :  { %14206 = vmatprep.subr.bf16.mxu0 %v21167_v56 }
 0xc37   :  { %14180 = vmatpush3.bf16.msra.mxu1 %v14179_v18  ;;  %v6524_v18 = vld [vmem:[%s23855_s13 + $0x68] sm:$0xff] }
 0xc38   :  { %14214 = vmatprep.subr.bf16.mxu1 %v21019_v40  ;;  %v21180_v39 = vpack.c.bf16 %v6524_v18, %v6523_v30 }
 0xc3a   :  { %12066 = vmatmul.mubr.f32.vlgmr.msra.gmra.mrb[50].mxu1 %v20719_v11  ;;  %v6565_v11 = vld [vmem:[%s23855_s13 + $0x1b0] sm:$0xff]  ;;  %14208 = vmatpush3.bf16.msra.mxu0 %v21180_v39 }
 0xc3b   :  { %14216 = vmatpush3.bf16.msra.mxu1 %v21033_v16  ;;  %v21073_v50 = vpack.c.bf16 %v6566_v28, %v6565_v11  ;;  %v6525_v11 = vld [vmem:[%s23855_s13 + $0x70] sm:$0xff]  ;;  %v6526_v28 = vld [vmem:[%s23855_s13 + $0x78] sm:$0xff]  ;;  %14210 = vmatprep.subr.bf16.mxu0 %v21203_v23 }
 0xc3c   :  { %14218 = vmatprep.subr.bf16.mxu1 %v21036_v60  ;;  %v21216_v3 = vpack.c.bf16 %v6526_v28, %v6525_v11  ;;  %v6575_v28 = vld [vmem:[%s23855_s13 + $0x200] sm:$0xff] }
 0xc3e   :  { %14212 = vmatpush3.bf16.msra.mxu0 %v21216_v3 }
 0xc3f   :  { %14220 = vmatpush3.bf16.msra.mxu1 %v21052_v4  ;;  %14245 = vmatprep.subr.bf16.mxu0 %v23871_v48 }
 0xc40   :  { %14222 = vmatprep.subr.bf16.mxu1 %v21055_v7 }
 0xc43   :  { %14224 = vmatpush3.bf16.msra.mxu1 %v21070_v31 }
 0xc44   :  { %14226 = vmatprep.subr.bf16.mxu1 %v21073_v50 }
 0xc47   :  { %14228 = vmatpush3.bf16.msra.mxu1 %v21082_v35 }
 0xc48   :  { %14230 = vmatprep.subr.bf16.mxu1 %v21106_v25 }
 0xc4b   :  { %14232 = vmatpush3.bf16.msra.mxu1 %v21117_v49 }
 0xc4c   :  { %14234 = vmatprep.subr.bf16.mxu1 %v21142_v59 }
 0xc4f   :  { %14236 = vmatpush3.bf16.msra.mxu1 %v21153_v38 }
 0xc50   :  { %14238 = vmatprep.subr.bf16.mxu1 %v21178_v22 }
 0xc53   :  { %14240 = vmatpush3.bf16.msra.mxu1 %v21189_v37 }
 0xc54   :  { %14242 = vmatprep.subr.bf16.mxu1 %v21214_v61 }
 0xc57   :  { %14244 = vmatpush3.bf16.msra.mxu1 %v21225_v51 }
 0xc58   :  { %14285 = vmatprep.subr.bf16.mxu1 %v23871_v48 }
 0xccd   :  { %v21232_v44 = vpop.f32.mrb[46].mxu1  ;;  %v21234_v33 = vpop.f32.mrb[42].mxu0 }
 0xcce   :  { %v6476_v55 = vsel %vm1768_vm2, %v21232_v44, 0.0  ;;  %v6490_v2 = vsel %vm1768_vm2, %v21234_v33, 0.0  ;;  %v21240_v27 = vpop.f32.mrb[47].mxu1  ;;  %v21242_v53 = vpop.f32.mrb[43].mxu0 }
 0xccf   :  { %v6477_v9 = vrot.slane %v6476_v55, 4  ;;  %v6491_v26 = vrot.slane %v6490_v2, 4  ;;  %v6483_v41 = vsel %vm1768_vm2, %v21240_v27, 0.0  ;;  %v6497_v12 = vsel %vm1768_vm2, %v21242_v53, 0.0 }
 0xcd0   :  { %v6484_v57 = vrot.slane %v6483_v41, 4  ;;  %v6498_v32 = vrot.slane %v6497_v12, 4 }
 0xcd1   :  { %v6478_v6 = vadd.f32 %v6477_v9, %v6476_v55  ;;  %v6492_v54 = vadd.f32 %v6491_v26, %v6490_v2  ;;  %v21254_v26 = vpack.c.bf16 %v6576_v58, %v6575_v28 }
 0xcd2   :  { %v6485_v14 = vadd.f32 %v6484_v57, %v6483_v41  ;;  %v6499_v63 = vadd.f32 %v6498_v32, %v6497_v12  ;;  %v6577_v57 = vld [vmem:[%s23855_s13 + $0x210] sm:$0xff]  ;;  %v6578_v32 = vld [vmem:[%s23855_s13 + $0x218] sm:$0xff] }
 0xcd3   :  { %v6479_v0 = vrot.slane %v6478_v6, 2  ;;  %v6493_v30 = vrot.slane %v6492_v54, 2 }
 0xcd4   :  { %v6486_v18 = vrot.slane %v6485_v14, 2  ;;  %v6500_v5 = vrot.slane %v6499_v63, 2 }
 0xcd5   :  { %v6480_v10 = vadd.f32 %v6479_v0, %v6478_v6  ;;  %v6494_v42 = vadd.f32 %v6493_v30, %v6492_v54  ;;  %v21263_v6 = vpack.c.bf16 %v6578_v32, %v6577_v57  ;;  %v6579_v54 = vld [vmem:[%s23855_s13 + $0x220] sm:$0xff]  ;;  %v6581_v0 = vld [vmem:[%s23855_s13 + $0x230] sm:$0xff]  ;;  %v6582_v30 = vld [vmem:[%s23855_s13 + $0x238] sm:$0xff] }
 0xcd6   :  { %v6487_v46 = vadd.f32 %v6486_v18, %v6485_v14  ;;  %v6501_v36 = vadd.f32 %v6500_v5, %v6499_v63  ;;  %v6580_v14 = vld [vmem:[%s23855_s13 + $0x228] sm:$0xff]  ;;  %v21287_v18 = vpack.c.bf16 %v6582_v30, %v6581_v0  ;;  %v6583_v5 = vld [vmem:[%s23855_s13 + $0x240] sm:$0xff]  ;;  %v6589_v32 = vld [vmem:[%s23855_s13 + $0x270] sm:$0xff] }
 0xcd7   :  { %v6481_v29 = vrot.slane %v6480_v10, 1  ;;  %v6495_v11 = vrot.slane %v6494_v42, 1  ;;  %v21277_v63 = vpack.c.bf16 %v6580_v14, %v6579_v54  ;;  %v6590_v54 = vld [vmem:[%s23855_s13 + $0x278] sm:$0xff] }
 0xcd8   :  { %v6488_v47 = vrot.slane %v6487_v46, 1  ;;  %v6502_v55 = vrot.slane %v6501_v36, 1  ;;  %v21327_v14 = vpack.c.bf16 %v6590_v54, %v6589_v32  ;;  %v6805_v32 = vld [vmem:[%s23856_s14 + $0x20] sm:$0xff]  ;;  %v6810_v54 = vld [vmem:[%s23856_s14 + $0x48] sm:$0xff] }
 0xcd9   :  { %v6482_v41 = vadd.f32 %v6481_v29, %v6480_v10  ;;  %v6496_v12 = vadd.f32 %v6495_v11, %v6494_v42  ;;  %v6584_v10 = vld [vmem:[%s23855_s13 + $0x248] sm:$0xff] }
 0xcda   :  { %v6489_v2 = vadd.f32 %v6488_v47, %v6487_v46  ;;  %v6503_v9 = vadd.f32 %v6502_v55, %v6501_v36  ;;  %v21297_v42 = vpack.c.bf16 %v6584_v10, %v6583_v5  ;;  %v6585_v46 = vld [vmem:[%s23855_s13 + $0x250] sm:$0xff]  ;;  %v6586_v36 = vld [vmem:[%s23855_s13 + $0x258] sm:$0xff] }
 0xcdb   :  { %v21307_v58 = vpack.c.bf16 %v6586_v36, %v6585_v46 }
 0xcdc   :  { %6655 = vmatprep.mubr.f32.mxu0 %v6489_v2  ;;  %6725 = vmatprep.mubr.f32.mxu1 %v6503_v9  ;;  %v6587_v2 = vld [vmem:[%s23855_s13 + $0x260] sm:$0xff]  ;;  %v6588_v9 = vld [vmem:[%s23855_s13 + $0x268] sm:$0xff] }
 0xcdd   :  { %6656 = vmatmul.mubr.f32.vlgmr.msra.gmra.mrb[46].mxu0 %v6482_v41  ;;  %6726 = vmatmul.mubr.f32.vlgmr.msra.gmra.mrb[52].mxu1 %v6496_v12  ;;  %v21317_v57 = vpack.c.bf16 %v6588_v9, %v6587_v2  ;;  %v6807_v2 = vld [vmem:[%s23856_s14 + $0x30] sm:$0xff]  ;;  %v6801_v9 = vld [vmem:[%s23856_s14] sm:$0xff] }
 0xcde   :  { %14247 = vmatpush3.bf16.msra.mxu0 %v21254_v26  ;;  %12100 = vmatprep.mubr.msk.f32.mxu0 %vm15304_vm1, %v23873_v19 }
 0xcdf   :  { %14248 = vmatprep.subr.bf16.mxu0 %v23871_v48  ;;  %12111 = vmatprep.mubr.msk.f32.mxu1 %vm15304_vm1, %v23873_v19 }
 0xce2   :  { %14250 = vmatpush3.bf16.msra.mxu0 %v21263_v6 }
 0xce3   :  { %14251 = vmatprep.subr.bf16.mxu0 %v23871_v48 }
 0xce6   :  { %14253 = vmatpush3.bf16.msra.mxu0 %v21277_v63 }
 0xce7   :  { %14254 = vmatprep.subr.bf16.mxu0 %v23871_v48 }
 0xcea   :  { %14256 = vmatpush3.bf16.msra.mxu0 %v21287_v18 }
 0xceb   :  { %14257 = vmatprep.subr.bf16.mxu0 %v23871_v48 }
 0xced   :  { %v11149_v29 = vpop.f32.mrb[48].mxu1 }
 0xcee   :  { %v11184_v11 = vpop.f32.mrb[44].mxu0  ;;  %v11150_v28 = vpop.f32.mrb[49].mxu1  ;;  %14259 = vmatpush3.bf16.msra.mxu0 %v21297_v42 }
 0xcef   :  { %v11151_v47 = vadd.f32 %v11150_v28, %v11149_v29  ;;  %v11185_v55 = vpop.f32.mrb[45].mxu0  ;;  %14260 = vmatprep.subr.bf16.mxu0 %v23871_v48 }
 0xcf0   :  { %v11186_v41 = vadd.f32 %v11185_v55, %v11184_v11  ;;  %v6802_v55 = vld [vmem:[%s23856_s14 + $0x8] sm:$0xff] }
 0xcf2   :  { %v6403_v12 = vadd.f32 %v11186_v41, %v11151_v47  ;;  %14262 = vmatpush3.bf16.msra.mxu0 %v21307_v58  ;;  %v21345_v41 = vpack.c.bf16 %v6807_v2, %v6802_v55  ;;  %v6820_v55 = vld [vmem:[%s23856_s14 + $0x98] sm:$0xff] }
 0xcf3   :  { %14263 = vmatprep.subr.bf16.mxu0 %v23871_v48 }
 0xcf6   :  { %14265 = vmatpush3.bf16.msra.mxu0 %v21317_v57 }
 0xcf7   :  { %14266 = vmatprep.subr.bf16.mxu0 %v23871_v48 }
 0xcfa   :  { %14268 = vmatpush3.bf16.msra.mxu0 %v21327_v14 }
 0xcfb   :  { %14270 = vmatprep.subr.bf16.mxu0 %v21345_v41 }
 0xd0d   :  { %v6472_v0 = vpop.f32.mrb[50].mxu1 }
 0xd0e   :  { %v21331_v30 = vadd.f32 %v6472_v0, %v6403_v12  ;;  %v12067_v5 = vpop.f32.mrb[51].mxu1  ;;  %v6806_v12 = vld [vmem:[%s23856_s14 + $0x28] sm:$0xff] }
 0xd0f   :  { %v21356_v0 = vpack.c.bf16 %v6806_v12, %v6801_v9  ;;  %v21358_v5 = vpack.c.bf16 %v6810_v54, %v6805_v32  ;;  %v6804_v9 = vld [vmem:[%s23856_s14 + $0x18] sm:$0xff]  ;;  %v6809_v12 = vld [vmem:[%s23856_s14 + $0x40] sm:$0xff] }
 0xd10   :  { %v6504_v10 = vsel %vm1768_vm2, %v21331_v30, 0.0  ;;  %v21397_v32 = vpack.c.bf16 %v6809_v12, %v6804_v9  ;;  %v6808_v9 = vld [vmem:[%s23856_s14 + $0x38] sm:$0xff]  ;;  %v6819_v12 = vld [vmem:[%s23856_s14 + $0x90] sm:$0xff] }
 0xd11   :  { %v6505_v46 = vrot.slane %v6504_v10, 4  ;;  %14287 = vmatpush3.bf16.msra.mxu1 %v21358_v5 }
 0xd12   :  { %14288 = vmatprep.subr.bf16.mxu1 %v23871_v48  ;;  %v6803_v48 = vld [vmem:[%s23856_s14 + $0x10] sm:$0xff] }
 0xd13   :  { %v6506_v36 = vadd.f32 %v6505_v46, %v6504_v10  ;;  %v6812_v10 = vld [vmem:[%s23856_s14 + $0x58] sm:$0xff]  ;;  %v6817_v46 = vld [vmem:[%s23856_s14 + $0x80] sm:$0xff] }
 0xd15   :  { %v6507_v29 = vrot.slane %v6506_v36, 2 }
 0xd17   :  { %v6508_v11 = vadd.f32 %v6507_v29, %v6506_v36  ;;  %v6811_v36 = vld [vmem:[%s23856_s14 + $0x50] sm:$0xff]  ;;  %v21370_v29 = vpack.c.bf16 %v6817_v46, %v6812_v10 }
 0xd19   :  { %v6509_v28 = vrot.slane %v6508_v11, 1 }
 0xd1b   :  { %v6510_v47 = vadd.f32 %v6509_v28, %v6508_v11  ;;  %v6816_v11 = vld [vmem:[%s23856_s14 + $0x78] sm:$0xff] }
 0xd1c   :  { %v21377_v28 = vpack.c.bf16 %v6816_v11, %v6811_v36 }
 0xd1d   :  { %12101 = vmatmul.mubr.f32.vlgmr.msra.gmra.mrb[48].mxu0 %v6510_v47  ;;  %v6815_v47 = vld [vmem:[%s23856_s14 + $0x70] sm:$0xff] }
 0xd1e   :  { %6889 = vmatprep.mubr.f32.mxu0 %v23873_v19  ;;  %14272 = vmatpush1.bf16.msra.mxu0 %v21356_v0  ;;  %v21388_v2 = vpack.c.bf16 %v6820_v55, %v6815_v47 }
 0xd1f   :  { %14274 = vmatprep.subr.bf16.mxu0 %v21370_v29 }
 0xd20   :  { %14290 = vmatpush3.bf16.msra.mxu1 %v21388_v2 }
 0xd21   :  { %14324 = vmatprep.subr.bf16.mxu1 %v21019_v40  ;;  %v6814_v40 = vld [vmem:[%s23856_s14 + $0x68] sm:$0xff] }
 0xd22   :  { %14276 = vmatpush1.bf16.msra.mxu0 %v21377_v28 }
 0xd23   :  { %14278 = vmatprep.subr.bf16.mxu0 %v21397_v32 }
 0xdb0   :  { %v11236_v54 = vpop.f32.mrb[46].mxu0  ;;  %v11271_v10 = vpop.f32.mrb[52].mxu1 }
 0xdb1   :  { %v11237_v46 = vpop.f32.mrb[47].mxu0  ;;  %v11272_v36 = vpop.f32.mrb[53].mxu1 }
 0xdb2   :  { %v11238_v11 = vadd.f32 %v11237_v46, %v11236_v54  ;;  %v11273_v47 = vadd.f32 %v11272_v36, %v11271_v10  ;;  %v21413_v54 = vpack.c.bf16 %v6808_v9, %v6803_v48  ;;  %v21415_v36 = vpack.c.bf16 %v6819_v12, %v6814_v40 }
 0xdb4   :  { %v6728_v55 = vadd.f32 %v11273_v47, %v11238_v11  ;;  %v6813_v11 = vld [vmem:[%s23856_s14 + $0x60] sm:$0xff]  ;;  %v6818_v47 = vld [vmem:[%s23856_s14 + $0x88] sm:$0xff] }
 0xdb5   :  { %v21426_v48 = vpack.c.bf16 %v6818_v47, %v6813_v11 }
 0xdf0   :  { %v6797_v19 = vpop.f32.mrb[48].mxu0 }
 0xdf1   :  { %v6798_v10 = vadd.f32 %v6797_v19, %v6728_v55  ;;  %v12102_v46 = vpop.f32.mrb[49].mxu0  ;;  %v23913_v19 = vmov 0.0  }
 0xdf3   :  { %10518 = vmatmul.mubr.msk.f32.vlgmr.msra.gmra.mrb[50].mxu0 %vm6821_vm5, %v6798_v10  ;;  %12112 = vmatmul.mubr.msk.f32.vlgmr.msra.gmra.mrb[54].mxu1 %vm6821_vm5, %v6798_v10 }
 0xdf4   :  { %14280 = vmatpush1.bf16.msra.mxu0 %v21413_v54  ;;  %6960 = vmatprep.mubr.f32.mxu0 %v23913_v19 }
 0xdf5   :  { %14282 = vmatprep.subr.bf16.mxu0 %v21415_v36  ;;  %14326 = vmatpush3.bf16.msra.mxu1 %v21033_v16 }
 0xdf6   :  { %14328 = vmatprep.subr.bf16.mxu1 %v21036_v60 }
 0xdf8   :  { %14284 = vmatpush1.bf16.msra.mxu0 %v21426_v48 }
 0xdf9   :  { %14292 = vmatprep.subr.bf16.mxu0 %v20893_v34  ;;  %14330 = vmatpush3.bf16.msra.mxu1 %v21052_v4  ;;  %v23914_v34 = vmov 0.0|0.0  }
 0xdfa   :  { %14332 = vmatprep.subr.bf16.mxu1 %v21055_v7 }
 0xdfb   :  { %10519 = vmatmul.mubr.msk.f32.vlgmr.msra.gmra.mrb[52].mxu0 %vm6821_vm5, %v6798_v10 }
 0xdfc   :  { %14294 = vmatpush3.bf16.msra.mxu0 %v20915_v62 }
 0xdfd   :  { %14296 = vmatprep.subr.bf16.mxu0 %v20918_v45  ;;  %14334 = vmatpush3.bf16.msra.mxu1 %v21070_v31 }
 0xdfe   :  { %14336 = vmatprep.subr.bf16.mxu1 %v21073_v50 }
 0xe00   :  { %14298 = vmatpush3.bf16.msra.mxu0 %v20943_v13 }
 0xe01   :  { %14300 = vmatprep.subr.bf16.mxu0 %v20946_v8  ;;  %14338 = vmatpush3.bf16.msra.mxu1 %v21082_v35 }
 0xe02   :  { %14340 = vmatprep.subr.bf16.mxu1 %v21106_v25 }
 0xe04   :  { %14302 = vmatpush3.bf16.msra.mxu0 %v20968_v1 }
 0xe05   :  { %14304 = vmatprep.subr.bf16.mxu0 %v20971_v20  ;;  %14342 = vmatpush3.bf16.msra.mxu1 %v21117_v49 }
 0xe06   :  { %14344 = vmatprep.subr.bf16.mxu1 %v21142_v59 }
 0xe08   :  { %14306 = vmatpush3.bf16.msra.mxu0 %v20987_v43 }
 0xe09   :  { %14308 = vmatprep.subr.bf16.mxu0 %v21095_v52  ;;  %14346 = vmatpush3.bf16.msra.mxu1 %v21153_v38 }
 0xe0a   :  { %14348 = vmatprep.subr.bf16.mxu1 %v21178_v22 }
 0xe0c   :  { %14310 = vmatpush3.bf16.msra.mxu0 %v21108_v21 }
 0xe0d   :  { %14312 = vmatprep.subr.bf16.mxu0 %v21131_v15  ;;  %14350 = vmatpush3.bf16.msra.mxu1 %v21189_v37 }
 0xe0e   :  { %14352 = vmatprep.subr.bf16.mxu1 %v21214_v61 }
 0xe10   :  { %14314 = vmatpush3.bf16.msra.mxu0 %v21144_v24 }
 0xe11   :  { %14316 = vmatprep.subr.bf16.mxu0 %v21167_v56  ;;  %14354 = vmatpush3.bf16.msra.mxu1 %v21225_v51 }
 0xe12   :  { %14380 = vmatprep.subr.bf16.mxu1 %v21345_v41 }
 0xe14   :  { %14318 = vmatpush3.bf16.msra.mxu0 %v21180_v39 }
 0xe15   :  { %14320 = vmatprep.subr.bf16.mxu0 %v21203_v23 }
 0xe18   :  { %14322 = vmatpush3.bf16.msra.mxu0 %v21216_v3 }
 0xe19   :  { %14355 = vmatprep.subr.bf16.mxu0 %v23914_v34 }
 0xec6   :  { %v6891_v62 = vpop.f32.mrb[50].mxu0  ;;  %v7033_v45 = vpop.f32.mrb[54].mxu1 }
 0xec7   :  { %v7040_v13 = vrot.slane %v6891_v62, %v17777_v17  ;;  %v6893_v8 = vpop.f32.mrb[51].mxu0  ;;  %v12113_v1 = vpop.f32.mrb[55].mxu1 }
 0xec8   :  { %v7044_v20 = vrot.slane %v6893_v8, %v17777_v17 }
 0xec9   :  { %v21468_v43 = vsub.f32 %v21232_v44, %v7040_v13 }
 0xeca   :  { %v21471_v16 = vsub.f32 %v21240_v27, %v7044_v20  ;;  %v7056_v27 = vrot.slane %v7033_v45, %v17777_v17 }
 0xecb   :  { %v7062_v60 = vmul.f32 %v21468_v43, %v21468_v43 }
 0xecc   :  { %v7063_v4 = vmul.f32 %v21471_v16, %v21471_v16  ;;  %v21495_v11 = vsub.f32 %v21331_v30, %v7056_v27 }
 0xecd   :  { %v7067_v7 = vsel %vm1768_vm2, %v7062_v60, 0.0 }
 0xece   :  { %v7068_v31 = vrot.slane %v7067_v7, 4  ;;  %v7074_v50 = vsel %vm1768_vm2, %v7063_v4, 0.0  ;;  %v6962_v35 = vpop.f32.mrb[52].mxu0  ;;  %v7066_v8 = vmul.f32 %v21495_v11, %v21495_v11 }
 0xecf   :  { %v7075_v52 = vrot.slane %v7074_v50, 4  ;;  %v7048_v25 = vrot.slane %v6962_v35, %v17777_v17  ;;  %v6964_v21 = vpop.f32.mrb[53].mxu0  ;;  %v7817_v35 = vld [vmem:[%s23859_s17 + $0x58] sm:$0xff] }
 0xed0   :  { %v7069_v49 = vadd.f32 %v7068_v31, %v7067_v7  ;;  %v7052_v15 = vrot.slane %v6964_v21, %v17777_v17  ;;  %v7095_v60 = vsel %vm1768_vm2, %v7066_v8, 0.0  ;;  %v7811_v31 = vld [vmem:[%s23859_s17 + $0x28] sm:$0xff]  ;;  %v7816_v21 = vld [vmem:[%s23859_s17 + $0x50] sm:$0xff] }
 0xed1   :  { %v7076_v59 = vadd.f32 %v7075_v52, %v7074_v50  ;;  %v21482_v24 = vsub.f32 %v21234_v33, %v7048_v25  ;;  %v7822_v52 = vld [vmem:[%s23859_s17 + $0x80] sm:$0xff] }
 0xed2   :  { %v7070_v38 = vrot.slane %v7069_v49, 2  ;;  %v21485_v56 = vsub.f32 %v21242_v53, %v7052_v15  ;;  %v14427_v25 = vpack.c.bf16 %v7822_v52, %v7817_v35 }
 0xed3   :  { %v7064_v22 = vmul.f32 %v21482_v24, %v21482_v24  ;;  %v7077_v39 = vrot.slane %v7076_v59, 2 }
 0xed4   :  { %v7065_v37 = vmul.f32 %v21485_v56, %v21485_v56  ;;  %v7071_v23 = vadd.f32 %v7070_v38, %v7069_v49  ;;  %v7821_v49 = vld [vmem:[%s23859_s17 + $0x78] sm:$0xff]  ;;  %v7832_v38 = vld [vmem:[%s23859_s17 + $0xd0] sm:$0xff] }
 0xed5   :  { %v7081_v61 = vsel %vm1768_vm2, %v7064_v22, 0.0  ;;  %v7078_v3 = vadd.f32 %v7077_v39, %v7076_v59  ;;  %v14429_v15 = vpack.c.bf16 %v7821_v49, %v7816_v21  ;;  %v7827_v59 = vld [vmem:[%s23859_s17 + $0xa8] sm:$0xff]  ;;  %v7826_v39 = vld [vmem:[%s23859_s17 + $0xa0] sm:$0xff] }
 0xed6   :  { %v7082_v51 = vrot.slane %v7081_v61, 4  ;;  %v7088_v44 = vsel %vm1768_vm2, %v7065_v37, 0.0  ;;  %v7072_v33 = vrot.slane %v7071_v23, 1  ;;  %v14431_v22 = vpack.c.bf16 %v7832_v38, %v7827_v59  ;;  %v7831_v37 = vld [vmem:[%s23859_s17 + $0xc8] sm:$0xff]  ;;  %v7102_v38 = vld [vmem:[%s23857_s15] sm:$0x1] }
 0xed7   :  { %v7089_v55 = vrot.slane %v7088_v44, 4  ;;  %v7079_v53 = vrot.slane %v7078_v3, 1 }
 0xed8   :  { %v7083_v9 = vadd.f32 %v7082_v51, %v7081_v61  ;;  %v7073_v46 = vadd.f32 %v7072_v33, %v7071_v23  ;;  %v14433_v23 = vpack.c.bf16 %v7831_v37, %v7826_v39  ;;  %v7837_v61 = vld [vmem:[%s23859_s17 + $0xf8] sm:$0xff] }
 0xed9   :  { %v7090_v40 = vadd.f32 %v7089_v55, %v7088_v44  ;;  %v7080_v12 = vadd.f32 %v7079_v53, %v7078_v3  ;;  %v7842_v3 = vld [vmem:[%s23859_s17 + $0x120] sm:$0xff]  ;;  %v7836_v44 = vld [vmem:[%s23859_s17 + $0xf0] sm:$0xff]  ;;  %v7841_v33 = vld [vmem:[%s23859_s17 + $0x118] sm:$0xff] }
 0xeda   :  { %v7084_v10 = vrot.slane %v7083_v9, 2  ;;  %v14435_v51 = vpack.c.bf16 %v7842_v3, %v7837_v61  ;;  %v14437_v27 = vpack.c.bf16 %v7841_v33, %v7836_v44  ;;  %v7847_v55 = vld [vmem:[%s23859_s17 + $0x148] sm:$0xff]  ;;  %v7852_v53 = vld [vmem:[%s23859_s17 + $0x170] sm:$0xff]  ;;  %v7829_v3 = vld [vmem:[%s23859_s17 + $0xb8] sm:$0xff] }
 0xedb   :  { %7167 = vmatprep.mubr.f32.mxu0 %v7080_v12  ;;  %v7091_v47 = vrot.slane %v7090_v40, 2  ;;  %v7851_v12 = vld [vmem:[%s23859_s17 + $0x168] sm:$0xff]  ;;  %v7828_v33 = vld [vmem:[%s23859_s17 + $0xb0] sm:$0xff] }
 0xedc   :  { %7168 = vmatmul.mubr.f32.vlgmr.msra.gmra.mrb[54].mxu0 %v7073_v46  ;;  %v7085_v62 = vadd.f32 %v7084_v10, %v7083_v9  ;;  %v14439_v9 = vpack.c.bf16 %v7852_v53, %v7847_v55  ;;  %v7857_v46 = vld [vmem:[%s23859_s17 + $0x198] sm:$0xff]  ;;  %v7823_v61 = vld [vmem:[%s23859_s17 + $0x88] sm:$0xff] }
 0xedd   :  { %14357 = vmatpush3.bf16.msra.mxu0 %v21254_v26  ;;  %v7092_v13 = vadd.f32 %v7091_v47, %v7090_v40  ;;  %12146 = vmatprep.mubr.msk.f32.mxu0 %vm15304_vm1, %v23913_v19  ;;  %v7096_v26 = vrot.slane %v7095_v60, 4  ;;  %v7846_v40 = vld [vmem:[%s23859_s17 + $0x140] sm:$0xff]  ;;  %v7839_v55 = vld [vmem:[%s23859_s17 + $0x108] sm:$0xff] }
 0xede   :  { %14358 = vmatprep.subr.bf16.mxu0 %v23914_v34  ;;  %v7086_v45 = vrot.slane %v7085_v62, 1  ;;  %v14441_v10 = vpack.c.bf16 %v7851_v12, %v7846_v40  ;;  %v7862_v47 = vld [vmem:[%s23859_s17 + $0x1c0] sm:$0xff]  ;;  %v7843_v12 = vld [vmem:[%s23859_s17 + $0x128] sm:$0xff] }
 0xedf   :  { %v7093_v1 = vrot.slane %v7092_v13, 1  ;;  %v7838_v40 = vld [vmem:[%s23859_s17 + $0x100] sm:$0xff] }
 0xee0   :  { %v7087_v20 = vadd.f32 %v7086_v45, %v7085_v62  ;;  %v14443_v62 = vpack.c.bf16 %v7862_v47, %v7857_v46  ;;  %v7861_v45 = vld [vmem:[%s23859_s17 + $0x1b8] sm:$0xff]  ;;  %v7854_v46 = vld [vmem:[%s23859_s17 + $0x180] sm:$0xff]  ;;  %v14597_v47 = vpack.c.bf16 %v7843_v12, %v7838_v40  ;;  %v7911_v12 = vld [vmem:[%s23859_s17 + $0x348] sm:$0xff] }
 0xee1   :  { %14360 = vmatpush3.bf16.msra.mxu0 %v21263_v6  ;;  %v7094_v30 = vadd.f32 %v7093_v1, %v7092_v13  ;;  %v7097_v6 = vadd.f32 %v7096_v26, %v7095_v60  ;;  %v7856_v13 = vld [vmem:[%s23859_s17 + $0x190] sm:$0xff]  ;;  %v7867_v1 = vld [vmem:[%s23859_s17 + $0x1e8] sm:$0xff]  ;;  %v7866_v60 = vld [vmem:[%s23859_s17 + $0x1e0] sm:$0xff] }
 0xee2   :  { %14361 = vmatprep.subr.bf16.mxu0 %v23914_v34  ;;  %v14445_v8 = vpack.c.bf16 %v7861_v45, %v7856_v13  ;;  %v7871_v26 = vld [vmem:[%s23859_s17 + $0x208] sm:$0xff]  ;;  %v7848_v13 = vld [vmem:[%s23859_s17 + $0x150] sm:$0xff]  ;;  %v7853_v45 = vld [vmem:[%s23859_s17 + $0x178] sm:$0xff] }
 0xee3   :  { %7237 = vmatprep.mubr.f32.mxu1 %v7094_v30  ;;  %v7872_v30 = vld [vmem:[%s23859_s17 + $0x210] sm:$0xff]  ;;  %v7906_v40 = vld [vmem:[%s23859_s17 + $0x320] sm:$0xff] }
 0xee4   :  { %7238 = vmatmul.mubr.f32.vlgmr.msra.gmra.mrb[56].mxu1 %v7087_v20  ;;  %v14447_v20 = vpack.c.bf16 %v7872_v30, %v7867_v1  ;;  %v7864_v1 = vld [vmem:[%s23859_s17 + $0x1d0] sm:$0xff]  ;;  %v14601_v30 = vpack.c.bf16 %v7853_v45, %v7848_v13 }
 0xee5   :  { %14363 = vmatpush3.bf16.msra.mxu0 %v21277_v63  ;;  %14382 = vmatpush1.bf16.msra.mxu1 %v21356_v0  ;;  %v7098_v63 = vrot.slane %v7097_v6, 2 }
 0xee6   :  { %14364 = vmatprep.subr.bf16.mxu0 %v23914_v34  ;;  %14384 = vmatprep.subr.bf16.mxu1 %v21370_v29 }
 0xee7   :  { %7382 = vmatprep.mubr.f32.mxu1 %v23913_v19  ;;  %v7099_v4 = vadd.f32 %v7098_v63, %v7097_v6  ;;  %v14449_v6 = vpack.c.bf16 %v7871_v26, %v7866_v60  ;;  %v7877_v63 = vld [vmem:[%s23859_s17 + $0x238] sm:$0xff]  ;;  %v7858_v60 = vld [vmem:[%s23859_s17 + $0x1a0] sm:$0xff]  ;;  %v7863_v26 = vld [vmem:[%s23859_s17 + $0x1c8] sm:$0xff] }
 0xee9   :  { %14366 = vmatpush3.bf16.msra.mxu0 %v21287_v18  ;;  %14386 = vmatpush1.bf16.msra.mxu1 %v21377_v28  ;;  %v7100_v18 = vrot.slane %v7099_v4, 1 }
 0xeea   :  { %14367 = vmatprep.subr.bf16.mxu0 %v23914_v34  ;;  %14388 = vmatprep.subr.bf16.mxu1 %v21397_v32 }
 0xeeb   :  { %v7101_v7 = vadd.f32 %v7100_v18, %v7099_v4  ;;  %v7882_v4 = vld [vmem:[%s23859_s17 + $0x260] sm:$0xff] }
 0xeec   :  { %v14451_v18 = vpack.c.bf16 %v7882_v4, %v7877_v63  ;;  %v7874_v63 = vld [vmem:[%s23859_s17 + $0x220] sm:$0xff]  ;;  %v14605_v4 = vpack.c.bf16 %v7863_v26, %v7858_v60  ;;  %v7924_v26 = vld [vmem:[%s23859_s17 + $0x3b0] sm:$0xff] }
 0xeed   :  { %14369 = vmatpush3.bf16.msra.mxu0 %v21297_v42  ;;  %v21530_v42 = vld [vmem:[%s23858_s16] sm:$0x1] }
 0xeee   :  { %14370 = vmatprep.subr.bf16.mxu0 %v23914_v34 }
 0xef1   :  { %14372 = vmatpush3.bf16.msra.mxu0 %v21307_v58  ;;  %v7807_v58 = vld [vmem:[%s23859_s17 + $0x8] sm:$0xff] }
 0xef2   :  { %14373 = vmatprep.subr.bf16.mxu0 %v23914_v34 }
 0xef5   :  { %14375 = vmatpush3.bf16.msra.mxu0 %v21317_v57  ;;  %v7812_v57 = vld [vmem:[%s23859_s17 + $0x30] sm:$0xff] }
 0xef6   :  { %14376 = vmatprep.subr.bf16.mxu0 %v23914_v34 }
 0xef9   :  { %14378 = vmatpush3.bf16.msra.mxu0 %v21327_v14  ;;  %v14423_v14 = vpack.c.bf16 %v7812_v57, %v7807_v58  ;;  %v7881_v58 = vld [vmem:[%s23859_s17 + $0x258] sm:$0xff] }
 0xefa   :  { %14410 = vmatprep.subr.bf16.mxu0 %v21397_v32  ;;  %v7806_v32 = vld [vmem:[%s23859_s17] sm:$0xff] }
 0xefb   :  { %v14425_v50 = vpack.c.bf16 %v7811_v31, %v7806_v32 }
 0xefc   :  { %12147 = vmatmul.mubr.f32.vlgmr.msra.gmra.mrb[56].mxu0 %v7101_v7  ;;  %v7876_v7 = vld [vmem:[%s23859_s17 + $0x230] sm:$0xff] }
 0xefd   :  { %14412 = vmatpush1.bf16.msra.mxu0 %v21413_v54  ;;  %7669 = vmatprep.mubr.f32.mxu0 %v23913_v19  ;;  %v14453_v57 = vpack.c.bf16 %v7881_v58, %v7876_v7  ;;  %v7868_v7 = vld [vmem:[%s23859_s17 + $0x1f0] sm:$0xff]  ;;  %v7873_v58 = vld [vmem:[%s23859_s17 + $0x218] sm:$0xff] }
 0xefe   :  { %14414 = vmatprep.subr.bf16.mxu0 %v21415_v36 }
 0xf01   :  { %14416 = vmatpush1.bf16.msra.mxu0 %v21426_v48 }
 0xf02   :  { %14424 = vmatprep.subr.bf16.mxu0 %v14423_v14 }
 0xf04   :  { %10525 = vmatmul.mubr.msk.f32.vlgmr.msra.gmra.mrb[58].mxu0 %vm6821_vm5, %v21530_v42 }
 0xf05   :  { %14426 = vmatpush1.bf16.msra.mxu0 %v14425_v50 }
 0xf06   :  { %14428 = vmatprep.subr.bf16.mxu0 %v14427_v25 }
 0xf09   :  { %14430 = vmatpush1.bf16.msra.mxu0 %v14429_v15 }
 0xf0a   :  { %14432 = vmatprep.subr.bf16.mxu0 %v14431_v22 }
 0xf0d   :  { %14434 = vmatpush1.bf16.msra.mxu0 %v14433_v23  ;;  %v7818_v23 = vld [vmem:[%s23859_s17 + $0x60] sm:$0xff] }
 0xf0e   :  { %14436 = vmatprep.subr.bf16.mxu0 %v14435_v51  ;;  %v7834_v51 = vld [vmem:[%s23859_s17 + $0xe0] sm:$0xff] }
 0xf0f   :  { %v14591_v44 = vpack.c.bf16 %v7834_v51, %v7829_v3 }
 0xf11   :  { %14438 = vmatpush1.bf16.msra.mxu0 %v14437_v27  ;;  %v7833_v27 = vld [vmem:[%s23859_s17 + $0xd8] sm:$0xff] }
 0xf12   :  { %14440 = vmatprep.subr.bf16.mxu0 %v14439_v9  ;;  %v14593_v53 = vpack.c.bf16 %v7833_v27, %v7828_v33  ;;  %v7907_v27 = vld [vmem:[%s23859_s17 + $0x328] sm:$0xff] }
 0xf15   :  { %14442 = vmatpush1.bf16.msra.mxu0 %v14441_v10  ;;  %v7849_v10 = vld [vmem:[%s23859_s17 + $0x158] sm:$0xff] }
 0xf16   :  { %14444 = vmatprep.subr.bf16.mxu0 %v14443_v62  ;;  %v14599_v62 = vpack.c.bf16 %v7854_v46, %v7849_v10  ;;  %v14465_v46 = vpack.c.bf16 %v7911_v12, %v7906_v40  ;;  %v7957_v12 = vld [vmem:[%s23859_s17 + $0x4b8] sm:$0xff] }
 0xf19   :  { %14446 = vmatpush1.bf16.msra.mxu0 %v14445_v8  ;;  %v7859_v8 = vld [vmem:[%s23859_s17 + $0x1a8] sm:$0xff] }
 0xf1a   :  { %14448 = vmatprep.subr.bf16.mxu0 %v14447_v20  ;;  %v14603_v20 = vpack.c.bf16 %v7864_v1, %v7859_v8  ;;  %v7917_v1 = vld [vmem:[%s23859_s17 + $0x378] sm:$0xff] }
 0xf1d   :  { %14450 = vmatpush1.bf16.msra.mxu0 %v14449_v6  ;;  %v7869_v6 = vld [vmem:[%s23859_s17 + $0x1f8] sm:$0xff] }
 0xf1e   :  { %14452 = vmatprep.subr.bf16.mxu0 %v14451_v18  ;;  %v14607_v18 = vpack.c.bf16 %v7874_v63, %v7869_v6  ;;  %v7916_v6 = vld [vmem:[%s23859_s17 + $0x370] sm:$0xff]  ;;  %v7921_v63 = vld [vmem:[%s23859_s17 + $0x398] sm:$0xff] }
 0xf21   :  { %14454 = vmatpush1.bf16.msra.mxu0 %v14453_v57  ;;  %v7879_v57 = vld [vmem:[%s23859_s17 + $0x248] sm:$0xff] }
 0xfaf   :  { %v11328_v14 = vpop.f32.mrb[54].mxu0 }
 0xfb0   :  { %v11329_v32 = vpop.f32.mrb[55].mxu0 }
 0xfb1   :  { %v11330_v31 = vadd.f32 %v11329_v32, %v11328_v14  ;;  %v7884_v14 = vld [vmem:[%s23859_s17 + $0x270] sm:$0xff]  ;;  %v14609_v32 = vpack.c.bf16 %v7873_v58, %v7868_v7  ;;  %v7918_v7 = vld [vmem:[%s23859_s17 + $0x380] sm:$0xff]  ;;  %v7923_v58 = vld [vmem:[%s23859_s17 + $0x3a8] sm:$0xff] }
 0xfb3   :  { %v7170_v52 = vadd.f32 1e-05, %v11330_v31  ;;  %v14611_v31 = vpack.c.bf16 %v7884_v14, %v7879_v57  ;;  %v14629_v57 = vpack.c.bf16 %v7923_v58, %v7918_v7  ;;  %v7927_v14 = vld [vmem:[%s23859_s17 + $0x3c8] sm:$0xff]  ;;  %v7974_v58 = vld [vmem:[%s23859_s17 + $0x540] sm:$0xff] }
 0xfb7   :  { %v11363_v50 = vpop.f32.mrb[56].mxu1 }
 0xfb8   :  { %v11364_v35 = vpop.f32.mrb[57].mxu1 }
 0xfb9   :  { %v11365_v25 = vadd.f32 %v11364_v35, %v11363_v50  ;;  %v7878_v50 = vld [vmem:[%s23859_s17 + $0x240] sm:$0xff]  ;;  %v7883_v35 = vld [vmem:[%s23859_s17 + $0x268] sm:$0xff] }
 0xfbb   :  { %v7240_v21 = vadd.f32 %v11365_v25, %v7170_v52  ;;  %v14613_v52 = vpack.c.bf16 %v7883_v35, %v7878_v50  ;;  %v7887_v25 = vld [vmem:[%s23859_s17 + $0x288] sm:$0xff]  ;;  %v7934_v35 = vld [vmem:[%s23859_s17 + $0x400] sm:$0xff] }
 0xfcf   :  { %v7309_v49 = vpop.f32.mrb[56].mxu0 }
 0xfd0   :  { %v7310_v15 = vadd.f32 %v7309_v49, %v7240_v21  ;;  %v12148_v59 = vpop.f32.mrb[57].mxu0  ;;  %v7892_v21 = vld [vmem:[%s23859_s17 + $0x2b0] sm:$0xff]  ;;  %v7889_v49 = vld [vmem:[%s23859_s17 + $0x298] sm:$0xff] }
 0xfd1   :  { %v7894_v59 = vld [vmem:[%s23859_s17 + $0x2c0] sm:$0xff] }
 0xfd2   :  { %15273 = vrsqrt.f32 %v7310_v15  ;;  %v14455_v15 = vpack.c.bf16 %v7892_v21, %v7887_v25  ;;  %v7931_v25 = vld [vmem:[%s23859_s17 + $0x3e8] sm:$0xff] }
 0xfd4   :  { %14456 = vmatprep.subr.bf16.mxu0 %v14455_v15  ;;  %v7928_v15 = vld [vmem:[%s23859_s17 + $0x3d0] sm:$0xff] }
 0xfd7   :  { %v21829_v13 = vpop.f32.mrb[58].mxu0 }
 0xfd8   :  { %v21831_v8 = vpop.f32.mrb[59].mxu0 }
 0xfdc   :  { %v15274_v22 = vpop.eup %15273 }
 0xfdd   :  { %v7314_v39 = vmul.f32 %v15274_v22, %v7102_v38  ;;  %v7886_v38 = vld [vmem:[%s23859_s17 + $0x280] sm:$0xff]  ;;  %v7891_v22 = vld [vmem:[%s23859_s17 + $0x2a8] sm:$0xff] }
 0xfdf   :  { %10521 = vmatmul.mubr.msk.f32.vlgmr.msra.gmra.mrb[58].mxu1 %vm6821_vm5, %v7314_v39 }
 0xfe0   :  { %14390 = vmatpush1.bf16.msra.mxu1 %v21413_v54  ;;  %7453 = vmatprep.mubr.f32.mxu1 %v23913_v19  ;;  %v7809_v54 = vld [vmem:[%s23859_s17 + $0x18] sm:$0xff] }
 0xfe1   :  { %14392 = vmatprep.subr.bf16.mxu1 %v21415_v36  ;;  %v7819_v36 = vld [vmem:[%s23859_s17 + $0x68] sm:$0xff] }
 0xfe4   :  { %14394 = vmatpush1.bf16.msra.mxu1 %v21426_v48 }
 0xfe5   :  { %14395 = vmatprep.subr.bf16.mxu1 %v23914_v34 }
 0xfe7   :  { %10522 = vmatmul.mubr.msk.f32.vlgmr.msra.gmra.mrb[60].mxu1 %vm6821_vm5, %v7314_v39 }
 0xfe8   :  { %14397 = vmatpush3.bf16.msra.mxu1 %v21358_v5  ;;  %12157 = vmatprep.mubr.msk.f32.mxu1 %vm15304_vm1, %v23913_v19 }
 0xfe9   :  { %14398 = vmatprep.subr.bf16.mxu1 %v23914_v34 }
 0xfec   :  { %14400 = vmatpush3.bf16.msra.mxu1 %v21388_v2 }
 0xfed   :  { %14402 = vmatprep.subr.bf16.mxu1 %v21345_v41  ;;  %v7814_v41 = vld [vmem:[%s23859_s17 + $0x40] sm:$0xff] }
 0xfef   :  { %12158 = vmatmul.mubr.msk.f32.vlgmr.msra.gmra.mrb[62].mxu1 %vm6821_vm5, %v7314_v39  ;;  %v14615_v39 = vpack.c.bf16 %v7894_v59, %v7889_v49  ;;  %v7933_v59 = vld [vmem:[%s23859_s17 + $0x3f8] sm:$0xff] }
 0xff0   :  { %14404 = vmatpush1.bf16.msra.mxu1 %v21356_v0  ;;  %7598 = vmatprep.mubr.f32.mxu1 %v23913_v19  ;;  %v14583_v0 = vpack.c.bf16 %v7814_v41, %v7809_v54  ;;  %v14457_v54 = vpack.c.bf16 %v7891_v22, %v7886_v38  ;;  %v7888_v41 = vld [vmem:[%s23859_s17 + $0x290] sm:$0xff]  ;;  %v14633_v38 = vpack.c.bf16 %v7933_v59, %v7928_v15  ;;  %v7937_v22 = vld [vmem:[%s23859_s17 + $0x418] sm:$0xff] }
 0xff1   :  { %14406 = vmatprep.subr.bf16.mxu1 %v21370_v29  ;;  %v7808_v29 = vld [vmem:[%s23859_s17 + $0x10] sm:$0xff] }
 0xff2   :  { %14458 = vmatpush1.bf16.msra.mxu0 %v14457_v54  ;;  %v7939_v54 = vld [vmem:[%s23859_s17 + $0x428] sm:$0xff] }
 0xff4   :  { %14408 = vmatpush1.bf16.msra.mxu1 %v21377_v28  ;;  %v7813_v28 = vld [vmem:[%s23859_s17 + $0x38] sm:$0xff] }
 0xff5   :  { %14417 = vmatprep.subr.bf16.mxu1 %v23914_v34  ;;  %v14585_v48 = vpack.c.bf16 %v7813_v28, %v7808_v29  ;;  %v7897_v28 = vld [vmem:[%s23859_s17 + $0x2d8] sm:$0xff] }
 0xff7   :  { %10524 = vmatmul.mubr.msk.f32.vlgmr.msra.gmra.mrb[64].mxu1 %vm6821_vm5, %v21530_v42 }
 0xff8   :  { %14419 = vmatpush3.bf16.msra.mxu1 %v21358_v5  ;;  %12168 = vmatprep.mubr.msk.f32.mxu1 %vm15304_vm1, %v23913_v19  ;;  %v7824_v5 = vld [vmem:[%s23859_s17 + $0x90] sm:$0xff] }
 0xff9   :  { %14420 = vmatprep.subr.bf16.mxu1 %v23914_v34  ;;  %v14587_v37 = vpack.c.bf16 %v7824_v5, %v7819_v36  ;;  %v7902_v36 = vld [vmem:[%s23859_s17 + $0x300] sm:$0xff]  ;;  %v7899_v5 = vld [vmem:[%s23859_s17 + $0x2e8] sm:$0xff] }
 0xffc   :  { %14422 = vmatpush3.bf16.msra.mxu1 %v21388_v2  ;;  %v14589_v2 = vpack.c.bf16 %v7823_v61, %v7818_v23  ;;  %v7896_v23 = vld [vmem:[%s23859_s17 + $0x2d0] sm:$0xff]  ;;  %v7901_v61 = vld [vmem:[%s23859_s17 + $0x2f8] sm:$0xff] }
 0xffd   :  { %14584 = vmatprep.subr.bf16.mxu1 %v14583_v0  ;;  %v7893_v0 = vld [vmem:[%s23859_s17 + $0x2b8] sm:$0xff]  ;;  %v14461_v51 = vpack.c.bf16 %v7901_v61, %v7896_v23  ;;  %v7947_v61 = vld [vmem:[%s23859_s17 + $0x468] sm:$0xff] }
 0xffe   :  { %v14617_v29 = vpack.c.bf16 %v7893_v0, %v7888_v41  ;;  %v7944_v0 = vld [vmem:[%s23859_s17 + $0x450] sm:$0xff] }
 0xfff   :  { %12169 = vmatmul.mubr.msk.f32.vlgmr.msra.gmra.mrb[66].mxu1 %vm6821_vm5, %v21530_v42  ;;  %v7844_v42 = vld [vmem:[%s23859_s17 + $0x130] sm:$0xff] }
0x1000   :  { %14586 = vmatpush1.bf16.msra.mxu1 %v14585_v48  ;;  %v14595_v9 = vpack.c.bf16 %v7844_v42, %v7839_v55  ;;  %v14459_v48 = vpack.c.bf16 %v7902_v36, %v7897_v28  ;;  %v7912_v55 = vld [vmem:[%s23859_s17 + $0x350] sm:$0xff]  ;;  %v7909_v42 = vld [vmem:[%s23859_s17 + $0x338] sm:$0xff]  ;;  %v14635_v36 = vpack.c.bf16 %v7944_v0, %v7939_v54 }
0x1001   :  { %14588 = vmatprep.subr.bf16.mxu1 %v14587_v37  ;;  %v7904_v37 = vld [vmem:[%s23859_s17 + $0x310] sm:$0xff]  ;;  %v7941_v28 = vld [vmem:[%s23859_s17 + $0x438] sm:$0xff] }
0x1002   :  { %v14619_v3 = vpack.c.bf16 %v7904_v37, %v7899_v5  ;;  %14460 = vmatprep.subr.bf16.mxu0 %v14459_v48  ;;  %v7938_v48 = vld [vmem:[%s23859_s17 + $0x420] sm:$0xff]  ;;  %v7943_v37 = vld [vmem:[%s23859_s17 + $0x448] sm:$0xff] }
0x1003   :  { %14462 = vmatpush1.bf16.msra.mxu0 %v14461_v51  ;;  %v14637_v23 = vpack.c.bf16 %v7943_v37, %v7938_v48  ;;  %v7949_v51 = vld [vmem:[%s23859_s17 + $0x478] sm:$0xff] }
0x1004   :  { %14590 = vmatpush1.bf16.msra.mxu1 %v14589_v2  ;;  %v7898_v2 = vld [vmem:[%s23859_s17 + $0x2e0] sm:$0xff] }
0x1005   :  { %14592 = vmatprep.subr.bf16.mxu1 %v14591_v44  ;;  %v7903_v44 = vld [vmem:[%s23859_s17 + $0x308] sm:$0xff] }
0x1006   :  { %v14621_v33 = vpack.c.bf16 %v7903_v44, %v7898_v2  ;;  %v7954_v44 = vld [vmem:[%s23859_s17 + $0x4a0] sm:$0xff] }
0x1008   :  { %14594 = vmatpush1.bf16.msra.mxu1 %v14593_v53  ;;  %v14463_v53 = vpack.c.bf16 %v7912_v55, %v7907_v27  ;;  %v7951_v27 = vld [vmem:[%s23859_s17 + $0x488] sm:$0xff]  ;;  %v14639_v55 = vpack.c.bf16 %v7954_v44, %v7949_v51 }
0x1009   :  { %14596 = vmatprep.subr.bf16.mxu1 %v14595_v9  ;;  %v7914_v9 = vld [vmem:[%s23859_s17 + $0x360] sm:$0xff]  ;;  %v7979_v44 = vld [vmem:[%s23859_s17 + $0x568] sm:$0xff] }
0x100a   :  { %v14623_v10 = vpack.c.bf16 %v7914_v9, %v7909_v42  ;;  %14464 = vmatprep.subr.bf16.mxu0 %v14463_v53  ;;  %v7948_v53 = vld [vmem:[%s23859_s17 + $0x470] sm:$0xff]  ;;  %v7953_v9 = vld [vmem:[%s23859_s17 + $0x498] sm:$0xff] }
0x100b   :  { %14466 = vmatpush1.bf16.msra.mxu0 %v14465_v46  ;;  %v14641_v40 = vpack.c.bf16 %v7953_v9, %v7948_v53  ;;  %v7959_v46 = vld [vmem:[%s23859_s17 + $0x4c8] sm:$0xff]  ;;  %v7976_v9 = vld [vmem:[%s23859_s17 + $0x550] sm:$0xff] }
0x100c   :  { %14598 = vmatpush1.bf16.msra.mxu1 %v14597_v47  ;;  %v7908_v47 = vld [vmem:[%s23859_s17 + $0x330] sm:$0xff] }
0x100d   :  { %14600 = vmatprep.subr.bf16.mxu1 %v14599_v62  ;;  %v7913_v62 = vld [vmem:[%s23859_s17 + $0x358] sm:$0xff] }
0x100e   :  { %v14625_v45 = vpack.c.bf16 %v7913_v62, %v7908_v47  ;;  %v7964_v62 = vld [vmem:[%s23859_s17 + $0x4f0] sm:$0xff] }
0x1010   :  { %14602 = vmatpush1.bf16.msra.mxu1 %v14601_v30  ;;  %v7922_v30 = vld [vmem:[%s23859_s17 + $0x3a0] sm:$0xff] }
0x1011   :  { %14604 = vmatprep.subr.bf16.mxu1 %v14603_v20  ;;  %v7919_v20 = vld [vmem:[%s23859_s17 + $0x388] sm:$0xff]  ;;  %v14467_v60 = vpack.c.bf16 %v7922_v30, %v7917_v1  ;;  %v7961_v1 = vld [vmem:[%s23859_s17 + $0x4d8] sm:$0xff]  ;;  %v14643_v30 = vpack.c.bf16 %v7964_v62, %v7959_v46 }
0x1012   :  { %v7983_v62 = vld [vmem:[%s23859_s17 + $0x588] sm:$0xff] }
0x1013   :  { %14468 = vmatprep.subr.bf16.mxu0 %v14467_v60  ;;  %v7958_v60 = vld [vmem:[%s23859_s17 + $0x4c0] sm:$0xff] }
0x1014   :  { %14606 = vmatpush1.bf16.msra.mxu1 %v14605_v4  ;;  %v14627_v4 = vpack.c.bf16 %v7924_v26, %v7919_v20  ;;  %v7963_v26 = vld [vmem:[%s23859_s17 + $0x4e8] sm:$0xff] }
0x1015   :  { %14608 = vmatprep.subr.bf16.mxu1 %v14607_v18  ;;  %v14469_v18 = vpack.c.bf16 %v7921_v63, %v7916_v6  ;;  %v14645_v6 = vpack.c.bf16 %v7963_v26, %v7958_v60  ;;  %v7967_v63 = vld [vmem:[%s23859_s17 + $0x508] sm:$0xff]  ;;  %v7989_v60 = vld [vmem:[%s23859_s17 + $0x5b8] sm:$0xff]  ;;  %v7994_v26 = vld [vmem:[%s23859_s17 + $0x5e0] sm:$0xff] }
0x1017   :  { %14470 = vmatpush1.bf16.msra.mxu0 %v14469_v18  ;;  %v7969_v18 = vld [vmem:[%s23859_s17 + $0x518] sm:$0xff] }
0x1018   :  { %14610 = vmatpush1.bf16.msra.mxu1 %v14609_v32  ;;  %v7932_v32 = vld [vmem:[%s23859_s17 + $0x3f0] sm:$0xff] }
0x1019   :  { %14612 = vmatprep.subr.bf16.mxu1 %v14611_v31  ;;  %v7929_v31 = vld [vmem:[%s23859_s17 + $0x3d8] sm:$0xff]  ;;  %v14471_v50 = vpack.c.bf16 %v7932_v32, %v7927_v14 }
0x101a   :  { %v14631_v21 = vpack.c.bf16 %v7934_v35, %v7929_v31 }
0x101b   :  { %14472 = vmatprep.subr.bf16.mxu0 %v14471_v50 }
0x101c   :  { %14614 = vmatpush1.bf16.msra.mxu1 %v14613_v52  ;;  %v7926_v52 = vld [vmem:[%s23859_s17 + $0x3c0] sm:$0xff] }
0x101d   :  { %14616 = vmatprep.subr.bf16.mxu1 %v14615_v39  ;;  %v14473_v49 = vpack.c.bf16 %v7931_v25, %v7926_v52  ;;  %v7942_v39 = vld [vmem:[%s23859_s17 + $0x440] sm:$0xff]  ;;  %v7782_v52 = vrot.slane %v21829_v13, %v17777_v17 }
0x101e   :  { %v14475_v41 = vpack.c.bf16 %v7942_v39, %v7937_v22 }
0x101f   :  { %14474 = vmatpush1.bf16.msra.mxu0 %v14473_v49 }
0x1020   :  { %14618 = vmatpush1.bf16.msra.mxu1 %v14617_v29  ;;  %v7936_v29 = vld [vmem:[%s23859_s17 + $0x410] sm:$0xff]  ;;  %14476 = vmatprep.subr.bf16.mxu0 %v14475_v41 }
0x1021   :  { %14620 = vmatprep.subr.bf16.mxu1 %v14619_v3  ;;  %v14477_v5 = vpack.c.bf16 %v7941_v28, %v7936_v29  ;;  %v7952_v3 = vld [vmem:[%s23859_s17 + $0x490] sm:$0xff] }
0x1022   :  { %v14479_v2 = vpack.c.bf16 %v7952_v3, %v7947_v61  ;;  %v7977_v3 = vld [vmem:[%s23859_s17 + $0x558] sm:$0xff] }
0x1023   :  { %14478 = vmatpush1.bf16.msra.mxu0 %v14477_v5  ;;  %v7966_v5 = vld [vmem:[%s23859_s17 + $0x500] sm:$0xff] }
0x1024   :  { %14622 = vmatpush1.bf16.msra.mxu1 %v14621_v33  ;;  %v7946_v33 = vld [vmem:[%s23859_s17 + $0x460] sm:$0xff]  ;;  %14480 = vmatprep.subr.bf16.mxu0 %v14479_v2 }
0x1025   :  { %14624 = vmatprep.subr.bf16.mxu1 %v14623_v10  ;;  %v14481_v42 = vpack.c.bf16 %v7951_v27, %v7946_v33  ;;  %v7962_v10 = vld [vmem:[%s23859_s17 + $0x4e0] sm:$0xff]  ;;  %v7984_v33 = vld [vmem:[%s23859_s17 + $0x590] sm:$0xff] }
0x1026   :  { %v14483_v47 = vpack.c.bf16 %v7962_v10, %v7957_v12  ;;  %v7982_v2 = vld [vmem:[%s23859_s17 + $0x580] sm:$0xff] }
0x1027   :  { %14482 = vmatpush1.bf16.msra.mxu0 %v14481_v42 }
0x1028   :  { %14626 = vmatpush1.bf16.msra.mxu1 %v14625_v45  ;;  %v7956_v45 = vld [vmem:[%s23859_s17 + $0x4b0] sm:$0xff]  ;;  %14484 = vmatprep.subr.bf16.mxu0 %v14483_v47  ;;  %v7978_v47 = vld [vmem:[%s23859_s17 + $0x560] sm:$0xff] }
0x1029   :  { %14628 = vmatprep.subr.bf16.mxu1 %v14627_v4  ;;  %v14485_v20 = vpack.c.bf16 %v7961_v1, %v7956_v45  ;;  %v7972_v4 = vld [vmem:[%s23859_s17 + $0x530] sm:$0xff]  ;;  %v7987_v45 = vld [vmem:[%s23859_s17 + $0x5a8] sm:$0xff] }
0x102a   :  { %v14487_v7 = vpack.c.bf16 %v7972_v4, %v7967_v63 }
0x102b   :  { %14486 = vmatpush1.bf16.msra.mxu0 %v14485_v20  ;;  %v7992_v20 = vld [vmem:[%s23859_s17 + $0x5d0] sm:$0xff] }
0x102c   :  { %14630 = vmatpush1.bf16.msra.mxu1 %v14629_v57  ;;  %v14647_v57 = vpack.c.bf16 %v7974_v58, %v7969_v18  ;;  %14488 = vmatprep.subr.bf16.mxu0 %v14487_v7  ;;  %v14653_v18 = vpack.c.bf16 %v7983_v62, %v7978_v47  ;;  %v7986_v7 = vld [vmem:[%s23859_s17 + $0x5a0] sm:$0xff]  ;;  %v7991_v58 = vld [vmem:[%s23859_s17 + $0x5c8] sm:$0xff] }
0x102d   :  { %14632 = vmatprep.subr.bf16.mxu1 %v14631_v21  ;;  %v7786_v21 = vrot.slane %v21831_v8, %v17777_v17  ;;  %v8034_v47 = vld [vmem:[%s23859_s17 + $0x720] sm:$0xff] }
0x1030   :  { %14634 = vmatpush1.bf16.msra.mxu1 %v14633_v38 }
0x1031   :  { %14636 = vmatprep.subr.bf16.mxu1 %v14635_v36 }
0x1034   :  { %14638 = vmatpush1.bf16.msra.mxu1 %v14637_v23  ;;  %v7968_v23 = vld [vmem:[%s23859_s17 + $0x510] sm:$0xff] }
0x1035   :  { %14640 = vmatprep.subr.bf16.mxu1 %v14639_v55 }
0x1038   :  { %14642 = vmatpush1.bf16.msra.mxu1 %v14641_v40  ;;  %v7981_v40 = vld [vmem:[%s23859_s17 + $0x578] sm:$0xff] }
0x1039   :  { %14644 = vmatprep.subr.bf16.mxu1 %v14643_v30  ;;  %v14651_v30 = vpack.c.bf16 %v7984_v33, %v7979_v44  ;;  %v14493_v4 = vpack.c.bf16 %v7981_v40, %v7976_v9  ;;  %v8016_v44 = vld [vmem:[%s23859_s17 + $0x690] sm:$0xff]  ;;  %v8021_v33 = vld [vmem:[%s23859_s17 + $0x6b8] sm:$0xff]  ;;  %v8023_v9 = vld [vmem:[%s23859_s17 + $0x6c8] sm:$0xff] }
0x103a   :  { %v8027_v40 = vld [vmem:[%s23859_s17 + $0x6e8] sm:$0xff]  ;;  %v14509_v62 = vpack.c.bf16 %v8021_v33, %v8016_v44  ;;  %v8069_v44 = vld [vmem:[%s23859_s17 + $0x838] sm:$0xff]  ;;  %v8074_v33 = vld [vmem:[%s23859_s17 + $0x860] sm:$0xff] }
0x103c   :  { %14646 = vmatpush1.bf16.msra.mxu1 %v14645_v6 }
0x103d   :  { %14648 = vmatprep.subr.bf16.mxu1 %v14647_v57  ;;  %v14495_v57 = vpack.c.bf16 %v7992_v20, %v7987_v45 }
0x10b2   :  { %v7384_v14 = vpop.f32.mrb[58].mxu1 }
0x10b3   :  { %v7386_v32 = vpop.f32.mrb[59].mxu1  ;;  %v7749_v54 = vrot.slane %v7384_v14, %v17777_v17  ;;  %v14655_v14 = vpack.c.bf16 %v7994_v26, %v7989_v60  ;;  %v8028_v60 = vld [vmem:[%s23859_s17 + $0x6f0] sm:$0xff]  ;;  %v8033_v26 = vld [vmem:[%s23859_s17 + $0x718] sm:$0xff] }
0x10b4   :  { %v7753_v41 = vrot.slane %v7386_v32, %v17777_v17  ;;  %v7988_v32 = vld [vmem:[%s23859_s17 + $0x5b0] sm:$0xff] }
0x10b5   :  { %v7766_v13 = vmul.f32 %v7749_v54, %v21468_v43  ;;  %v7971_v43 = vld [vmem:[%s23859_s17 + $0x528] sm:$0xff]  ;;  %v7998_v54 = vld [vmem:[%s23859_s17 + $0x600] sm:$0xff] }
0x10b6   :  { %v7767_v8 = vmul.f32 %v7753_v41, %v21471_v16  ;;  %v7973_v16 = vld [vmem:[%s23859_s17 + $0x538] sm:$0xff]  ;;  %v14489_v42 = vpack.c.bf16 %v7971_v43, %v7966_v5  ;;  %v8003_v41 = vld [vmem:[%s23859_s17 + $0x628] sm:$0xff] }
0x10b7   :  { %v14649_v53 = vpack.c.bf16 %v7973_v16, %v7968_v23  ;;  %v8013_v43 = vld [vmem:[%s23859_s17 + $0x678] sm:$0xff]  ;;  %v8022_v16 = vld [vmem:[%s23859_s17 + $0x6c0] sm:$0xff] }
0x10b8   :  { %v8017_v23 = vld [vmem:[%s23859_s17 + $0x698] sm:$0xff] }
0x10ba   :  { %v7455_v31 = vpop.f32.mrb[60].mxu1 }
0x10bb   :  { %v7757_v50 = vrot.slane %v7455_v31, %v17777_v17  ;;  %v7457_v35 = vpop.f32.mrb[61].mxu1  ;;  %v7993_v31 = vld [vmem:[%s23859_s17 + $0x5d8] sm:$0xff] }
0x10bc   :  { %v7761_v25 = vrot.slane %v7457_v35, %v17777_v17  ;;  %v8002_v35 = vld [vmem:[%s23859_s17 + $0x620] sm:$0xff] }
0x10bd   :  { %v7768_v49 = vmul.f32 %v7757_v50, %v21482_v24  ;;  %v7997_v50 = vld [vmem:[%s23859_s17 + $0x5f8] sm:$0xff] }
0x10be   :  { %v7769_v15 = vmul.f32 %v7761_v25, %v21485_v56  ;;  %v8004_v25 = vld [vmem:[%s23859_s17 + $0x630] sm:$0xff] }
0x10bf   :  { %v21973_v59 = vadd.f32 %v7782_v52, %v7768_v49  ;;  %v7999_v52 = vld [vmem:[%s23859_s17 + $0x608] sm:$0xff]  ;;  %v14657_v49 = vpack.c.bf16 %v7993_v31, %v7988_v32  ;;  %v8036_v32 = vld [vmem:[%s23859_s17 + $0x730] sm:$0xff]  ;;  %v8041_v31 = vld [vmem:[%s23859_s17 + $0x758] sm:$0xff] }
0x10c0   :  { %v7794_v38 = vadd.f32 %v7786_v21, %v7769_v15  ;;  %v14497_v21 = vpack.c.bf16 %v7991_v58, %v7986_v7  ;;  %v7996_v15 = vld [vmem:[%s23859_s17 + $0x5f0] sm:$0xff]  ;;  %v8039_v7 = vld [vmem:[%s23859_s17 + $0x748] sm:$0xff] }
0x10c1   :  { %v8044_v58 = vld [vmem:[%s23859_s17 + $0x770] sm:$0xff] }
0x10c2   :  { %v7526_v22 = vpop.f32.mrb[62].mxu1  ;;  %v7799_v51 = vmul.f32 0.2, %v7794_v38 }
0x10c3   :  { %v12159_v39 = vpop.f32.mrb[63].mxu1  ;;  %v7765_v48 = vrot.slane %v7526_v22, %v17777_v17  ;;  %v14499_v22 = vpack.c.bf16 %v8002_v35, %v7997_v50  ;;  %v14675_v35 = vpack.c.bf16 %v8044_v58, %v8039_v7  ;;  %v8078_v7 = vld [vmem:[%s23859_s17 + $0x880] sm:$0xff]  ;;  %v8083_v58 = vld [vmem:[%s23859_s17 + $0x8a8] sm:$0xff] }
0x10c4   :  { %v22042_v63 = vmax.f32 %v7794_v38, %v7799_v51  ;;  %v8001_v38 = vld [vmem:[%s23859_s17 + $0x618] sm:$0xff]  ;;  %v14659_v39 = vpack.c.bf16 %v8004_v25, %v7999_v52  ;;  %v8038_v52 = vld [vmem:[%s23859_s17 + $0x740] sm:$0xff]  ;;  %v8043_v25 = vld [vmem:[%s23859_s17 + $0x768] sm:$0xff] }
0x10c5   :  { %v7770_v12 = vmul.f32 %v7765_v48, %v21495_v11  ;;  %v14491_v11 = vpack.c.bf16 %v7982_v2, %v7977_v3  ;;  %v8024_v3 = vld [vmem:[%s23859_s17 + $0x6d0] sm:$0xff] }
0x10ca   :  { %v7600_v0 = vpop.f32.mrb[64].mxu1 }
0x10cb   :  { %v7774_v29 = vrot.slane %v7600_v0, %v17777_v17  ;;  %v7602_v28 = vpop.f32.mrb[65].mxu1  ;;  %v8007_v0 = vld [vmem:[%s23859_s17 + $0x648] sm:$0xff] }
0x10cc   :  { %v7778_v24 = vrot.slane %v7602_v28, %v17777_v17  ;;  %v8014_v28 = vld [vmem:[%s23859_s17 + $0x680] sm:$0xff] }
0x10cd   :  { %v7791_v56 = vadd.f32 %v7774_v29, %v7766_v13  ;;  %v8012_v13 = vld [vmem:[%s23859_s17 + $0x670] sm:$0xff]  ;;  %v8009_v29 = vld [vmem:[%s23859_s17 + $0x658] sm:$0xff] }
0x10ce   :  { %v7792_v36 = vadd.f32 %v7778_v24, %v7767_v8  ;;  %v14501_v8 = vpack.c.bf16 %v8001_v38, %v7996_v15  ;;  %v14661_v24 = vpack.c.bf16 %v8003_v41, %v7998_v54  ;;  %v14503_v5 = vpack.c.bf16 %v8012_v13, %v8007_v0  ;;  %v8049_v15 = vld [vmem:[%s23859_s17 + $0x798] sm:$0xff]  ;;  %v8054_v38 = vld [vmem:[%s23859_s17 + $0x7c0] sm:$0xff]  ;;  %v8051_v41 = vld [vmem:[%s23859_s17 + $0x7a8] sm:$0xff] }
0x10cf   :  { %v7796_v37 = vmul.f32 0.2, %v7791_v56  ;;  %v14663_v48 = vpack.c.bf16 %v8014_v28, %v8009_v29  ;;  %v8046_v54 = vld [vmem:[%s23859_s17 + $0x780] sm:$0xff]  ;;  %v14679_v13 = vpack.c.bf16 %v8054_v38, %v8049_v15  ;;  %v8048_v29 = vld [vmem:[%s23859_s17 + $0x790] sm:$0xff]  ;;  %v8053_v28 = vld [vmem:[%s23859_s17 + $0x7b8] sm:$0xff] }
0x10d0   :  { %v7797_v61 = vmul.f32 0.2, %v7792_v36  ;;  %v8088_v15 = vld [vmem:[%s23859_s17 + $0x8d0] sm:$0xff]  ;;  %v8093_v38 = vld [vmem:[%s23859_s17 + $0x8f8] sm:$0xff] }
0x10d1   :  { %v22015_v10 = vmax.f32 %v7791_v56, %v7796_v37  ;;  %v8006_v56 = vld [vmem:[%s23859_s17 + $0x640] sm:$0xff]  ;;  %v8008_v37 = vld [vmem:[%s23859_s17 + $0x650] sm:$0xff] }
0x10d2   :  { %v7742_v27 = vpop.f32.mrb[66].mxu1  ;;  %v22006_v55 = vmax.f32 %v7792_v36, %v7797_v61  ;;  %v8011_v36 = vld [vmem:[%s23859_s17 + $0x668] sm:$0xff]  ;;  %v14665_v2 = vpack.c.bf16 %v8013_v43, %v8008_v37  ;;  %v8056_v37 = vld [vmem:[%s23859_s17 + $0x7d0] sm:$0xff]  ;;  %v8061_v43 = vld [vmem:[%s23859_s17 + $0x7f8] sm:$0xff] }
0x10d3   :  { %v7790_v46 = vrot.slane %v7742_v27, %v17777_v17  ;;  %v12170_v1 = vpop.f32.mrb[67].mxu1  ;;  %v8019_v61 = vld [vmem:[%s23859_s17 + $0x6a8] sm:$0xff]  ;;  %v14505_v51 = vpack.c.bf16 %v8011_v36, %v8006_v56  ;;  %v14507_v27 = vpack.c.bf16 %v8022_v16, %v8017_v23  ;;  %v8064_v36 = vld [vmem:[%s23859_s17 + $0x810] sm:$0xff] }
0x10d4   :  { %8270 = vmatprep.mubr.f32.mxu0 %v22006_v55  ;;  %8483 = vmatprep.mubr.f32.mxu1 %v22006_v55  ;;  %v8026_v1 = vld [vmem:[%s23859_s17 + $0x6e0] sm:$0xff]  ;;  %v8059_v56 = vld [vmem:[%s23859_s17 + $0x7e8] sm:$0xff] }
0x10d5   :  { %v22038_v6 = vadd.f32 %v7790_v46, %v7770_v12  ;;  %8271 = vmatmul.mubr.f32.vlgmr.msra.gmra.mrb[60].mxu0 %v22015_v10  ;;  %8484 = vmatmul.mubr.f32.vlgmr.msra.gmra.mrb[68].mxu1 %v22015_v10  ;;  %v8032_v12 = vld [vmem:[%s23859_s17 + $0x710] sm:$0xff]  ;;  %v8029_v46 = vld [vmem:[%s23859_s17 + $0x6f8] sm:$0xff]  ;;  %v14683_v16 = vpack.c.bf16 %v8064_v36, %v8059_v56  ;;  %v8098_v56 = vld [vmem:[%s23859_s17 + $0x920] sm:$0xff] }
0x10d6   :  { %14490 = vmatpush1.bf16.msra.mxu0 %v14489_v42  ;;  %14650 = vmatpush1.bf16.msra.mxu1 %v14649_v53  ;;  %v14667_v42 = vpack.c.bf16 %v8024_v3, %v8019_v61  ;;  %v8018_v53 = vld [vmem:[%s23859_s17 + $0x6a0] sm:$0xff]  ;;  %v14671_v20 = vpack.c.bf16 %v8034_v47, %v8029_v46  ;;  %v8063_v3 = vld [vmem:[%s23859_s17 + $0x808] sm:$0xff]  ;;  %v8068_v46 = vld [vmem:[%s23859_s17 + $0x830] sm:$0xff] }
0x10d7   :  { %8341 = vmatprep.mubr.f32.mxu0 %v22042_v63  ;;  %8554 = vmatprep.mubr.f32.mxu1 %v22042_v63  ;;  %v14669_v45 = vpack.c.bf16 %v8023_v9, %v8018_v53  ;;  %v8058_v61 = vld [vmem:[%s23859_s17 + $0x7e0] sm:$0xff]  ;;  %v8071_v9 = vld [vmem:[%s23859_s17 + $0x848] sm:$0xff]  ;;  %v8073_v47 = vld [vmem:[%s23859_s17 + $0x858] sm:$0xff] }
0x10d8   :  { %14492 = vmatprep.subr.bf16.mxu0 %v14491_v11  ;;  %14652 = vmatprep.subr.bf16.mxu1 %v14651_v30  ;;  %v8031_v11 = vld [vmem:[%s23859_s17 + $0x708] sm:$0xff]  ;;  %v14511_v30 = vpack.c.bf16 %v8032_v12, %v8027_v40  ;;  %v8066_v53 = vld [vmem:[%s23859_s17 + $0x820] sm:$0xff]  ;;  %v14687_v12 = vpack.c.bf16 %v8074_v33, %v8069_v44  ;;  %v8108_v44 = vld [vmem:[%s23859_s17 + $0x970] sm:$0xff] }
0x10d9   :  { %v8103_v36 = vld [vmem:[%s23859_s17 + $0x948] sm:$0xff]  ;;  %v8113_v33 = vld [vmem:[%s23859_s17 + $0x998] sm:$0xff] }
0x10da   :  { %14494 = vmatpush1.bf16.msra.mxu0 %v14493_v4  ;;  %14654 = vmatpush1.bf16.msra.mxu1 %v14653_v18  ;;  %v8037_v4 = vld [vmem:[%s23859_s17 + $0x738] sm:$0xff]  ;;  %v8042_v18 = vld [vmem:[%s23859_s17 + $0x760] sm:$0xff] }
0x10db   :  { %14496 = vmatprep.subr.bf16.mxu0 %v14495_v57  ;;  %14656 = vmatprep.subr.bf16.mxu1 %v14655_v14  ;;  %v14513_v57 = vpack.c.bf16 %v8031_v11, %v8026_v1  ;;  %v14673_v14 = vpack.c.bf16 %v8033_v26, %v8028_v60  ;;  %v14515_v50 = vpack.c.bf16 %v8042_v18, %v8037_v4  ;;  %v8079_v1 = vld [vmem:[%s23859_s17 + $0x888] sm:$0xff]  ;;  %v8084_v11 = vld [vmem:[%s23859_s17 + $0x8b0] sm:$0xff]  ;;  %v8081_v26 = vld [vmem:[%s23859_s17 + $0x898] sm:$0xff] }
0x10dc   :  { %v8076_v60 = vld [vmem:[%s23859_s17 + $0x870] sm:$0xff]  ;;  %v14691_v18 = vpack.c.bf16 %v8084_v11, %v8079_v1  ;;  %v8118_v1 = vld [vmem:[%s23859_s17 + $0x9c0] sm:$0xff]  ;;  %v8123_v11 = vld [vmem:[%s23859_s17 + $0x9e8] sm:$0xff] }
0x10de   :  { %14498 = vmatpush1.bf16.msra.mxu0 %v14497_v21  ;;  %14658 = vmatpush1.bf16.msra.mxu1 %v14657_v49  ;;  %v8047_v21 = vld [vmem:[%s23859_s17 + $0x788] sm:$0xff]  ;;  %v8052_v49 = vld [vmem:[%s23859_s17 + $0x7b0] sm:$0xff] }
0x10df   :  { %14500 = vmatprep.subr.bf16.mxu0 %v14499_v22  ;;  %14660 = vmatprep.subr.bf16.mxu1 %v14659_v39  ;;  %v14517_v22 = vpack.c.bf16 %v8041_v31, %v8036_v32  ;;  %v14677_v39 = vpack.c.bf16 %v8043_v25, %v8038_v52  ;;  %v14519_v0 = vpack.c.bf16 %v8052_v49, %v8047_v21  ;;  %v8089_v32 = vld [vmem:[%s23859_s17 + $0x8d8] sm:$0xff]  ;;  %v8094_v31 = vld [vmem:[%s23859_s17 + $0x900] sm:$0xff]  ;;  %v8091_v25 = vld [vmem:[%s23859_s17 + $0x8e8] sm:$0xff] }
0x10e0   :  { %v8086_v52 = vld [vmem:[%s23859_s17 + $0x8c0] sm:$0xff]  ;;  %v14695_v49 = vpack.c.bf16 %v8094_v31, %v8089_v32  ;;  %v8128_v31 = vld [vmem:[%s23859_s17 + $0xa10] sm:$0xff] }
0x10e2   :  { %14502 = vmatpush1.bf16.msra.mxu0 %v14501_v8  ;;  %14662 = vmatpush1.bf16.msra.mxu1 %v14661_v24  ;;  %v8057_v8 = vld [vmem:[%s23859_s17 + $0x7d8] sm:$0xff]  ;;  %v8062_v24 = vld [vmem:[%s23859_s17 + $0x800] sm:$0xff] }
0x10e3   :  { %14504 = vmatprep.subr.bf16.mxu0 %v14503_v5  ;;  %14664 = vmatprep.subr.bf16.mxu1 %v14663_v48  ;;  %v14521_v5 = vpack.c.bf16 %v8051_v41, %v8046_v54  ;;  %v14681_v48 = vpack.c.bf16 %v8053_v28, %v8048_v29  ;;  %v14523_v23 = vpack.c.bf16 %v8062_v24, %v8057_v8  ;;  %v8099_v54 = vld [vmem:[%s23859_s17 + $0x928] sm:$0xff]  ;;  %v8104_v41 = vld [vmem:[%s23859_s17 + $0x950] sm:$0xff]  ;;  %v8101_v28 = vld [vmem:[%s23859_s17 + $0x938] sm:$0xff] }
0x10e4   :  { %v8096_v29 = vld [vmem:[%s23859_s17 + $0x910] sm:$0xff]  ;;  %v14699_v24 = vpack.c.bf16 %v8104_v41, %v8099_v54 }
0x10e6   :  { %14506 = vmatpush1.bf16.msra.mxu0 %v14505_v51  ;;  %14666 = vmatpush1.bf16.msra.mxu1 %v14665_v2  ;;  %v8067_v51 = vld [vmem:[%s23859_s17 + $0x828] sm:$0xff]  ;;  %v8072_v2 = vld [vmem:[%s23859_s17 + $0x850] sm:$0xff] }
0x10e7   :  { %14508 = vmatprep.subr.bf16.mxu0 %v14507_v27  ;;  %14668 = vmatprep.subr.bf16.mxu1 %v14667_v42  ;;  %v14525_v27 = vpack.c.bf16 %v8061_v43, %v8056_v37  ;;  %v14685_v42 = vpack.c.bf16 %v8063_v3, %v8058_v61  ;;  %v14527_v40 = vpack.c.bf16 %v8072_v2, %v8067_v51  ;;  %v8109_v37 = vld [vmem:[%s23859_s17 + $0x978] sm:$0xff]  ;;  %v8114_v43 = vld [vmem:[%s23859_s17 + $0x9a0] sm:$0xff]  ;;  %v8111_v3 = vld [vmem:[%s23859_s17 + $0x988] sm:$0xff] }
0x10e8   :  { %v8106_v61 = vld [vmem:[%s23859_s17 + $0x960] sm:$0xff]  ;;  %v14703_v2 = vpack.c.bf16 %v8114_v43, %v8109_v37  ;;  %v8148_v43 = vld [vmem:[%s23859_s17 + $0xab0] sm:$0xff] }
0x10ea   :  { %14510 = vmatpush1.bf16.msra.mxu0 %v14509_v62  ;;  %14670 = vmatpush1.bf16.msra.mxu1 %v14669_v45  ;;  %v8077_v62 = vld [vmem:[%s23859_s17 + $0x878] sm:$0xff]  ;;  %v8082_v45 = vld [vmem:[%s23859_s17 + $0x8a0] sm:$0xff] }
0x10eb   :  { %14512 = vmatprep.subr.bf16.mxu0 %v14511_v30  ;;  %14672 = vmatprep.subr.bf16.mxu1 %v14671_v20  ;;  %v14529_v30 = vpack.c.bf16 %v8071_v9, %v8066_v53  ;;  %v14689_v20 = vpack.c.bf16 %v8073_v47, %v8068_v46  ;;  %v14531_v4 = vpack.c.bf16 %v8082_v45, %v8077_v62  ;;  %v8119_v53 = vld [vmem:[%s23859_s17 + $0x9c8] sm:$0xff]  ;;  %v8124_v9 = vld [vmem:[%s23859_s17 + $0x9f0] sm:$0xff]  ;;  %v8121_v47 = vld [vmem:[%s23859_s17 + $0x9d8] sm:$0xff] }
0x10ec   :  { %v8116_v46 = vld [vmem:[%s23859_s17 + $0x9b0] sm:$0xff]  ;;  %v14707_v45 = vpack.c.bf16 %v8124_v9, %v8119_v53  ;;  %v8158_v9 = vld [vmem:[%s23859_s17 + $0xb00] sm:$0xff] }
0x10ee   :  { %14514 = vmatpush1.bf16.msra.mxu0 %v14513_v57  ;;  %14674 = vmatpush1.bf16.msra.mxu1 %v14673_v14  ;;  %v8087_v57 = vld [vmem:[%s23859_s17 + $0x8c8] sm:$0xff]  ;;  %v8092_v14 = vld [vmem:[%s23859_s17 + $0x8f0] sm:$0xff] }
0x10ef   :  { %14516 = vmatprep.subr.bf16.mxu0 %v14515_v50  ;;  %14676 = vmatprep.subr.bf16.mxu1 %v14675_v35  ;;  %v14533_v50 = vpack.c.bf16 %v8081_v26, %v8076_v60  ;;  %v14693_v35 = vpack.c.bf16 %v8083_v58, %v8078_v7  ;;  %v14535_v21 = vpack.c.bf16 %v8092_v14, %v8087_v57  ;;  %v8129_v60 = vld [vmem:[%s23859_s17 + $0xa18] sm:$0xff]  ;;  %v8134_v26 = vld [vmem:[%s23859_s17 + $0xa40] sm:$0xff]  ;;  %v8131_v58 = vld [vmem:[%s23859_s17 + $0xa28] sm:$0xff]  ;;  %v7798_v57 = vmul.f32 0.2, %v21973_v59 }
0x10f0   :  { %v8126_v7 = vld [vmem:[%s23859_s17 + $0xa00] sm:$0xff]  ;;  %v14711_v32 = vpack.c.bf16 %v8134_v26, %v8129_v60  ;;  %v8168_v26 = vld [vmem:[%s23859_s17 + $0xb50] sm:$0xff] }
0x10f2   :  { %14518 = vmatpush1.bf16.msra.mxu0 %v14517_v22  ;;  %14678 = vmatpush1.bf16.msra.mxu1 %v14677_v39  ;;  %v8097_v22 = vld [vmem:[%s23859_s17 + $0x918] sm:$0xff]  ;;  %v8102_v39 = vld [vmem:[%s23859_s17 + $0x940] sm:$0xff] }
0x10f3   :  { %14520 = vmatprep.subr.bf16.mxu0 %v14519_v0  ;;  %14680 = vmatprep.subr.bf16.mxu1 %v14679_v13  ;;  %v14537_v0 = vpack.c.bf16 %v8091_v25, %v8086_v52  ;;  %v14697_v13 = vpack.c.bf16 %v8093_v38, %v8088_v15  ;;  %v14539_v8 = vpack.c.bf16 %v8102_v39, %v8097_v22  ;;  %v8142_v52 = vld [vmem:[%s23859_s17 + $0xa80] sm:$0xff]  ;;  %v8139_v25 = vld [vmem:[%s23859_s17 + $0xa68] sm:$0xff]  ;;  %v8136_v38 = vld [vmem:[%s23859_s17 + $0xa50] sm:$0xff] }
0x10f4   :  { %v8141_v22 = vld [vmem:[%s23859_s17 + $0xa78] sm:$0xff]  ;;  %v22414_v39 = vmax.f32 %v21973_v59, %v7798_v57  ;;  %v8152_v59 = vld [vmem:[%s23859_s17 + $0xad0] sm:$0xff] }
0x10f5   :  { %v8184_v57 = vld [vmem:[%s23859_s17 + $0xbd0] sm:$0xff] }
0x10f6   :  { %14522 = vmatpush1.bf16.msra.mxu0 %v14521_v5  ;;  %14682 = vmatpush1.bf16.msra.mxu1 %v14681_v48  ;;  %v8107_v5 = vld [vmem:[%s23859_s17 + $0x968] sm:$0xff]  ;;  %v8112_v48 = vld [vmem:[%s23859_s17 + $0x990] sm:$0xff] }
0x10f7   :  { %14524 = vmatprep.subr.bf16.mxu0 %v14523_v23  ;;  %14684 = vmatprep.subr.bf16.mxu1 %v14683_v16  ;;  %v14541_v23 = vpack.c.bf16 %v8101_v28, %v8096_v29  ;;  %v14701_v16 = vpack.c.bf16 %v8103_v36, %v8098_v56  ;;  %v14543_v51 = vpack.c.bf16 %v8112_v48, %v8107_v5  ;;  %v8147_v29 = vld [vmem:[%s23859_s17 + $0xaa8] sm:$0xff]  ;;  %v8149_v28 = vld [vmem:[%s23859_s17 + $0xab8] sm:$0xff]  ;;  %v8146_v36 = vld [vmem:[%s23859_s17 + $0xaa0] sm:$0xff] }
0x10f8   :  { %v8151_v5 = vld [vmem:[%s23859_s17 + $0xac8] sm:$0xff]  ;;  %v14559_v48 = vpack.c.bf16 %v8152_v59, %v8147_v29 }
0x10fa   :  { %14526 = vmatpush1.bf16.msra.mxu0 %v14525_v27  ;;  %14686 = vmatpush1.bf16.msra.mxu1 %v14685_v42  ;;  %v8117_v27 = vld [vmem:[%s23859_s17 + $0x9b8] sm:$0xff]  ;;  %v8122_v42 = vld [vmem:[%s23859_s17 + $0x9e0] sm:$0xff] }
0x10fb   :  { %14528 = vmatprep.subr.bf16.mxu0 %v14527_v40  ;;  %14688 = vmatprep.subr.bf16.mxu1 %v14687_v12  ;;  %v14545_v40 = vpack.c.bf16 %v8111_v3, %v8106_v61  ;;  %v14705_v12 = vpack.c.bf16 %v8113_v33, %v8108_v44  ;;  %v14547_v62 = vpack.c.bf16 %v8122_v42, %v8117_v27  ;;  %v8162_v61 = vld [vmem:[%s23859_s17 + $0xb20] sm:$0xff]  ;;  %v8159_v3 = vld [vmem:[%s23859_s17 + $0xb08] sm:$0xff]  ;;  %v8156_v33 = vld [vmem:[%s23859_s17 + $0xaf0] sm:$0xff] }
0x10fc   :  { %v8161_v27 = vld [vmem:[%s23859_s17 + $0xb18] sm:$0xff] }
0x10fe   :  { %14530 = vmatpush1.bf16.msra.mxu0 %v14529_v30  ;;  %14690 = vmatpush1.bf16.msra.mxu1 %v14689_v20  ;;  %v8127_v30 = vld [vmem:[%s23859_s17 + $0xa08] sm:$0xff]  ;;  %v8132_v20 = vld [vmem:[%s23859_s17 + $0xa30] sm:$0xff] }
0x10ff   :  { %14532 = vmatprep.subr.bf16.mxu0 %v14531_v4  ;;  %14692 = vmatprep.subr.bf16.mxu1 %v14691_v18  ;;  %v14549_v4 = vpack.c.bf16 %v8121_v47, %v8116_v46  ;;  %v14709_v18 = vpack.c.bf16 %v8123_v11, %v8118_v1  ;;  %v14551_v14 = vpack.c.bf16 %v8132_v20, %v8127_v30  ;;  %v8172_v46 = vld [vmem:[%s23859_s17 + $0xb70] sm:$0xff]  ;;  %v8169_v47 = vld [vmem:[%s23859_s17 + $0xb58] sm:$0xff]  ;;  %v8166_v11 = vld [vmem:[%s23859_s17 + $0xb40] sm:$0xff] }
0x1100   :  { %v8171_v30 = vld [vmem:[%s23859_s17 + $0xb68] sm:$0xff] }
0x1102   :  { %14534 = vmatpush1.bf16.msra.mxu0 %v14533_v50  ;;  %14694 = vmatpush1.bf16.msra.mxu1 %v14693_v35  ;;  %v8133_v50 = vld [vmem:[%s23859_s17 + $0xa38] sm:$0xff] }
0x1103   :  { %14536 = vmatprep.subr.bf16.mxu0 %v14535_v21  ;;  %14696 = vmatprep.subr.bf16.mxu1 %v14695_v49  ;;  %v8137_v35 = vld [vmem:[%s23859_s17 + $0xa58] sm:$0xff]  ;;  %v8144_v21 = vld [vmem:[%s23859_s17 + $0xa90] sm:$0xff]  ;;  %v14553_v49 = vpack.c.bf16 %v8131_v58, %v8126_v7  ;;  %v14713_v15 = vpack.c.bf16 %v8133_v50, %v8128_v31  ;;  %v8182_v7 = vld [vmem:[%s23859_s17 + $0xbc0] sm:$0xff] }
0x1104   :  { %v14555_v54 = vpack.c.bf16 %v8142_v52, %v8137_v35  ;;  %v14715_v41 = vpack.c.bf16 %v8144_v21, %v8139_v25  ;;  %v8179_v58 = vld [vmem:[%s23859_s17 + $0xba8] sm:$0xff]  ;;  %v8176_v31 = vld [vmem:[%s23859_s17 + $0xb90] sm:$0xff]  ;;  %v8181_v50 = vld [vmem:[%s23859_s17 + $0xbb8] sm:$0xff] }
0x1105   :  { %v14731_v52 = vpack.c.bf16 %v8184_v57, %v8179_v58  ;;  %v8178_v25 = vld [vmem:[%s23859_s17 + $0xba0] sm:$0xff]  ;;  %v8183_v21 = vld [vmem:[%s23859_s17 + $0xbc8] sm:$0xff]  ;;  %v7980_v58 = vld [vmem:[%s23859_s17 + $0x570] sm:$0xff] }
0x1106   :  { %14538 = vmatpush1.bf16.msra.mxu0 %v14537_v0  ;;  %14698 = vmatpush1.bf16.msra.mxu1 %v14697_v13  ;;  %v8138_v0 = vld [vmem:[%s23859_s17 + $0xa60] sm:$0xff]  ;;  %v8143_v13 = vld [vmem:[%s23859_s17 + $0xa88] sm:$0xff] }
0x1107   :  { %14540 = vmatprep.subr.bf16.mxu0 %v14539_v8  ;;  %14700 = vmatprep.subr.bf16.mxu1 %v14699_v24  ;;  %v8154_v8 = vld [vmem:[%s23859_s17 + $0xae0] sm:$0xff]  ;;  %v14557_v24 = vpack.c.bf16 %v8141_v22, %v8136_v38  ;;  %v14717_v56 = vpack.c.bf16 %v8143_v13, %v8138_v0  ;;  %v8189_v38 = vld [vmem:[%s23859_s17 + $0xbf8] sm:$0xff]  ;;  %v8191_v13 = vld [vmem:[%s23859_s17 + $0xc08] sm:$0xff] }
0x1108   :  { %v14719_v37 = vpack.c.bf16 %v8154_v8, %v8149_v28  ;;  %v8194_v22 = vld [vmem:[%s23859_s17 + $0xc20] sm:$0xff]  ;;  %v8188_v28 = vld [vmem:[%s23859_s17 + $0xbf0] sm:$0xff]  ;;  %v8193_v8 = vld [vmem:[%s23859_s17 + $0xc18] sm:$0xff] }
0x1109   :  { %v8186_v0 = vld [vmem:[%s23859_s17 + $0xbe0] sm:$0xff]  ;;  %v14735_v59 = vpack.c.bf16 %v8194_v22, %v8189_v38  ;;  %v7920_v22 = vld [vmem:[%s23859_s17 + $0x390] sm:$0xff] }
0x110a   :  { %14542 = vmatpush1.bf16.msra.mxu0 %v14541_v23  ;;  %14702 = vmatpush1.bf16.msra.mxu1 %v14701_v16  ;;  %v8153_v23 = vld [vmem:[%s23859_s17 + $0xad8] sm:$0xff]  ;;  %v7990_v38 = vld [vmem:[%s23859_s17 + $0x5c0] sm:$0xff] }
0x110b   :  { %14544 = vmatprep.subr.bf16.mxu0 %v14543_v51  ;;  %14704 = vmatprep.subr.bf16.mxu1 %v14703_v2  ;;  %v8157_v16 = vld [vmem:[%s23859_s17 + $0xaf8] sm:$0xff]  ;;  %v8164_v51 = vld [vmem:[%s23859_s17 + $0xb30] sm:$0xff]  ;;  %v14561_v2 = vpack.c.bf16 %v8151_v5, %v8146_v36  ;;  %v14721_v44 = vpack.c.bf16 %v8153_v23, %v8148_v43  ;;  %v8199_v36 = vld [vmem:[%s23859_s17 + $0xc48] sm:$0xff] }
0x110c   :  { %v14563_v42 = vpack.c.bf16 %v8162_v61, %v8157_v16  ;;  %v14723_v53 = vpack.c.bf16 %v8164_v51, %v8159_v3  ;;  %v8204_v5 = vld [vmem:[%s23859_s17 + $0xc70] sm:$0xff]  ;;  %v8201_v23 = vld [vmem:[%s23859_s17 + $0xc58] sm:$0xff]  ;;  %v8198_v3 = vld [vmem:[%s23859_s17 + $0xc40] sm:$0xff] }
0x110d   :  { %v8196_v43 = vld [vmem:[%s23859_s17 + $0xc30] sm:$0xff]  ;;  %v14739_v61 = vpack.c.bf16 %v8204_v5, %v8199_v36  ;;  %v8203_v51 = vld [vmem:[%s23859_s17 + $0xc68] sm:$0xff]  ;;  %v8005_v36 = vld [vmem:[%s23859_s17 + $0x638] sm:$0xff] }
0x110e   :  { %14546 = vmatpush1.bf16.msra.mxu0 %v14545_v40  ;;  %14706 = vmatpush1.bf16.msra.mxu1 %v14705_v12  ;;  %v8163_v40 = vld [vmem:[%s23859_s17 + $0xb28] sm:$0xff]  ;;  %v7930_v5 = vld [vmem:[%s23859_s17 + $0x3e0] sm:$0xff] }
0x110f   :  { %14548 = vmatprep.subr.bf16.mxu0 %v14547_v62  ;;  %14708 = vmatprep.subr.bf16.mxu1 %v14707_v45  ;;  %v8167_v12 = vld [vmem:[%s23859_s17 + $0xb48] sm:$0xff]  ;;  %v8174_v62 = vld [vmem:[%s23859_s17 + $0xb80] sm:$0xff]  ;;  %v14565_v45 = vpack.c.bf16 %v8161_v27, %v8156_v33  ;;  %v14725_v1 = vpack.c.bf16 %v8163_v40, %v8158_v9  ;;  %v7800_v9 = vmul.f32 0.2, %v22038_v6 }
0x1110   :  { %v14567_v20 = vpack.c.bf16 %v8172_v46, %v8167_v12  ;;  %v14727_v60 = vpack.c.bf16 %v8174_v62, %v8169_v47  ;;  %v8050_v33 = vld [vmem:[%s23859_s17 + $0x7a0] sm:$0xff]  ;;  %v8055_v27 = vld [vmem:[%s23859_s17 + $0x7c8] sm:$0xff] }
0x1111   :  { %v14775_v12 = vpack.c.bf16 %v8055_v27, %v8050_v33  ;;  %v7810_v46 = vld [vmem:[%s23859_s17 + $0x20] sm:$0xff]  ;;  %v7815_v47 = vld [vmem:[%s23859_s17 + $0x48] sm:$0xff]  ;;  %v7940_v27 = vld [vmem:[%s23859_s17 + $0x430] sm:$0xff] }
0x1112   :  { %14550 = vmatpush1.bf16.msra.mxu0 %v14549_v4  ;;  %14710 = vmatpush1.bf16.msra.mxu1 %v14709_v18  ;;  %v8173_v4 = vld [vmem:[%s23859_s17 + $0xb78] sm:$0xff]  ;;  %v7970_v62 = vld [vmem:[%s23859_s17 + $0x520] sm:$0xff]  ;;  %v8015_v33 = vld [vmem:[%s23859_s17 + $0x688] sm:$0xff] }
0x1113   :  { %14552 = vmatprep.subr.bf16.mxu0 %v14551_v14  ;;  %14712 = vmatprep.subr.bf16.mxu1 %v14711_v32  ;;  %v8177_v18 = vld [vmem:[%s23859_s17 + $0xb98] sm:$0xff]  ;;  %v14569_v14 = vpack.c.bf16 %v8171_v30, %v8166_v11  ;;  %v14729_v32 = vpack.c.bf16 %v8173_v4, %v8168_v26  ;;  %v8060_v30 = vld [vmem:[%s23859_s17 + $0x7f0] sm:$0xff]  ;;  %v22608_v26 = vmax.f32 %v22038_v6, %v7800_v9 }
0x1114   :  { %v14571_v35 = vpack.c.bf16 %v8182_v7, %v8177_v18  ;;  %v7905_v11 = vld [vmem:[%s23859_s17 + $0x318] sm:$0xff]  ;;  %v7820_v18 = vld [vmem:[%s23859_s17 + $0x70] sm:$0xff] }
0x1115   :  { %8342 = vmatmul.mubr.f32.vlgmr.msra.gmra.mrb[60].mxu0 %v22414_v39  ;;  %8555 = vmatmul.mubr.f32.vlgmr.msra.gmra.mrb[68].mxu1 %v22414_v39  ;;  %v7825_v7 = vld [vmem:[%s23859_s17 + $0x98] sm:$0xff] }
0x1116   :  { %14554 = vmatpush1.bf16.msra.mxu0 %v14553_v49  ;;  %14714 = vmatpush1.bf16.msra.mxu1 %v14713_v15  ;;  %v8187_v49 = vld [vmem:[%s23859_s17 + $0xbe8] sm:$0xff]  ;;  %v8192_v15 = vld [vmem:[%s23859_s17 + $0xc10] sm:$0xff]  ;;  %v7985_v6 = vld [vmem:[%s23859_s17 + $0x598] sm:$0xff] }
0x1117   :  { %14556 = vmatprep.subr.bf16.mxu0 %v14555_v54  ;;  %14716 = vmatprep.subr.bf16.mxu1 %v14715_v41  ;;  %v14573_v54 = vpack.c.bf16 %v8181_v50, %v8176_v31  ;;  %v14733_v41 = vpack.c.bf16 %v8183_v21, %v8178_v25  ;;  %v14575_v29 = vpack.c.bf16 %v8192_v15, %v8187_v49  ;;  %v7915_v31 = vld [vmem:[%s23859_s17 + $0x368] sm:$0xff]  ;;  %v8070_v50 = vld [vmem:[%s23859_s17 + $0x840] sm:$0xff]  ;;  %v8105_v9 = vld [vmem:[%s23859_s17 + $0x958] sm:$0xff] }
0x1118   :  { %8412 = vmatprep.mubr.f32.mxu0 %v23913_v19  ;;  %8625 = vmatprep.mubr.f32.mxu1 %v23913_v19  ;;  %v14781_v25 = vpack.c.bf16 %v7985_v6, %v7980_v58  ;;  %v7830_v49 = vld [vmem:[%s23859_s17 + $0xc0] sm:$0xff]  ;;  %v7835_v15 = vld [vmem:[%s23859_s17 + $0xe8] sm:$0xff] }
0x1119   :  { %v8030_v6 = vld [vmem:[%s23859_s17 + $0x700] sm:$0xff] }
0x111a   :  { %14558 = vmatpush1.bf16.msra.mxu0 %v14557_v24  ;;  %14718 = vmatpush1.bf16.msra.mxu1 %v14717_v56  ;;  %v8197_v24 = vld [vmem:[%s23859_s17 + $0xc38] sm:$0xff]  ;;  %v8202_v56 = vld [vmem:[%s23859_s17 + $0xc60] sm:$0xff] }
0x111b   :  { %14560 = vmatprep.subr.bf16.mxu0 %v14559_v48  ;;  %14720 = vmatprep.subr.bf16.mxu1 %v14719_v37  ;;  %v14577_v48 = vpack.c.bf16 %v8191_v13, %v8186_v0  ;;  %v14737_v37 = vpack.c.bf16 %v8193_v8, %v8188_v28  ;;  %v14579_v16 = vpack.c.bf16 %v8202_v56, %v8197_v24  ;;  %v8085_v0 = vld [vmem:[%s23859_s17 + $0x8b8] sm:$0xff]  ;;  %v7840_v28 = vld [vmem:[%s23859_s17 + $0x110] sm:$0xff] }
0x111c   :  { %v14753_v13 = vpack.c.bf16 %v7835_v15, %v7830_v49  ;;  %v7845_v8 = vld [vmem:[%s23859_s17 + $0x138] sm:$0xff]  ;;  %v8000_v24 = vld [vmem:[%s23859_s17 + $0x610] sm:$0xff] }
0x111e   :  { %14562 = vmatpush1.bf16.msra.mxu0 %v14561_v2  ;;  %14722 = vmatpush1.bf16.msra.mxu1 %v14721_v44  ;;  %v7890_v2 = vld [vmem:[%s23859_s17 + $0x2a0] sm:$0xff]  ;;  %v7895_v44 = vld [vmem:[%s23859_s17 + $0x2c8] sm:$0xff] }
0x111f   :  { %14564 = vmatprep.subr.bf16.mxu0 %v14563_v42  ;;  %14724 = vmatprep.subr.bf16.mxu1 %v14723_v53  ;;  %v14581_v42 = vpack.c.bf16 %v8201_v23, %v8196_v43  ;;  %v14741_v53 = vpack.c.bf16 %v8203_v51, %v8198_v3  ;;  %v14743_v40 = vpack.c.bf16 %v7895_v44, %v7890_v2  ;;  %v8095_v43 = vld [vmem:[%s23859_s17 + $0x908] sm:$0xff]  ;;  %v7850_v3 = vld [vmem:[%s23859_s17 + $0x160] sm:$0xff] }
0x1120   :  { %v14757_v23 = vpack.c.bf16 %v7845_v8, %v7840_v28  ;;  %v7855_v51 = vld [vmem:[%s23859_s17 + $0x188] sm:$0xff]  ;;  %v8010_v2 = vld [vmem:[%s23859_s17 + $0x660] sm:$0xff] }
0x1121   :  { %v8135_v28 = vld [vmem:[%s23859_s17 + $0xa48] sm:$0xff] }
0x1122   :  { %14566 = vmatpush1.bf16.msra.mxu0 %v14565_v45  ;;  %14726 = vmatpush1.bf16.msra.mxu1 %v14725_v1  ;;  %v7975_v45 = vld [vmem:[%s23859_s17 + $0x548] sm:$0xff]  ;;  %v7900_v1 = vld [vmem:[%s23859_s17 + $0x2f0] sm:$0xff] }
0x1123   :  { %14568 = vmatprep.subr.bf16.mxu0 %v14567_v20  ;;  %14728 = vmatprep.subr.bf16.mxu1 %v14727_v60  ;;  %v8065_v20 = vld [vmem:[%s23859_s17 + $0x818] sm:$0xff]  ;;  %v14745_v60 = vpack.c.bf16 %v7815_v47, %v7810_v46  ;;  %v14777_v4 = vpack.c.bf16 %v7975_v45, %v7970_v62  ;;  %v14747_v57 = vpack.c.bf16 %v7905_v11, %v7900_v1  ;;  %v7860_v47 = vld [vmem:[%s23859_s17 + $0x1b0] sm:$0xff] }
0x1124   :  { %v7865_v62 = vld [vmem:[%s23859_s17 + $0x1d8] sm:$0xff]  ;;  %v8020_v45 = vld [vmem:[%s23859_s17 + $0x6b0] sm:$0xff] }
0x1125   :  { %v8025_v11 = vld [vmem:[%s23859_s17 + $0x6d8] sm:$0xff] }
0x1126   :  { %14570 = vmatpush1.bf16.msra.mxu0 %v14569_v14  ;;  %14730 = vmatpush1.bf16.msra.mxu1 %v14729_v32  ;;  %v14779_v14 = vpack.c.bf16 %v8065_v20, %v8060_v30  ;;  %v7910_v32 = vld [vmem:[%s23859_s17 + $0x340] sm:$0xff]  ;;  %v7955_v20 = vld [vmem:[%s23859_s17 + $0x4a8] sm:$0xff] }
0x1127   :  { %14572 = vmatprep.subr.bf16.mxu0 %v14571_v35  ;;  %14732 = vmatprep.subr.bf16.mxu1 %v14731_v52  ;;  %v8075_v35 = vld [vmem:[%s23859_s17 + $0x868] sm:$0xff]  ;;  %v14749_v52 = vpack.c.bf16 %v7825_v7, %v7820_v18  ;;  %v14751_v21 = vpack.c.bf16 %v7915_v31, %v7910_v32  ;;  %v7950_v30 = vld [vmem:[%s23859_s17 + $0x480] sm:$0xff]  ;;  %v14765_v18 = vpack.c.bf16 %v7865_v62, %v7860_v47  ;;  %v8165_v47 = vld [vmem:[%s23859_s17 + $0xb38] sm:$0xff] }
0x1128   :  { %v14797_v7 = vpack.c.bf16 %v8025_v11, %v8020_v45  ;;  %v14767_v58 = vpack.c.bf16 %v7955_v20, %v7950_v30  ;;  %v8035_v31 = vld [vmem:[%s23859_s17 + $0x728] sm:$0xff]  ;;  %v8884_v11 = vld [vmem:[%s23860_s18 + $0x38] sm:$0xff]  ;;  %v8170_v20 = vld [vmem:[%s23859_s17 + $0xb60] sm:$0xff] }
0x1129   :  { %v14801_v49 = vpack.c.bf16 %v8035_v31, %v8030_v6  ;;  %v8195_v6 = vld [vmem:[%s23859_s17 + $0xc28] sm:$0xff]  ;;  %v8200_v31 = vld [vmem:[%s23859_s17 + $0xc50] sm:$0xff] }
0x112a   :  { %14574 = vmatpush1.bf16.msra.mxu0 %v14573_v54  ;;  %14734 = vmatpush1.bf16.msra.mxu1 %v14733_v41  ;;  %v7925_v54 = vld [vmem:[%s23859_s17 + $0x3b8] sm:$0xff]  ;;  %v8080_v41 = vld [vmem:[%s23859_s17 + $0x890] sm:$0xff] }
0x112b   :  { %14576 = vmatprep.subr.bf16.mxu0 %v14575_v29  ;;  %14736 = vmatprep.subr.bf16.mxu1 %v14735_v59  ;;  %v14755_v59 = vpack.c.bf16 %v7925_v54, %v7920_v22  ;;  %v14787_v56 = vpack.c.bf16 %v8085_v0, %v8080_v41  ;;  %v8040_v22 = vld [vmem:[%s23859_s17 + $0x750] sm:$0xff]  ;;  %v8045_v54 = vld [vmem:[%s23859_s17 + $0x778] sm:$0xff]  ;;  %v8893_v41 = vld [vmem:[%s23860_s18 + $0x80] sm:$0xff] }
0x112c   :  { %v8894_v0 = vld [vmem:[%s23860_s18 + $0x88] sm:$0xff] }
0x112d   :  { %v22782_v8 = vpack.c.bf16 %v8894_v0, %v8893_v41  ;;  %v8912_v41 = vld [vmem:[%s23860_s18 + $0x118] sm:$0xff]  ;;  %v8929_v0 = vld [vmem:[%s23860_s18 + $0x1a0] sm:$0xff] }
0x112e   :  { %14578 = vmatpush1.bf16.msra.mxu0 %v14577_v48  ;;  %14738 = vmatpush1.bf16.msra.mxu1 %v14737_v37  ;;  %v7935_v48 = vld [vmem:[%s23859_s17 + $0x408] sm:$0xff]  ;;  %v8090_v37 = vld [vmem:[%s23859_s17 + $0x8e0] sm:$0xff] }
0x112f   :  { %14580 = vmatprep.subr.bf16.mxu0 %v14579_v16  ;;  %14740 = vmatprep.subr.bf16.mxu1 %v14739_v61  ;;  %v14789_v16 = vpack.c.bf16 %v8005_v36, %v8000_v24  ;;  %v14759_v61 = vpack.c.bf16 %v7935_v48, %v7930_v5  ;;  %v14791_v44 = vpack.c.bf16 %v8095_v43, %v8090_v37  ;;  %v8877_v24 = vld [vmem:[%s23860_s18] sm:$0xff]  ;;  %v8895_v5 = vld [vmem:[%s23860_s18 + $0x90] sm:$0xff]  ;;  %v8896_v48 = vld [vmem:[%s23860_s18 + $0x98] sm:$0xff] }
0x1130   :  { %v8140_v37 = vld [vmem:[%s23859_s17 + $0xa70] sm:$0xff]  ;;  %v8145_v43 = vld [vmem:[%s23859_s17 + $0xa98] sm:$0xff] }
0x1132   :  { %14582 = vmatpush1.bf16.msra.mxu0 %v14581_v42  ;;  %14742 = vmatpush1.bf16.msra.mxu1 %v14741_v53  ;;  %v7945_v42 = vld [vmem:[%s23859_s17 + $0x458] sm:$0xff]  ;;  %v8100_v53 = vld [vmem:[%s23859_s17 + $0x930] sm:$0xff] }
0x1133   :  { %14744 = vmatprep.subr.bf16.mxu0 %v14743_v40  ;;  %14776 = vmatprep.subr.bf16.mxu1 %v14775_v12  ;;  %v14761_v40 = vpack.c.bf16 %v7855_v51, %v7850_v3  ;;  %v14793_v12 = vpack.c.bf16 %v8015_v33, %v8010_v2  ;;  %v14763_v46 = vpack.c.bf16 %v7945_v42, %v7940_v27  ;;  %v8880_v3 = vld [vmem:[%s23860_s18 + $0x18] sm:$0xff]  ;;  %v8897_v2 = vld [vmem:[%s23860_s18 + $0xa0] sm:$0xff] }
0x1134   :  { %v14795_v1 = vpack.c.bf16 %v8105_v9, %v8100_v53  ;;  %v14811_v51 = vpack.c.bf16 %v8145_v43, %v8140_v37  ;;  %v8881_v42 = vld [vmem:[%s23860_s18 + $0x20] sm:$0xff]  ;;  %v8882_v53 = vld [vmem:[%s23860_s18 + $0x28] sm:$0xff]  ;;  %v8916_v37 = vld [vmem:[%s23860_s18 + $0x138] sm:$0xff] }
0x1135   :  { %8413 = vmatmul.mubr.f32.vlgmr.msra.gmra.mrb[60].mxu0 %v22608_v26  ;;  %8626 = vmatmul.mubr.f32.vlgmr.msra.gmra.mrb[68].mxu1 %v22608_v26  ;;  %v22857_v62 = vpack.c.bf16 %v8882_v53, %v8881_v42 }
0x1136   :  { %14746 = vmatpush3.bf16.msra.mxu0 %v14745_v60  ;;  %8696 = vmatprep.mubr.f32.mxu0 %v22006_v55  ;;  %v14783_v55 = vpack.c.bf16 %v8075_v35, %v8070_v50  ;;  %v8110_v60 = vld [vmem:[%s23859_s17 + $0x980] sm:$0xff]  ;;  %v7960_v50 = vld [vmem:[%s23859_s17 + $0x4d0] sm:$0xff]  ;;  %v7965_v35 = vld [vmem:[%s23859_s17 + $0x4f8] sm:$0xff] }
0x1137   :  { %14778 = vmatpush3.bf16.msra.mxu1 %v14777_v4  ;;  %8766 = vmatprep.mubr.f32.mxu1 %v22042_v63  ;;  %v7995_v63 = vld [vmem:[%s23859_s17 + $0x5e8] sm:$0xff]  ;;  %v14771_v15 = vpack.c.bf16 %v7965_v35, %v7960_v50  ;;  %v8205_v50 = vld [vmem:[%s23859_s17 + $0xc78] sm:$0xff]  ;;  %v8925_v35 = vld [vmem:[%s23860_s18 + $0x180] sm:$0xff] }
0x1138   :  { %14748 = vmatprep.subr.bf16.mxu0 %v14747_v57  ;;  %14780 = vmatprep.subr.bf16.mxu1 %v14779_v14  ;;  %v14785_v29 = vpack.c.bf16 %v7995_v63, %v7990_v38  ;;  %v8115_v4 = vld [vmem:[%s23859_s17 + $0x9a8] sm:$0xff]  ;;  %v7870_v57 = vld [vmem:[%s23859_s17 + $0x200] sm:$0xff]  ;;  %v7880_v38 = vld [vmem:[%s23859_s17 + $0x250] sm:$0xff] }
0x1139   :  { %v7875_v14 = vld [vmem:[%s23859_s17 + $0x228] sm:$0xff]  ;;  %v14799_v32 = vpack.c.bf16 %v8115_v4, %v8110_v60 }
0x113a   :  { %14750 = vmatpush3.bf16.msra.mxu0 %v14749_v52  ;;  %v8120_v52 = vld [vmem:[%s23859_s17 + $0x9d0] sm:$0xff]  ;;  %v8175_v60 = vld [vmem:[%s23859_s17 + $0xb88] sm:$0xff] }
0x113b   :  { %14782 = vmatpush3.bf16.msra.mxu1 %v14781_v25  ;;  %14752 = vmatprep.subr.bf16.mxu0 %v14751_v21  ;;  %v8125_v25 = vld [vmem:[%s23859_s17 + $0x9f8] sm:$0xff]  ;;  %v14769_v21 = vpack.c.bf16 %v7875_v14, %v7870_v57  ;;  %v8190_v14 = vld [vmem:[%s23859_s17 + $0xc00] sm:$0xff] }
0x113c   :  { %14784 = vmatprep.subr.bf16.mxu1 %v14783_v55  ;;  %v7885_v55 = vld [vmem:[%s23859_s17 + $0x278] sm:$0xff]  ;;  %v14803_v63 = vpack.c.bf16 %v8125_v25, %v8120_v52  ;;  %v8926_v52 = vld [vmem:[%s23860_s18 + $0x188] sm:$0xff]  ;;  %v14829_v25 = vpack.c.bf16 %v8205_v50, %v8200_v31  ;;  %v8937_v31 = vld [vmem:[%s23860_s18 + $0x1e0] sm:$0xff] }
0x113e   :  { %14754 = vmatpush3.bf16.msra.mxu0 %v14753_v13  ;;  %v14773_v13 = vpack.c.bf16 %v7885_v55, %v7880_v38  ;;  %v8927_v38 = vld [vmem:[%s23860_s18 + $0x190] sm:$0xff]  ;;  %v8928_v55 = vld [vmem:[%s23860_s18 + $0x198] sm:$0xff] }
0x113f   :  { %14786 = vmatpush3.bf16.msra.mxu1 %v14785_v29  ;;  %14756 = vmatprep.subr.bf16.mxu0 %v14755_v59  ;;  %v14805_v29 = vpack.c.bf16 %v8045_v54, %v8040_v22  ;;  %v8130_v59 = vld [vmem:[%s23859_s17 + $0xa20] sm:$0xff]  ;;  %v22925_v22 = vpack.c.bf16 %v8928_v55, %v8927_v38  ;;  %v8911_v54 = vld [vmem:[%s23860_s18 + $0x110] sm:$0xff]  ;;  %v8922_v55 = vld [vmem:[%s23860_s18 + $0x168] sm:$0xff] }
0x1140   :  { %14788 = vmatprep.subr.bf16.mxu1 %v14787_v56  ;;  %v8878_v56 = vld [vmem:[%s23860_s18 + $0x8] sm:$0xff]  ;;  %v14808_v36 = vpack.c.bf16 %v8135_v28, %v8130_v59  ;;  %v8913_v28 = vld [vmem:[%s23860_s18 + $0x120] sm:$0xff] }
0x1141   :  { %v8921_v38 = vld [vmem:[%s23860_s18 + $0x160] sm:$0xff] }
0x1142   :  { %14758 = vmatpush3.bf16.msra.mxu0 %v14757_v23  ;;  %v22804_v23 = vpack.c.bf16 %v8878_v56, %v8877_v24  ;;  %v8914_v24 = vld [vmem:[%s23860_s18 + $0x128] sm:$0xff]  ;;  %v8932_v56 = vld [vmem:[%s23860_s18 + $0x1b8] sm:$0xff] }
0x1143   :  { %14790 = vmatpush3.bf16.msra.mxu1 %v14789_v16  ;;  %14760 = vmatprep.subr.bf16.mxu0 %v14759_v61  ;;  %v22807_v16 = vpack.c.bf16 %v8896_v48, %v8895_v5  ;;  %v8879_v61 = vld [vmem:[%s23860_s18 + $0x10] sm:$0xff] }
0x1144   :  { %14792 = vmatprep.subr.bf16.mxu1 %v14791_v44  ;;  %v8150_v44 = vld [vmem:[%s23859_s17 + $0xac0] sm:$0xff]  ;;  %v22832_v33 = vpack.c.bf16 %v8880_v3, %v8879_v61  ;;  %v8915_v48 = vld [vmem:[%s23860_s18 + $0x130] sm:$0xff]  ;;  %v8902_v3 = vld [vmem:[%s23860_s18 + $0xc8] sm:$0xff] }
0x1145   :  { %v22971_v43 = vpack.c.bf16 %v8916_v37, %v8915_v48  ;;  %v8901_v61 = vld [vmem:[%s23860_s18 + $0xc0] sm:$0xff] }
0x1146   :  { %14762 = vmatpush3.bf16.msra.mxu0 %v14761_v40  ;;  %v8899_v40 = vld [vmem:[%s23860_s18 + $0xb0] sm:$0xff] }
0x1147   :  { %14794 = vmatpush3.bf16.msra.mxu1 %v14793_v12  ;;  %14764 = vmatprep.subr.bf16.mxu0 %v14763_v46  ;;  %v8900_v12 = vld [vmem:[%s23860_s18 + $0xb8] sm:$0xff]  ;;  %v8160_v46 = vld [vmem:[%s23859_s17 + $0xb10] sm:$0xff] }
0x1148   :  { %14796 = vmatprep.subr.bf16.mxu1 %v14795_v1  ;;  %v22860_v45 = vpack.c.bf16 %v8900_v12, %v8899_v40  ;;  %v8883_v1 = vld [vmem:[%s23860_s18 + $0x30] sm:$0xff]  ;;  %v14817_v30 = vpack.c.bf16 %v8165_v47, %v8160_v46  ;;  %v8918_v40 = vld [vmem:[%s23860_s18 + $0x148] sm:$0xff]  ;;  %v8904_v47 = vld [vmem:[%s23860_s18 + $0xd8] sm:$0xff] }
0x1149   :  { %v22876_v4 = vpack.c.bf16 %v8884_v11, %v8883_v1  ;;  %v8903_v46 = vld [vmem:[%s23860_s18 + $0xd0] sm:$0xff] }
0x114a   :  { %14766 = vmatpush3.bf16.msra.mxu0 %v14765_v18  ;;  %v14820_v18 = vpack.c.bf16 %v8175_v60, %v8170_v20  ;;  %v8935_v1 = vld [vmem:[%s23860_s18 + $0x1d0] sm:$0xff]  ;;  %v23020_v11 = vpack.c.bf16 %v8904_v47, %v8903_v46  ;;  %v8888_v60 = vld [vmem:[%s23860_s18 + $0x58] sm:$0xff] }
0x114b   :  { %14798 = vmatpush3.bf16.msra.mxu1 %v14797_v7  ;;  %14768 = vmatprep.subr.bf16.mxu0 %v14767_v58  ;;  %v8180_v7 = vld [vmem:[%s23859_s17 + $0xbb0] sm:$0xff]  ;;  %v8185_v58 = vld [vmem:[%s23859_s17 + $0xbd8] sm:$0xff] }
0x114c   :  { %14800 = vmatprep.subr.bf16.mxu1 %v14799_v32  ;;  %v14823_v57 = vpack.c.bf16 %v8185_v58, %v8180_v7  ;;  %v14826_v32 = vpack.c.bf16 %v8195_v6, %v8190_v14  ;;  %v8887_v20 = vld [vmem:[%s23860_s18 + $0x50] sm:$0xff]  ;;  %v8905_v6 = vld [vmem:[%s23860_s18 + $0xe0] sm:$0xff] }
0x114d   :  { %v23033_v7 = vpack.c.bf16 %v8888_v60, %v8887_v20  ;;  %v8919_v58 = vld [vmem:[%s23860_s18 + $0x150] sm:$0xff] }
0x114e   :  { %14770 = vmatpush3.bf16.msra.mxu0 %v14769_v21  ;;  %v22908_v21 = vpack.c.bf16 %v8926_v52, %v8925_v35  ;;  %v8938_v35 = vld [vmem:[%s23860_s18 + $0x1e8] sm:$0xff]  ;;  %v8889_v52 = vld [vmem:[%s23860_s18 + $0x60] sm:$0xff] }
0x114f   :  { %14802 = vmatpush3.bf16.msra.mxu1 %v14801_v49  ;;  %14772 = vmatprep.subr.bf16.mxu0 %v14771_v15  ;;  %v8909_v49 = vld [vmem:[%s23860_s18 + $0x100] sm:$0xff]  ;;  %v8910_v15 = vld [vmem:[%s23860_s18 + $0x108] sm:$0xff] }
0x1150   :  { %14804 = vmatprep.subr.bf16.mxu1 %v14803_v63  ;;  %v22922_v63 = vpack.c.bf16 %v8910_v15, %v8909_v49  ;;  %v23067_v49 = vpack.c.bf16 %v8938_v35, %v8937_v31 }
0x1152   :  { %14774 = vmatpush3.bf16.msra.mxu0 %v14773_v13  ;;  %v8930_v13 = vld [vmem:[%s23860_s18 + $0x1a8] sm:$0xff] }
0x1153   :  { %14806 = vmatpush3.bf16.msra.mxu1 %v14805_v29  ;;  %14807 = vmatprep.subr.bf16.mxu0 %v23914_v34  ;;  %v22941_v29 = vpack.c.bf16 %v8912_v41, %v8911_v54  ;;  %v22944_v59 = vpack.c.bf16 %v8930_v13, %v8929_v0  ;;  %v23078_v54 = vpack.c.bf16 %v8922_v55, %v8921_v38  ;;  %v8907_v41 = vld [vmem:[%s23860_s18 + $0xf0] sm:$0xff]  ;;  %v8908_v0 = vld [vmem:[%s23860_s18 + $0xf8] sm:$0xff] }
0x1154   :  { %14832 = vmatprep.subr.bf16.mxu1 %v22782_v8  ;;  %v8939_v13 = vld [vmem:[%s23860_s18 + $0x1f0] sm:$0xff] }
0x1155   :  { %8697 = vmatmul.mubr.f32.vlgmr.msra.gmra.mrb[62].mxu0 %v22015_v10  ;;  %v8898_v10 = vld [vmem:[%s23860_s18 + $0xa8] sm:$0xff] }
0x1156   :  { %8767 = vmatmul.mubr.f32.vlgmr.msra.gmra.mrb[70].mxu1 %v22414_v39  ;;  %14809 = vmatpush3.bf16.msra.mxu0 %v14808_v36  ;;  %v8155_v39 = vld [vmem:[%s23859_s17 + $0xae8] sm:$0xff]  ;;  %v22835_v27 = vpack.c.bf16 %v8898_v10, %v8897_v2  ;;  %v22959_v36 = vpack.c.bf16 %v8914_v24, %v8913_v28  ;;  %v22984_v2 = vpack.c.bf16 %v8902_v3, %v8901_v61  ;;  %v8940_v24 = vld [vmem:[%s23860_s18 + $0x1f8] sm:$0xff]  ;;  %v8923_v61 = vld [vmem:[%s23860_s18 + $0x170] sm:$0xff] }
0x1157   :  { %14810 = vmatprep.subr.bf16.mxu0 %v23914_v34  ;;  %12203 = vmatprep.mubr.msk.f32.mxu0 %vm15304_vm1, %v23913_v19  ;;  %v14814_v9 = vpack.c.bf16 %v8155_v39, %v8150_v44  ;;  %v8934_v10 = vld [vmem:[%s23860_s18 + $0x1c8] sm:$0xff]  ;;  %v8885_v44 = vld [vmem:[%s23860_s18 + $0x40] sm:$0xff]  ;;  %v23092_v28 = vpack.c.bf16 %v8908_v0, %v8907_v41  ;;  %v23103_v48 = vpack.c.bf16 %v8940_v24, %v8939_v13  ;;  %v8924_v3 = vld [vmem:[%s23860_s18 + $0x178] sm:$0xff] }
0x1158   :  { %14834 = vmatpush3.bf16.msra.mxu1 %v22804_v23  ;;  %v8886_v39 = vld [vmem:[%s23860_s18 + $0x48] sm:$0xff] }
0x1159   :  { %14836 = vmatprep.subr.bf16.mxu1 %v22807_v16  ;;  %v22997_v53 = vpack.c.bf16 %v8886_v39, %v8885_v44 }
0x115a   :  { %14812 = vmatpush3.bf16.msra.mxu0 %v14811_v51  ;;  %v8933_v51 = vld [vmem:[%s23860_s18 + $0x1c0] sm:$0xff] }
0x115b   :  { %14813 = vmatprep.subr.bf16.mxu0 %v23914_v34  ;;  %v22995_v42 = vpack.c.bf16 %v8934_v10, %v8933_v51  ;;  %v23114_v51 = vpack.c.bf16 %v8924_v3, %v8923_v61  ;;  %v8942_v61 = vld [vmem:[%s23860_s18 + $0x208] sm:$0xff] }
0x115c   :  { %14838 = vmatpush3.bf16.msra.mxu1 %v22832_v33 }
0x115d   :  { %14840 = vmatprep.subr.bf16.mxu1 %v22835_v27 }
0x115e   :  { %14815 = vmatpush3.bf16.msra.mxu0 %v14814_v9  ;;  %v8917_v9 = vld [vmem:[%s23860_s18 + $0x140] sm:$0xff] }
0x115f   :  { %14816 = vmatprep.subr.bf16.mxu0 %v23914_v34  ;;  %v23006_v12 = vpack.c.bf16 %v8918_v40, %v8917_v9 }
0x1160   :  { %14842 = vmatpush3.bf16.msra.mxu1 %v22857_v62 }
0x1161   :  { %14844 = vmatprep.subr.bf16.mxu1 %v22860_v45 }
0x1162   :  { %14818 = vmatpush3.bf16.msra.mxu0 %v14817_v30  ;;  %v8936_v30 = vld [vmem:[%s23860_s18 + $0x1d8] sm:$0xff] }
0x1163   :  { %14819 = vmatprep.subr.bf16.mxu0 %v23914_v34 }
0x1164   :  { %14846 = vmatpush3.bf16.msra.mxu1 %v22876_v4 }
0x1165   :  { %14848 = vmatprep.subr.bf16.mxu1 %v22984_v2 }
0x1166   :  { %14821 = vmatpush3.bf16.msra.mxu0 %v14820_v18  ;;  %v23031_v18 = vpack.c.bf16 %v8936_v30, %v8935_v1 }
0x1167   :  { %14822 = vmatprep.subr.bf16.mxu0 %v23914_v34 }
0x1168   :  { %14850 = vmatpush3.bf16.msra.mxu1 %v22997_v53 }
0x1169   :  { %14852 = vmatprep.subr.bf16.mxu1 %v23020_v11 }
0x116a   :  { %14824 = vmatpush3.bf16.msra.mxu0 %v14823_v57  ;;  %v8920_v57 = vld [vmem:[%s23860_s18 + $0x158] sm:$0xff] }
0x116b   :  { %14825 = vmatprep.subr.bf16.mxu0 %v23914_v34  ;;  %v23042_v14 = vpack.c.bf16 %v8920_v57, %v8919_v58 }
0x116c   :  { %14854 = vmatpush3.bf16.msra.mxu1 %v23033_v7 }
0x116e   :  { %14827 = vmatpush3.bf16.msra.mxu0 %v14826_v32  ;;  %v8906_v32 = vld [vmem:[%s23860_s18 + $0xe8] sm:$0xff] }
0x116f   :  { %14828 = vmatprep.subr.bf16.mxu0 %v23914_v34  ;;  %v23056_v50 = vpack.c.bf16 %v8906_v32, %v8905_v6 }
0x1171   :  { %14856 = vmatprep.subr.bf16.mxu1 %v23056_v50 }
0x1172   :  { %14830 = vmatpush3.bf16.msra.mxu0 %v14829_v25  ;;  %v8890_v25 = vld [vmem:[%s23860_s18 + $0x68] sm:$0xff] }
0x1173   :  { %14864 = vmatprep.subr.bf16.mxu0 %v22908_v21  ;;  %v23069_v15 = vpack.c.bf16 %v8890_v25, %v8889_v52 }
0x1175   :  { %12204 = vmatmul.mubr.f32.vlgmr.msra.gmra.mrb[64].mxu0 %v22608_v26  ;;  %v8931_v26 = vld [vmem:[%s23860_s18 + $0x1b0] sm:$0xff]  ;;  %14858 = vmatpush3.bf16.msra.mxu1 %v23069_v15 }
0x1176   :  { %14866 = vmatpush3.bf16.msra.mxu0 %v22922_v63  ;;  %v22962_v5 = vpack.c.bf16 %v8932_v56, %v8931_v26  ;;  %v8891_v26 = vld [vmem:[%s23860_s18 + $0x70] sm:$0xff]  ;;  %v8892_v56 = vld [vmem:[%s23860_s18 + $0x78] sm:$0xff]  ;;  %14860 = vmatprep.subr.bf16.mxu1 %v23092_v28 }
0x1177   :  { %14868 = vmatprep.subr.bf16.mxu0 %v22925_v22  ;;  %v23105_v37 = vpack.c.bf16 %v8892_v56, %v8891_v26  ;;  %v8941_v56 = vld [vmem:[%s23860_s18 + $0x200] sm:$0xff] }
0x1179   :  { %14862 = vmatpush3.bf16.msra.mxu1 %v23105_v37 }
0x117a   :  { %14870 = vmatpush3.bf16.msra.mxu0 %v22941_v29  ;;  %14895 = vmatprep.subr.bf16.mxu1 %v23914_v34 }
0x117b   :  { %14872 = vmatprep.subr.bf16.mxu0 %v22944_v59 }
0x117e   :  { %14874 = vmatpush3.bf16.msra.mxu0 %v22959_v36 }
0x117f   :  { %14876 = vmatprep.subr.bf16.mxu0 %v22962_v5 }
0x1182   :  { %14878 = vmatpush3.bf16.msra.mxu0 %v22971_v43 }
0x1183   :  { %14880 = vmatprep.subr.bf16.mxu0 %v22995_v42 }
0x1186   :  { %14882 = vmatpush3.bf16.msra.mxu0 %v23006_v12 }
0x1187   :  { %14884 = vmatprep.subr.bf16.mxu0 %v23031_v18 }
0x118a   :  { %14886 = vmatpush3.bf16.msra.mxu0 %v23042_v14 }
0x118b   :  { %14888 = vmatprep.subr.bf16.mxu0 %v23067_v49 }
0x118e   :  { %14890 = vmatpush3.bf16.msra.mxu0 %v23078_v54 }
0x118f   :  { %14892 = vmatprep.subr.bf16.mxu0 %v23103_v48 }
0x1192   :  { %14894 = vmatpush3.bf16.msra.mxu0 %v23114_v51 }
0x1208   :  { %v23120_v10 = vpop.f32.mrb[60].mxu0  ;;  %v23122_v44 = vpop.f32.mrb[68].mxu1 }
0x1209   :  { %v8842_v39 = vsel %vm1768_vm2, %v23120_v10, 0.0  ;;  %v8856_v9 = vsel %vm1768_vm2, %v23122_v44, 0.0  ;;  %v23128_v40 = vpop.f32.mrb[61].mxu0  ;;  %v23130_v46 = vpop.f32.mrb[69].mxu1 }
0x120a   :  { %v8843_v47 = vrot.slane %v8842_v39, 4  ;;  %v8857_v1 = vrot.slane %v8856_v9, 4  ;;  %v8849_v30 = vsel %vm1768_vm2, %v23128_v40, 0.0  ;;  %v8863_v20 = vsel %vm1768_vm2, %v23130_v46, 0.0 }
0x120b   :  { %v8850_v60 = vrot.slane %v8849_v30, 4  ;;  %v8864_v58 = vrot.slane %v8863_v20, 4 }
0x120c   :  { %v8844_v57 = vadd.f32 %v8843_v47, %v8842_v39  ;;  %v8858_v6 = vadd.f32 %v8857_v1, %v8856_v9  ;;  %v23142_v1 = vpack.c.bf16 %v8942_v61, %v8941_v56 }
0x120d   :  { %v8851_v32 = vadd.f32 %v8850_v60, %v8849_v30  ;;  %v8865_v31 = vadd.f32 %v8864_v58, %v8863_v20  ;;  %v8943_v60 = vld [vmem:[%s23860_s18 + $0x210] sm:$0xff]  ;;  %v8944_v58 = vld [vmem:[%s23860_s18 + $0x218] sm:$0xff] }
0x120e   :  { %v8845_v35 = vrot.slane %v8844_v57, 2  ;;  %v8859_v52 = vrot.slane %v8858_v6, 2 }
0x120f   :  { %v8852_v25 = vrot.slane %v8851_v32, 2  ;;  %v8866_v38 = vrot.slane %v8865_v31, 2 }
0x1210   :  { %v8846_v55 = vadd.f32 %v8845_v35, %v8844_v57  ;;  %v8860_v41 = vadd.f32 %v8859_v52, %v8858_v6  ;;  %v23151_v57 = vpack.c.bf16 %v8944_v58, %v8943_v60  ;;  %v8945_v6 = vld [vmem:[%s23860_s18 + $0x220] sm:$0xff]  ;;  %v8947_v35 = vld [vmem:[%s23860_s18 + $0x230] sm:$0xff]  ;;  %v8948_v52 = vld [vmem:[%s23860_s18 + $0x238] sm:$0xff] }
0x1211   :  { %v8853_v0 = vadd.f32 %v8852_v25, %v8851_v32  ;;  %v8867_v13 = vadd.f32 %v8866_v38, %v8865_v31  ;;  %v8946_v32 = vld [vmem:[%s23860_s18 + $0x228] sm:$0xff]  ;;  %v23174_v25 = vpack.c.bf16 %v8948_v52, %v8947_v35  ;;  %v8949_v38 = vld [vmem:[%s23860_s18 + $0x240] sm:$0xff]  ;;  %v8955_v58 = vld [vmem:[%s23860_s18 + $0x270] sm:$0xff] }
0x1212   :  { %v8847_v24 = vrot.slane %v8846_v55, 1  ;;  %v8861_v26 = vrot.slane %v8860_v41, 1  ;;  %v23164_v31 = vpack.c.bf16 %v8946_v32, %v8945_v6  ;;  %v8956_v6 = vld [vmem:[%s23860_s18 + $0x278] sm:$0xff] }
0x1213   :  { %v8854_v3 = vrot.slane %v8853_v0, 1  ;;  %v8868_v39 = vrot.slane %v8867_v13, 1  ;;  %v23214_v32 = vpack.c.bf16 %v8956_v6, %v8955_v58  ;;  %v9170_v58 = vld [vmem:[%s23861_s19 + $0x18] sm:$0xff]  ;;  %v9175_v6 = vld [vmem:[%s23861_s19 + $0x40] sm:$0xff] }
0x1214   :  { %v8848_v30 = vadd.f32 %v8847_v24, %v8846_v55  ;;  %v8862_v20 = vadd.f32 %v8861_v26, %v8860_v41  ;;  %v8950_v55 = vld [vmem:[%s23860_s18 + $0x248] sm:$0xff] }
0x1215   :  { %v8855_v9 = vadd.f32 %v8854_v3, %v8853_v0  ;;  %v8869_v47 = vadd.f32 %v8868_v39, %v8867_v13  ;;  %v23184_v41 = vpack.c.bf16 %v8950_v55, %v8949_v38  ;;  %v8951_v0 = vld [vmem:[%s23860_s18 + $0x250] sm:$0xff]  ;;  %v8952_v13 = vld [vmem:[%s23860_s18 + $0x258] sm:$0xff]  ;;  %23918 = vst [vmem:[#allocation8_spill] sm:$0xff] %v23214_v32 }
0x1216   :  { %v23194_v61 = vpack.c.bf16 %v8952_v13, %v8951_v0 }
0x1217   :  { %9021 = vmatprep.mubr.f32.mxu1 %v8855_v9  ;;  %9091 = vmatprep.mubr.f32.mxu0 %v8869_v47  ;;  %23915 = vst [vmem:[#allocation5_spill] sm:$0xff] %v23184_v41  ;;  %v8953_v9 = vld [vmem:[%s23860_s18 + $0x260] sm:$0xff]  ;;  %v8954_v47 = vld [vmem:[%s23860_s18 + $0x268] sm:$0xff] }
0x1218   :  { %9022 = vmatmul.mubr.f32.vlgmr.msra.gmra.mrb[72].mxu1 %v8848_v30  ;;  %9092 = vmatmul.mubr.f32.vlgmr.msra.gmra.mrb[66].mxu0 %v8862_v20  ;;  %23916 = vst [vmem:[#allocation6_spill] sm:$0xff] %v23194_v61  ;;  %v23204_v60 = vpack.c.bf16 %v8954_v47, %v8953_v9  ;;  %v9173_v9 = vld [vmem:[%s23861_s19 + $0x30] sm:$0xff]  ;;  %v9167_v47 = vld [vmem:[%s23861_s19] sm:$0xff] }
0x1219   :  { %14897 = vmatpush3.bf16.msra.mxu1 %v23142_v1  ;;  %12238 = vmatprep.mubr.msk.f32.mxu1 %vm15304_vm1, %v23913_v19 }
0x121a   :  { %14898 = vmatprep.subr.bf16.mxu1 %v23914_v34  ;;  %9274 = vmatprep.mubr.f32.mxu0 %v23913_v19  ;;  %23917 = vst [vmem:[#allocation7_spill] sm:$0xff] %v23204_v60 }
0x121d   :  { %14900 = vmatpush3.bf16.msra.mxu1 %v23151_v57 }
0x121e   :  { %14901 = vmatprep.subr.bf16.mxu1 %v23914_v34 }
0x1221   :  { %14903 = vmatpush3.bf16.msra.mxu1 %v23164_v31 }
0x1222   :  { %14904 = vmatprep.subr.bf16.mxu1 %v23914_v34 }
0x1225   :  { %14906 = vmatpush3.bf16.msra.mxu1 %v23174_v25 }
0x1226   :  { %14907 = vmatprep.subr.bf16.mxu1 %v23914_v34 }
0x1228   :  { %v11425_v24 = vpop.f32.mrb[62].mxu0 }
0x1229   :  { %v11460_v26 = vpop.f32.mrb[70].mxu1  ;;  %v11426_v56 = vpop.f32.mrb[63].mxu0  ;;  %14909 = vmatpush3.bf16.msra.mxu1 %v23184_v41  ;;  %v9171_v41 = vld [vmem:[%s23861_s19 + $0x20] sm:$0xff] }
0x122a   :  { %v11427_v3 = vadd.f32 %v11426_v56, %v11425_v24  ;;  %v11461_v39 = vpop.f32.mrb[71].mxu1  ;;  %14910 = vmatprep.subr.bf16.mxu1 %v23914_v34 }
0x122b   :  { %v11462_v30 = vadd.f32 %v11461_v39, %v11460_v26  ;;  %v9168_v39 = vld [vmem:[%s23861_s19 + $0x8] sm:$0xff] }
0x122d   :  { %v8769_v20 = vadd.f32 %v11462_v30, %v11427_v3  ;;  %14912 = vmatpush3.bf16.msra.mxu1 %v23194_v61  ;;  %v23232_v30 = vpack.c.bf16 %v9173_v9, %v9168_v39  ;;  %v9205_v61 = vld [vmem:[%s23861_s19 + $0x130] sm:$0xff] }
0x122e   :  { %14913 = vmatprep.subr.bf16.mxu1 %v23914_v34 }
0x122f   :  { %14920 = vmatprep.subr.bf16.mxu0 %v23232_v30 }
0x1231   :  { %14915 = vmatpush3.bf16.msra.mxu1 %v23204_v60  ;;  %v9197_v60 = vld [vmem:[%s23861_s19 + $0xf0] sm:$0xff] }
0x1232   :  { %14916 = vmatprep.subr.bf16.mxu1 %v23914_v34 }
0x1235   :  { %14918 = vmatpush3.bf16.msra.mxu1 %v23214_v32  ;;  %v9203_v32 = vld [vmem:[%s23861_s19 + $0x120] sm:$0xff] }
0x1248   :  { %v8838_v35 = vpop.f32.mrb[64].mxu0 }
0x1249   :  { %v23218_v52 = vadd.f32 %v8838_v35, %v8769_v20  ;;  %v12205_v38 = vpop.f32.mrb[65].mxu0  ;;  %v9172_v20 = vld [vmem:[%s23861_s19 + $0x28] sm:$0xff] }
0x124a   :  { %v23243_v35 = vpack.c.bf16 %v9172_v20, %v9167_v47  ;;  %v23245_v38 = vpack.c.bf16 %v9175_v6, %v9170_v58  ;;  %v9180_v47 = vld [vmem:[%s23861_s19 + $0x68] sm:$0xff]  ;;  %v9185_v20 = vld [vmem:[%s23861_s19 + $0x90] sm:$0xff]  ;;  %v9179_v58 = vld [vmem:[%s23861_s19 + $0x60] sm:$0xff] }
0x124b   :  { %v8870_v55 = vsel %vm1768_vm2, %v23218_v52, 0.0  ;;  %v23284_v6 = vpack.c.bf16 %v9185_v20, %v9180_v47  ;;  %v9192_v47 = vld [vmem:[%s23861_s19 + $0xc8] sm:$0xff]  ;;  %v9190_v20 = vld [vmem:[%s23861_s19 + $0xb8] sm:$0xff] }
0x124c   :  { %v8871_v0 = vrot.slane %v8870_v55, 4  ;;  %23919 = vst [vmem:[#allocation9_spill] sm:$0xff] %v23245_v38  ;;  %14922 = vmatpush1.bf16.msra.mxu0 %v23243_v35  ;;  %14936 = vmatprep.subr.bf16.mxu1 %v23245_v38 }
0x124d   :  { %23921 = vst [vmem:[#allocation11_spill] sm:$0xff] %v23284_v6 }
0x124e   :  { %v8872_v13 = vadd.f32 %v8871_v0, %v8870_v55  ;;  %v9169_v55 = vld [vmem:[%s23861_s19 + $0x10] sm:$0xff]  ;;  %v9174_v0 = vld [vmem:[%s23861_s19 + $0x38] sm:$0xff] }
0x1250   :  { %v8873_v24 = vrot.slane %v8872_v13, 2 }
0x1252   :  { %v8874_v26 = vadd.f32 %v8873_v24, %v8872_v13  ;;  %v9178_v13 = vld [vmem:[%s23861_s19 + $0x58] sm:$0xff]  ;;  %v23257_v24 = vpack.c.bf16 %v9174_v0, %v9169_v55  ;;  %v9184_v55 = vld [vmem:[%s23861_s19 + $0x88] sm:$0xff] }
0x1253   :  { %v9188_v0 = vld [vmem:[%s23861_s19 + $0xa8] sm:$0xff] }
0x1254   :  { %v8875_v56 = vrot.slane %v8874_v26, 1  ;;  %23920 = vst [vmem:[#allocation10_spill] sm:$0xff] %v23257_v24 }
0x1256   :  { %v8876_v3 = vadd.f32 %v8875_v56, %v8874_v26  ;;  %v9183_v26 = vld [vmem:[%s23861_s19 + $0x80] sm:$0xff]  ;;  %v9177_v56 = vld [vmem:[%s23861_s19 + $0x50] sm:$0xff] }
0x1257   :  { %v23270_v39 = vpack.c.bf16 %v9183_v26, %v9178_v13  ;;  %v9193_v13 = vld [vmem:[%s23861_s19 + $0xd0] sm:$0xff]  ;;  %v23296_v26 = vpack.c.bf16 %v9184_v55, %v9179_v58  ;;  %v9195_v58 = vld [vmem:[%s23861_s19 + $0xe0] sm:$0xff] }
0x1258   :  { %12239 = vmatmul.mubr.f32.vlgmr.msra.gmra.mrb[74].mxu1 %v8876_v3  ;;  %v9182_v3 = vld [vmem:[%s23861_s19 + $0x78] sm:$0xff]  ;;  %v9189_v55 = vld [vmem:[%s23861_s19 + $0xb0] sm:$0xff] }
0x1259   :  { %9345 = vmatprep.mubr.f32.mxu1 %v23913_v19  ;;  %v23272_v9 = vpack.c.bf16 %v9182_v3, %v9177_v56  ;;  %14938 = vmatpush1.bf16.msra.mxu1 %v23257_v24  ;;  %23922 = vst [vmem:[#allocation12_spill] sm:$0xff] %v23296_v26  ;;  %v23298_v56 = vpack.c.bf16 %v9193_v13, %v9188_v0  ;;  %v9187_v3 = vld [vmem:[%s23861_s19 + $0xa0] sm:$0xff]  ;;  %v9194_v0 = vld [vmem:[%s23861_s19 + $0xd8] sm:$0xff] }
0x125a   :  { %14924 = vmatprep.subr.bf16.mxu0 %v23270_v39  ;;  %14940 = vmatprep.subr.bf16.mxu1 %v23284_v6  ;;  %v23320_v13 = vpack.c.bf16 %v9192_v47, %v9187_v3  ;;  %v23322_v24 = vpack.c.bf16 %v9195_v58, %v9190_v20  ;;  %v9198_v6 = vld [vmem:[%s23861_s19 + $0xf8] sm:$0xff]  ;;  %v23335_v3 = vpack.c.bf16 %v9194_v0, %v9189_v55  ;;  %v9200_v58 = vld [vmem:[%s23861_s19 + $0x108] sm:$0xff] }
0x125b   :  { %14926 = vmatpush1.bf16.msra.mxu0 %v23272_v9  ;;  %v23337_v47 = vpack.c.bf16 %v9203_v32, %v9198_v6  ;;  %v9202_v20 = vld [vmem:[%s23861_s19 + $0x118] sm:$0xff]  ;;  %v9199_v6 = vld [vmem:[%s23861_s19 + $0x100] sm:$0xff] }
0x125c   :  { %23923 = vst [vmem:[#allocation13_spill] sm:$0xff] %v23322_v24  ;;  %14928 = vmatprep.subr.bf16.mxu0 %v23298_v56  ;;  %23924 = vst [vmem:[#allocation14_spill] sm:$0xff] %v23335_v3  ;;  %v23352_v32 = vpack.c.bf16 %v9202_v20, %v9197_v60 }
0x125d   :  { %14942 = vmatpush1.bf16.msra.mxu1 %v23296_v26  ;;  %v23349_v26 = vpack.c.bf16 %v9205_v61, %v9200_v58  ;;  %v9204_v61 = vld [vmem:[%s23861_s19 + $0x128] sm:$0xff] }
0x125e   :  { %14944 = vmatprep.subr.bf16.mxu1 %v23322_v24  ;;  %23926 = vst [vmem:[#allocation16_spill] sm:$0xff] %v23352_v32  ;;  %v23365_v60 = vpack.c.bf16 %v9204_v61, %v9199_v6  ;;  %v9176_v6 = vld [vmem:[%s23861_s19 + $0x48] sm:$0xff] }
0x125f   :  { %23925 = vst [vmem:[#allocation15_spill] sm:$0xff] %v23349_v26  ;;  %14930 = vmatpush1.bf16.msra.mxu0 %v23320_v13  ;;  %v23375_v38 = vpack.c.bf16 %v9176_v6, %v9171_v41  ;;  %v9191_v41 = vld [vmem:[%s23861_s19 + $0xc0] sm:$0xff] }
0x1260   :  { %14932 = vmatprep.subr.bf16.mxu0 %v23337_v47  ;;  %23927 = vst [vmem:[#allocation17_spill] sm:$0xff] %v23365_v60 }
0x1261   :  { %14946 = vmatpush1.bf16.msra.mxu1 %v23335_v3 }
0x1262   :  { %14948 = vmatprep.subr.bf16.mxu1 %v23349_v26 }
0x1263   :  { %14934 = vmatpush1.bf16.msra.mxu0 %v23352_v32  ;;  %v9181_v32 = vld [vmem:[%s23861_s19 + $0x70] sm:$0xff] }
0x1264   :  { %14951 = vmatprep.subr.bf16.mxu0 %v23914_v34 }
0x1265   :  { %14950 = vmatpush1.bf16.msra.mxu1 %v23365_v60 }
0x1266   :  { %14964 = vmatprep.subr.bf16.mxu1 %v22782_v8 }
0x12eb   :  { %v11512_v55 = vpop.f32.mrb[72].mxu1  ;;  %v11547_v0 = vpop.f32.mrb[66].mxu0 }
0x12ec   :  { %v11513_v20 = vpop.f32.mrb[73].mxu1  ;;  %v11548_v58 = vpop.f32.mrb[67].mxu0 }
0x12ed   :  { %v11514_v26 = vadd.f32 %v11513_v20, %v11512_v55  ;;  %v11549_v3 = vadd.f32 %v11548_v58, %v11547_v0  ;;  %v9201_v55 = vld [vmem:[%s23861_s19 + $0x110] sm:$0xff]  ;;  %v9206_v0 = vld [vmem:[%s23861_s19 + $0x138] sm:$0xff] }
0x12ef   :  { %v9094_v24 = vadd.f32 %v11549_v3, %v11514_v26  ;;  %v9186_v26 = vld [vmem:[%s23861_s19 + $0x98] sm:$0xff] }
0x12f0   :  { %v23386_v3 = vpack.c.bf16 %v9186_v26, %v9181_v32 }
0x132b   :  { %v9163_v61 = vpop.f32.mrb[74].mxu1 }
0x132c   :  { %v9164_v60 = vadd.f32 %v9163_v61, %v9094_v24  ;;  %v12240_v8 = vpop.f32.mrb[75].mxu1  ;;  %v9196_v24 = vld [vmem:[%s23861_s19 + $0xe8] sm:$0xff] }
0x132d   :  { %v23400_v32 = vpack.c.bf16 %v9196_v24, %v9191_v41 }
0x132e   :  { %10527 = vmatmul.mubr.msk.f32.vlgmr.msra.gmra.mrb[68].mxu0 %vm295_vm0, %v9164_v60  ;;  %10528 = vmatmul.mubr.msk.f32.vlgmr.msra.gmra.mrb[76].mxu1 %vm295_vm0, %v9164_v60 }
0x132f   :  { %14953 = vmatpush3.bf16.msra.mxu0 %v23375_v38  ;;  %12257 = vmatprep.mubr.msk.f32.mxu0 %vm15304_vm1, %v23913_v19 }
0x1330   :  { %14954 = vmatprep.subr.bf16.mxu0 %v23914_v34  ;;  %14966 = vmatpush3.bf16.msra.mxu1 %v22804_v23  ;;  %v23412_v23 = vpack.c.bf16 %v9206_v0, %v9201_v55 }
0x1331   :  { %14968 = vmatprep.subr.bf16.mxu1 %v22807_v16 }
0x1333   :  { %14956 = vmatpush3.bf16.msra.mxu0 %v23386_v3 }
0x1334   :  { %14957 = vmatprep.subr.bf16.mxu0 %v23914_v34  ;;  %14970 = vmatpush3.bf16.msra.mxu1 %v22832_v33 }
0x1335   :  { %14972 = vmatprep.subr.bf16.mxu1 %v22835_v27 }
0x1337   :  { %14959 = vmatpush3.bf16.msra.mxu0 %v23400_v32 }
0x1338   :  { %14960 = vmatprep.subr.bf16.mxu0 %v23914_v34  ;;  %14974 = vmatpush3.bf16.msra.mxu1 %v22857_v62 }
0x1339   :  { %14976 = vmatprep.subr.bf16.mxu1 %v22860_v45 }
0x133b   :  { %14962 = vmatpush3.bf16.msra.mxu0 %v23412_v23 }
0x133c   :  { %14996 = vmatprep.subr.bf16.mxu0 %v22908_v21  ;;  %14978 = vmatpush3.bf16.msra.mxu1 %v22876_v4 }
0x133d   :  { %14980 = vmatprep.subr.bf16.mxu1 %v22984_v2 }
0x133e   :  { %12258 = vmatmul.mubr.msk.f32.vlgmr.msra.gmra.mrb[70].mxu0 %vm295_vm0, %v9164_v60 }
0x133f   :  { %14998 = vmatpush3.bf16.msra.mxu0 %v22922_v63 }
0x1340   :  { %15000 = vmatprep.subr.bf16.mxu0 %v22925_v22  ;;  %14982 = vmatpush3.bf16.msra.mxu1 %v22997_v53 }
0x1341   :  { %14984 = vmatprep.subr.bf16.mxu1 %v23020_v11 }
0x1343   :  { %15002 = vmatpush3.bf16.msra.mxu0 %v22941_v29 }
0x1344   :  { %15004 = vmatprep.subr.bf16.mxu0 %v22944_v59  ;;  %14986 = vmatpush3.bf16.msra.mxu1 %v23033_v7 }
0x1345   :  { %14988 = vmatprep.subr.bf16.mxu1 %v23056_v50 }
0x1347   :  { %15006 = vmatpush3.bf16.msra.mxu0 %v22959_v36 }
0x1348   :  { %15008 = vmatprep.subr.bf16.mxu0 %v22962_v5  ;;  %14990 = vmatpush3.bf16.msra.mxu1 %v23069_v15 }
0x1349   :  { %14992 = vmatprep.subr.bf16.mxu1 %v23092_v28 }
0x134b   :  { %15010 = vmatpush3.bf16.msra.mxu0 %v22971_v43 }
0x134c   :  { %15012 = vmatprep.subr.bf16.mxu0 %v22995_v42  ;;  %14994 = vmatpush3.bf16.msra.mxu1 %v23105_v37 }
0x134d   :  { %15027 = vmatprep.subr.bf16.mxu1 %v23914_v34 }
0x134f   :  { %15014 = vmatpush3.bf16.msra.mxu0 %v23006_v12 }
0x1350   :  { %15016 = vmatprep.subr.bf16.mxu0 %v23031_v18 }
0x1353   :  { %15018 = vmatpush3.bf16.msra.mxu0 %v23042_v14 }
0x1354   :  { %15020 = vmatprep.subr.bf16.mxu0 %v23067_v49 }
0x1357   :  { %15022 = vmatpush3.bf16.msra.mxu0 %v23078_v54 }
0x1358   :  { %15024 = vmatprep.subr.bf16.mxu0 %v23103_v48 }
0x135b   :  { %15026 = vmatpush3.bf16.msra.mxu0 %v23114_v51 }
0x135c   :  { %15052 = vmatprep.subr.bf16.mxu0 %v23232_v30 }
0x1401   :  { %v9276_v16 = vpop.f32.mrb[68].mxu0  ;;  %v9347_v33 = vpop.f32.mrb[76].mxu1 }
0x1402   :  { %v9425_v27 = vrot.slane %v9276_v16, %v17777_v17  ;;  %v9433_v62 = vrot.slane %v9347_v33, %v17777_v17  ;;  %v9278_v45 = vpop.f32.mrb[69].mxu0  ;;  %v9349_v4 = vpop.f32.mrb[77].mxu1 }
0x1403   :  { %v9429_v21 = vrot.slane %v9278_v45, %v17777_v17  ;;  %v9437_v63 = vrot.slane %v9349_v4, %v17777_v17  ;;  %v23928_v45 = vld [vmem:[#allocation16_spill] sm:$0xff]  ;;  %v23929_v4 = vld [vmem:[#allocation9_spill] sm:$0xff] }
0x1404   :  { %v23451_v22 = vsub.f32 %v23120_v10, %v9425_v27  ;;  %v23454_v29 = vsub.f32 %v23122_v44, %v9433_v62 }
0x1405   :  { %v23457_v59 = vsub.f32 %v23128_v40, %v9429_v21  ;;  %v23460_v36 = vsub.f32 %v23130_v46, %v9437_v63  ;;  %v23930_v21 = vld [vmem:[#allocation5_spill] sm:$0xff] }
0x1406   :  { %v9447_v5 = vmul.f32 %v23451_v22, %v23451_v22  ;;  %v9449_v43 = vmul.f32 %v23454_v29, %v23454_v29 }
0x1407   :  { %v9448_v2 = vmul.f32 %v23457_v59, %v23457_v59  ;;  %v9450_v42 = vmul.f32 %v23460_v36, %v23460_v36 }
0x1408   :  { %v9452_v53 = vsel %vm1768_vm2, %v9447_v5, 0.0  ;;  %v9466_v12 = vsel %vm1768_vm2, %v9449_v43, 0.0  ;;  %v23932_v43 = vld [vmem:[#allocation7_spill] sm:$0xff] }
0x1409   :  { %v9453_v11 = vrot.slane %v9452_v53, 4  ;;  %v9467_v18 = vrot.slane %v9466_v12, 4  ;;  %v9459_v7 = vsel %vm1768_vm2, %v9448_v2, 0.0  ;;  %v9473_v14 = vsel %vm1768_vm2, %v9450_v42, 0.0  ;;  %v23933_v2 = vld [vmem:[#allocation8_spill] sm:$0xff] }
0x140a   :  { %v9460_v50 = vrot.slane %v9459_v7, 4  ;;  %v9474_v49 = vrot.slane %v9473_v14, 4 }
0x140b   :  { %v9454_v15 = vadd.f32 %v9453_v11, %v9452_v53  ;;  %v9468_v54 = vadd.f32 %v9467_v18, %v9466_v12 }
0x140c   :  { %v9461_v28 = vadd.f32 %v9460_v50, %v9459_v7  ;;  %v9475_v48 = vadd.f32 %v9474_v49, %v9473_v14 }
0x140d   :  { %v9455_v37 = vrot.slane %v9454_v15, 2  ;;  %v9469_v51 = vrot.slane %v9468_v54, 2 }
0x140e   :  { %v9462_v10 = vrot.slane %v9461_v28, 2  ;;  %v9476_v44 = vrot.slane %v9475_v48, 2 }
0x140f   :  { %v9456_v40 = vadd.f32 %v9455_v37, %v9454_v15  ;;  %v9470_v46 = vadd.f32 %v9469_v51, %v9468_v54 }
0x1410   :  { %v9463_v60 = vadd.f32 %v9462_v10, %v9461_v28  ;;  %v9477_v20 = vadd.f32 %v9476_v44, %v9475_v48  ;;  %v9487_v48 = vld [vmem:[%s23862_s20] sm:$0x1]  ;;  %v23934_v10 = vld [vmem:[#allocation10_spill] sm:$0xff]  ;;  %v23935_v44 = vld [vmem:[#allocation11_spill] sm:$0xff] }
0x1411   :  { %v9418_v58 = vpop.f32.mrb[70].mxu0  ;;  %v9457_v6 = vrot.slane %v9456_v40, 1  ;;  %v9471_v61 = vrot.slane %v9470_v46, 1 }
0x1412   :  { %v9441_v8 = vrot.slane %v9418_v58, %v17777_v17  ;;  %v12259_v26 = vpop.f32.mrb[71].mxu0  ;;  %v9464_v41 = vrot.slane %v9463_v60, 1  ;;  %v9478_v24 = vrot.slane %v9477_v20, 1  ;;  %v23940_v58 = vld [vmem:[#allocation17_spill] sm:$0xff] }
0x1413   :  { %v9458_v16 = vadd.f32 %v9457_v6, %v9456_v40  ;;  %v9472_v33 = vadd.f32 %v9471_v61, %v9470_v46  ;;  %v23936_v40 = vld [vmem:[#allocation12_spill] sm:$0xff]  ;;  %v23937_v46 = vld [vmem:[#allocation13_spill] sm:$0xff] }
0x1414   :  { %v9465_v55 = vadd.f32 %v9464_v41, %v9463_v60  ;;  %v9479_v0 = vadd.f32 %v9478_v24, %v9477_v20  ;;  %v23476_v27 = vsub.f32 %v23218_v52, %v9441_v8  ;;  %v23938_v60 = vld [vmem:[#allocation14_spill] sm:$0xff]  ;;  %v23939_v20 = vld [vmem:[#allocation15_spill] sm:$0xff]  ;;  %v9915_v6 = vld [vmem:[%s23863_s21] sm:$0x1] }
0x1415   :  { %v10243_v8 = vld [vmem:[%s23864_s22 + $0x1a0] sm:$0xff]  ;;  %v10244_v26 = vld [vmem:[%s23864_s22 + $0x1a8] sm:$0xff] }
0x1416   :  { %9552 = vmatprep.mubr.f32.mxu1 %v9465_v55  ;;  %9622 = vmatprep.mubr.f32.mxu0 %v9479_v0  ;;  %v9451_v62 = vmul.f32 %v23476_v27, %v23476_v27  ;;  %v15179_v41 = vpack.c.bf16 %v10244_v26, %v10243_v8  ;;  %v10227_v24 = vld [vmem:[%s23864_s22 + $0x120] sm:$0xff]  ;;  %v10228_v55 = vld [vmem:[%s23864_s22 + $0x128] sm:$0xff] }
0x1417   :  { %9553 = vmatmul.mubr.f32.vlgmr.msra.gmra.mrb[78].mxu1 %v9458_v16  ;;  %9623 = vmatmul.mubr.f32.vlgmr.msra.gmra.mrb[72].mxu0 %v9472_v33  ;;  %v15181_v0 = vpack.c.bf16 %v10228_v55, %v10227_v24  ;;  %v10245_v16 = vld [vmem:[%s23864_s22 + $0x1b0] sm:$0xff]  ;;  %v10246_v33 = vld [vmem:[%s23864_s22 + $0x1b8] sm:$0xff]  ;;  %v10215_v26 = vld [vmem:[%s23864_s22 + $0xc0] sm:$0xff] }
0x1418   :  { %15029 = vmatpush3.bf16.msra.mxu1 %v23142_v1  ;;  %12292 = vmatprep.mubr.msk.f32.mxu1 %vm15304_vm1, %v23913_v19  ;;  %v9480_v1 = vsel %vm1768_vm2, %v9451_v62, 0.0  ;;  %v10207_v62 = vld [vmem:[%s23864_s22 + $0x80] sm:$0xff]  ;;  %v10237_v24 = vld [vmem:[%s23864_s22 + $0x170] sm:$0xff] }
0x1419   :  { %15030 = vmatprep.subr.bf16.mxu1 %v23914_v34  ;;  %15054 = vmatpush1.bf16.msra.mxu0 %v23243_v35  ;;  %v9481_v52 = vrot.slane %v9480_v1, 4 }
0x141a   :  { %15056 = vmatprep.subr.bf16.mxu0 %v23270_v39  ;;  %9767 = vmatprep.mubr.f32.mxu0 %v23913_v19 }
0x141c   :  { %15032 = vmatpush3.bf16.msra.mxu1 %v23151_v57  ;;  %v9482_v57 = vadd.f32 %v9481_v52, %v9480_v1  ;;  %v15183_v1 = vpack.c.bf16 %v10246_v33, %v10245_v16  ;;  %v10208_v52 = vld [vmem:[%s23864_s22 + $0x88] sm:$0xff]  ;;  %v10199_v16 = vld [vmem:[%s23864_s22 + $0x40] sm:$0xff] }
0x141d   :  { %15033 = vmatprep.subr.bf16.mxu1 %v23914_v34  ;;  %15058 = vmatpush1.bf16.msra.mxu0 %v23272_v9  ;;  %v10200_v33 = vld [vmem:[%s23864_s22 + $0x48] sm:$0xff] }
0x141e   :  { %15060 = vmatprep.subr.bf16.mxu0 %v23298_v56  ;;  %v9483_v63 = vrot.slane %v9482_v57, 2 }
0x1420   :  { %15035 = vmatpush3.bf16.msra.mxu1 %v23164_v31  ;;  %v23931_v31 = vld [vmem:[#allocation6_spill] sm:$0xff]  ;;  %v9484_v5 = vadd.f32 %v9483_v63, %v9482_v57  ;;  %v10191_v63 = vld [vmem:[%s23864_s22] sm:$0xff] }
0x1421   :  { %15036 = vmatprep.subr.bf16.mxu1 %v23914_v34  ;;  %15062 = vmatpush1.bf16.msra.mxu0 %v23320_v13  ;;  %v10229_v57 = vld [vmem:[%s23864_s22 + $0x130] sm:$0xff] }
0x1422   :  { %15064 = vmatprep.subr.bf16.mxu0 %v23337_v47 }
0x1424   :  { %15038 = vmatpush3.bf16.msra.mxu1 %v23174_v25  ;;  %v9485_v25 = vrot.slane %v9484_v5, 1 }
0x1425   :  { %15039 = vmatprep.subr.bf16.mxu1 %v23914_v34  ;;  %15066 = vmatpush1.bf16.msra.mxu0 %v23928_v45 }
0x1426   :  { %15068 = vmatprep.subr.bf16.mxu0 %v23929_v4  ;;  %v9486_v42 = vadd.f32 %v9485_v25, %v9484_v5  ;;  %v10247_v5 = vld [vmem:[%s23864_s22 + $0x1c0] sm:$0xff]  ;;  %v10248_v25 = vld [vmem:[%s23864_s22 + $0x1c8] sm:$0xff] }
0x1428   :  { %15041 = vmatpush3.bf16.msra.mxu1 %v23930_v21 }
0x1429   :  { %15042 = vmatprep.subr.bf16.mxu1 %v23914_v34 }
0x142c   :  { %15044 = vmatpush3.bf16.msra.mxu1 %v23931_v31  ;;  %v10192_v31 = vld [vmem:[%s23864_s22 + $0x8] sm:$0xff] }
0x142d   :  { %15045 = vmatprep.subr.bf16.mxu1 %v23914_v34 }
0x1430   :  { %15047 = vmatpush3.bf16.msra.mxu1 %v23932_v43  ;;  %v15141_v43 = vpack.c.bf16 %v10192_v31, %v10191_v63  ;;  %v10219_v31 = vld [vmem:[%s23864_s22 + $0xe0] sm:$0xff] }
0x1431   :  { %15048 = vmatprep.subr.bf16.mxu1 %v23914_v34 }
0x1434   :  { %15050 = vmatpush3.bf16.msra.mxu1 %v23933_v2  ;;  %v10209_v2 = vld [vmem:[%s23864_s22 + $0x90] sm:$0xff] }
0x1435   :  { %15083 = vmatprep.subr.bf16.mxu1 %v23914_v34 }
0x1437   :  { %12293 = vmatmul.mubr.f32.vlgmr.msra.gmra.mrb[80].mxu1 %v9486_v42  ;;  %v10210_v42 = vld [vmem:[%s23864_s22 + $0x98] sm:$0xff] }
0x1438   :  { %15085 = vmatpush3.bf16.msra.mxu1 %v23375_v38  ;;  %12311 = vmatprep.mubr.msk.f32.mxu1 %vm15304_vm1, %v23913_v19 }
0x1439   :  { %15086 = vmatprep.subr.bf16.mxu1 %v23914_v34 }
0x143c   :  { %15088 = vmatpush3.bf16.msra.mxu1 %v23386_v3 }
0x143d   :  { %15089 = vmatprep.subr.bf16.mxu1 %v23914_v34 }
0x1440   :  { %15091 = vmatpush3.bf16.msra.mxu1 %v23400_v32 }
0x1441   :  { %15092 = vmatprep.subr.bf16.mxu1 %v23914_v34 }
0x1444   :  { %15094 = vmatpush3.bf16.msra.mxu1 %v23412_v23 }
0x1445   :  { %15112 = vmatprep.subr.bf16.mxu1 %v23929_v4  ;;  %v15139_v4 = vpack.c.bf16 %v10208_v52, %v10207_v62  ;;  %v10217_v52 = vld [vmem:[%s23864_s22 + $0xd0] sm:$0xff] }
0x14ea   :  { %v11608_v53 = vpop.f32.mrb[78].mxu1  ;;  %v11643_v12 = vpop.f32.mrb[72].mxu0 }
0x14eb   :  { %v11609_v11 = vpop.f32.mrb[79].mxu1  ;;  %v11644_v18 = vpop.f32.mrb[73].mxu0 }
0x14ec   :  { %v11610_v7 = vadd.f32 %v11609_v11, %v11608_v53  ;;  %v11645_v14 = vadd.f32 %v11644_v18, %v11643_v12  ;;  %v15187_v53 = vpack.c.bf16 %v10248_v25, %v10247_v5  ;;  %v15143_v12 = vpack.c.bf16 %v10210_v42, %v10209_v2  ;;  %v10231_v11 = vld [vmem:[%s23864_s22 + $0x140] sm:$0xff]  ;;  %v10232_v18 = vld [vmem:[%s23864_s22 + $0x148] sm:$0xff] }
0x14ed   :  { %v10220_v5 = vld [vmem:[%s23864_s22 + $0xe8] sm:$0xff]  ;;  %v10203_v25 = vld [vmem:[%s23864_s22 + $0x60] sm:$0xff] }
0x14ee   :  { %v9555_v50 = vadd.f32 1e-05, %v11610_v7  ;;  %v10193_v7 = vld [vmem:[%s23864_s22 + $0x10] sm:$0xff]  ;;  %v10204_v2 = vld [vmem:[%s23864_s22 + $0x68] sm:$0xff] }
0x14ef   :  { %v15165_v42 = vpack.c.bf16 %v10204_v2, %v10203_v25  ;;  %v10265_v2 = vld [vmem:[%s23864_s22 + $0x250] sm:$0xff] }
0x14f0   :  { %v9625_v49 = vadd.f32 %v11645_v14, %v9555_v50  ;;  %v10194_v14 = vld [vmem:[%s23864_s22 + $0x18] sm:$0xff]  ;;  %v15189_v50 = vpack.c.bf16 %v10232_v18, %v10231_v11  ;;  %v10205_v18 = vld [vmem:[%s23864_s22 + $0x70] sm:$0xff] }
0x150a   :  { %v9694_v15 = vpop.f32.mrb[80].mxu1 }
0x150b   :  { %v9695_v54 = vadd.f32 %v9694_v15, %v9625_v49  ;;  %v12294_v28 = vpop.f32.mrb[81].mxu1  ;;  %v15145_v49 = vpack.c.bf16 %v10194_v14, %v10193_v7  ;;  %v10249_v15 = vld [vmem:[%s23864_s22 + $0x1d0] sm:$0xff]  ;;  %v10206_v7 = vld [vmem:[%s23864_s22 + $0x78] sm:$0xff] }
0x150c   :  { %v15169_v14 = vpack.c.bf16 %v10206_v7, %v10205_v18  ;;  %v10269_v7 = vld [vmem:[%s23864_s22 + $0x270] sm:$0xff] }
0x150d   :  { %15275 = vrsqrt.f32 %v9695_v54  ;;  %v10250_v54 = vld [vmem:[%s23864_s22 + $0x1d8] sm:$0xff] }
0x150e   :  { %v15191_v28 = vpack.c.bf16 %v10250_v54, %v10249_v15 }
0x1517   :  { %v15276_v37 = vpop.eup %15275 }
0x1518   :  { %v9699_v51 = vmul.f32 %v15276_v37, %v9487_v48  ;;  %v10211_v48 = vld [vmem:[%s23864_s22 + $0xa0] sm:$0xff]  ;;  %v10212_v37 = vld [vmem:[%s23864_s22 + $0xa8] sm:$0xff] }
0x151a   :  { %10530 = vmatmul.mubr.msk.f32.vlgmr.msra.gmra.mrb[74].mxu0 %vm295_vm0, %v9699_v51  ;;  %12312 = vmatmul.mubr.msk.f32.vlgmr.msra.gmra.mrb[82].mxu1 %vm295_vm0, %v9699_v51 }
0x151b   :  { %15070 = vmatpush1.bf16.msra.mxu0 %v23934_v10  ;;  %15114 = vmatpush1.bf16.msra.mxu1 %v23934_v10  ;;  %v15147_v10 = vpack.c.bf16 %v10212_v37, %v10211_v48 }
0x151c   :  { %15072 = vmatprep.subr.bf16.mxu0 %v23935_v44  ;;  %15116 = vmatprep.subr.bf16.mxu1 %v23935_v44  ;;  %v10234_v44 = vld [vmem:[%s23864_s22 + $0x158] sm:$0xff] }
0x151d   :  { %9838 = vmatprep.mubr.f32.mxu0 %v23913_v19  ;;  %10054 = vmatprep.mubr.f32.mxu1 %v23913_v19 }
0x151f   :  { %15074 = vmatpush1.bf16.msra.mxu0 %v23936_v40  ;;  %15118 = vmatpush1.bf16.msra.mxu1 %v23936_v40  ;;  %v10195_v40 = vld [vmem:[%s23864_s22 + $0x20] sm:$0xff] }
0x1520   :  { %15076 = vmatprep.subr.bf16.mxu0 %v23937_v46  ;;  %15120 = vmatprep.subr.bf16.mxu1 %v23937_v46  ;;  %v10196_v46 = vld [vmem:[%s23864_s22 + $0x28] sm:$0xff] }
0x1523   :  { %15078 = vmatpush1.bf16.msra.mxu0 %v23938_v60  ;;  %15122 = vmatpush1.bf16.msra.mxu1 %v23938_v60 }
0x1524   :  { %15080 = vmatprep.subr.bf16.mxu0 %v23939_v20  ;;  %15124 = vmatprep.subr.bf16.mxu1 %v23939_v20  ;;  %v15149_v20 = vpack.c.bf16 %v10196_v46, %v10195_v40 }
0x1527   :  { %15082 = vmatpush1.bf16.msra.mxu0 %v23940_v58  ;;  %15126 = vmatpush1.bf16.msra.mxu1 %v23940_v58  ;;  %v10251_v58 = vld [vmem:[%s23864_s22 + $0x1e0] sm:$0xff] }
0x1528   :  { %15096 = vmatprep.subr.bf16.mxu0 %v23232_v30  ;;  %v10239_v30 = vld [vmem:[%s23864_s22 + $0x180] sm:$0xff]  ;;  %15140 = vmatprep.subr.bf16.mxu1 %v15139_v4  ;;  %v10201_v4 = vld [vmem:[%s23864_s22 + $0x50] sm:$0xff] }
0x152a   :  { %10531 = vmatmul.mubr.msk.f32.vlgmr.msra.gmra.mrb[76].mxu0 %vm295_vm0, %v9699_v51  ;;  %10534 = vmatmul.mubr.msk.f32.vlgmr.msra.gmra.mrb[84].mxu1 %vm295_vm0, %v9915_v6  ;;  %v10233_v51 = vld [vmem:[%s23864_s22 + $0x150] sm:$0xff] }
0x152b   :  { %15098 = vmatpush1.bf16.msra.mxu0 %v23243_v35  ;;  %9983 = vmatprep.mubr.f32.mxu0 %v23913_v19  ;;  %v10240_v35 = vld [vmem:[%s23864_s22 + $0x188] sm:$0xff]  ;;  %v15193_v60 = vpack.c.bf16 %v10234_v44, %v10233_v51 }
0x152c   :  { %15100 = vmatprep.subr.bf16.mxu0 %v23270_v39  ;;  %v10223_v39 = vld [vmem:[%s23864_s22 + $0x100] sm:$0xff]  ;;  %15142 = vmatpush3.bf16.msra.mxu1 %v15141_v43  ;;  %v15163_v43 = vpack.c.bf16 %v10220_v5, %v10219_v31 }
0x152d   :  { %15144 = vmatprep.subr.bf16.mxu1 %v15143_v12  ;;  %v10222_v12 = vld [vmem:[%s23864_s22 + $0xf8] sm:$0xff] }
0x152f   :  { %15102 = vmatpush1.bf16.msra.mxu0 %v23272_v9  ;;  %v10224_v9 = vld [vmem:[%s23864_s22 + $0x108] sm:$0xff] }
0x1530   :  { %15104 = vmatprep.subr.bf16.mxu0 %v23298_v56  ;;  %v15173_v56 = vpack.c.bf16 %v10224_v9, %v10223_v39  ;;  %15146 = vmatpush3.bf16.msra.mxu1 %v15145_v49  ;;  %v10235_v39 = vld [vmem:[%s23864_s22 + $0x160] sm:$0xff] }
0x1531   :  { %15148 = vmatprep.subr.bf16.mxu1 %v15147_v10 }
0x1533   :  { %15106 = vmatpush1.bf16.msra.mxu0 %v23320_v13  ;;  %v10241_v13 = vld [vmem:[%s23864_s22 + $0x190] sm:$0xff] }
0x1534   :  { %15108 = vmatprep.subr.bf16.mxu0 %v23337_v47  ;;  %v10242_v47 = vld [vmem:[%s23864_s22 + $0x198] sm:$0xff]  ;;  %15150 = vmatpush3.bf16.msra.mxu1 %v15149_v20 }
0x1537   :  { %15110 = vmatpush1.bf16.msra.mxu0 %v23928_v45  ;;  %v10230_v45 = vld [vmem:[%s23864_s22 + $0x138] sm:$0xff] }
0x1538   :  { %15127 = vmatprep.subr.bf16.mxu0 %v23914_v34  ;;  %v15185_v21 = vpack.c.bf16 %v10230_v45, %v10229_v57  ;;  %v10218_v57 = vld [vmem:[%s23864_s22 + $0xd8] sm:$0xff] }
0x1539   :  { %v15159_v45 = vpack.c.bf16 %v10218_v57, %v10217_v52  ;;  %v10260_v52 = vld [vmem:[%s23864_s22 + $0x228] sm:$0xff] }
0x153a   :  { %10533 = vmatmul.mubr.msk.f32.vlgmr.msra.gmra.mrb[78].mxu0 %vm295_vm0, %v9915_v6 }
0x153b   :  { %15129 = vmatpush3.bf16.msra.mxu0 %v23375_v38  ;;  %12330 = vmatprep.mubr.msk.f32.mxu0 %vm15304_vm1, %v23913_v19  ;;  %v15171_v38 = vpack.c.bf16 %v10240_v35, %v10239_v30  ;;  %v10213_v35 = vld [vmem:[%s23864_s22 + $0xb0] sm:$0xff] }
0x153c   :  { %15130 = vmatprep.subr.bf16.mxu0 %v23914_v34 }
0x153f   :  { %15132 = vmatpush3.bf16.msra.mxu0 %v23386_v3  ;;  %v15175_v3 = vpack.c.bf16 %v10242_v47, %v10241_v13  ;;  %v10197_v13 = vld [vmem:[%s23864_s22 + $0x30] sm:$0xff]  ;;  %v10198_v47 = vld [vmem:[%s23864_s22 + $0x38] sm:$0xff] }
0x1540   :  { %15133 = vmatprep.subr.bf16.mxu0 %v23914_v34 }
0x1543   :  { %15135 = vmatpush3.bf16.msra.mxu0 %v23400_v32  ;;  %v10225_v32 = vld [vmem:[%s23864_s22 + $0x110] sm:$0xff] }
0x1544   :  { %15136 = vmatprep.subr.bf16.mxu0 %v23914_v34 }
0x1547   :  { %15138 = vmatpush3.bf16.msra.mxu0 %v23412_v23  ;;  %v10226_v23 = vld [vmem:[%s23864_s22 + $0x118] sm:$0xff] }
0x1548   :  { %15172 = vmatprep.subr.bf16.mxu0 %v15171_v38  ;;  %v15177_v61 = vpack.c.bf16 %v10226_v23, %v10225_v32  ;;  %v10214_v38 = vld [vmem:[%s23864_s22 + $0xb8] sm:$0xff]  ;;  %v15153_v32 = vpack.c.bf16 %v10198_v47, %v10197_v13  ;;  %v10253_v23 = vld [vmem:[%s23864_s22 + $0x1f0] sm:$0xff] }
0x1549   :  { %v15151_v9 = vpack.c.bf16 %v10214_v38, %v10213_v35 }
0x154a   :  { %12331 = vmatmul.mubr.msk.f32.vlgmr.msra.gmra.mrb[80].mxu0 %vm295_vm0, %v9915_v6  ;;  %v10252_v6 = vld [vmem:[%s23864_s22 + $0x1e8] sm:$0xff] }
0x154b   :  { %15174 = vmatpush3.bf16.msra.mxu0 %v15173_v56  ;;  %v15195_v30 = vpack.c.bf16 %v10252_v6, %v10251_v58  ;;  %v10236_v56 = vld [vmem:[%s23864_s22 + $0x168] sm:$0xff]  ;;  %15152 = vmatprep.subr.bf16.mxu1 %v15151_v9 }
0x154c   :  { %15176 = vmatprep.subr.bf16.mxu0 %v15175_v3  ;;  %v15197_v3 = vpack.c.bf16 %v10236_v56, %v10235_v39  ;;  %15154 = vmatpush3.bf16.msra.mxu1 %v15153_v32 }
0x154f   :  { %15178 = vmatpush3.bf16.msra.mxu0 %v15177_v61  ;;  %v10254_v61 = vld [vmem:[%s23864_s22 + $0x1f8] sm:$0xff] }
0x1550   :  { %15180 = vmatprep.subr.bf16.mxu0 %v15179_v41  ;;  %v15199_v8 = vpack.c.bf16 %v10254_v61, %v10253_v23  ;;  %v10216_v41 = vld [vmem:[%s23864_s22 + $0xc8] sm:$0xff] }
0x1551   :  { %v15155_v55 = vpack.c.bf16 %v10216_v41, %v10215_v26  ;;  %v10255_v26 = vld [vmem:[%s23864_s22 + $0x200] sm:$0xff]  ;;  %v10256_v41 = vld [vmem:[%s23864_s22 + $0x208] sm:$0xff] }
0x1553   :  { %15182 = vmatpush3.bf16.msra.mxu0 %v15181_v0  ;;  %v10238_v0 = vld [vmem:[%s23864_s22 + $0x178] sm:$0xff]  ;;  %15156 = vmatprep.subr.bf16.mxu1 %v15155_v55  ;;  %v15204_v55 = vpack.c.bf16 %v10256_v41, %v10255_v26 }
0x1554   :  { %15184 = vmatprep.subr.bf16.mxu0 %v15183_v1  ;;  %v15201_v62 = vpack.c.bf16 %v10238_v0, %v10237_v24  ;;  %v15157_v1 = vpack.c.bf16 %v10200_v33, %v10199_v16  ;;  %v10258_v16 = vld [vmem:[%s23864_s22 + $0x218] sm:$0xff] }
0x1556   :  { %15158 = vmatpush3.bf16.msra.mxu1 %v15157_v1  ;;  %v10259_v1 = vld [vmem:[%s23864_s22 + $0x220] sm:$0xff] }
0x1557   :  { %15186 = vmatpush3.bf16.msra.mxu0 %v15185_v21  ;;  %v10202_v21 = vld [vmem:[%s23864_s22 + $0x58] sm:$0xff]  ;;  %15160 = vmatprep.subr.bf16.mxu1 %v15159_v45  ;;  %v15210_v45 = vpack.c.bf16 %v10260_v52, %v10259_v1 }
0x1558   :  { %15188 = vmatprep.subr.bf16.mxu0 %v15187_v53  ;;  %v15161_v63 = vpack.c.bf16 %v10202_v21, %v10201_v4  ;;  %v10221_v53 = vld [vmem:[%s23864_s22 + $0xf0] sm:$0xff] }
0x1559   :  { %v15167_v11 = vpack.c.bf16 %v10222_v12, %v10221_v53  ;;  %v10267_v12 = vld [vmem:[%s23864_s22 + $0x260] sm:$0xff] }
0x155a   :  { %15162 = vmatpush3.bf16.msra.mxu1 %v15161_v63  ;;  %v10262_v63 = vld [vmem:[%s23864_s22 + $0x238] sm:$0xff] }
0x155b   :  { %15190 = vmatpush3.bf16.msra.mxu0 %v15189_v50  ;;  %15164 = vmatprep.subr.bf16.mxu1 %v15163_v43 }
0x155c   :  { %15192 = vmatprep.subr.bf16.mxu0 %v15191_v28 }
0x155e   :  { %15166 = vmatpush3.bf16.msra.mxu1 %v15165_v42  ;;  %v10266_v42 = vld [vmem:[%s23864_s22 + $0x258] sm:$0xff] }
0x155f   :  { %15194 = vmatpush3.bf16.msra.mxu0 %v15193_v60  ;;  %15168 = vmatprep.subr.bf16.mxu1 %v15167_v11  ;;  %v15219_v53 = vpack.c.bf16 %v10266_v42, %v10265_v2  ;;  %v10268_v11 = vld [vmem:[%s23864_s22 + $0x268] sm:$0xff] }
0x1560   :  { %15196 = vmatprep.subr.bf16.mxu0 %v15195_v30  ;;  %v15222_v18 = vpack.c.bf16 %v10268_v11, %v10267_v12 }
0x1562   :  { %15170 = vmatpush3.bf16.msra.mxu1 %v15169_v14  ;;  %v10270_v14 = vld [vmem:[%s23864_s22 + $0x278] sm:$0xff] }
0x1563   :  { %15198 = vmatpush3.bf16.msra.mxu0 %v15197_v3  ;;  %15203 = vmatprep.subr.bf16.mxu1 %v23914_v34 }
0x1564   :  { %15200 = vmatprep.subr.bf16.mxu0 %v15199_v8 }
0x1567   :  { %15202 = vmatpush3.bf16.msra.mxu0 %v15201_v62 }
0x15ed   :  { %v9769_v50 = vpop.f32.mrb[74].mxu0  ;;  %v9911_v49 = vpop.f32.mrb[82].mxu1 }
0x15ee   :  { %v9771_v15 = vpop.f32.mrb[75].mxu0  ;;  %v12313_v54 = vpop.f32.mrb[83].mxu1  ;;  %v10134_v9 = vrot.slane %v9769_v50, %v17777_v17  ;;  %v10150_v62 = vrot.slane %v9911_v49, %v17777_v17  ;;  %v15225_v50 = vpack.c.bf16 %v10270_v14, %v10269_v7 }
0x15ef   :  { %v10138_v56 = vrot.slane %v9771_v15, %v17777_v17 }
0x15f0   :  { %v10151_v47 = vmul.f32 %v10134_v9, %v23451_v22  ;;  %v10155_v4 = vmul.f32 %v10150_v62, %v23476_v27  ;;  %v10264_v27 = vld [vmem:[%s23864_s22 + $0x248] sm:$0xff] }
0x15fd   :  { %v9840_v28 = vpop.f32.mrb[76].mxu0  ;;  %v10056_v48 = vpop.f32.mrb[84].mxu1 }
0x15fe   :  { %v10142_v37 = vrot.slane %v9840_v28, %v17777_v17  ;;  %v9842_v51 = vpop.f32.mrb[77].mxu0  ;;  %v10167_v10 = vrot.slane %v10056_v48, %v17777_v17  ;;  %v10058_v44 = vpop.f32.mrb[85].mxu1 }
0x15ff   :  { %v10146_v40 = vrot.slane %v9842_v51, %v17777_v17  ;;  %v10171_v46 = vrot.slane %v10058_v44, %v17777_v17 }
0x1600   :  { %v10153_v60 = vmul.f32 %v10142_v37, %v23454_v29 }
0x1601   :  { %v10154_v20 = vmul.f32 %v10146_v40, %v23460_v36  ;;  %v10152_v36 = vmul.f32 %v10138_v56, %v23457_v59  ;;  %v10257_v59 = vld [vmem:[%s23864_s22 + $0x210] sm:$0xff] }
0x1602   :  { %v10178_v58 = vadd.f32 %v10167_v10, %v10153_v60  ;;  %v15207_v33 = vpack.c.bf16 %v10258_v16, %v10257_v59 }
0x1603   :  { %v10179_v6 = vadd.f32 %v10171_v46, %v10154_v20 }
0x1604   :  { %v10183_v30 = vmul.f32 0.2, %v10178_v58 }
0x1605   :  { %v10184_v35 = vmul.f32 0.2, %v10179_v6 }
0x1606   :  { %v10188_v39 = vmax.f32 %v10178_v58, %v10183_v30 }
0x1607   :  { %v10189_v38 = vmax.f32 %v10179_v6, %v10184_v35 }
0x1609   :  { %10405 = vmatprep.mubr.f32.mxu0 %v10189_v38 }
0x160a   :  { %10406 = vmatmul.mubr.f32.vlgmr.msra.gmra.mrb[82].mxu0 %v10188_v39 }
0x160d   :  { %v9985_v13 = vpop.f32.mrb[78].mxu0 }
0x160e   :  { %v10159_v3 = vrot.slane %v9985_v13, %v17777_v17  ;;  %v9987_v29 = vpop.f32.mrb[79].mxu0 }
0x160f   :  { %v10163_v32 = vrot.slane %v9987_v29, %v17777_v17 }
0x1610   :  { %v10176_v23 = vadd.f32 %v10159_v3, %v10151_v47 }
0x1611   :  { %v10177_v61 = vadd.f32 %v10163_v32, %v10152_v36 }
0x1612   :  { %v10181_v8 = vmul.f32 0.2, %v10176_v23 }
0x1613   :  { %v10182_v24 = vmul.f32 0.2, %v10177_v61 }
0x1614   :  { %v10186_v0 = vmax.f32 %v10176_v23, %v10181_v8 }
0x1615   :  { %v10187_v22 = vmax.f32 %v10177_v61, %v10182_v24 }
0x1617   :  { %10335 = vmatprep.mubr.f32.mxu1 %v10187_v22 }
0x1618   :  { %10336 = vmatmul.mubr.f32.vlgmr.msra.gmra.mrb[86].mxu1 %v10186_v0 }
0x1619   :  { %15205 = vmatpush3.bf16.msra.mxu1 %v15204_v55  ;;  %12365 = vmatprep.mubr.msk.f32.mxu1 %vm15304_vm1, %v23913_v19  ;;  %v10261_v19 = vld [vmem:[%s23864_s22 + $0x230] sm:$0xff] }
0x161a   :  { %15206 = vmatprep.subr.bf16.mxu1 %v23914_v34  ;;  %v15213_v43 = vpack.c.bf16 %v10262_v63, %v10261_v19 }
0x161d   :  { %15208 = vmatpush3.bf16.msra.mxu1 %v15207_v33  ;;  %v10127_v57 = vpop.f32.mrb[80].mxu0 }
0x161e   :  { %v10175_v21 = vrot.slane %v10127_v57, %v17777_v17  ;;  %15209 = vmatprep.subr.bf16.mxu1 %v23914_v34  ;;  %v12332_v31 = vpop.f32.mrb[81].mxu0  ;;  %v10263_v17 = vld [vmem:[%s23864_s22 + $0x240] sm:$0xff]  ;;  %s15277_s22 = scalar_lea.vmem %s10490_s11, 32 }
0x161f   :  { %v15216_v25 = vpack.c.bf16 %v10264_v27, %v10263_v17  ;;  %p15278_p0 = scmp.ne.s32.totalorder %s10490_s11, %s15277_s22  ;;  %p15283_p2 = scmp.lt.s32.totalorder %s15277_s22, %s15277_s22 }
0x1620   :  { %v10180_v5 = vadd.f32 %v10175_v21, %v10155_v4 }
0x1621   :  { %15211 = vmatpush3.bf16.msra.mxu1 %v15210_v45  ;;  %p15284_p3 = por %p15283_p2, %p15282_p1 }
0x1622   :  { %15212 = vmatprep.subr.bf16.mxu1 %v23914_v34  ;;  %v10185_v49 = vmul.f32 0.2, %v10180_v5 }
0x1623   :  { %p15285_p4 = pnand %p15284_p3, %p15278_p0 }
0x1624   :  { %v10190_v15 = vmax.f32 %v10180_v5, %v10185_v49 }
0x1625   :  { %15214 = vmatpush3.bf16.msra.mxu1 %v15213_v43 }
0x1626   :  { %15215 = vmatprep.subr.bf16.mxu1 %v23914_v34 }
0x1629   :  { %15217 = vmatpush3.bf16.msra.mxu1 %v15216_v25 }
0x162a   :  { %15218 = vmatprep.subr.bf16.mxu1 %v23914_v34 }
0x162d   :  { %15220 = vmatpush3.bf16.msra.mxu1 %v15219_v53 }
0x162e   :  { %15221 = vmatprep.subr.bf16.mxu1 %v23914_v34 }
0x1631   :  { %15223 = vmatpush3.bf16.msra.mxu1 %v15222_v18 }
0x1632   :  { %15224 = vmatprep.subr.bf16.mxu1 %v23914_v34 }
0x1635   :  { %15226 = vmatpush3.bf16.msra.mxu1 %v15225_v50 }
0x1638   :  { %12366 = vmatmul.mubr.f32.vlgmr.msra.gmra.mrb[88].mxu1 %v10190_v15 }
0x16dd   :  { %v11748_v54 = vpop.f32.mrb[82].mxu0 }
0x16de   :  { %v11749_v28 = vpop.f32.mrb[83].mxu0 }
0x16df   :  { %v11750_v48 = vadd.f32 %v11749_v28, %v11748_v54 }
0x16eb   :  { %v11713_v37 = vpop.f32.mrb[86].mxu1 }
0x16ec   :  { %v11714_v51 = vpop.f32.mrb[87].mxu1 }
0x16ed   :  { %v11715_v10 = vadd.f32 %v11714_v51, %v11713_v37 }
0x16ef   :  { %v10408_v44 = vadd.f32 %v11750_v48, %v11715_v10 }
0x170b   :  { %v10477_v40 = vpop.f32.mrb[88].mxu1 }
0x170c   :  { %v10478_v46 = vadd.f32 %v10477_v40, %v10408_v44  ;;  %v12367_v60 = vpop.f32.mrb[89].mxu1 }
0x170e   :  { %10482 = vst.msk [vmem:[#allocation2] sm:$0x3] %vm10481_vm6, %v10478_v46 }
0x170f   :  { %15288 = shalt.err (!%p15285_p4)
}
0x1710   :  { %s15289_s27 = scalar_lea.hbm %s23865_s23, 32 }
0x1711   :  { %p15290_p5 = scmp.ne.s32.totalorder %s23865_s23, %s15289_s27  ;;  %p15293_p6 = scmp.lt.u32.totalorder %s15289_s27, %s23865_s23 }
0x1713   :  { %p15295_p7 = pnand %p15293_p6, %p15290_p5 }
0x1715   :  { %15298 = shalt.err (!%p15295_p7)
}
0x1716   :  { %10492 = dma.vmem_to_hbm [thread:$0]  %s10490_s11, 32, %s23865_s23, [#allocation3]  }
0x1717   :  { %15299 = dma.done.wait [#allocation3], 32  }
0x1718   :  { %15300 = vsyncadd [#allocation3], 4294967264 }
0x1719   :  { %10496 = vsyncpa [#allocation3], 1 }

</bundles_post_ra>
